<compile_context>
chip_gen: v7x
topology: tpu7x:2x2x1
jax: 0.10.0
libtpu: 0.0.40
codegen_flags: <defaults>
</compile_context>

<pallas_src>
import functools

import jax
import jax.numpy as jnp
import numpy as np
from jax import lax
from jax.experimental import pallas as pl
from jax.experimental.pallas import tpu as pltpu


# --------------------------------------------------------------------------
# Activations (fused into the kernel epilogue).
# --------------------------------------------------------------------------
def _apply_act(x, act):
    if act is None or act == "none":
        return x
    if act == "relu":
        return jnp.maximum(x, 0.0)
    if act == "leaky":
        return jnp.where(x >= 0, x, 0.01 * x)
    if act == "leaky01":
        return jnp.where(x >= 0, x, 0.1 * x)
    if act == "relu6":
        return jnp.clip(x, 0.0, 6.0)
    if act == "gelu":
        return jax.nn.gelu(x, approximate=True)   # see TODO(synk) above
    if act == "swish":
        return x * jax.nn.sigmoid(x)
    if act == "sin":
        return jnp.sin(x)
    if act == "softplus":
        return jnp.logaddexp(x, 0.0)
    if act == "hardswish":
        return x * jnp.clip(x + 3.0, 0.0, 6.0) * (1.0 / 6.0)
    raise KeyError(f"Unknown activation {act}")


_EUP_ACTS = ("gelu", "swish", "sin", "softplus")


# --------------------------------------------------------------------------
# Pallas kernel: fused in-VMEM im2col + (Cout, K) @ (K, TM) + bias + act.
# --------------------------------------------------------------------------
def _fused_conv_kernel(w_ref, b_ref, *rest, act, tap_offsets):
    """One grid step.

    w_ref : (Cout, n_taps*Cin) resident weights (tap-major, cin-minor rows)
    b_ref : (Cout, 128)        resident f32 bias (pre-broadcast)
    rest  : (1 + n_extra) streamed flat-activation blocks (Cin, TM), then o_ref.

    Builds the (n_taps*Cin, TM) patch slab in VMEM with static lane-shifted
    slices of the concatenated blocks, then a single MXU dot with f32
    accumulation, fused bias + activation, lane-dense store.
    """
    *x_refs, o_ref = rest
    tm = o_ref.shape[1]

    if len(x_refs) > 1:
        xcat = jnp.concatenate([r[...] for r in x_refs], axis=1)
    else:
        xcat = x_refs[0][...]

    if len(tap_offsets) > 1:
        patches = jnp.concatenate(
            [xcat[:, off:off + tm] for off in tap_offsets], axis=0)
    else:
        patches = xcat[:, :tm]

    acc = jnp.dot(w_ref[...], patches, preferred_element_type=jnp.float32)
    acc = acc + b_ref[...][:, 0:1]            # f32 bias, broadcast along lanes
    acc = _apply_act(acc, act)
    o_ref[...] = acc.astype(o_ref.dtype)


def _round128(v):
    return max(128, (v // 128) * 128)


def _fused_conv_matmul(wmat, x_flat, bias, act, *, tap_offsets, halo,
                       out_dtype, tm_max=2048, tm_min=256):
    """out[c, m] = act( sum_{t, ci} wmat[c, t*Cin+ci] * x_flat[ci, m + off(t)] + bias[c] ).

    wmat:   (Cout, n_taps*Cin)   MXU operand dtype (bf16 or f32)
    x_flat: (Cin, M)             flat padded activation, MXU operand dtype
    bias:   (Cout,)              float32 (or castable)
    returns (Cout, n_tiles*TM)   out_dtype
    """
    cout, k = wmat.shape
    cin, m = x_flat.shape
    n_taps = len(tap_offsets)
    assert k == n_taps * cin

    in_isz = x_flat.dtype.itemsize
    out_isz = jnp.dtype(out_dtype).itemsize

    def vmem_bytes(tm_):
        n_extra_ = pl.cdiv(halo, tm_) if halo else 0
        blocks = (1 + n_extra_) * 2 * cin * tm_ * in_isz          # dbl-buffered in
        temps = (1 + n_extra_ + n_taps) * cin * tm_ * in_isz      # xcat + patches
        outb = cout * tm_ * (4 + 2 * out_isz)                     # f32 acc + dbl out
        return blocks + temps + outb

    # Big tile for DMA efficiency; clamp down so the grid has >= 4 steps
    # (v7x: both TensorCores get work) and VMEM stays a few MiB (v7x budget).
    tm = _round128(min(tm_max, pl.cdiv(m, 128) * 128))
    while tm > tm_min and pl.cdiv(m, tm) < 4:
        tm = _round128(tm // 2)
    while tm > tm_min and vmem_bytes(tm) > 12 * 1024 * 1024:
        tm = _round128(tm // 2)

    n_extra = pl.cdiv(halo, tm) if halo else 0
    n_tiles = pl.cdiv(m, tm)
    total_cols = (n_tiles + n_extra) * tm
    if total_cols != m:
        # Pad the 1x flat activation at the source (never a 27x patch matrix).
        x_flat = jnp.pad(x_flat, ((0, 0), (0, total_cols - m)))

    bias_b = jnp.broadcast_to(
        bias.astype(jnp.float32).reshape(cout, 1), (cout, 128))

    in_specs = [
        pl.BlockSpec((cout, k), lambda i: (0, 0)),        # resident weights
        pl.BlockSpec((cout, 128), lambda i: (0, 0)),      # resident bias
    ]
    for e in range(1 + n_extra):                          # streamed blocks (+halo)
        in_specs.append(pl.BlockSpec((cin, tm), lambda i, e=e: (0, i + e)))

    m_out = n_tiles * tm
    cost = pl.CostEstimate(
        flops=2 * cout * k * m_out,
        transcendentals=cout * m_out if act in _EUP_ACTS else 0,
        bytes_accessed=((1 + n_extra) * cin * m_out * in_isz
                        + cout * k * wmat.dtype.itemsize
                        + cout * 128 * 4
                        + cout * m_out * out_isz),
    )

    return pl.pallas_call(
        functools.partial(_fused_conv_kernel, act=act, tap_offsets=tap_offsets),
        out_shape=jax.ShapeDtypeStruct((cout, m_out), out_dtype),
        grid_spec=pltpu.PrefetchScalarGridSpec(
            num_scalar_prefetch=0,
            grid=(n_tiles,),
            in_specs=in_specs,
            out_specs=pl.BlockSpec((cout, tm), lambda i: (0, i)),
        ),
        compiler_params=pltpu.CompilerParams(
            dimension_semantics=("parallel",)),   # split M tiles across TCs
        cost_estimate=cost,
    )(wmat, bias_b, *([x_flat] * (1 + n_extra)))


# --------------------------------------------------------------------------
# Conv wrappers, channels-first (C, N, D, H, W).
# --------------------------------------------------------------------------
def _conv3d_3x3x3_cf(x_cf, weight, bias, act, mxu_dtype, out_dtype):
    """3x3x3 conv, stride 1, padding 1.  weight: (Cout, Cin, 3, 3, 3) torch layout."""
    cin, n, d, h, w = x_cf.shape
    cout = weight.shape[0]
    pd, ph, pw = d + 2, h + 2, w + 2

    # One spatial pad of the 1x activation (already MXU dtype), then flatten the
    # whole padded volume: every conv tap is a constant lane shift of one stream,
    # so im2col happens inside the kernel (VMEM), never in HBM.
    xp = jnp.pad(x_cf.astype(mxu_dtype), ((0, 0), (0, 0), (1, 1), (1, 1), (1, 1)))
    mp = n * pd * ph * pw
    x_flat = xp.reshape(cin, mp)

    tap_offsets = tuple(kd * ph * pw + kh * pw + kw
                        for kd in range(3) for kh in range(3) for kw in range(3))
    halo = tap_offsets[-1]

    # Weight rows tap-major / cin-minor to match the in-kernel patch-slab order.
    wmat = jnp.transpose(weight, (0, 2, 3, 4, 1)).reshape(cout, 27 * cin)

    out_flat = _fused_conv_matmul(
        wmat.astype(mxu_dtype), x_flat, bias, act,
        tap_offsets=tap_offsets, halo=halo, out_dtype=out_dtype)

    out = out_flat[:, :mp].reshape(cout, n, pd, ph, pw)
    return out[:, :, :d, :h, :w]    # keep only valid conv outputs


def _conv3d_1x1x1_cf(x_cf, weight, bias, act, mxu_dtype, out_dtype):
    """1x1x1 conv, stride 1, no padding.  weight: (Cout, Cin, 1, 1, 1)."""
    cin, n, d, h, w = x_cf.shape
    cout = weight.shape[0]
    m = n * d * h * w
    wmat = weight.reshape(cout, cin)
    out_flat = _fused_conv_matmul(
        wmat.astype(mxu_dtype), x_cf.reshape(cin, m).astype(mxu_dtype), bias, act,
        tap_offsets=(0,), halo=0, out_dtype=out_dtype)
    return out_flat[:, :m].reshape(cout, n, d, h, w)


def _pixel_shuffle_3d_cf(y, s):
    """PixelShuffle3D with channels leading (same math as the torch NCDHW op)."""
    c, n, d, h, w = y.shape
    cn = c // (s ** 3)
    y = y.reshape(cn, s, s, s, n, d, h, w)
    y = jnp.transpose(y, (0, 4, 5, 1, 6, 2, 7, 3))
    return y.reshape(cn, n, d * s, h * s, w * s)


# --------------------------------------------------------------------------
# QuantDecoder forward (conv_type='conv').
# --------------------------------------------------------------------------
def quant_decoder_forward(embed_features, params, cfg, mxu_dtype=jnp.bfloat16):
    """embed_features: (N, D, H, W, embed_dim) -> (N, D', H', W', 4) float32."""
    compute_dtype = jnp.bfloat16 if mxu_dtype == jnp.bfloat16 else jnp.float32
    # Cast BEFORE any layout work; channels become (and stay) the major axis.
    x = jnp.transpose(embed_features.astype(compute_dtype), (4, 0, 1, 2, 3))

    if cfg["after_embed_dim"] > 0:
        x = _conv3d_1x1x1_cf(x, params["embed_w"], params["embed_b"], None,
                             mxu_dtype, compute_dtype)

    for i, scale in enumerate(cfg["decoder_stride_list"]):
        # QuantNeRVBlock3D: act(PixelShuffle(conv3x3(x))).  The activation is
        # elementwise, so it is fused into the conv epilogue (commutes with the
        # shuffle).  Intermediates stay bf16 on the fast path.
        y = _conv3d_3x3x3_cf(x, params["block_w"][i], params["block_b"][i],
                             cfg["act"], mxu_dtype, compute_dtype)
        x = _pixel_shuffle_3d_cf(y, scale)

    out = _conv3d_3x3x3_cf(x, params["head_w"], params["head_b"], None,
                           mxu_dtype, jnp.float32)        # head output in f32
    return jnp.transpose(out, (1, 2, 3, 4, 0))


# --------------------------------------------------------------------------
# Plain-JAX reference (direct transcription of the torch forward, NCDHW, f32).
# --------------------------------------------------------------------------
def _conv3d_ref(x_ncdhw, weight, bias, padding):
    out = lax.conv_general_dilated(
        x_ncdhw, weight, window_strides=(1, 1, 1), padding=padding,
        dimension_numbers=("NCDHW", "OIDHW", "NCDHW"))
    return out + bias[None, :, None, None, None]


def _pixel_shuffle_3d_ref(x, s):
    n, c, d, h, w = x.shape
    cn = c // (s ** 3)
    x = x.reshape(n, cn, s, s, s, d, h, w)
    x = jnp.transpose(x, (0, 1, 5, 2, 6, 3, 7, 4))
    return x.reshape(n, cn, d * s, h * s, w * s)


def quant_decoder_reference(embed_features, params, cfg):
    x = jnp.transpose(embed_features, (0, 4, 1, 2, 3))
    if cfg["after_embed_dim"] > 0:
        x = _conv3d_ref(x, params["embed_w"], params["embed_b"],
                        ((0, 0), (0, 0), (0, 0)))
    for i, scale in enumerate(cfg["decoder_stride_list"]):
        y = _conv3d_ref(x, params["block_w"][i], params["block_b"][i],
                        ((1, 1), (1, 1), (1, 1)))
        y = _pixel_shuffle_3d_ref(y, scale)
        x = _apply_act(y, cfg["act"])
    x = _conv3d_ref(x, params["head_w"], params["head_b"],
                    ((1, 1), (1, 1), (1, 1)))
    return jnp.transpose(x, (0, 2, 3, 4, 1))


# --------------------------------------------------------------------------
# Demo / correctness check.
# --------------------------------------------------------------------------
if __name__ == "__main__":
    cfg = dict(
        embed_dim=16,
        after_embed_dim=8,
        decoder_dim_list=[8, 4],
        decoder_stride_list=[2, 2],
        act="gelu",
        bias=True,
        conv_type="conv",
        num_bits=8,   # TODO(synk): quantization not applied (QuantConv3d body not given)
    )
    N, D, H, W = 2, 4, 4, 4

    keys = iter(jax.random.split(jax.random.PRNGKey(0), 32))

    def nk():
        return next(keys)

    def winit(k, cout, cin, ks):
        fan_in = cin * ks ** 3
        return (jax.random.normal(k, (cout, cin, ks, ks, ks), jnp.float32)
                / np.sqrt(fan_in))

    x = jax.random.normal(nk(), (N, D, H, W, cfg["embed_dim"]), jnp.float32)

    params = {"block_w": [], "block_b": []}
    params["embed_w"] = winit(nk(), cfg["after_embed_dim"], cfg["embed_dim"], 1)
    params["embed_b"] = 0.01 * jax.random.normal(
        nk(), (cfg["after_embed_dim"],), jnp.float32)
    in_ch = cfg["after_embed_dim"] if cfg["after_embed_dim"] > 0 else cfg["embed_dim"]
    for dim, scale in zip(cfg["decoder_dim_list"], cfg["decoder_stride_list"]):
        cout = dim * scale ** 3
        params["block_w"].append(winit(nk(), cout, in_ch, 3))
        params["block_b"].append(0.01 * jax.random.normal(nk(), (cout,), jnp.float32))
        in_ch = dim
    params["head_w"] = winit(nk(), 4, in_ch, 3)
    params["head_b"] = 0.01 * jax.random.normal(nk(), (4,), jnp.float32)

    fwd_bf16 = jax.jit(functools.partial(
        quant_decoder_forward, cfg=cfg, mxu_dtype=jnp.bfloat16))
    fwd_f32 = jax.jit(functools.partial(
        quant_decoder_forward, cfg=cfg, mxu_dtype=jnp.float32))
    ref_fn = jax.jit(functools.partial(quant_decoder_reference, cfg=cfg))

    y_bf16 = jax.block_until_ready(fwd_bf16(x, params))   # fast path (bf16 intermediates)
    y_f32 = jax.block_until_ready(fwd_f32(x, params))     # exact-semantics path
    ref = jax.block_until_ready(ref_fn(x, params))

    total_scale = int(np.prod(cfg["decoder_stride_list"]))
    expect = (N, D * total_scale, H * total_scale, W * total_scale, 4)
    assert y_bf16.shape == expect and y_f32.shape == expect, (y_bf16.shape, expect)

    # Exact check: f32 MXU operands / f32 intermediates vs plain-JAX f32 reference.
    np.testing.assert_allclose(np.asarray(y_f32), np.asarray(ref),
                               rtol=1e-3, atol=1e-3)
    # Fast path: bf16 MXU operands + bf16 intermediates, f32 accumulation;
    # looser tolerance accounts for bf16 rounding compounding across layers.
    np.testing.assert_allclose(np.asarray(y_bf16), np.asarray(ref),
                               rtol=5e-2, atol=5e-2)
    print("KERNEL_OK")
</pallas_src>

<mosaic_0001>
module attributes {stable_mosaic.version = 11 : i64} {
  func.func @_fused_conv_kernel(%arg0: i32, %arg1: memref<8x16xbf16, #tpu.memory_space<vmem>>, %arg2: memref<8x128xf32, #tpu.memory_space<vmem>>, %arg3: memref<16x128xbf16, #tpu.memory_space<vmem>>, %arg4: memref<8x128xbf16, #tpu.memory_space<vmem>>) attributes {dimension_semantics = [#tpu.dimension_semantics<parallel>], iteration_bounds = array<i64: 1>, scalar_prefetch = 0 : i64, scratch_operands = 0 : i64, tpu.core_type = #tpu.core_type<tc>, window_params = [{pipeline_mode = #tpu.pipeline_mode<synchronous>, transform_indices = @transform_0, window_bounds = array<i64: 8, 16>}, {pipeline_mode = #tpu.pipeline_mode<synchronous>, transform_indices = @transform_1, window_bounds = array<i64: 8, 128>}, {transform_indices = @transform_2, window_bounds = array<i64: 16, 128>}, {transform_indices = @transform_3, window_bounds = array<i64: 8, 128>}]} {
    %c0 = arith.constant 0 : index
    %c0_0 = arith.constant 0 : index
    %0 = vector.load %arg3[%c0, %c0_0] : memref<16x128xbf16, #tpu.memory_space<vmem>>, vector<16x128xbf16>
    %c0_1 = arith.constant 0 : index
    %c0_2 = arith.constant 0 : index
    %1 = vector.load %arg1[%c0_1, %c0_2] : memref<8x16xbf16, #tpu.memory_space<vmem>>, vector<8x16xbf16>
    %cst = arith.constant dense<0.000000e+00> : vector<8x128xf32>
    %2 = tpu.matmul %1, %0, %cst {dimension_numbers = #tpu.dot_dimension_numbers<[1], [0], [0], [1], [0, 0, 1, 1], [], []>} : vector<8x16xbf16>, vector<16x128xbf16>, vector<8x128xf32> -> vector<8x128xf32>
    %c0_3 = arith.constant 0 : index
    %c0_4 = arith.constant 0 : index
    %3 = vector.load %arg2[%c0_3, %c0_4] : memref<8x128xf32, #tpu.memory_space<vmem>>, vector<8x128xf32>
    %4 = vector.extract_strided_slice %3 {offsets = [0, 0], sizes = [8, 1], strides = [1, 1]} : vector<8x128xf32> to vector<8x1xf32>
    %5 = vector.broadcast %4 : vector<8x1xf32> to vector<8x128xf32>
    %6 = arith.addf %2, %5 : vector<8x128xf32>
    %7 = arith.truncf %6 : vector<8x128xf32> to vector<8x128xbf16>
    %c0_5 = arith.constant 0 : index
    %c0_6 = arith.constant 0 : index
    %8 = vector.load %arg4[%c0_5, %c0_6] : memref<8x128xbf16, #tpu.memory_space<vmem>>, vector<8x128xbf16>
    tpu.vector_store %arg4[%c0_5, %c0_6], %7 {strides = array<i32>} : memref<8x128xbf16, #tpu.memory_space<vmem>>, vector<8x128xbf16>,
    return
  }
  func.func @transform_0(%arg0: i32) -> (i32, i32) {
    %c0_i32 = arith.constant 0 : i32
    %c0_i32_0 = arith.constant 0 : i32
    %c0_i32_1 = arith.constant 0 : i32
    return %c0_i32, %c0_i32_0 : i32, i32
  }
  func.func @transform_1(%arg0: i32) -> (i32, i32) {
    %c0_i32 = arith.constant 0 : i32
    %c0_i32_0 = arith.constant 0 : i32
    %c0_i32_1 = arith.constant 0 : i32
    return %c0_i32, %c0_i32_0 : i32, i32
  }
  func.func @transform_2(%arg0: i32) -> (i32, i32) {
    %c0_i32 = arith.constant 0 : i32
    %0 = arith.addi %arg0, %c0_i32 : i32
    %c0_i32_0 = arith.constant 0 : i32
    %c0_i32_1 = arith.constant 0 : i32
    return %c0_i32_0, %0 : i32, i32
  }
  func.func @transform_3(%arg0: i32) -> (i32, i32) {
    %c0_i32 = arith.constant 0 : i32
    %c0_i32_0 = arith.constant 0 : i32
    return %c0_i32, %arg0 : i32, i32
  }
}

module attributes {stable_mosaic.version = 11 : i64} {
  func.func @_fused_conv_kernel(%arg0: i32, %arg1: memref<64x216xbf16, #tpu.memory_space<vmem>>, %arg2: memref<64x128xf32, #tpu.memory_space<vmem>>, %arg3: memref<8x256xbf16, #tpu.memory_space<vmem>>, %arg4: memref<8x256xbf16, #tpu.memory_space<vmem>>, %arg5: memref<64x256xbf16, #tpu.memory_space<vmem>>) attributes {dimension_semantics = [#tpu.dimension_semantics<parallel>], iteration_bounds = array<i64: 2>, scalar_prefetch = 0 : i64, scratch_operands = 0 : i64, tpu.core_type = #tpu.core_type<tc>, window_params = [{pipeline_mode = #tpu.pipeline_mode<synchronous>, transform_indices = @transform_0, window_bounds = array<i64: 64, 216>}, {pipeline_mode = #tpu.pipeline_mode<synchronous>, transform_indices = @transform_1, window_bounds = array<i64: 64, 128>}, {transform_indices = @transform_2, window_bounds = array<i64: 8, 256>}, {transform_indices = @transform_3, window_bounds = array<i64: 8, 256>}, {transform_indices = @transform_4, window_bounds = array<i64: 64, 256>}]} {
    %c0 = arith.constant 0 : index
    %c0_0 = arith.constant 0 : index
    %0 = vector.load %arg3[%c0, %c0_0] : memref<8x256xbf16, #tpu.memory_space<vmem>>, vector<8x256xbf16>
    %c0_1 = arith.constant 0 : index
    %c0_2 = arith.constant 0 : index
    %1 = vector.load %arg4[%c0_1, %c0_2] : memref<8x256xbf16, #tpu.memory_space<vmem>>, vector<8x256xbf16>
    %2 = tpu.concatenate %0, %1 in 1 : vector<8x256xbf16>, vector<8x256xbf16> -> vector<8x512xbf16>
    %3 = vector.extract_strided_slice %2 {offsets = [0, 0], sizes = [8, 256], strides = [1, 1]} : vector<8x512xbf16> to vector<8x256xbf16>
    %4 = vector.extract_strided_slice %2 {offsets = [0, 1], sizes = [8, 256], strides = [1, 1]} : vector<8x512xbf16> to vector<8x256xbf16>
    %5 = vector.extract_strided_slice %2 {offsets = [0, 2], sizes = [8, 256], strides = [1, 1]} : vector<8x512xbf16> to vector<8x256xbf16>
    %6 = vector.extract_strided_slice %2 {offsets = [0, 6], sizes = [8, 256], strides = [1, 1]} : vector<8x512xbf16> to vector<8x256xbf16>
    %7 = vector.extract_strided_slice %2 {offsets = [0, 7], sizes = [8, 256], strides = [1, 1]} : vector<8x512xbf16> to vector<8x256xbf16>
    %8 = vector.extract_strided_slice %2 {offsets = [0, 8], sizes = [8, 256], strides = [1, 1]} : vector<8x512xbf16> to vector<8x256xbf16>
    %9 = vector.extract_strided_slice %2 {offsets = [0, 12], sizes = [8, 256], strides = [1, 1]} : vector<8x512xbf16> to vector<8x256xbf16>
    %10 = vector.extract_strided_slice %2 {offsets = [0, 13], sizes = [8, 256], strides = [1, 1]} : vector<8x512xbf16> to vector<8x256xbf16>
    %11 = vector.extract_strided_slice %2 {offsets = [0, 14], sizes = [8, 256], strides = [1, 1]} : vector<8x512xbf16> to vector<8x256xbf16>
    %12 = vector.extract_strided_slice %2 {offsets = [0, 36], sizes = [8, 256], strides = [1, 1]} : vector<8x512xbf16> to vector<8x256xbf16>
    %13 = vector.extract_strided_slice %2 {offsets = [0, 37], sizes = [8, 256], strides = [1, 1]} : vector<8x512xbf16> to vector<8x256xbf16>
    %14 = vector.extract_strided_slice %2 {offsets = [0, 38], sizes = [8, 256], strides = [1, 1]} : vector<8x512xbf16> to vector<8x256xbf16>
    %15 = vector.extract_strided_slice %2 {offsets = [0, 42], sizes = [8, 256], strides = [1, 1]} : vector<8x512xbf16> to vector<8x256xbf16>
    %16 = vector.extract_strided_slice %2 {offsets = [0, 43], sizes = [8, 256], strides = [1, 1]} : vector<8x512xbf16> to vector<8x256xbf16>
    %17 = vector.extract_strided_slice %2 {offsets = [0, 44], sizes = [8, 256], strides = [1, 1]} : vector<8x512xbf16> to vector<8x256xbf16>
    %18 = vector.extract_strided_slice %2 {offsets = [0, 48], sizes = [8, 256], strides = [1, 1]} : vector<8x512xbf16> to vector<8x256xbf16>
    %19 = vector.extract_strided_slice %2 {offsets = [0, 49], sizes = [8, 256], strides = [1, 1]} : vector<8x512xbf16> to vector<8x256xbf16>
    %20 = vector.extract_strided_slice %2 {offsets = [0, 50], sizes = [8, 256], strides = [1, 1]} : vector<8x512xbf16> to vector<8x256xbf16>
    %21 = vector.extract_strided_slice %2 {offsets = [0, 72], sizes = [8, 256], strides = [1, 1]} : vector<8x512xbf16> to vector<8x256xbf16>
    %22 = vector.extract_strided_slice %2 {offsets = [0, 73], sizes = [8, 256], strides = [1, 1]} : vector<8x512xbf16> to vector<8x256xbf16>
    %23 = vector.extract_strided_slice %2 {offsets = [0, 74], sizes = [8, 256], strides = [1, 1]} : vector<8x512xbf16> to vector<8x256xbf16>
    %24 = vector.extract_strided_slice %2 {offsets = [0, 78], sizes = [8, 256], strides = [1, 1]} : vector<8x512xbf16> to vector<8x256xbf16>
    %25 = vector.extract_strided_slice %2 {offsets = [0, 79], sizes = [8, 256], strides = [1, 1]} : vector<8x512xbf16> to vector<8x256xbf16>
    %26 = vector.extract_strided_slice %2 {offsets = [0, 80], sizes = [8, 256], strides = [1, 1]} : vector<8x512xbf16> to vector<8x256xbf16>
    %27 = vector.extract_strided_slice %2 {offsets = [0, 84], sizes = [8, 256], strides = [1, 1]} : vector<8x512xbf16> to vector<8x256xbf16>
    %28 = vector.extract_strided_slice %2 {offsets = [0, 85], sizes = [8, 256], strides = [1, 1]} : vector<8x512xbf16> to vector<8x256xbf16>
    %29 = vector.extract_strided_slice %2 {offsets = [0, 86], sizes = [8, 256], strides = [1, 1]} : vector<8x512xbf16> to vector<8x256xbf16>
    %30 = tpu.concatenate %3, %4, %5, %6, %7, %8, %9, %10, %11, %12, %13, %14, %15, %16, %17, %18 in 0 : vector<8x256xbf16>, vector<8x256xbf16>, vector<8x256xbf16>, vector<8x256xbf16>, vector<8x256xbf16>, vector<8x256xbf16>, vector<8x256xbf16>, vector<8x256xbf16>, vector<8x256xbf16>, vector<8x256xbf16>, vector<8x256xbf16>, vector<8x256xbf16>, vector<8x256xbf16>, vector<8x256xbf16>, vector<8x256xbf16>, vector<8x256xbf16> -> vector<128x256xbf16>
    %31 = tpu.concatenate %19, %20, %21, %22, %23, %24, %25, %26, %27, %28, %29 in 0 : vector<8x256xbf16>, vector<8x256xbf16>, vector<8x256xbf16>, vector<8x256xbf16>, vector<8x256xbf16>, vector<8x256xbf16>, vector<8x256xbf16>, vector<8x256xbf16>, vector<8x256xbf16>, vector<8x256xbf16>, vector<8x256xbf16> -> vector<88x256xbf16>
    %32 = tpu.concatenate %30, %31 in 0 : vector<128x256xbf16>, vector<88x256xbf16> -> vector<216x256xbf16>
    %c0_3 = arith.constant 0 : index
    %c0_4 = arith.constant 0 : index
    %33 = vector.load %arg1[%c0_3, %c0_4] : memref<64x216xbf16, #tpu.memory_space<vmem>>, vector<64x216xbf16>
    %cst = arith.constant dense<0.000000e+00> : vector<64x256xf32>
    %34 = tpu.matmul %33, %32, %cst {dimension_numbers = #tpu.dot_dimension_numbers<[1], [0], [0], [1], [0, 0, 1, 1], [], []>} : vector<64x216xbf16>, vector<216x256xbf16>, vector<64x256xf32> -> vector<64x256xf32>
    %c0_5 = arith.constant 0 : index
    %c0_6 = arith.constant 0 : index
    %35 = vector.load %arg2[%c0_5, %c0_6] : memref<64x128xf32, #tpu.memory_space<vmem>>, vector<64x128xf32>
    %36 = vector.extract_strided_slice %35 {offsets = [0, 0], sizes = [64, 1], strides = [1, 1]} : vector<64x128xf32> to vector<64x1xf32>
    %37 = vector.broadcast %36 : vector<64x1xf32> to vector<64x256xf32>
    %38 = arith.addf %34, %37 : vector<64x256xf32>
    %39 = arith.mulf %38, %38 : vector<64x256xf32>
    %40 = arith.mulf %38, %39 : vector<64x256xf32>
    %cst_7 = arith.constant 4.471500e-02 : f32
    %41 = vector.broadcast %cst_7 : f32 to vector<64x256xf32>
    %42 = arith.mulf %41, %40 : vector<64x256xf32>
    %43 = arith.addf %38, %42 : vector<64x256xf32>
    %cst_8 = arith.constant 0.797884583 : f32
    %44 = vector.broadcast %cst_8 : f32 to vector<64x256xf32>
    %45 = arith.mulf %44, %43 : vector<64x256xf32>
    %46 = math.tanh %45 : vector<64x256xf32>
    %cst_9 = arith.constant 1.000000e+00 : f32
    %47 = vector.broadcast %cst_9 : f32 to vector<64x256xf32>
    %48 = arith.addf %47, %46 : vector<64x256xf32>
    %cst_10 = arith.constant 5.000000e-01 : f32
    %49 = vector.broadcast %cst_10 : f32 to vector<64x256xf32>
    %50 = arith.mulf %49, %48 : vector<64x256xf32>
    %51 = arith.mulf %38, %50 : vector<64x256xf32>
    %52 = arith.truncf %51 : vector<64x256xf32> to vector<64x256xbf16>
    %c0_11 = arith.constant 0 : index
    %c0_12 = arith.constant 0 : index
    %53 = vector.load %arg5[%c0_11, %c0_12] : memref<64x256xbf16, #tpu.memory_space<vmem>>, vector<64x256xbf16>
    tpu.vector_store %arg5[%c0_11, %c0_12], %52 {strides = array<i32>} : memref<64x256xbf16, #tpu.memory_space<vmem>>, vector<64x256xbf16>,
    return
  }
  func.func @transform_0(%arg0: i32) -> (i32, i32) {
    %c0_i32 = arith.constant 0 : i32
    %c0_i32_0 = arith.constant 0 : i32
    %c0_i32_1 = arith.constant 0 : i32
    return %c0_i32, %c0_i32_0 : i32, i32
  }
  func.func @transform_1(%arg0: i32) -> (i32, i32) {
    %c0_i32 = arith.constant 0 : i32
    %c0_i32_0 = arith.constant 0 : i32
    %c0_i32_1 = arith.constant 0 : i32
    return %c0_i32, %c0_i32_0 : i32, i32
  }
  func.func @transform_2(%arg0: i32) -> (i32, i32) {
    %c0_i32 = arith.constant 0 : i32
    %0 = arith.addi %arg0, %c0_i32 : i32
    %c0_i32_0 = arith.constant 0 : i32
    %c0_i32_1 = arith.constant 0 : i32
    return %c0_i32_0, %0 : i32, i32
  }
  func.func @transform_3(%arg0: i32) -> (i32, i32) {
    %c1_i32 = arith.constant 1 : i32
    %0 = arith.addi %arg0, %c1_i32 : i32
    %c0_i32 = arith.constant 0 : i32
    %c0_i32_0 = arith.constant 0 : i32
    return %c0_i32, %0 : i32, i32
  }
  func.func @transform_4(%arg0: i32) -> (i32, i32) {
    %c0_i32 = arith.constant 0 : i32
    %c0_i32_0 = arith.constant 0 : i32
    return %c0_i32, %arg0 : i32, i32
  }
}

module attributes {stable_mosaic.version = 11 : i64} {
  func.func @_fused_conv_kernel(%arg0: i32, %arg1: memref<32x216xbf16, #tpu.memory_space<vmem>>, %arg2: memref<32x128xf32, #tpu.memory_space<vmem>>, %arg3: memref<8x512xbf16, #tpu.memory_space<vmem>>, %arg4: memref<8x512xbf16, #tpu.memory_space<vmem>>, %arg5: memref<32x512xbf16, #tpu.memory_space<vmem>>) attributes {dimension_semantics = [#tpu.dimension_semantics<parallel>], iteration_bounds = array<i64: 4>, scalar_prefetch = 0 : i64, scratch_operands = 0 : i64, tpu.core_type = #tpu.core_type<tc>, window_params = [{pipeline_mode = #tpu.pipeline_mode<synchronous>, transform_indices = @transform_0, window_bounds = array<i64: 32, 216>}, {pipeline_mode = #tpu.pipeline_mode<synchronous>, transform_indices = @transform_1, window_bounds = array<i64: 32, 128>}, {transform_indices = @transform_2, window_bounds = array<i64: 8, 512>}, {transform_indices = @transform_3, window_bounds = array<i64: 8, 512>}, {transform_indices = @transform_4, window_bounds = array<i64: 32, 512>}]} {
    %c0 = arith.constant 0 : index
    %c0_0 = arith.constant 0 : index
    %0 = vector.load %arg3[%c0, %c0_0] : memref<8x512xbf16, #tpu.memory_space<vmem>>, vector<8x512xbf16>
    %c0_1 = arith.constant 0 : index
    %c0_2 = arith.constant 0 : index
    %1 = vector.load %arg4[%c0_1, %c0_2] : memref<8x512xbf16, #tpu.memory_space<vmem>>, vector<8x512xbf16>
    %2 = tpu.concatenate %0, %1 in 1 : vector<8x512xbf16>, vector<8x512xbf16> -> vector<8x1024xbf16>
    %3 = vector.extract_strided_slice %2 {offsets = [0, 0], sizes = [8, 512], strides = [1, 1]} : vector<8x1024xbf16> to vector<8x512xbf16>
    %4 = vector.extract_strided_slice %2 {offsets = [0, 1], sizes = [8, 512], strides = [1, 1]} : vector<8x1024xbf16> to vector<8x512xbf16>
    %5 = vector.extract_strided_slice %2 {offsets = [0, 2], sizes = [8, 512], strides = [1, 1]} : vector<8x1024xbf16> to vector<8x512xbf16>
    %6 = vector.extract_strided_slice %2 {offsets = [0, 10], sizes = [8, 512], strides = [1, 1]} : vector<8x1024xbf16> to vector<8x512xbf16>
    %7 = vector.extract_strided_slice %2 {offsets = [0, 11], sizes = [8, 512], strides = [1, 1]} : vector<8x1024xbf16> to vector<8x512xbf16>
    %8 = vector.extract_strided_slice %2 {offsets = [0, 12], sizes = [8, 512], strides = [1, 1]} : vector<8x1024xbf16> to vector<8x512xbf16>
    %9 = vector.extract_strided_slice %2 {offsets = [0, 20], sizes = [8, 512], strides = [1, 1]} : vector<8x1024xbf16> to vector<8x512xbf16>
    %10 = vector.extract_strided_slice %2 {offsets = [0, 21], sizes = [8, 512], strides = [1, 1]} : vector<8x1024xbf16> to vector<8x512xbf16>
    %11 = vector.extract_strided_slice %2 {offsets = [0, 22], sizes = [8, 512], strides = [1, 1]} : vector<8x1024xbf16> to vector<8x512xbf16>
    %12 = vector.extract_strided_slice %2 {offsets = [0, 100], sizes = [8, 512], strides = [1, 1]} : vector<8x1024xbf16> to vector<8x512xbf16>
    %13 = vector.extract_strided_slice %2 {offsets = [0, 101], sizes = [8, 512], strides = [1, 1]} : vector<8x1024xbf16> to vector<8x512xbf16>
    %14 = vector.extract_strided_slice %2 {offsets = [0, 102], sizes = [8, 512], strides = [1, 1]} : vector<8x1024xbf16> to vector<8x512xbf16>
    %15 = vector.extract_strided_slice %2 {offsets = [0, 110], sizes = [8, 512], strides = [1, 1]} : vector<8x1024xbf16> to vector<8x512xbf16>
    %16 = vector.extract_strided_slice %2 {offsets = [0, 111], sizes = [8, 512], strides = [1, 1]} : vector<8x1024xbf16> to vector<8x512xbf16>
    %17 = vector.extract_strided_slice %2 {offsets = [0, 112], sizes = [8, 512], strides = [1, 1]} : vector<8x1024xbf16> to vector<8x512xbf16>
    %18 = vector.extract_strided_slice %2 {offsets = [0, 120], sizes = [8, 512], strides = [1, 1]} : vector<8x1024xbf16> to vector<8x512xbf16>
    %19 = vector.extract_strided_slice %2 {offsets = [0, 121], sizes = [8, 512], strides = [1, 1]} : vector<8x1024xbf16> to vector<8x512xbf16>
    %20 = vector.extract_strided_slice %2 {offsets = [0, 122], sizes = [8, 512], strides = [1, 1]} : vector<8x1024xbf16> to vector<8x512xbf16>
    %21 = vector.extract_strided_slice %2 {offsets = [0, 200], sizes = [8, 512], strides = [1, 1]} : vector<8x1024xbf16> to vector<8x512xbf16>
    %22 = vector.extract_strided_slice %2 {offsets = [0, 201], sizes = [8, 512], strides = [1, 1]} : vector<8x1024xbf16> to vector<8x512xbf16>
    %23 = vector.extract_strided_slice %2 {offsets = [0, 202], sizes = [8, 512], strides = [1, 1]} : vector<8x1024xbf16> to vector<8x512xbf16>
    %24 = vector.extract_strided_slice %2 {offsets = [0, 210], sizes = [8, 512], strides = [1, 1]} : vector<8x1024xbf16> to vector<8x512xbf16>
    %25 = vector.extract_strided_slice %2 {offsets = [0, 211], sizes = [8, 512], strides = [1, 1]} : vector<8x1024xbf16> to vector<8x512xbf16>
    %26 = vector.extract_strided_slice %2 {offsets = [0, 212], sizes = [8, 512], strides = [1, 1]} : vector<8x1024xbf16> to vector<8x512xbf16>
    %27 = vector.extract_strided_slice %2 {offsets = [0, 220], sizes = [8, 512], strides = [1, 1]} : vector<8x1024xbf16> to vector<8x512xbf16>
    %28 = vector.extract_strided_slice %2 {offsets = [0, 221], sizes = [8, 512], strides = [1, 1]} : vector<8x1024xbf16> to vector<8x512xbf16>
    %29 = vector.extract_strided_slice %2 {offsets = [0, 222], sizes = [8, 512], strides = [1, 1]} : vector<8x1024xbf16> to vector<8x512xbf16>
    %30 = tpu.concatenate %3, %4, %5, %6, %7, %8, %9, %10, %11, %12, %13, %14, %15, %16, %17, %18 in 0 : vector<8x512xbf16>, vector<8x512xbf16>, vector<8x512xbf16>, vector<8x512xbf16>, vector<8x512xbf16>, vector<8x512xbf16>, vector<8x512xbf16>, vector<8x512xbf16>, vector<8x512xbf16>, vector<8x512xbf16>, vector<8x512xbf16>, vector<8x512xbf16>, vector<8x512xbf16>, vector<8x512xbf16>, vector<8x512xbf16>, vector<8x512xbf16> -> vector<128x512xbf16>
    %31 = tpu.concatenate %19, %20, %21, %22, %23, %24, %25, %26, %27, %28, %29 in 0 : vector<8x512xbf16>, vector<8x512xbf16>, vector<8x512xbf16>, vector<8x512xbf16>, vector<8x512xbf16>, vector<8x512xbf16>, vector<8x512xbf16>, vector<8x512xbf16>, vector<8x512xbf16>, vector<8x512xbf16>, vector<8x512xbf16> -> vector<88x512xbf16>
    %32 = tpu.concatenate %30, %31 in 0 : vector<128x512xbf16>, vector<88x512xbf16> -> vector<216x512xbf16>
    %c0_3 = arith.constant 0 : index
    %c0_4 = arith.constant 0 : index
    %33 = vector.load %arg1[%c0_3, %c0_4] : memref<32x216xbf16, #tpu.memory_space<vmem>>, vector<32x216xbf16>
    %cst = arith.constant dense<0.000000e+00> : vector<32x512xf32>
    %34 = tpu.matmul %33, %32, %cst {dimension_numbers = #tpu.dot_dimension_numbers<[1], [0], [0], [1], [0, 0, 1, 1], [], []>} : vector<32x216xbf16>, vector<216x512xbf16>, vector<32x512xf32> -> vector<32x512xf32>
    %c0_5 = arith.constant 0 : index
    %c0_6 = arith.constant 0 : index
    %35 = vector.load %arg2[%c0_5, %c0_6] : memref<32x128xf32, #tpu.memory_space<vmem>>, vector<32x128xf32>
    %36 = vector.extract_strided_slice %35 {offsets = [0, 0], sizes = [32, 1], strides = [1, 1]} : vector<32x128xf32> to vector<32x1xf32>
    %37 = vector.broadcast %36 : vector<32x1xf32> to vector<32x512xf32>
    %38 = arith.addf %34, %37 : vector<32x512xf32>
    %39 = arith.mulf %38, %38 : vector<32x512xf32>
    %40 = arith.mulf %38, %39 : vector<32x512xf32>
    %cst_7 = arith.constant 4.471500e-02 : f32
    %41 = vector.broadcast %cst_7 : f32 to vector<32x512xf32>
    %42 = arith.mulf %41, %40 : vector<32x512xf32>
    %43 = arith.addf %38, %42 : vector<32x512xf32>
    %cst_8 = arith.constant 0.797884583 : f32
    %44 = vector.broadcast %cst_8 : f32 to vector<32x512xf32>
    %45 = arith.mulf %44, %43 : vector<32x512xf32>
    %46 = math.tanh %45 : vector<32x512xf32>
    %cst_9 = arith.constant 1.000000e+00 : f32
    %47 = vector.broadcast %cst_9 : f32 to vector<32x512xf32>
    %48 = arith.addf %47, %46 : vector<32x512xf32>
    %cst_10 = arith.constant 5.000000e-01 : f32
    %49 = vector.broadcast %cst_10 : f32 to vector<32x512xf32>
    %50 = arith.mulf %49, %48 : vector<32x512xf32>
    %51 = arith.mulf %38, %50 : vector<32x512xf32>
    %52 = arith.truncf %51 : vector<32x512xf32> to vector<32x512xbf16>
    %c0_11 = arith.constant 0 : index
    %c0_12 = arith.constant 0 : index
    %53 = vector.load %arg5[%c0_11, %c0_12] : memref<32x512xbf16, #tpu.memory_space<vmem>>, vector<32x512xbf16>
    tpu.vector_store %arg5[%c0_11, %c0_12], %52 {strides = array<i32>} : memref<32x512xbf16, #tpu.memory_space<vmem>>, vector<32x512xbf16>,
    return
  }
  func.func @transform_0(%arg0: i32) -> (i32, i32) {
    %c0_i32 = arith.constant 0 : i32
    %c0_i32_0 = arith.constant 0 : i32
    %c0_i32_1 = arith.constant 0 : i32
    return %c0_i32, %c0_i32_0 : i32, i32
  }
  func.func @transform_1(%arg0: i32) -> (i32, i32) {
    %c0_i32 = arith.constant 0 : i32
    %c0_i32_0 = arith.constant 0 : i32
    %c0_i32_1 = arith.constant 0 : i32
    return %c0_i32, %c0_i32_0 : i32, i32
  }
  func.func @transform_2(%arg0: i32) -> (i32, i32) {
    %c0_i32 = arith.constant 0 : i32
    %0 = arith.addi %arg0, %c0_i32 : i32
    %c0_i32_0 = arith.constant 0 : i32
    %c0_i32_1 = arith.constant 0 : i32
    return %c0_i32_0, %0 : i32, i32
  }
  func.func @transform_3(%arg0: i32) -> (i32, i32) {
    %c1_i32 = arith.constant 1 : i32
    %0 = arith.addi %arg0, %c1_i32 : i32
    %c0_i32 = arith.constant 0 : i32
    %c0_i32_0 = arith.constant 0 : i32
    return %c0_i32, %0 : i32, i32
  }
  func.func @transform_4(%arg0: i32) -> (i32, i32) {
    %c0_i32 = arith.constant 0 : i32
    %c0_i32_0 = arith.constant 0 : i32
    return %c0_i32, %arg0 : i32, i32
  }
}

module attributes {stable_mosaic.version = 11 : i64} {
  func.func @_fused_conv_kernel(%arg0: i32, %arg1: memref<4x108xbf16, #tpu.memory_space<vmem>>, %arg2: memref<4x128xf32, #tpu.memory_space<vmem>>, %arg3: memref<4x2048xbf16, #tpu.memory_space<vmem>>, %arg4: memref<4x2048xbf16, #tpu.memory_space<vmem>>, %arg5: memref<4x2048xf32, #tpu.memory_space<vmem>>) attributes {dimension_semantics = [#tpu.dimension_semantics<parallel>], iteration_bounds = array<i64: 6>, scalar_prefetch = 0 : i64, scratch_operands = 0 : i64, tpu.core_type = #tpu.core_type<tc>, window_params = [{pipeline_mode = #tpu.pipeline_mode<synchronous>, transform_indices = @transform_0, window_bounds = array<i64: 4, 108>}, {pipeline_mode = #tpu.pipeline_mode<synchronous>, transform_indices = @transform_1, window_bounds = array<i64: 4, 128>}, {transform_indices = @transform_2, window_bounds = array<i64: 4, 2048>}, {transform_indices = @transform_3, window_bounds = array<i64: 4, 2048>}, {transform_indices = @transform_4, window_bounds = array<i64: 4, 2048>}]} {
    %c0 = arith.constant 0 : index
    %c0_0 = arith.constant 0 : index
    %0 = vector.load %arg3[%c0, %c0_0] : memref<4x2048xbf16, #tpu.memory_space<vmem>>, vector<4x2048xbf16>
    %c0_1 = arith.constant 0 : index
    %c0_2 = arith.constant 0 : index
    %1 = vector.load %arg4[%c0_1, %c0_2] : memref<4x2048xbf16, #tpu.memory_space<vmem>>, vector<4x2048xbf16>
    %2 = tpu.concatenate %0, %1 in 1 : vector<4x2048xbf16>, vector<4x2048xbf16> -> vector<4x4096xbf16>
    %3 = vector.extract_strided_slice %2 {offsets = [0, 0], sizes = [4, 2048], strides = [1, 1]} : vector<4x4096xbf16> to vector<4x2048xbf16>
    %4 = vector.extract_strided_slice %2 {offsets = [0, 1], sizes = [4, 2048], strides = [1, 1]} : vector<4x4096xbf16> to vector<4x2048xbf16>
    %5 = vector.extract_strided_slice %2 {offsets = [0, 2], sizes = [4, 2048], strides = [1, 1]} : vector<4x4096xbf16> to vector<4x2048xbf16>
    %6 = vector.extract_strided_slice %2 {offsets = [0, 18], sizes = [4, 2048], strides = [1, 1]} : vector<4x4096xbf16> to vector<4x2048xbf16>
    %7 = vector.extract_strided_slice %2 {offsets = [0, 19], sizes = [4, 2048], strides = [1, 1]} : vector<4x4096xbf16> to vector<4x2048xbf16>
    %8 = vector.extract_strided_slice %2 {offsets = [0, 20], sizes = [4, 2048], strides = [1, 1]} : vector<4x4096xbf16> to vector<4x2048xbf16>
    %9 = vector.extract_strided_slice %2 {offsets = [0, 36], sizes = [4, 2048], strides = [1, 1]} : vector<4x4096xbf16> to vector<4x2048xbf16>
    %10 = vector.extract_strided_slice %2 {offsets = [0, 37], sizes = [4, 2048], strides = [1, 1]} : vector<4x4096xbf16> to vector<4x2048xbf16>
    %11 = vector.extract_strided_slice %2 {offsets = [0, 38], sizes = [4, 2048], strides = [1, 1]} : vector<4x4096xbf16> to vector<4x2048xbf16>
    %12 = vector.extract_strided_slice %2 {offsets = [0, 324], sizes = [4, 2048], strides = [1, 1]} : vector<4x4096xbf16> to vector<4x2048xbf16>
    %13 = vector.extract_strided_slice %2 {offsets = [0, 325], sizes = [4, 2048], strides = [1, 1]} : vector<4x4096xbf16> to vector<4x2048xbf16>
    %14 = vector.extract_strided_slice %2 {offsets = [0, 326], sizes = [4, 2048], strides = [1, 1]} : vector<4x4096xbf16> to vector<4x2048xbf16>
    %15 = vector.extract_strided_slice %2 {offsets = [0, 342], sizes = [4, 2048], strides = [1, 1]} : vector<4x4096xbf16> to vector<4x2048xbf16>
    %16 = vector.extract_strided_slice %2 {offsets = [0, 343], sizes = [4, 2048], strides = [1, 1]} : vector<4x4096xbf16> to vector<4x2048xbf16>
    %17 = vector.extract_strided_slice %2 {offsets = [0, 344], sizes = [4, 2048], strides = [1, 1]} : vector<4x4096xbf16> to vector<4x2048xbf16>
    %18 = vector.extract_strided_slice %2 {offsets = [0, 360], sizes = [4, 2048], strides = [1, 1]} : vector<4x4096xbf16> to vector<4x2048xbf16>
    %19 = vector.extract_strided_slice %2 {offsets = [0, 361], sizes = [4, 2048], strides = [1, 1]} : vector<4x4096xbf16> to vector<4x2048xbf16>
    %20 = vector.extract_strided_slice %2 {offsets = [0, 362], sizes = [4, 2048], strides = [1, 1]} : vector<4x4096xbf16> to vector<4x2048xbf16>
    %21 = vector.extract_strided_slice %2 {offsets = [0, 648], sizes = [4, 2048], strides = [1, 1]} : vector<4x4096xbf16> to vector<4x2048xbf16>
    %22 = vector.extract_strided_slice %2 {offsets = [0, 649], sizes = [4, 2048], strides = [1, 1]} : vector<4x4096xbf16> to vector<4x2048xbf16>
    %23 = vector.extract_strided_slice %2 {offsets = [0, 650], sizes = [4, 2048], strides = [1, 1]} : vector<4x4096xbf16> to vector<4x2048xbf16>
    %24 = vector.extract_strided_slice %2 {offsets = [0, 666], sizes = [4, 2048], strides = [1, 1]} : vector<4x4096xbf16> to vector<4x2048xbf16>
    %25 = vector.extract_strided_slice %2 {offsets = [0, 667], sizes = [4, 2048], strides = [1, 1]} : vector<4x4096xbf16> to vector<4x2048xbf16>
    %26 = vector.extract_strided_slice %2 {offsets = [0, 668], sizes = [4, 2048], strides = [1, 1]} : vector<4x4096xbf16> to vector<4x2048xbf16>
    %27 = vector.extract_strided_slice %2 {offsets = [0, 684], sizes = [4, 2048], strides = [1, 1]} : vector<4x4096xbf16> to vector<4x2048xbf16>
    %28 = vector.extract_strided_slice %2 {offsets = [0, 685], sizes = [4, 2048], strides = [1, 1]} : vector<4x4096xbf16> to vector<4x2048xbf16>
    %29 = vector.extract_strided_slice %2 {offsets = [0, 686], sizes = [4, 2048], strides = [1, 1]} : vector<4x4096xbf16> to vector<4x2048xbf16>
    %30 = tpu.concatenate %3, %4, %5, %6, %7, %8, %9, %10, %11, %12, %13, %14, %15, %16, %17, %18 in 0 : vector<4x2048xbf16>, vector<4x2048xbf16>, vector<4x2048xbf16>, vector<4x2048xbf16>, vector<4x2048xbf16>, vector<4x2048xbf16>, vector<4x2048xbf16>, vector<4x2048xbf16>, vector<4x2048xbf16>, vector<4x2048xbf16>, vector<4x2048xbf16>, vector<4x2048xbf16>, vector<4x2048xbf16>, vector<4x2048xbf16>, vector<4x2048xbf16>, vector<4x2048xbf16> -> vector<64x2048xbf16>
    %31 = tpu.concatenate %19, %20, %21, %22, %23, %24, %25, %26, %27, %28, %29 in 0 : vector<4x2048xbf16>, vector<4x2048xbf16>, vector<4x2048xbf16>, vector<4x2048xbf16>, vector<4x2048xbf16>, vector<4x2048xbf16>, vector<4x2048xbf16>, vector<4x2048xbf16>, vector<4x2048xbf16>, vector<4x2048xbf16>, vector<4x2048xbf16> -> vector<44x2048xbf16>
    %32 = tpu.concatenate %30, %31 in 0 : vector<64x2048xbf16>, vector<44x2048xbf16> -> vector<108x2048xbf16>
    %c0_3 = arith.constant 0 : index
    %c0_4 = arith.constant 0 : index
    %33 = vector.load %arg1[%c0_3, %c0_4] : memref<4x108xbf16, #tpu.memory_space<vmem>>, vector<4x108xbf16>
    %cst = arith.constant dense<0.000000e+00> : vector<4x2048xf32>
    %34 = tpu.matmul %33, %32, %cst {dimension_numbers = #tpu.dot_dimension_numbers<[1], [0], [0], [1], [0, 0, 1, 1], [], []>} : vector<4x108xbf16>, vector<108x2048xbf16>, vector<4x2048xf32> -> vector<4x2048xf32>
    %c0_5 = arith.constant 0 : index
    %c0_6 = arith.constant 0 : index
    %35 = vector.load %arg2[%c0_5, %c0_6] : memref<4x128xf32, #tpu.memory_space<vmem>>, vector<4x128xf32>
    %36 = vector.extract_strided_slice %35 {offsets = [0, 0], sizes = [4, 1], strides = [1, 1]} : vector<4x128xf32> to vector<4x1xf32>
    %37 = vector.broadcast %36 : vector<4x1xf32> to vector<4x2048xf32>
    %38 = arith.addf %34, %37 : vector<4x2048xf32>
    %c0_7 = arith.constant 0 : index
    %c0_8 = arith.constant 0 : index
    %39 = vector.load %arg5[%c0_7, %c0_8] : memref<4x2048xf32, #tpu.memory_space<vmem>>, vector<4x2048xf32>
    tpu.vector_store %arg5[%c0_7, %c0_8], %38 {strides = array<i32>} : memref<4x2048xf32, #tpu.memory_space<vmem>>, vector<4x2048xf32>,
    return
  }
  func.func @transform_0(%arg0: i32) -> (i32, i32) {
    %c0_i32 = arith.constant 0 : i32
    %c0_i32_0 = arith.constant 0 : i32
    %c0_i32_1 = arith.constant 0 : i32
    return %c0_i32, %c0_i32_0 : i32, i32
  }
  func.func @transform_1(%arg0: i32) -> (i32, i32) {
    %c0_i32 = arith.constant 0 : i32
    %c0_i32_0 = arith.constant 0 : i32
    %c0_i32_1 = arith.constant 0 : i32
    return %c0_i32, %c0_i32_0 : i32, i32
  }
  func.func @transform_2(%arg0: i32) -> (i32, i32) {
    %c0_i32 = arith.constant 0 : i32
    %0 = arith.addi %arg0, %c0_i32 : i32
    %c0_i32_0 = arith.constant 0 : i32
    %c0_i32_1 = arith.constant 0 : i32
    return %c0_i32_0, %0 : i32, i32
  }
  func.func @transform_3(%arg0: i32) -> (i32, i32) {
    %c1_i32 = arith.constant 1 : i32
    %0 = arith.addi %arg0, %c1_i32 : i32
    %c0_i32 = arith.constant 0 : i32
    %c0_i32_0 = arith.constant 0 : i32
    return %c0_i32, %0 : i32, i32
  }
  func.func @transform_4(%arg0: i32) -> (i32, i32) {
    %c0_i32 = arith.constant 0 : i32
    %c0_i32_0 = arith.constant 0 : i32
    return %c0_i32, %arg0 : i32, i32
  }
}

</mosaic_0001>

<bundles_post_ra>
// kernel: quant_decoder_forward.4
= control target key start
LH: loop header
LB: loop body
LE: loop exit
PB: predicated region body
PF: predicated region fallthrough
CT: control target
= control target key end

     0   :  { %v95_v0 = vmov 0.0   ;;  %vm96_vm0 = vmmov 0   ;;  %v97_v2 = vmov 0   ;;  %vm30_vm1 = vcmask 130048   ;;  %s130_s2 = inlined_call_operand.vmem [shape: bf16[16,128], index: 2, kind: input, shape index: {}]   ;;  %s131_s0 = inlined_call_operand.vmem [shape: bf16[8,16], index: 0, kind: input, shape index: {}]   ;;  %s132_s1 = inlined_call_operand.vmem [shape: f32[8,128], index: 1, kind: input, shape index: {}]   ;;  %s133_s3 = inlined_call_operand.vmem [shape: bf16[8,128], index: 3, kind: output, shape index: {}]  }
   0x1   :  { %84 = vmatprep.subr.bf16.mxu0 %v95_v0  ;;  %v94_v1 = vld [vmem:[%s130_s2] sm:$0xff]   ;;  %86 = vmatprep.mubr.msk.bf16.mxu0 %vm96_vm0, %v95_v0 }
   0x2   :  { %93 = vset.pattern.permute.xlu0 %v97_v2  ;;  %v18_v3 = vld [vmem:[%s132_s1] sm:$0xff]  ;;  %85 = vmatpush3.bf16.msra.mxu0 %v94_v1 }
   0x3   :  { %v17_v4 = vld [vmem:[%s131_s0] sm:$0xf]  ;;  %21 = vperm.xlu0 %93, %v18_v3  }
   0x5   :  { %87 = vmatmul.mubr.msk.bf16.vlgmr.msra.gmra.mrb[0].mxu0 %vm30_vm1, %v17_v4 }
  0x82   :  { %v22_v5 = vpop.permute.xlu0 %21 }
  0xd8   :  { %v68_v6 = vpop.f32.mrb[0].mxu0 }
  0xd9   :  { %v69_v7 = vadd.f32 %v68_v6, %v22_v5  ;;  %v88_v8 = vpop.f32.mrb[1].mxu0 }
  0xda   :  { %v71_v9 = vpop.f32.mrb[2].mxu0 }
  0xdb   :  { %v74_v10 = vpack.c.bf16 %v69_v7, %v69_v7  ;;  %v89_v11 = vpop.f32.mrb[3].mxu0 }
  0xdd   :  { %75 = vst [vmem:[%s133_s3] sm:$0xf] %v74_v10 }

// kernel: quant_decoder_forward.5
= control target key start
LH: loop header
LB: loop body
LE: loop exit
PB: predicated region body
PF: predicated region fallthrough
CT: control target
= control target key end

     0   :  { %s1376_s15 = smov 0   ;;  %s1378_s16 = smov 0   ;;  %s1778_s0 = inlined_call_operand.vmem [shape: bf16[64,216], index: 0, kind: input, shape index: {}]   ;;  %s1779_s1 = inlined_call_operand.vmem [shape: f32[64,128], index: 1, kind: input, shape index: {}]   ;;  %s1780_s2 = inlined_call_operand.vmem [shape: bf16[8,768], index: 2, kind: input, shape index: {}, may-alias: {2,3}]   ;;  %s1781_s3 = inlined_call_operand.vmem [shape: bf16[8,768], index: 3, kind: input, shape index: {}, may-alias: {2,3}]   ;;  %s1782_s4 = inlined_call_operand.vmem [shape: bf16[64,512], index: 4, kind: output, shape index: {}]  }
   0x1   :  { %s1380_s17 = smov 0  }
   0x2 LB: > { %s1389_s18 = sadd.s32 4294967295, %s1325_s17   ;;  %s1391_s19 = sadd.s32 1, %s1325_s17   ;;  %s1325_s17 = sphi %s1380_s17, %s1786_s17   ;;  %s1321_s16 = sphi %s1378_s16, %s1785_s16   ;;  %s1317_s15 = sphi %s1376_s15, %s1784_s15  }
   0x3   : > { %s114_s20 = ssub.s32 %s1325_s17, %s1391_s19  ;;  %s117_s21 = sadd.s32 1, %s1321_s16 }
   0x4   : > { %p115_p0 = scmp.eq.s32.totalorder %s114_s20, 0  ;;  %p127_p1 = scmp.ne.s32.totalorder %s1321_s16, %s1317_s15 }
   0x5   : > { %p128_p2 = scmp.eq.s32.totalorder %s1389_s18, 1  ;;  %p1132_p3 = scmp.ge.s32.totalorder %s1325_s17, 1 }
   0x6   : > { %s1399_s22 = scalar_select %p115_p0, %s1321_s16, %s117_s21  }
   0x7   : > { %p1401_p4 = por %p128_p2, %p127_p1  ;;  %p178_p5 = scmp.lt.s32.totalorder %s1325_s17, 3 }
   0x9   : > { %p179_p6 = pnand %p1132_p3, %p178_p5 }
   0xa   : > { %s1134_s24 = sshll.u32 (!%p179_p6), %s1389_s18, 1  ;;  %s1327_s8 = smov (!%p179_p6), 127   ;;  %vm244_vm0 = vcmask (!%p179_p6), 1039360   ;;  %vm373_vm1 = vcmask (!%p179_p6), 1043456   ;;  %vm453_vm2 = vcmask (!%p179_p6), 850944   ;;  %vm444_vm3 = vcmask (!%p179_p6), 859136  }
   0xb   : > { %182 = sbr.rel (%p179_p6) target bundleno = 601 (0x259), region = 36  ;;  %p210_p7 = scmp.lt.s32.totalorder (!%p179_p6), %s1134_s24, 5  ;;  %vm471_vm4 = vcmask (!%p179_p6), 809984   ;;  %vm462_vm5 = vcmask (!%p179_p6), 842752   ;;  %vm480_vm6 = vcmask (!%p179_p6), 801792   ;;  %vm489_vm7 = vcmask (!%p179_p6), 793600  }
   0xc   : > { %s1168_s25 = sadd.s32 (!%p179_p6), 2, %s1134_s24  ;;  %s1328_s9 = smov (!%p179_p6), 105   ;;  %vm316_vm8 = vcmask (!%p179_p6), 752640   ;;  %vm498_vm9 = vcmask (!%p179_p6), 760832   ;;  %v1261_v60 = vld [vmem:[%s1778_s0 + $0x4] ss:$8 sps:$4 sm:$0xff] (!%p179_p6)  }
   0xd   : > { %p217_p8 = scmp.lt.s32.totalorder (!%p179_p6), %s1168_s25, 5  ;;  %s1329_s10 = smov (!%p179_p6), 104   ;;  %vm704_vm10 = vcmask (!%p179_p6), 719872   ;;  %v1264_v63 = vld [vmem:[%s1778_s0 + $0x24] ss:$8 sps:$4 sm:$0xff] (!%p179_p6)   ;;  %vm325_vm11 = vcmask (!%p179_p6), 744448  }
   0xe   : > { %s1330_s11 = smov (!%p179_p6), 103   ;;  %s1331_s12 = smov (!%p179_p6), 99   ;;  %1150 = vmatprep.mubr.msk.bf16.mxu0 (!%p179_p6), %vm704_vm10, %v1261_v60  ;;  %1152 = vmatprep.mubr.msk.bf16.mxu1 (!%p179_p6), %vm704_vm10, %v1264_v63  ;;  %vm253_vm12 = vcmask (!%p179_p6), 1031168   ;;  %vm262_vm13 = vcmask (!%p179_p6), 998400   ;;  %vm271_vm14 = vcmask (!%p179_p6), 990208   ;;  %vm280_vm15 = vcmask (!%p179_p6), 982016  }
   0xf   : > { %s1332_s13 = smov (!%p179_p6), 98   ;;  %s1333_s14 = smov (!%p179_p6), 97  }
  0x10   : > { %s1334_s17 = smov (!%p179_p6), 92   ;;  %s1335_s20 = smov (!%p179_p6), 93  }
  0x11   : > { %s1336_s21 = smov (!%p179_p6), 91   ;;  %s1340_s27 = smov (!%p179_p6), 120  }
  0x12   : > { %s1788_s24 = smov (!%p210_p7, %s1134_s24), 5  ;;  %s1790_s25 = smov (!%p217_p8, %s1168_s25), 5 }
  0x13   : > { %s1135_s26 = sshll.u32 %s1788_s24, 2  ;;  %s1137_s30 = sshll.u32 %s1790_s25, 2 }
  0x14   : > { %s213_s29 = scalar_lea.vmem %s1780_s2, %s1135_s26  ;;  %s220_s7 = scalar_lea.vmem %s1781_s3, %s1137_s30 }
  0x15   : > { %v225_v0 = vld [vmem:[%s213_s29] sm:$0xff]  ;;  %s1337_s24 = smov 126   ;;  %s1338_s25 = smov 122  }
  0x16   : > { %v1412_v1 = vcombine.high %v225_v0, %v225_v0  ;;  %v1414_v2 = vcombine.low %v225_v0, %v225_v0  ;;  %v1418_v3 = vld [vmem:[%s220_s7] ss:$0 sps:$4 sm:$0xff]   ;;  %s1339_s26 = smov 121   ;;  %s1341_s28 = smov 116  }
  0x17   : > { %s1342_s29 = smov 115   ;;  %s1343_s30 = smov 114  }
  0x18   : > { %240 = vrot.lane.b32.xlu0 %v1412_v1, %s1327_s8  ;;  %238 = vrot.lane.b32.xlu1 %v1414_v2, %s1327_s8  ;;  %s1344_s5 = smov 90   ;;  %s1345_s6 = smov 86  }
  0x19   : > { %s1346_s7 = smov 85  }
  0x1c   : > { %242 = vrot.lane.b32.xlu0 %v1418_v3, %s1327_s8  ;;  %440 = vrot.lane.b32.xlu1 %v1412_v1, %s1328_s9  ;;  %s1347_s8 = smov 84  }
  0x20   : > { %442 = vrot.lane.b32.xlu0 %v1418_v3, %s1328_s9  ;;  %449 = vrot.lane.b32.xlu1 %v1412_v1, %s1329_s10 }
  0x24   : > { %451 = vrot.lane.b32.xlu0 %v1418_v3, %s1329_s10  ;;  %438 = vrot.lane.b32.xlu1 %v1414_v2, %s1328_s9  ;;  %s1348_s9 = smov 80  }
  0x28   : > { %447 = vrot.lane.b32.xlu0 %v1414_v2, %s1329_s10  ;;  %458 = vrot.lane.b32.xlu1 %v1412_v1, %s1330_s11  ;;  %s1349_s10 = smov 79  }
  0x2c   : > { %460 = vrot.lane.b32.xlu0 %v1418_v3, %s1330_s11  ;;  %467 = vrot.lane.b32.xlu1 %v1412_v1, %s1331_s12 }
  0x30   : > { %469 = vrot.lane.b32.xlu0 %v1418_v3, %s1331_s12  ;;  %456 = vrot.lane.b32.xlu1 %v1414_v2, %s1330_s11 }
  0x34   : > { %465 = vrot.lane.b32.xlu0 %v1414_v2, %s1331_s12  ;;  %476 = vrot.lane.b32.xlu1 %v1412_v1, %s1332_s13 }
  0x38   : > { %478 = vrot.lane.b32.xlu0 %v1418_v3, %s1332_s13  ;;  %485 = vrot.lane.b32.xlu1 %v1412_v1, %s1333_s14 }
  0x3c   : > { %487 = vrot.lane.b32.xlu0 %v1418_v3, %s1333_s14  ;;  %474 = vrot.lane.b32.xlu1 %v1414_v2, %s1332_s13 }
  0x40   : > { %483 = vrot.lane.b32.xlu0 %v1414_v2, %s1333_s14  ;;  %312 = vrot.lane.b32.xlu1 %v1412_v1, %s1334_s17 }
  0x44   : > { %314 = vrot.lane.b32.xlu0 %v1418_v3, %s1334_s17  ;;  %494 = vrot.lane.b32.xlu1 %v1412_v1, %s1335_s20 }
  0x48   : > { %496 = vrot.lane.b32.xlu0 %v1418_v3, %s1335_s20  ;;  %310 = vrot.lane.b32.xlu1 %v1414_v2, %s1334_s17 }
  0x4c   : > { %492 = vrot.lane.b32.xlu0 %v1414_v2, %s1335_s20  ;;  %319 = vrot.lane.b32.xlu1 %v1414_v2, %s1336_s21 }
  0x50   : > { %321 = vrot.lane.b32.xlu0 %v1412_v1, %s1336_s21  ;;  %323 = vrot.lane.b32.xlu1 %v1418_v3, %s1336_s21 }
  0x54   : > { %249 = vrot.lane.b32.xlu0 %v1412_v1, %s1337_s24  ;;  %251 = vrot.lane.b32.xlu1 %v1418_v3, %s1337_s24 }
  0x58   : > { %258 = vrot.lane.b32.xlu0 %v1412_v1, %s1338_s25  ;;  %260 = vrot.lane.b32.xlu1 %v1418_v3, %s1338_s25 }
  0x5c   : > { %247 = vrot.lane.b32.xlu0 %v1414_v2, %s1337_s24  ;;  %256 = vrot.lane.b32.xlu1 %v1414_v2, %s1338_s25 }
  0x60   : > { %267 = vrot.lane.b32.xlu0 %v1412_v1, %s1339_s26  ;;  %269 = vrot.lane.b32.xlu1 %v1418_v3, %s1339_s26 }
  0x64   : > { %276 = vrot.lane.b32.xlu0 %v1412_v1, %s1340_s27  ;;  %278 = vrot.lane.b32.xlu1 %v1418_v3, %s1340_s27 }
  0x68   : > { %265 = vrot.lane.b32.xlu0 %v1414_v2, %s1339_s26  ;;  %274 = vrot.lane.b32.xlu1 %v1414_v2, %s1340_s27 }
  0x6c   : > { %285 = vrot.lane.b32.xlu0 %v1412_v1, %s1341_s28  ;;  %287 = vrot.lane.b32.xlu1 %v1418_v3, %s1341_s28 }
  0x70   : > { %294 = vrot.lane.b32.xlu0 %v1412_v1, %s1342_s29  ;;  %296 = vrot.lane.b32.xlu1 %v1418_v3, %s1342_s29 }
  0x74   : > { %283 = vrot.lane.b32.xlu0 %v1414_v2, %s1341_s28  ;;  %292 = vrot.lane.b32.xlu1 %v1414_v2, %s1342_s29  ;;  %s206_s29 = sand.u32 1, %s1317_s15  }
  0x78   : > { %303 = vrot.lane.b32.xlu0 %v1412_v1, %s1343_s30  ;;  %305 = vrot.lane.b32.xlu1 %v1418_v3, %s1343_s30 }
  0x7c   : > { %301 = vrot.lane.b32.xlu0 %v1414_v2, %s1343_s30  ;;  %330 = vrot.lane.b32.xlu1 %v1412_v1, %s1344_s5  ;;  %s1133_s30 = sshll.u32 %s206_s29, 6 }
  0x7d   : > { %s1731_s15 = scalar_lea.vmem [#allocation2], %s1133_s30 }
  0x80   : > { %332 = vrot.lane.b32.xlu0 %v1418_v3, %s1344_s5  ;;  %328 = vrot.lane.b32.xlu1 %v1414_v2, %s1344_s5  ;;  %s1177_s5 = sshll.u32 (%p1401_p4), %s1389_s18, 3 }
  0x84   : > { %339 = vrot.lane.b32.xlu0 %v1412_v1, %s1345_s6  ;;  %341 = vrot.lane.b32.xlu1 %v1418_v3, %s1345_s6 }
  0x88   : > { %348 = vrot.lane.b32.xlu0 %v1412_v1, %s1346_s7  ;;  %350 = vrot.lane.b32.xlu1 %v1418_v3, %s1346_s7 }
  0x8a   : > { %v241_v4 = vpop.permute.xlu0 %240  ;;  %v239_v5 = vpop.permute.xlu1 %238 }
  0x8b   : > { %v245_v6 = vsel %vm244_vm0, %v239_v5, %v241_v4 }
  0x8c   : > { %337 = vrot.lane.b32.xlu0 %v1414_v2, %s1345_s6  ;;  %346 = vrot.lane.b32.xlu1 %v1414_v2, %s1346_s7  ;;  %v376_v11 = vsel %vm373_vm1, %v1414_v2, %v245_v6 }
  0x8e   : > { %v243_v7 = vpop.permute.xlu0 %242  ;;  %v441_v8 = vpop.permute.xlu1 %440 }
  0x8f   : > { %v246_v9 = vsel %vm244_vm0, %v241_v4, %v243_v7  ;;  %v503_v18 = vsel %vm373_vm1, %v1418_v3, %v243_v7  ;;  %vm289_vm0 = vcmask 949248  }
  0x90   : > { %357 = vrot.lane.b32.xlu0 %v1412_v1, %s1347_s8  ;;  %359 = vrot.lane.b32.xlu1 %v1418_v3, %s1347_s8  ;;  %v380_v10 = vsel %vm373_vm1, %v1412_v1, %v246_v9  ;;  %v620_v9 = vld [vmem:[%s1779_s1] sm:$0xff] }
  0x91   : > { %723 = vmatprep.subr.bf16.mxu0 %v380_v10  ;;  %1178 = vmatprep.subr.bf16.mxu1 %v380_v10 }
  0x92   : > { %v443_v12 = vpop.permute.xlu0 %442  ;;  %724 = vmatpush1.bf16.msra.mxu0 %v376_v11  ;;  %1192 = vmatpush1.bf16.msra.mxu1 %v376_v11  ;;  %v450_v13 = vpop.permute.xlu1 %449 }
  0x93   : > { %v446_v20 = vsel %vm444_vm3, %v441_v8, %v443_v12 }
  0x94   : > { %366 = vrot.lane.b32.xlu0 %v1412_v1, %s1348_s9  ;;  %368 = vrot.lane.b32.xlu1 %v1418_v3, %s1348_s9 }
  0x96   : > { %v452_v14 = vpop.permute.xlu0 %451  ;;  %v439_v15 = vpop.permute.xlu1 %438 }
  0x97   : > { %v455_v19 = vsel %vm453_vm2, %v450_v13, %v452_v14  ;;  %v445_v25 = vsel %vm444_vm3, %v439_v15, %v441_v8  ;;  %v512_v28 = vsel %vm373_vm1, %v443_v12, %v452_v14  ;;  %v621_v12 = vld [vmem:[%s1779_s1 + $0x8] sm:$0xff]  ;;  %vm307_vm3 = vcmask 932864  }
  0x98   : > { %355 = vrot.lane.b32.xlu0 %v1414_v2, %s1347_s8  ;;  %364 = vrot.lane.b32.xlu1 %v1414_v2, %s1348_s9  ;;  %v509_v23 = vsel %vm373_vm1, %v446_v20, %v455_v19  ;;  %s1005_s8 = scalar_lea.vmem (%p1401_p4), %s1782_s4, %s1177_s5 }
  0x9a   : > { %v448_v16 = vpop.permute.xlu0 %447  ;;  %v459_v17 = vpop.permute.xlu1 %458 }
  0x9b   : > { %v454_v24 = vsel %vm453_vm2, %v448_v16, %v450_v13  ;;  %v623_v16 = vld [vmem:[%s1779_s1 + $0x18] sm:$0xff]  ;;  %vm298_vm2 = vcmask 941056  }
  0x9c   : > { %555 = vrot.lane.b32.xlu0 %v380_v10, %s1349_s10  ;;  %557 = vrot.lane.b32.xlu1 %v503_v18, %s1349_s10  ;;  %v506_v29 = vsel %vm373_vm1, %v445_v25, %v454_v24  ;;  %v622_v18 = vld [vmem:[%s1779_s1 + $0x10] sm:$0xff]  ;;  %v624_v25 = vld [vmem:[%s1779_s1 + $0x20] sm:$0xff] }
  0x9e   : > { %v461_v21 = vpop.permute.xlu0 %460  ;;  %v468_v22 = vpop.permute.xlu1 %467 }
  0x9f   : > { %v464_v31 = vsel %vm462_vm5, %v459_v17, %v461_v21 }
  0xa0   : > { %553 = vrot.lane.b32.xlu0 %v376_v11, %s1349_s10  ;;  %561 = vrot.lane.b32.xlu1 %v509_v23, %s1349_s10  ;;  %v1350_v11 = vmov 0   ;;  %v625_v23 = vld [vmem:[%s1779_s1 + $0x28] sm:$0xff] }
  0xa1   : > { %1255 = vset.pattern.permute.xlu1 %v1350_v11  ;;  %1254 = vset.pattern.permute.xlu0 %v1350_v11 }
  0xa2   : > { %v470_v26 = vpop.permute.xlu0 %469  ;;  %v457_v27 = vpop.permute.xlu1 %456 }
  0xa3   : > { %v473_v30 = vsel %vm471_vm4, %v468_v22, %v470_v26  ;;  %v521_v34 = vsel %vm373_vm1, %v461_v21, %v470_v26  ;;  %v463_v37 = vsel %vm462_vm5, %v457_v27, %v459_v17  ;;  %vm343_vm5 = vcmask 703488  }
  0xa4   : > { %563 = vrot.lane.b32.xlu0 %v512_v28, %s1349_s10  ;;  %559 = vrot.lane.b32.xlu1 %v506_v29, %s1349_s10  ;;  %v518_v35 = vsel %vm373_vm1, %v464_v31, %v473_v30  ;;  %v627_v28 = vld [vmem:[%s1779_s1 + $0x38] sm:$0xff]  ;;  %v626_v30 = vld [vmem:[%s1779_s1 + $0x30] sm:$0xff] }
  0xa6   : > { %v466_v32 = vpop.permute.xlu0 %465  ;;  %v477_v33 = vpop.permute.xlu1 %476 }
  0xa7   : > { %v472_v36 = vsel %vm471_vm4, %v466_v32, %v468_v22  ;;  %vm334_vm4 = vcmask 736256  }
  0xa8   : > { %569 = vrot.lane.b32.xlu1 %v521_v34, %s1349_s10  ;;  %567 = vrot.lane.b32.xlu0 %v518_v35, %s1349_s10  ;;  %v515_v40 = vsel %vm373_vm1, %v463_v37, %v472_v36 }
  0xaa   : > { %v479_v38 = vpop.permute.xlu0 %478  ;;  %v486_v39 = vpop.permute.xlu1 %485 }
  0xab   : > { %v482_v43 = vsel %vm480_vm6, %v477_v33, %v479_v38 }
  0xac   : > { %565 = vrot.lane.b32.xlu0 %v515_v40, %s1349_s10 }
  0xae   : > { %v488_v41 = vpop.permute.xlu0 %487  ;;  %v475_v42 = vpop.permute.xlu1 %474 }
  0xaf   : > { %v491_v44 = vsel %vm489_vm7, %v486_v39, %v488_v41  ;;  %v530_v45 = vsel %vm373_vm1, %v479_v38, %v488_v41  ;;  %v481_v49 = vsel %vm480_vm6, %v475_v42, %v477_v33  ;;  %vm352_vm6 = vcmask 695296  }
  0xb0   : > { %575 = vrot.lane.b32.xlu0 %v530_v45, %s1349_s10  ;;  %v527_v46 = vsel %vm373_vm1, %v482_v43, %v491_v44 }
  0xb1   : > { %573 = vrot.lane.b32.xlu1 %v527_v46, %s1349_s10 }
  0xb2   : > { %v484_v47 = vpop.permute.xlu0 %483  ;;  %v313_v48 = vpop.permute.xlu1 %312 }
  0xb3   : > { %v490_v50 = vsel %vm489_vm7, %v484_v47, %v486_v39  ;;  %vm361_vm7 = vcmask 687104  }
  0xb4   : > { %v524_v51 = vsel %vm373_vm1, %v481_v49, %v490_v50 }
  0xb5   : > { %571 = vrot.lane.b32.xlu1 %v524_v51, %s1349_s10 }
  0xb6   : > { %v315_v52 = vpop.permute.xlu0 %314  ;;  %v495_v53 = vpop.permute.xlu1 %494 }
  0xb7   : > { %v1511_v56 = vsel %vm316_vm8, %v313_v48, %v315_v52 }
  0xba   : > { %v497_v54 = vpop.permute.xlu0 %496  ;;  %v311_v55 = vpop.permute.xlu1 %310 }
  0xbb   : > { %v500_v57 = vsel %vm498_vm9, %v495_v53, %v497_v54  ;;  %v537_v58 = vsel %vm373_vm1, %v497_v54, %v315_v52  ;;  %v1524_v0 = vsel %vm316_vm8, %v311_v55, %v313_v48  ;;  %vm370_vm8 = vcmask 654336  }
  0xbc   : > { %581 = vrot.lane.b32.xlu1 %v537_v58, %s1349_s10  ;;  %v534_v59 = vsel %vm373_vm1, %v500_v57, %v1511_v56 }
  0xbd   : > { %579 = vrot.lane.b32.xlu0 %v534_v59, %s1349_s10 }
  0xbe   : > { %v493_v61 = vpop.permute.xlu0 %492  ;;  %v320_v62 = vpop.permute.xlu1 %319 }
  0xbf   : > { %v499_v1 = vsel %vm498_vm9, %v493_v61, %v495_v53  ;;  %vm589_vm9 = vcmask 646144  }
  0xc0   : > { %v532_v2 = vsel %vm373_vm1, %v499_v1, %v1524_v0 }
  0xc1   : > { %577 = vrot.lane.b32.xlu0 %v532_v2, %s1349_s10 }
  0xc2   : > { %v322_v3 = vpop.permute.xlu0 %321  ;;  %v324_v4 = vpop.permute.xlu1 %323 }
  0xc3   : > { %v1531_v5 = vsel %vm325_vm11, %v320_v62, %v322_v3  ;;  %v1533_v6 = vsel %vm325_vm11, %v322_v3, %v324_v4 }
  0xc4   : > { %583 = vrot.lane.b32.xlu1 %v1531_v5, %s1349_s10 }
  0xc5   : > { %585 = vrot.lane.b32.xlu0 %v1533_v6, %s1349_s10 }
  0xc6   : > { %v250_v7 = vpop.permute.xlu0 %249  ;;  %v252_v8 = vpop.permute.xlu1 %251 }
  0xc7   : > { %v255_v10 = vsel %vm253_vm12, %v250_v7, %v252_v8 }
  0xc8   : > { %587 = vrot.lane.b32.xlu1 %v324_v4, %s1349_s10 }
  0xc9   : > { %630 = vperm.xlu0 %1254, %v620_v9  }
  0xca   : > { %v259_v13 = vpop.permute.xlu0 %258  ;;  %v261_v14 = vpop.permute.xlu1 %260 }
  0xcb   : > { %v264_v15 = vsel %vm262_vm13, %v259_v13, %v261_v14 }
  0xcc   : > { %v388_v17 = vsel %vm373_vm1, %v255_v10, %v264_v15  ;;  %635 = vperm.xlu1 %1255, %v621_v12  }
  0xcd   : > { %725 = vmatprep.subr.bf16.mxu0 %v388_v17  ;;  %1179 = vmatprep.subr.bf16.mxu1 %v388_v17 }
  0xce   : > { %v248_v19 = vpop.permute.xlu0 %247  ;;  %v257_v20 = vpop.permute.xlu1 %256  ;;  %645 = vperm.xlu0 %1254, %v623_v16  }
  0xcf   : > { %v254_v21 = vsel %vm253_vm12, %v248_v19, %v250_v7  ;;  %v263_v22 = vsel %vm262_vm13, %v257_v20, %v259_v13 }
  0xd0   : > { %v384_v24 = vsel %vm373_vm1, %v254_v21, %v263_v22  ;;  %640 = vperm.xlu1 %1255, %v622_v18  }
  0xd1   : > { %726 = vmatpush1.bf16.msra.mxu0 %v384_v24  ;;  %1193 = vmatpush1.bf16.msra.mxu1 %v384_v24 }
  0xd2   : > { %v268_v26 = vpop.permute.xlu0 %267  ;;  %v270_v27 = vpop.permute.xlu1 %269  ;;  %655 = vperm.xlu0 %1254, %v625_v23  }
  0xd3   : > { %v273_v29 = vsel %vm271_vm14, %v268_v26, %v270_v27 }
  0xd4   : > { %650 = vperm.xlu1 %1255, %v624_v25  }
  0xd6   : > { %v277_v31 = vpop.permute.xlu0 %276  ;;  %v279_v32 = vpop.permute.xlu1 %278  ;;  %665 = vperm.xlu0 %1254, %v627_v28  }
  0xd7   : > { %v282_v33 = vsel %vm280_vm15, %v277_v31, %v279_v32 }
  0xd8   : > { %v396_v34 = vsel %vm373_vm1, %v273_v29, %v282_v33  ;;  %660 = vperm.xlu1 %1255, %v626_v30  }
  0xd9   : > { %727 = vmatprep.subr.bf16.mxu0 %v396_v34  ;;  %1180 = vmatprep.subr.bf16.mxu1 %v396_v34 }
  0xda   : > { %v266_v35 = vpop.permute.xlu0 %265  ;;  %v275_v36 = vpop.permute.xlu1 %274 }
  0xdb   : > { %v272_v37 = vsel %vm271_vm14, %v266_v35, %v268_v26  ;;  %v281_v38 = vsel %vm280_vm15, %v275_v36, %v277_v31 }
  0xdc   : > { %v392_v39 = vsel %vm373_vm1, %v272_v37, %v281_v38 }
  0xdd   : > { %728 = vmatpush1.bf16.msra.mxu0 %v392_v39  ;;  %1194 = vmatpush1.bf16.msra.mxu1 %v392_v39 }
  0xde   : > { %v286_v40 = vpop.permute.xlu0 %285  ;;  %v288_v41 = vpop.permute.xlu1 %287 }
  0xdf   : > { %v291_v42 = vsel %vm289_vm0, %v286_v40, %v288_v41 }
  0xe2   : > { %v295_v43 = vpop.permute.xlu0 %294  ;;  %v297_v44 = vpop.permute.xlu1 %296 }
  0xe3   : > { %v300_v45 = vsel %vm298_vm2, %v295_v43, %v297_v44 }
  0xe4   : > { %v404_v46 = vsel %vm373_vm1, %v291_v42, %v300_v45 }
  0xe5   : > { %729 = vmatprep.subr.bf16.mxu0 %v404_v46  ;;  %1181 = vmatprep.subr.bf16.mxu1 %v404_v46 }
  0xe6   : > { %v284_v47 = vpop.permute.xlu0 %283  ;;  %v293_v48 = vpop.permute.xlu1 %292 }
  0xe7   : > { %v290_v49 = vsel %vm289_vm0, %v284_v47, %v286_v40  ;;  %v299_v50 = vsel %vm298_vm2, %v293_v48, %v295_v43 }
  0xe8   : > { %v400_v51 = vsel %vm373_vm1, %v290_v49, %v299_v50 }
  0xe9   : > { %730 = vmatpush1.bf16.msra.mxu0 %v400_v51  ;;  %1195 = vmatpush1.bf16.msra.mxu1 %v400_v51 }
  0xea   : > { %v304_v52 = vpop.permute.xlu0 %303  ;;  %v306_v53 = vpop.permute.xlu1 %305 }
  0xeb   : > { %v309_v54 = vsel %vm307_vm3, %v304_v52, %v306_v53 }
  0xec   : > { %v412_v55 = vsel %vm373_vm1, %v309_v54, %v1511_v56 }
  0xed   : > { %731 = vmatprep.subr.bf16.mxu0 %v412_v55  ;;  %1182 = vmatprep.subr.bf16.mxu1 %v412_v55 }
  0xee   : > { %v302_v57 = vpop.permute.xlu0 %301  ;;  %v331_v58 = vpop.permute.xlu1 %330 }
  0xef   : > { %v308_v59 = vsel %vm307_vm3, %v302_v57, %v304_v52 }
  0xf0   : > { %v408_v60 = vsel %vm373_vm1, %v308_v59, %v1524_v0  ;;  %v1262_v59 = vld [vmem:[%s1778_s0 + $0x20] ss:$8 sps:$4 sm:$0xff]  }
  0xf1   : > { %732 = vmatpush1.bf16.msra.mxu0 %v408_v60  ;;  %1196 = vmatpush1.bf16.msra.mxu1 %v408_v60  ;;  %v1265_v60 = vld [vmem:[%s1778_s0 + $0x14] ss:$8 sps:$4 sm:$0xff]  }
  0xf2   : > { %v333_v61 = vpop.permute.xlu0 %332  ;;  %v329_v62 = vpop.permute.xlu1 %328 }
  0xf3   : > { %v336_v63 = vsel %vm334_vm4, %v331_v58, %v333_v61  ;;  %v335_v1 = vsel %vm334_vm4, %v329_v62, %v331_v58  ;;  %v1259_v58 = vld [vmem:[%s1778_s0] ss:$8 sps:$4 sm:$0xff]   ;;  %v1267_v61 = vld [vmem:[%s1778_s0 + $0x34] ss:$8 sps:$4 sm:$0xff]   ;;  %v1269_v62 = vld [vmem:[%s1778_s0 + $0x10] ss:$8 sps:$4 sm:$0xff]  }
  0xf4   : > { %v420_v2 = vsel %vm373_vm1, %v1533_v6, %v336_v63  ;;  %v416_v56 = vsel %vm373_vm1, %v1531_v5, %v335_v1  ;;  %v1270_v63 = vld [vmem:[%s1778_s0 + $0x30] ss:$8 sps:$4 sm:$0xff]  }
  0xf5   : > { %733 = vmatprep.subr.bf16.mxu0 %v420_v2  ;;  %1183 = vmatprep.subr.bf16.mxu1 %v420_v2 }
  0xf6   : > { %v340_v3 = vpop.permute.xlu0 %339  ;;  %734 = vmatpush1.bf16.msra.mxu0 %v416_v56  ;;  %1197 = vmatpush1.bf16.msra.mxu1 %v416_v56  ;;  %v342_v0 = vpop.permute.xlu1 %341 }
  0xf7   : > { %v345_v4 = vsel %vm343_vm5, %v340_v3, %v342_v0 }
  0xfa   : > { %v349_v7 = vpop.permute.xlu0 %348  ;;  %v351_v8 = vpop.permute.xlu1 %350 }
  0xfb   : > { %v354_v9 = vsel %vm352_vm6, %v349_v7, %v351_v8 }
  0xfc   : > { %v428_v10 = vsel %vm373_vm1, %v345_v4, %v354_v9 }
  0xfd   : > { %735 = vmatprep.subr.bf16.mxu0 %v428_v10  ;;  %1184 = vmatprep.subr.bf16.mxu1 %v428_v10 }
  0xfe   : > { %v338_v6 = vpop.permute.xlu0 %337  ;;  %v347_v11 = vpop.permute.xlu1 %346 }
  0xff   : > { %v344_v12 = vsel %vm343_vm5, %v338_v6, %v340_v3  ;;  %v353_v5 = vsel %vm352_vm6, %v347_v11, %v349_v7 }
 0x100   : > { %v424_v13 = vsel %vm373_vm1, %v344_v12, %v353_v5 }
 0x101   : > { %736 = vmatpush1.bf16.msra.mxu0 %v424_v13  ;;  %1198 = vmatpush1.bf16.msra.mxu1 %v424_v13 }
 0x102   : > { %v358_v14 = vpop.permute.xlu0 %357  ;;  %v360_v15 = vpop.permute.xlu1 %359 }
 0x103   : > { %v363_v16 = vsel %vm361_vm7, %v358_v14, %v360_v15 }
 0x106   : > { %v367_v17 = vpop.permute.xlu0 %366  ;;  %v369_v18 = vpop.permute.xlu1 %368 }
 0x107   : > { %v372_v19 = vsel %vm370_vm8, %v367_v17, %v369_v18 }
 0x108   : > { %v436_v20 = vsel %vm373_vm1, %v363_v16, %v372_v19 }
 0x109   : > { %737 = vmatprep.subr.bf16.mxu0 %v436_v20  ;;  %1185 = vmatprep.subr.bf16.mxu1 %v436_v20 }
 0x10a   : > { %v356_v21 = vpop.permute.xlu0 %355  ;;  %v365_v22 = vpop.permute.xlu1 %364 }
 0x10b   : > { %v362_v23 = vsel %vm361_vm7, %v356_v21, %v358_v14  ;;  %v371_v24 = vsel %vm370_vm8, %v365_v22, %v367_v17 }
 0x10c   : > { %v432_v25 = vsel %vm373_vm1, %v362_v23, %v371_v24 }
 0x10d   : > { %738 = vmatpush1.bf16.msra.mxu0 %v432_v25  ;;  %1199 = vmatpush1.bf16.msra.mxu1 %v432_v25 }
 0x10e   : > { %v556_v26 = vpop.permute.xlu0 %555  ;;  %v558_v27 = vpop.permute.xlu1 %557 }
 0x10f   : > { %v591_v28 = vsel %vm589_vm9, %v556_v26, %v558_v27 }
 0x110   : > { %739 = vmatprep.subr.bf16.mxu0 %v591_v28  ;;  %1186 = vmatprep.subr.bf16.mxu1 %v591_v28 }
 0x112   : > { %v554_v29 = vpop.permute.xlu0 %553  ;;  %v562_v30 = vpop.permute.xlu1 %561 }
 0x113   : > { %v590_v31 = vsel %vm589_vm9, %v554_v29, %v556_v26 }
 0x114   : > { %740 = vmatpush1.bf16.msra.mxu0 %v590_v31  ;;  %1200 = vmatpush1.bf16.msra.mxu1 %v590_v31 }
 0x116   : > { %v564_v32 = vpop.permute.xlu0 %563  ;;  %v560_v33 = vpop.permute.xlu1 %559 }
 0x117   : > { %v593_v34 = vsel %vm589_vm9, %v562_v30, %v564_v32  ;;  %v592_v35 = vsel %vm589_vm9, %v560_v33, %v562_v30 }
 0x118   : > { %741 = vmatprep.subr.bf16.mxu0 %v593_v34  ;;  %1187 = vmatprep.subr.bf16.mxu1 %v593_v34 }
 0x119   : > { %742 = vmatpush1.bf16.msra.mxu0 %v592_v35  ;;  %1201 = vmatpush1.bf16.msra.mxu1 %v592_v35 }
 0x11a   : > { %v568_v36 = vpop.permute.xlu0 %567  ;;  %v570_v37 = vpop.permute.xlu1 %569 }
 0x11b   : > { %v595_v38 = vsel %vm589_vm9, %v568_v36, %v570_v37 }
 0x11c   : > { %743 = vmatprep.subr.bf16.mxu0 %v595_v38  ;;  %1188 = vmatprep.subr.bf16.mxu1 %v595_v38 }
 0x11e   : > { %v566_v39 = vpop.permute.xlu0 %565 }
 0x11f   : > { %v594_v40 = vsel %vm589_vm9, %v566_v39, %v568_v36 }
 0x120   : > { %744 = vmatpush1.bf16.msra.mxu0 %v594_v40  ;;  %1202 = vmatpush1.bf16.msra.mxu1 %v594_v40 }
 0x122   : > { %v576_v41 = vpop.permute.xlu0 %575 }
 0x123   : > { %v574_v42 = vpop.permute.xlu1 %573 }
 0x124   : > { %v597_v43 = vsel %vm589_vm9, %v574_v42, %v576_v41 }
 0x125   : > { %745 = vmatprep.subr.bf16.mxu0 %v597_v43  ;;  %1189 = vmatprep.subr.bf16.mxu1 %v597_v43 }
 0x127   : > { %v572_v44 = vpop.permute.xlu1 %571 }
 0x128   : > { %v596_v45 = vsel %vm589_vm9, %v572_v44, %v574_v42 }
 0x129   : > { %746 = vmatpush1.bf16.msra.mxu0 %v596_v45  ;;  %1203 = vmatpush1.bf16.msra.mxu1 %v596_v45 }
 0x12e   : > { %v582_v46 = vpop.permute.xlu1 %581 }
 0x12f   : > { %v580_v47 = vpop.permute.xlu0 %579 }
 0x130   : > { %v599_v48 = vsel %vm589_vm9, %v580_v47, %v582_v46 }
 0x131   : > { %747 = vmatprep.subr.bf16.mxu0 %v599_v48  ;;  %1190 = vmatprep.subr.bf16.mxu1 %v599_v48 }
 0x133   : > { %v578_v49 = vpop.permute.xlu0 %577 }
 0x134   : > { %v598_v50 = vsel %vm589_vm9, %v578_v49, %v580_v47 }
 0x135   : > { %748 = vmatpush1.bf16.msra.mxu0 %v598_v50  ;;  %1204 = vmatpush1.bf16.msra.mxu1 %v598_v50 }
 0x136   : > { %v584_v51 = vpop.permute.xlu1 %583 }
 0x137   : > { %v586_v52 = vpop.permute.xlu0 %585 }
 0x138   : > { %v600_v53 = vsel %vm589_vm9, %v584_v51, %v586_v52 }
 0x139   : > { %v718_v57 = vsel %vm373_vm1, %v600_v53, 0 }
 0x13a   : > { %v588_v54 = vpop.permute.xlu1 %587 }
 0x13b   : > { %v601_v55 = vsel %vm589_vm9, %v586_v52, %v588_v54 }
 0x13c   : > { %1149 = vmatprep.subr.msk.bf16.mxu0 %vm373_vm1, %v601_v55  ;;  %1191 = vmatprep.subr.msk.bf16.mxu1 %vm373_vm1, %v601_v55 }
 0x13d   : > { %750 = vmatpush1.bf16.msra.mxu0 %v718_v57  ;;  %1205 = vmatpush1.bf16.msra.mxu1 %v718_v57 }
 0x140   : > { %756 = vmatmul.mubr.bf16.vlgmr.msra.gmra.mrb[0].mxu0 %v1259_v58  ;;  %776 = vmatmul.mubr.bf16.vlgmr.msra.gmra.mrb[0].mxu1 %v1262_v59 }
 0x141   : > { %1151 = vmatprep.mubr.msk.bf16.mxu0 %vm704_vm10, %v1265_v60  ;;  %1153 = vmatprep.mubr.msk.bf16.mxu1 %vm704_vm10, %v1267_v61 }
 0x148   : > { %766 = vmatmul.mubr.bf16.gmra.mrb[4].mxu0 %v1269_v62  ;;  %786 = vmatmul.mubr.bf16.gmra.mrb[4].mxu1 %v1270_v63  ;;  %v631_v1 = vpop.permute.xlu0 %630 }
 0x14b   : > { %v636_v2 = vpop.permute.xlu1 %635 }
 0x14d   : > { %v1623_v56 = vpop.permute.xlu0 %645 }
 0x14f   : > { %v1625_v3 = vpop.permute.xlu1 %640 }
 0x151   : > { %v656_v0 = vpop.permute.xlu0 %655 }
 0x153   : > { %v651_v4 = vpop.permute.xlu1 %650 }
 0x213   : > { %v757_v7 = vpop.f32.mrb[0].mxu0  ;;  %v777_v8 = vpop.f32.mrb[0].mxu1 }
 0x214   : > { %v1627_v9 = vadd.f32 %v757_v7, %v631_v1  ;;  %v1629_v10 = vadd.f32 %v777_v8, %v651_v4  ;;  %v759_v6 = vpop.f32.mrb[1].mxu0  ;;  %v779_v11 = vpop.f32.mrb[1].mxu1 }
 0x215   : > { %v1631_v12 = vadd.f32 %v759_v6, %v631_v1  ;;  %v1633_v5 = vadd.f32 %v779_v11, %v651_v4  ;;  %v761_v13 = vpop.f32.mrb[2].mxu0  ;;  %v781_v14 = vpop.f32.mrb[2].mxu1 }
 0x216   : > { %v796_v15 = vmul.f32 %v1627_v9, %v1627_v9  ;;  %v804_v16 = vmul.f32 %v1629_v10, %v1629_v10  ;;  %v1639_v17 = vadd.f32 %v761_v13, %v636_v2  ;;  %v1641_v18 = vadd.f32 %v781_v14, %v656_v0  ;;  %v763_v19 = vpop.f32.mrb[3].mxu0  ;;  %v783_v20 = vpop.f32.mrb[3].mxu1 }
 0x217   : > { %v797_v21 = vmul.f32 %v1631_v12, %v1631_v12  ;;  %v805_v22 = vmul.f32 %v1633_v5, %v1633_v5  ;;  %v1647_v23 = vadd.f32 %v763_v19, %v636_v2  ;;  %v1649_v24 = vadd.f32 %v783_v20, %v656_v0  ;;  %v661_v0 = vpop.permute.xlu1 %660  ;;  %v666_v14 = vpop.permute.xlu0 %665 }
 0x218   : > { %v812_v25 = vmul.f32 %v796_v15, %v1627_v9  ;;  %v820_v26 = vmul.f32 %v804_v16, %v1629_v10  ;;  %v798_v27 = vmul.f32 %v1639_v17, %v1639_v17  ;;  %v806_v28 = vmul.f32 %v1641_v18, %v1641_v18 }
 0x219   : > { %v813_v29 = vmul.f32 %v797_v21, %v1631_v12  ;;  %v821_v30 = vmul.f32 %v805_v22, %v1633_v5  ;;  %v799_v31 = vmul.f32 %v1647_v23, %v1647_v23  ;;  %v807_v32 = vmul.f32 %v1649_v24, %v1649_v24 }
 0x21a   : > { %v828_v33 = vmul.f32 0.044715, %v812_v25  ;;  %v836_v34 = vmul.f32 0.044715, %v820_v26  ;;  %v814_v35 = vmul.f32 %v798_v27, %v1639_v17  ;;  %v822_v36 = vmul.f32 %v806_v28, %v1641_v18 }
 0x21b   : > { %v829_v37 = vmul.f32 0.044715, %v813_v29  ;;  %v837_v38 = vmul.f32 0.044715, %v821_v30  ;;  %v815_v39 = vmul.f32 %v799_v31, %v1647_v23  ;;  %v823_v40 = vmul.f32 %v807_v32, %v1649_v24  ;;  %v767_v41 = vpop.f32.mrb[4].mxu0  ;;  %v787_v42 = vpop.f32.mrb[4].mxu1 }
 0x21c   : > { %v844_v43 = vadd.f32 %v828_v33, %v1627_v9  ;;  %v852_v44 = vadd.f32 %v836_v34, %v1629_v10  ;;  %v830_v45 = vmul.f32 0.044715, %v814_v35  ;;  %v838_v46 = vmul.f32 0.044715, %v822_v36  ;;  %v769_v47 = vpop.f32.mrb[5].mxu0  ;;  %v789_v48 = vpop.f32.mrb[5].mxu1 }
 0x21d   : > { %v845_v49 = vadd.f32 %v829_v37, %v1631_v12  ;;  %v853_v50 = vadd.f32 %v837_v38, %v1633_v5  ;;  %v831_v51 = vmul.f32 0.044715, %v815_v39  ;;  %v839_v52 = vmul.f32 0.044715, %v823_v40  ;;  %v771_v53 = vpop.f32.mrb[6].mxu0  ;;  %v791_v54 = vpop.f32.mrb[6].mxu1 }
 0x21e   : > { %v860_v55 = vmul.f32 0.7978846, %v844_v43  ;;  %v868_v57 = vmul.f32 0.7978846, %v852_v44  ;;  %v846_v58 = vadd.f32 %v830_v45, %v1639_v17  ;;  %v854_v59 = vadd.f32 %v838_v46, %v1641_v18  ;;  %v773_v60 = vpop.f32.mrb[7].mxu0  ;;  %v793_v61 = vpop.f32.mrb[7].mxu1 }
 0x21f   : > { %v861_v62 = vmul.f32 0.7978846, %v845_v49  ;;  %v869_v63 = vmul.f32 0.7978846, %v853_v50  ;;  %v847_v1 = vadd.f32 %v831_v51, %v1647_v23  ;;  %v855_v2 = vadd.f32 %v839_v52, %v1649_v24 }
 0x220   : > { %1271 = vtanh.f32 %v860_v55  ;;  %v862_v4 = vmul.f32 0.7978846, %v846_v58  ;;  %v870_v7 = vmul.f32 0.7978846, %v854_v59  ;;  %v1676_v8 = vadd.f32 %v767_v41, %v1625_v3 }
 0x221   : > { %1273 = vtanh.f32 %v868_v57  ;;  %v863_v6 = vmul.f32 0.7978846, %v847_v1  ;;  %v871_v11 = vmul.f32 0.7978846, %v855_v2  ;;  %v1678_v13 = vadd.f32 %v787_v42, %v661_v0 }
 0x222   : > { %1275 = vtanh.f32 %v861_v62  ;;  %v800_v15 = vmul.f32 %v1676_v8, %v1676_v8  ;;  %v1683_v16 = vadd.f32 %v769_v47, %v1625_v3  ;;  %v1685_v19 = vadd.f32 %v789_v48, %v661_v0 }
 0x223   : > { %1277 = vtanh.f32 %v869_v63  ;;  %v808_v20 = vmul.f32 %v1678_v13, %v1678_v13  ;;  %v1690_v21 = vadd.f32 %v771_v53, %v1623_v56  ;;  %v1692_v22 = vadd.f32 %v791_v54, %v666_v14 }
 0x224   : > { %1279 = vtanh.f32 %v862_v4  ;;  %v816_v25 = vmul.f32 %v800_v15, %v1676_v8  ;;  %v801_v26 = vmul.f32 %v1683_v16, %v1683_v16  ;;  %v809_v3 = vmul.f32 %v1685_v19, %v1685_v19 }
 0x225   : > { %1281 = vtanh.f32 %v870_v7  ;;  %v824_v27 = vmul.f32 %v808_v20, %v1678_v13  ;;  %v802_v28 = vmul.f32 %v1690_v21, %v1690_v21  ;;  %v810_v29 = vmul.f32 %v1692_v22, %v1692_v22 }
 0x226   : > { %1283 = vtanh.f32 %v863_v6  ;;  %v832_v30 = vmul.f32 0.044715, %v816_v25  ;;  %v817_v31 = vmul.f32 %v801_v26, %v1683_v16  ;;  %v825_v32 = vmul.f32 %v809_v3, %v1685_v19 }
 0x227   : > { %1285 = vtanh.f32 %v871_v11  ;;  %v840_v33 = vmul.f32 0.044715, %v824_v27  ;;  %v818_v34 = vmul.f32 %v802_v28, %v1690_v21  ;;  %v826_v35 = vmul.f32 %v810_v29, %v1692_v22 }
 0x228   : > { %v848_v36 = vadd.f32 %v832_v30, %v1676_v8  ;;  %v833_v37 = vmul.f32 0.044715, %v817_v31  ;;  %v841_v38 = vmul.f32 0.044715, %v825_v32  ;;  %v1711_v42 = vadd.f32 %v773_v60, %v1623_v56 }
 0x229   : > { %v856_v39 = vadd.f32 %v840_v33, %v1678_v13  ;;  %v834_v40 = vmul.f32 0.044715, %v818_v34  ;;  %v842_v41 = vmul.f32 0.044715, %v826_v35  ;;  %v1715_v47 = vadd.f32 %v793_v61, %v666_v14 }
 0x22a   : > { %v1272_v43 = vpop.eup %1271  ;;  %v864_v44 = vmul.f32 0.7978846, %v848_v36  ;;  %v849_v45 = vadd.f32 %v833_v37, %v1683_v16  ;;  %v857_v46 = vadd.f32 %v841_v38, %v1685_v19  ;;  %v803_v1 = vmul.f32 %v1711_v42, %v1711_v42 }
 0x22b   : > { %v1274_v48 = vpop.eup %1273  ;;  %v892_v49 = vadd.f32 1.0, %v1272_v43  ;;  %v872_v50 = vmul.f32 0.7978846, %v856_v39  ;;  %v850_v51 = vadd.f32 %v834_v40, %v1690_v21  ;;  %v858_v52 = vadd.f32 %v842_v41, %v1692_v22 }
 0x22c   : > { %v1276_v53 = vpop.eup %1275  ;;  %v900_v54 = vadd.f32 1.0, %v1274_v48  ;;  %1287 = vtanh.f32 %v864_v44  ;;  %v865_v56 = vmul.f32 0.7978846, %v849_v45  ;;  %v873_v55 = vmul.f32 0.7978846, %v857_v46 }
 0x22d   : > { %v1278_v57 = vpop.eup %1277  ;;  %v908_v58 = vmul.f32 0.5, %v892_v49  ;;  %v893_v59 = vadd.f32 1.0, %v1276_v53  ;;  %1289 = vtanh.f32 %v872_v50  ;;  %v866_v60 = vmul.f32 0.7978846, %v850_v51 }
 0x22e   : > { %v1280_v61 = vpop.eup %1279  ;;  %v916_v62 = vmul.f32 0.5, %v900_v54  ;;  %v901_v63 = vadd.f32 1.0, %v1278_v57  ;;  %1291 = vtanh.f32 %v865_v56  ;;  %v874_v20 = vmul.f32 0.7978846, %v858_v52 }
 0x22f   : > { %v1282_v2 = vpop.eup %1281  ;;  %v924_v0 = vmul.f32 %v908_v58, %v1627_v9  ;;  %v909_v4 = vmul.f32 0.5, %v893_v59  ;;  %v894_v7 = vadd.f32 1.0, %v1280_v61  ;;  %1293 = vtanh.f32 %v873_v55 }
 0x230   : > { %v1284_v6 = vpop.eup %1283  ;;  %v932_v11 = vmul.f32 %v916_v62, %v1629_v10  ;;  %v917_v14 = vmul.f32 0.5, %v901_v63  ;;  %v902_v15 = vadd.f32 1.0, %v1282_v2  ;;  %1295 = vtanh.f32 %v866_v60 }
 0x231   : > { %v1286_v25 = vpop.eup %1285  ;;  %v925_v26 = vmul.f32 %v909_v4, %v1631_v12  ;;  %v910_v3 = vmul.f32 0.5, %v894_v7  ;;  %v895_v27 = vadd.f32 1.0, %v1284_v6  ;;  %v819_v30 = vmul.f32 %v803_v1, %v1711_v42 }
 0x232   : > { %v933_v28 = vmul.f32 %v917_v14, %v1633_v5  ;;  %v918_v29 = vmul.f32 0.5, %v902_v15  ;;  %v903_v9 = vadd.f32 1.0, %v1286_v25  ;;  %v811_v10 = vmul.f32 %v1715_v47, %v1715_v47 }
 0x233   : > { %v1169_v31 = vpack.c.bf16 %v925_v26, %v924_v0  ;;  %v926_v32 = vmul.f32 %v910_v3, %v1639_v17  ;;  %v911_v33 = vmul.f32 0.5, %v895_v27  ;;  %v835_v36 = vmul.f32 0.044715, %v819_v30 }
 0x234   : > { %v1173_v34 = vpack.c.bf16 %v933_v28, %v932_v11  ;;  %v934_v35 = vmul.f32 %v918_v29, %v1641_v18  ;;  %v919_v12 = vmul.f32 0.5, %v903_v9  ;;  %1297 = vtanh.f32 %v874_v20 }
 0x235   : > { %988 = vst [vmem:[%s1731_s15] sm:$0xff] %v1169_v31  ;;  %v927_v5 = vmul.f32 %v911_v33, %v1647_v23  ;;  %v827_v17 = vmul.f32 %v811_v10, %v1715_v47  ;;  %v851_v18 = vadd.f32 %v835_v36, %v1711_v42 }
 0x236   : > { %v1288_v37 = vpop.eup %1287  ;;  %992 = vst [vmem:[%s1731_s15 + $0x20] sm:$0xff] %v1173_v34  ;;  %v935_v38 = vmul.f32 %v919_v12, %v1649_v24 }
 0x237   : > { %v1290_v39 = vpop.eup %1289  ;;  %v1170_v40 = vpack.c.bf16 %v927_v5, %v926_v32  ;;  %v896_v41 = vadd.f32 1.0, %v1288_v37  ;;  %v843_v43 = vmul.f32 0.044715, %v827_v17  ;;  %v867_v48 = vmul.f32 0.7978846, %v851_v18 }
 0x238   : > { %v1292_v44 = vpop.eup %1291  ;;  %v1174_v45 = vpack.c.bf16 %v935_v38, %v934_v35  ;;  %v904_v46 = vadd.f32 1.0, %v1290_v39 }
 0x239   : > { %v1294_v23 = vpop.eup %1293  ;;  %989 = vst [vmem:[%s1731_s15 + $0x8] sm:$0xff] %v1170_v40  ;;  %v912_v49 = vmul.f32 0.5, %v896_v41  ;;  %v897_v50 = vadd.f32 1.0, %v1292_v44  ;;  %v859_v51 = vadd.f32 %v843_v43, %v1715_v47  ;;  %1299 = vtanh.f32 %v867_v48 }
 0x23a   : > { %993 = vst [vmem:[%s1731_s15 + $0x28] sm:$0xff] %v1174_v45  ;;  %v920_v52 = vmul.f32 0.5, %v904_v46  ;;  %v905_v24 = vadd.f32 1.0, %v1294_v23  ;;  %v1296_v53 = vpop.eup %1295 }
 0x23b   : > { %v928_v54 = vmul.f32 %v912_v49, %v1676_v8  ;;  %v913_v56 = vmul.f32 0.5, %v897_v50  ;;  %v875_v55 = vmul.f32 0.7978846, %v859_v51  ;;  %v898_v63 = vadd.f32 1.0, %v1296_v53 }
 0x23c   : > { %v936_v57 = vmul.f32 %v920_v52, %v1678_v13  ;;  %v921_v58 = vmul.f32 0.5, %v905_v24 }
 0x23d   : > { %v929_v59 = vmul.f32 %v913_v56, %v1683_v16  ;;  %1301 = vtanh.f32 %v875_v55  ;;  %v914_v8 = vmul.f32 0.5, %v898_v63  ;;  %v1055_v3 = vld [vmem:[%s1731_s15 + $0x20] sm:$0xff] (%p1401_p4) }
 0x23e   : > { %v937_v60 = vmul.f32 %v921_v58, %v1685_v19  ;;  %v1298_v61 = vpop.eup %1297  ;;  %1056 = vst [vmem:[%s1005_s8 + $0x40] sm:$0xff] (%p1401_p4), %v1055_v3 }
 0x23f   : > { %v1171_v62 = vpack.c.bf16 %v929_v59, %v928_v54  ;;  %v906_v2 = vadd.f32 1.0, %v1298_v61  ;;  %v930_v6 = vmul.f32 %v914_v8, %v1690_v21  ;;  %v1047_v21 = vld [vmem:[%s1731_s15] sm:$0xff] (%p1401_p4) }
 0x240   : > { %v1175_v1 = vpack.c.bf16 %v937_v60, %v936_v57  ;;  %1048 = vst [vmem:[%s1005_s8] sm:$0xff] (%p1401_p4), %v1047_v21 }
 0x241   : > { %990 = vst [vmem:[%s1731_s15 + $0x10] sm:$0xff] %v1171_v62  ;;  %v922_v7 = vmul.f32 0.5, %v906_v2  ;;  %v1057_v27 = vld [vmem:[%s1731_s15 + $0x28] sm:$0xff] (%p1401_p4) }
 0x242   : > { %994 = vst [vmem:[%s1731_s15 + $0x30] sm:$0xff] %v1175_v1  ;;  %1058 = vst [vmem:[%s1005_s8 + $0x50] sm:$0xff] (%p1401_p4), %v1057_v27 }
 0x243   : > { %v1300_v0 = vpop.eup %1299  ;;  %v938_v14 = vmul.f32 %v922_v7, %v1692_v22  ;;  %v1049_v22 = vld [vmem:[%s1731_s15 + $0x8] sm:$0xff] (%p1401_p4) }
 0x244   : > { %v899_v4 = vadd.f32 1.0, %v1300_v0  ;;  %1050 = vst [vmem:[%s1005_s8 + $0x10] sm:$0xff] (%p1401_p4), %v1049_v22 }
 0x246   : > { %v915_v16 = vmul.f32 0.5, %v899_v4 }
 0x247   : > { %v1302_v13 = vpop.eup %1301 }
 0x248   : > { %v907_v11 = vadd.f32 1.0, %v1302_v13  ;;  %v931_v19 = vmul.f32 %v915_v16, %v1711_v42  ;;  %v1051_v42 = vld [vmem:[%s1731_s15 + $0x10] sm:$0xff] (%p1401_p4) }
 0x249   : > { %1052 = vst [vmem:[%s1005_s8 + $0x20] sm:$0xff] (%p1401_p4), %v1051_v42  ;;  %v1059_v28 = vld [vmem:[%s1731_s15 + $0x30] sm:$0xff] (%p1401_p4) }
 0x24a   : > { %v923_v15 = vmul.f32 0.5, %v907_v11  ;;  %v1172_v20 = vpack.c.bf16 %v931_v19, %v930_v6  ;;  %1002 = sbr.rel (!%p1401_p4) target bundleno = 601 (0x259), region = 40  ;;  %1060 = vst [vmem:[%s1005_s8 + $0x60] sm:$0xff] (%p1401_p4), %v1059_v28 }
 0x24c   : > { %v939_v25 = vmul.f32 %v923_v15, %v1715_v47  ;;  %991 = vst [vmem:[%s1731_s15 + $0x18] sm:$0xff] %v1172_v20 }
 0x24e   : > { %v1176_v26 = vpack.c.bf16 %v939_v25, %v938_v14 }
 0x250   : > { %995 = vst [vmem:[%s1731_s15 + $0x38] sm:$0xff] %v1176_v26 }
 0x253   : > { %v1053_v47 = vld [vmem:[%s1731_s15 + $0x18] sm:$0xff] }
 0x254   : > { %1054 = vst [vmem:[%s1005_s8 + $0x30] sm:$0xff] %v1053_v47 }
 0x257   : > { %v1061_v29 = vld [vmem:[%s1731_s15 + $0x38] sm:$0xff] }
 0x258   : > { %1062 = vst [vmem:[%s1005_s8 + $0x70] sm:$0xff] %v1061_v29 }
 0x259 PF: > { %p11_p9 = scmp.ge.s32.totalorder %s1391_s19, 4   ;;  %s1784_s15 = smov %s1321_s16 }
 0x25a   : > { %s1785_s16 = smov %s1399_s22  ;;  %s1786_s17 = smov %s1391_s19 }
 0x25b   :  { %13 = sbr.rel (!%p11_p9) target bundleno = 2 (0x2), region = 107 }

// kernel: quant_decoder_forward.6
= control target key start
LH: loop header
LB: loop body
LE: loop exit
PB: predicated region body
PF: predicated region fallthrough
CT: control target
= control target key end

     0   :  { %s1595_s15 = smov 0   ;;  %s1597_s16 = smov 0   ;;  %s2331_s0 = inlined_call_operand.vmem [shape: bf16[32,216], index: 0, kind: input, shape index: {}]   ;;  %s2332_s1 = inlined_call_operand.vmem [shape: f32[32,128], index: 1, kind: input, shape index: {}]   ;;  %s2333_s2 = inlined_call_operand.vmem [shape: bf16[8,2560], index: 2, kind: input, shape index: {}, may-alias: {2,3}]   ;;  %s2334_s3 = inlined_call_operand.vmem [shape: bf16[8,2560], index: 3, kind: input, shape index: {}, may-alias: {2,3}]   ;;  %s2335_s4 = inlined_call_operand.vmem [shape: bf16[32,2048], index: 4, kind: output, shape index: {}]  }
   0x1   :  { %s1599_s17 = smov 0  }
   0x2 LB: > { %s1608_s18 = sadd.s32 4294967295, %s1544_s17   ;;  %s1610_s19 = sadd.s32 1, %s1544_s17   ;;  %s1544_s17 = sphi %s1599_s17, %s2344_s17   ;;  %s1540_s16 = sphi %s1597_s16, %s2343_s16   ;;  %s1536_s15 = sphi %s1595_s15, %s2342_s15  }
   0x3   : > { %s114_s20 = ssub.s32 %s1544_s17, %s1610_s19  ;;  %s117_s21 = sadd.s32 1, %s1540_s16 }
   0x4   : > { %p115_p0 = scmp.eq.s32.totalorder %s114_s20, 0  ;;  %p127_p1 = scmp.ne.s32.totalorder %s1540_s16, %s1536_s15 }
   0x5   : > { %p128_p2 = scmp.eq.s32.totalorder %s1608_s18, 3  ;;  %p1382_p3 = scmp.ge.s32.totalorder %s1544_s17, 1 }
   0x6   : > { %s1618_s22 = scalar_select %p115_p0, %s1540_s16, %s117_s21  }
   0x7   : > { %p1620_p4 = por %p128_p2, %p127_p1  ;;  %p178_p5 = scmp.lt.s32.totalorder %s1544_s17, 5 }
   0x9   : > { %p179_p6 = pnand %p1382_p3, %p178_p5 }
   0xb   : > { %182 = sbr.rel (%p179_p6) target bundleno = 706 (0x2c2), region = 36 }
  0x12   : > { %s1384_s24 = sshll.u32 %s1608_s18, 2  ;;  %s1546_s5 = smov 127   ;;  %vm258_vm0 = vcmask 1039360   ;;  %vm473_vm1 = vcmask 1043456   ;;  %vm393_vm2 = vcmask 220160   ;;  %vm273_vm3 = vcmask 1031168  }
  0x13   : > { %p210_p7 = scmp.lt.s32.totalorder %s1384_s24, 19  ;;  %s1418_s25 = sadd.s32 4, %s1384_s24  ;;  %vm288_vm4 = vcmask 965632   ;;  %vm628_vm5 = vcmask 392192   ;;  %vm612_vm6 = vcmask 400384   ;;  %vm658_vm7 = vcmask 318464  }
  0x14   : > { %p217_p8 = scmp.lt.s32.totalorder %s1418_s25, 19  ;;  %s1547_s9 = smov 49   ;;  %vm643_vm8 = vcmask 384000   ;;  %vm303_vm9 = vcmask 957440   ;;  %vm318_vm10 = vcmask 949248   ;;  %vm688_vm11 = vcmask 302080  }
  0x15   : > { %s2346_s24 = smov (!%p210_p7, %s1384_s24), 19  ;;  %s1548_s10 = smov 48   ;;  %vm673_vm12 = vcmask 310272   ;;  %vm703_vm13 = vcmask 236544   ;;  %vm378_vm14 = vcmask 228352   ;;  %vm333_vm15 = vcmask 883712  }
  0x16   : > { %s1385_s26 = sshll.u32 %s2346_s24, 2  ;;  %s2348_s25 = smov (!%p217_p8, %s1418_s25), 19 }
  0x17   : > { %s213_s29 = scalar_lea.vmem %s2333_s2, %s1385_s26  ;;  %s1387_s30 = sshll.u32 %s2348_s25, 2 }
  0x18   : > { %v226_v0 = vld [vmem:[%s213_s29 + $0x8] sm:$0xff]  ;;  %v225_v1 = vld [vmem:[%s213_s29] sm:$0xff]  ;;  %s220_s8 = scalar_lea.vmem %s2334_s3, %s1387_s30  ;;  %s1549_s11 = smov 47  }
  0x19   : > { %v1628_v2 = vcombine.high %v226_v0, %v226_v0  ;;  %v1630_v3 = vcombine.high %v225_v1, %v225_v1  ;;  %v1634_v4 = vcombine.low %v226_v0, %v226_v0  ;;  %v227_v5 = vld [vmem:[%s220_s8] sm:$0xff]  ;;  %v1643_v7 = vcombine.low %v225_v1, %v225_v1  ;;  %s1550_s12 = smov 39   ;;  %s1551_s13 = smov 38  }
  0x1a   : > { %v1641_v6 = vcombine.low %v227_v5, %v227_v5  ;;  %v1393_v8 = vcombine.high %v227_v5, %v227_v5  ;;  %s1552_s14 = smov 37   ;;  %s1553_s17 = smov 28  }
  0x1b   : > { %254 = vrot.lane.b32.xlu1 %v1628_v2, %s1546_s5  ;;  %250 = vrot.lane.b32.xlu0 %v1630_v3, %s1546_s5  ;;  %s1554_s20 = smov 29   ;;  %s1555_s21 = smov 27  }
  0x1c   : > { %s1556_s24 = smov 126   ;;  %s1557_s25 = smov 118  }
  0x1d   : > { %s1558_s26 = smov 117   ;;  %s1559_s27 = smov 116  }
  0x1e   : > { %s1560_s28 = smov 108   ;;  %s1561_s29 = smov 107  }
  0x1f   : > { %602 = vrot.lane.b32.xlu1 %v1630_v3, %s1547_s9  ;;  %252 = vrot.lane.b32.xlu0 %v1634_v4, %s1546_s5  ;;  %s1562_s30 = smov 106   ;;  %s1564_s6 = smov 18  }
  0x20   : > { %s1565_s7 = smov 17   ;;  %s1566_s8 = smov 16  }
  0x23   : > { %256 = vrot.lane.b32.xlu1 %v1641_v6, %s1546_s5  ;;  %248 = vrot.lane.b32.xlu0 %v1643_v7, %s1546_s5  ;;  %s1563_s5 = smov 26  }
  0x27   : > { %606 = vrot.lane.b32.xlu1 %v1628_v2, %s1547_s9  ;;  %604 = vrot.lane.b32.xlu0 %v1634_v4, %s1547_s9 }
  0x2b   : > { %610 = vrot.lane.b32.xlu1 %v1393_v8, %s1547_s9  ;;  %608 = vrot.lane.b32.xlu0 %v1641_v6, %s1547_s9  ;;  %s1567_s9 = smov 8  }
  0x2f   : > { %620 = vrot.lane.b32.xlu1 %v1634_v4, %s1548_s10  ;;  %618 = vrot.lane.b32.xlu0 %v1630_v3, %s1548_s10 }
  0x33   : > { %624 = vrot.lane.b32.xlu1 %v1641_v6, %s1548_s10  ;;  %622 = vrot.lane.b32.xlu0 %v1628_v2, %s1548_s10 }
  0x37   : > { %633 = vrot.lane.b32.xlu1 %v1630_v3, %s1549_s11  ;;  %626 = vrot.lane.b32.xlu0 %v1393_v8, %s1548_s10  ;;  %s1568_s10 = smov 7  }
  0x3b   : > { %637 = vrot.lane.b32.xlu1 %v1628_v2, %s1549_s11  ;;  %635 = vrot.lane.b32.xlu0 %v1634_v4, %s1549_s11 }
  0x3f   : > { %641 = vrot.lane.b32.xlu1 %v1393_v8, %s1549_s11  ;;  %639 = vrot.lane.b32.xlu0 %v1641_v6, %s1549_s11 }
  0x43   : > { %650 = vrot.lane.b32.xlu1 %v1634_v4, %s1550_s12  ;;  %648 = vrot.lane.b32.xlu0 %v1630_v3, %s1550_s12 }
  0x47   : > { %654 = vrot.lane.b32.xlu1 %v1641_v6, %s1550_s12  ;;  %652 = vrot.lane.b32.xlu0 %v1628_v2, %s1550_s12 }
  0x4b   : > { %663 = vrot.lane.b32.xlu1 %v1630_v3, %s1551_s13  ;;  %656 = vrot.lane.b32.xlu0 %v1393_v8, %s1550_s12 }
  0x4f   : > { %667 = vrot.lane.b32.xlu1 %v1628_v2, %s1551_s13  ;;  %665 = vrot.lane.b32.xlu0 %v1634_v4, %s1551_s13 }
  0x53   : > { %671 = vrot.lane.b32.xlu1 %v1393_v8, %s1551_s13  ;;  %669 = vrot.lane.b32.xlu0 %v1641_v6, %s1551_s13 }
  0x57   : > { %680 = vrot.lane.b32.xlu1 %v1634_v4, %s1552_s14  ;;  %678 = vrot.lane.b32.xlu0 %v1630_v3, %s1552_s14 }
  0x5b   : > { %684 = vrot.lane.b32.xlu1 %v1641_v6, %s1552_s14  ;;  %682 = vrot.lane.b32.xlu0 %v1628_v2, %s1552_s14 }
  0x5f   : > { %370 = vrot.lane.b32.xlu1 %v1630_v3, %s1553_s17  ;;  %686 = vrot.lane.b32.xlu0 %v1393_v8, %s1552_s14 }
  0x63   : > { %374 = vrot.lane.b32.xlu1 %v1628_v2, %s1553_s17  ;;  %372 = vrot.lane.b32.xlu0 %v1634_v4, %s1553_s17 }
  0x67   : > { %693 = vrot.lane.b32.xlu1 %v1630_v3, %s1554_s20  ;;  %376 = vrot.lane.b32.xlu0 %v1641_v6, %s1553_s17 }
  0x6b   : > { %697 = vrot.lane.b32.xlu1 %v1628_v2, %s1554_s20  ;;  %695 = vrot.lane.b32.xlu0 %v1634_v4, %s1554_s20 }
  0x6f   : > { %701 = vrot.lane.b32.xlu1 %v1393_v8, %s1554_s20  ;;  %699 = vrot.lane.b32.xlu0 %v1641_v6, %s1554_s20 }
  0x73   : > { %385 = vrot.lane.b32.xlu1 %v1630_v3, %s1555_s21  ;;  %708 = vrot.lane.b32.xlu0 %v1393_v8, %s1553_s17 }
  0x77   : > { %389 = vrot.lane.b32.xlu1 %v1628_v2, %s1555_s21  ;;  %387 = vrot.lane.b32.xlu0 %v1634_v4, %s1555_s21 }
  0x7b   : > { %711 = vrot.lane.b32.xlu1 %v1393_v8, %s1555_s21  ;;  %391 = vrot.lane.b32.xlu0 %v1641_v6, %s1555_s21 }
  0x7f   : > { %267 = vrot.lane.b32.xlu1 %v1634_v4, %s1556_s24  ;;  %265 = vrot.lane.b32.xlu0 %v1630_v3, %s1556_s24 }
  0x83   : > { %271 = vrot.lane.b32.xlu1 %v1641_v6, %s1556_s24  ;;  %269 = vrot.lane.b32.xlu0 %v1628_v2, %s1556_s24 }
  0x87   : > { %282 = vrot.lane.b32.xlu1 %v1634_v4, %s1557_s25  ;;  %280 = vrot.lane.b32.xlu0 %v1630_v3, %s1557_s25 }
  0x8b   : > { %286 = vrot.lane.b32.xlu1 %v1641_v6, %s1557_s25  ;;  %284 = vrot.lane.b32.xlu0 %v1628_v2, %s1557_s25 }
  0x8d   : > { %v255_v9 = vpop.permute.xlu1 %254  ;;  %v251_v10 = vpop.permute.xlu0 %250 }
  0x8f   : > { %278 = vrot.lane.b32.xlu1 %v1643_v7, %s1557_s25  ;;  %263 = vrot.lane.b32.xlu0 %v1643_v7, %s1556_s24 }
  0x91   : > { %v1702_v11 = vpop.permute.xlu1 %602  ;;  %v253_v12 = vpop.permute.xlu0 %252 }
  0x92   : > { %v260_v13 = vsel %vm258_vm0, %v251_v10, %v253_v12  ;;  %v261_v17 = vsel %vm258_vm0, %v253_v12, %v255_v9 }
  0x93   : > { %297 = vrot.lane.b32.xlu1 %v1634_v4, %s1558_s26  ;;  %295 = vrot.lane.b32.xlu0 %v1630_v3, %s1558_s26  ;;  %v1710_v14 = vsel %vm473_vm1, %v1630_v3, %v260_v13  ;;  %v1732_v22 = vsel %vm473_vm1, %v1634_v4, %v261_v17 }
  0x94   : > { %969 = vmatprep.subr.bf16.mxu0 %v1710_v14 }
  0x95   : > { %v1713_v15 = vpop.permute.xlu1 %256  ;;  %v249_v16 = vpop.permute.xlu0 %248 }
  0x96   : > { %v259_v18 = vsel %vm258_vm0, %v249_v16, %v251_v10  ;;  %v262_v19 = vsel %vm258_vm0, %v255_v9, %v1713_v15  ;;  %vm348_vm0 = vcmask 875520  }
  0x97   : > { %301 = vrot.lane.b32.xlu1 %v1641_v6, %s1558_s26  ;;  %299 = vrot.lane.b32.xlu0 %v1628_v2, %s1558_s26  ;;  %v1722_v20 = vsel %vm473_vm1, %v1643_v7, %v259_v18  ;;  %v1726_v21 = vsel %vm473_vm1, %v1628_v2, %v262_v19  ;;  %v716_v19 = vsel %vm473_vm1, %v1641_v6, %v1713_v15 }
  0x98   : > { %970 = vmatpush1.bf16.msra.mxu0 %v1722_v20  ;;  %1022 = vmatprep.subr.bf16.mxu1 %v1726_v21 }
  0x99   : > { %v1734_v23 = vpop.permute.xlu1 %606  ;;  %1023 = vmatpush1.bf16.msra.mxu1 %v1732_v22  ;;  %v1737_v24 = vpop.permute.xlu0 %604 }
  0x9a   : > { %v613_v15 = vsel %vm612_vm6, %v1702_v11, %v1737_v24 }
  0x9b   : > { %312 = vrot.lane.b32.xlu1 %v1634_v4, %s1559_s27  ;;  %310 = vrot.lane.b32.xlu0 %v1630_v3, %s1559_s27 }
  0x9d   : > { %v1741_v25 = vpop.permute.xlu1 %610  ;;  %v1743_v26 = vpop.permute.xlu0 %608 }
  0x9f   : > { %316 = vrot.lane.b32.xlu1 %v1641_v6, %s1559_s27  ;;  %314 = vrot.lane.b32.xlu0 %v1628_v2, %s1559_s27 }
  0xa1   : > { %v1747_v27 = vpop.permute.xlu1 %620  ;;  %v1749_v28 = vpop.permute.xlu0 %618 }
  0xa3   : > { %308 = vrot.lane.b32.xlu1 %v1643_v7, %s1559_s27  ;;  %293 = vrot.lane.b32.xlu0 %v1643_v7, %s1558_s26 }
  0xa5   : > { %v1754_v29 = vpop.permute.xlu1 %624  ;;  %v1756_v30 = vpop.permute.xlu0 %622 }
  0xa7   : > { %327 = vrot.lane.b32.xlu1 %v1634_v4, %s1560_s28  ;;  %325 = vrot.lane.b32.xlu0 %v1630_v3, %s1560_s28 }
  0xa9   : > { %v1760_v31 = vpop.permute.xlu1 %633  ;;  %v1762_v32 = vpop.permute.xlu0 %626 }
  0xab   : > { %331 = vrot.lane.b32.xlu1 %v1641_v6, %s1560_s28  ;;  %329 = vrot.lane.b32.xlu0 %v1628_v2, %s1560_s28 }
  0xad   : > { %v1766_v33 = vpop.permute.xlu1 %637  ;;  %v1768_v34 = vpop.permute.xlu0 %635 }
  0xaf   : > { %342 = vrot.lane.b32.xlu1 %v1634_v4, %s1561_s29  ;;  %340 = vrot.lane.b32.xlu0 %v1630_v3, %s1561_s29 }
  0xb1   : > { %v1772_v35 = vpop.permute.xlu1 %641  ;;  %v1774_v36 = vpop.permute.xlu0 %639 }
  0xb3   : > { %346 = vrot.lane.b32.xlu1 %v1641_v6, %s1561_s29  ;;  %344 = vrot.lane.b32.xlu0 %v1628_v2, %s1561_s29 }
  0xb5   : > { %v1778_v37 = vpop.permute.xlu1 %650  ;;  %v1780_v38 = vpop.permute.xlu0 %648 }
  0xb7   : > { %338 = vrot.lane.b32.xlu1 %v1643_v7, %s1561_s29  ;;  %323 = vrot.lane.b32.xlu0 %v1643_v7, %s1560_s28 }
  0xb9   : > { %v1784_v39 = vpop.permute.xlu1 %654  ;;  %v1786_v40 = vpop.permute.xlu0 %652 }
  0xbb   : > { %357 = vrot.lane.b32.xlu1 %v1634_v4, %s1562_s30  ;;  %355 = vrot.lane.b32.xlu0 %v1630_v3, %s1562_s30 }
  0xbd   : > { %v1790_v41 = vpop.permute.xlu1 %663  ;;  %v1792_v42 = vpop.permute.xlu0 %656 }
  0xbf   : > { %361 = vrot.lane.b32.xlu1 %v1641_v6, %s1562_s30  ;;  %359 = vrot.lane.b32.xlu0 %v1628_v2, %s1562_s30 }
  0xc1   : > { %v1796_v43 = vpop.permute.xlu1 %667  ;;  %v1798_v44 = vpop.permute.xlu0 %665 }
  0xc3   : > { %368 = vrot.lane.b32.xlu1 %v1643_v7, %s1553_s17  ;;  %353 = vrot.lane.b32.xlu0 %v1643_v7, %s1562_s30 }
  0xc5   : > { %v1803_v45 = vpop.permute.xlu1 %671  ;;  %v1805_v46 = vpop.permute.xlu0 %669 }
  0xc7   : > { %402 = vrot.lane.b32.xlu1 %v1634_v4, %s1563_s5  ;;  %400 = vrot.lane.b32.xlu0 %v1630_v3, %s1563_s5 }
  0xc9   : > { %v1809_v47 = vpop.permute.xlu1 %680  ;;  %v1811_v48 = vpop.permute.xlu0 %678 }
  0xcb   : > { %406 = vrot.lane.b32.xlu1 %v1641_v6, %s1563_s5  ;;  %404 = vrot.lane.b32.xlu0 %v1628_v2, %s1563_s5 }
  0xcd   : > { %v1815_v49 = vpop.permute.xlu1 %684  ;;  %v1817_v50 = vpop.permute.xlu0 %682 }
  0xcf   : > { %398 = vrot.lane.b32.xlu1 %v1643_v7, %s1563_s5  ;;  %383 = vrot.lane.b32.xlu0 %v1643_v7, %s1555_s21 }
  0xd1   : > { %v1822_v51 = vpop.permute.xlu1 %370  ;;  %v1824_v52 = vpop.permute.xlu0 %686 }
  0xd3   : > { %417 = vrot.lane.b32.xlu1 %v1634_v4, %s1564_s6  ;;  %415 = vrot.lane.b32.xlu0 %v1630_v3, %s1564_s6 }
  0xd5   : > { %v1828_v53 = vpop.permute.xlu1 %374  ;;  %v1830_v54 = vpop.permute.xlu0 %372 }
  0xd7   : > { %421 = vrot.lane.b32.xlu1 %v1641_v6, %s1564_s6  ;;  %419 = vrot.lane.b32.xlu0 %v1628_v2, %s1564_s6 }
  0xd9   : > { %v1834_v55 = vpop.permute.xlu1 %693  ;;  %v1836_v56 = vpop.permute.xlu0 %376 }
  0xdb   : > { %432 = vrot.lane.b32.xlu1 %v1634_v4, %s1565_s7  ;;  %430 = vrot.lane.b32.xlu0 %v1630_v3, %s1565_s7 }
  0xdd   : > { %v1840_v57 = vpop.permute.xlu1 %697  ;;  %v1842_v58 = vpop.permute.xlu0 %695 }
  0xdf   : > { %436 = vrot.lane.b32.xlu1 %v1641_v6, %s1565_s7  ;;  %434 = vrot.lane.b32.xlu0 %v1628_v2, %s1565_s7 }
  0xe1   : > { %v1846_v59 = vpop.permute.xlu1 %701  ;;  %v1848_v60 = vpop.permute.xlu0 %699 }
  0xe3   : > { %428 = vrot.lane.b32.xlu1 %v1643_v7, %s1565_s7  ;;  %413 = vrot.lane.b32.xlu0 %v1643_v7, %s1564_s6  ;;  %s206_s7 = sand.u32 1, %s1536_s15  }
  0xe4   : > { %s1383_s15 = sshll.u32 %s206_s7, 6 }
  0xe5   : > { %v1852_v61 = vpop.permute.xlu1 %385  ;;  %v1854_v62 = vpop.permute.xlu0 %708 }
  0xe7   : > { %447 = vrot.lane.b32.xlu1 %v1634_v4, %s1566_s8  ;;  %445 = vrot.lane.b32.xlu0 %v1630_v3, %s1566_s8 }
  0xe9   : > { %v1858_v63 = vpop.permute.xlu1 %389  ;;  %v1860_v0 = vpop.permute.xlu0 %387 }
  0xeb   : > { %451 = vrot.lane.b32.xlu1 %v1641_v6, %s1566_s8  ;;  %449 = vrot.lane.b32.xlu0 %v1628_v2, %s1566_s8 }
  0xed   : > { %v712_v1 = vpop.permute.xlu1 %711  ;;  %v1864_v5 = vpop.permute.xlu0 %391 }
  0xee   : > { %2338 = vst [vmem:[#allocation3_spill] sm:$0xff] %v1864_v5  ;;  %v1868_v8 = vsel %vm393_vm2, %v1864_v5, %v712_v1 }
  0xef   : > { %2339 = vst [vmem:[#allocation4_spill] sm:$0xff] %v1868_v8  ;;  %462 = vrot.lane.b32.xlu1 %v1634_v4, %s1567_s9  ;;  %460 = vrot.lane.b32.xlu0 %v1630_v3, %s1567_s9 }
  0xf1   : > { %v268_v9 = vpop.permute.xlu1 %267  ;;  %v266_v10 = vpop.permute.xlu0 %265 }
  0xf2   : > { %v275_v4 = vsel %vm273_vm3, %v266_v10, %v268_v9 }
  0xf3   : > { %466 = vrot.lane.b32.xlu1 %v1641_v6, %s1567_s9  ;;  %464 = vrot.lane.b32.xlu0 %v1628_v2, %s1567_s9 }
  0xf5   : > { %v272_v12 = vpop.permute.xlu1 %271  ;;  %v270_v13 = vpop.permute.xlu0 %269 }
  0xf6   : > { %v276_v1 = vsel %vm273_vm3, %v268_v9, %v270_v13  ;;  %v277_v8 = vsel %vm273_vm3, %v270_v13, %v272_v12 }
  0xf7   : > { %458 = vrot.lane.b32.xlu1 %v1643_v7, %s1567_s9  ;;  %443 = vrot.lane.b32.xlu0 %v1643_v7, %s1566_s8  ;;  %s2279_s8 = scalar_lea.vmem [#allocation2], %s1383_s15  ;;  %s1427_s9 = sshll.u32 (%p1620_p4), %s1608_s18, 4 }
  0xf8   : > { %s1284_s12 = scalar_lea.vmem (%p1620_p4), %s2335_s4, %s1427_s9 }
  0xf9   : > { %v283_v16 = vpop.permute.xlu1 %282  ;;  %v281_v17 = vpop.permute.xlu0 %280 }
  0xfa   : > { %v290_v3 = vsel %vm288_vm4, %v281_v17, %v283_v16 }
  0xfb   : > { %803 = vrot.lane.b32.xlu1 %v1732_v22, %s1568_s10  ;;  %801 = vrot.lane.b32.xlu0 %v1710_v14, %s1568_s10  ;;  %v496_v2 = vsel %vm473_vm1, %v275_v4, %v290_v3  ;;  %v629_v14 = vsel %vm628_vm5, %v1749_v28, %v1747_v27 }
  0xfc   : > { %971 = vmatprep.subr.bf16.mxu0 %v496_v2  ;;  %v722_v3 = vsel %vm473_vm1, %v613_v15, %v629_v14  ;;  %v662_v14 = vsel %vm658_vm7, %v1784_v39, %v1792_v42 }
  0xfd   : > { %v287_v7 = vpop.permute.xlu1 %286  ;;  %v285_v18 = vpop.permute.xlu0 %284 }
  0xfe   : > { %v291_v22 = vsel %vm288_vm4, %v283_v16, %v285_v18  ;;  %v292_v5 = vsel %vm288_vm4, %v285_v18, %v287_v7 }
  0xff   : > { %807 = vrot.lane.b32.xlu1 %v716_v19, %s1568_s10  ;;  %805 = vrot.lane.b32.xlu0 %v1726_v21, %s1568_s10  ;;  %v504_v4 = vsel %vm473_vm1, %v277_v8, %v292_v5  ;;  %v500_v6 = vsel %vm473_vm1, %v276_v1, %v291_v22  ;;  %v630_v21 = vsel %vm628_vm5, %v1747_v27, %v1756_v30 }
 0x100   : > { %1024 = vmatprep.subr.bf16.mxu1 %v504_v4  ;;  %v631_v5 = vsel %vm628_vm5, %v1756_v30, %v1754_v29  ;;  %v615_v27 = vsel %vm612_vm6, %v1734_v23, %v1743_v26  ;;  %v659_v19 = vsel %vm658_vm7, %v1780_v38, %v1778_v37  ;;  %v660_v1 = vsel %vm658_vm7, %v1778_v37, %v1786_v40 }
 0x101   : > { %v279_v9 = vpop.permute.xlu1 %278  ;;  %1025 = vmatpush1.bf16.msra.mxu1 %v500_v6  ;;  %v264_v12 = vpop.permute.xlu0 %263  ;;  %v728_v30 = vsel %vm473_vm1, %v615_v27, %v631_v5 }
 0x102   : > { %v289_v13 = vsel %vm288_vm4, %v279_v9, %v281_v17  ;;  %v274_v16 = vsel %vm273_vm3, %v264_v12, %v266_v10  ;;  %v614_v10 = vsel %vm612_vm6, %v1737_v24, %v1734_v23  ;;  %v616_v24 = vsel %vm612_vm6, %v1743_v26, %v1741_v25 }
 0x103   : > { %811 = vrot.lane.b32.xlu1 %v722_v3, %s1568_s10  ;;  %799 = vrot.lane.b32.xlu0 %v1722_v20, %s1568_s10  ;;  %v492_v8 = vsel %vm473_vm1, %v274_v16, %v289_v13  ;;  %v725_v7 = vsel %vm473_vm1, %v614_v10, %v630_v21  ;;  %v632_v20 = vsel %vm628_vm5, %v1754_v29, %v1762_v32  ;;  %vm950_vm3 = vcmask 719872  }
 0x104   : > { %972 = vmatpush1.bf16.msra.mxu0 %v492_v8  ;;  %v719_v29 = vsel %vm473_vm1, %v1702_v11, %v1749_v28  ;;  %v731_v32 = vsel %vm473_vm1, %v616_v24, %v632_v20  ;;  %v644_v25 = vsel %vm643_vm8, %v1760_v31, %v1768_v34  ;;  %v645_v11 = vsel %vm643_vm8, %v1768_v34, %v1766_v33 }
 0x105   : > { %v298_v17 = vpop.permute.xlu1 %297  ;;  %v296_v2 = vpop.permute.xlu0 %295  ;;  %v661_v26 = vsel %vm658_vm7, %v1786_v40, %v1784_v39  ;;  %v737_v22 = vsel %vm473_vm1, %v644_v25, %v659_v19  ;;  %v740_v15 = vsel %vm473_vm1, %v645_v11, %v660_v1  ;;  %v646_v40 = vsel %vm643_vm8, %v1766_v33, %v1774_v36 }
 0x106   : > { %v305_v4 = vsel %vm303_vm9, %v296_v2, %v298_v17  ;;  %v647_v39 = vsel %vm643_vm8, %v1774_v36, %v1772_v35  ;;  %v743_v13 = vsel %vm473_vm1, %v646_v40, %v661_v26  ;;  %v689_v35 = vsel %vm688_vm11, %v1811_v48, %v1809_v47 }
 0x107   : > { %815 = vrot.lane.b32.xlu1 %v728_v30, %s1568_s10  ;;  %813 = vrot.lane.b32.xlu0 %v725_v7, %s1568_s10  ;;  %v746_v12 = vsel %vm473_vm1, %v647_v39, %v662_v14  ;;  %v674_v8 = vsel %vm673_vm12, %v1790_v41, %v1798_v44  ;;  %v734_v7 = vsel %vm473_vm1, %v1760_v31, %v1780_v38  ;;  %vm363_vm4 = vcmask 867328  }
 0x108   : > { %v752_v20 = vsel %vm473_vm1, %v674_v8, %v689_v35  ;;  %v690_v24 = vsel %vm688_vm11, %v1809_v47, %v1817_v50  ;;  %v675_v31 = vsel %vm673_vm12, %v1798_v44, %v1796_v43  ;;  %v676_v38 = vsel %vm673_vm12, %v1796_v43, %v1805_v46 }
 0x109   : > { %v302_v23 = vpop.permute.xlu1 %301  ;;  %v300_v18 = vpop.permute.xlu0 %299  ;;  %v677_v44 = vsel %vm673_vm12, %v1805_v46, %v1803_v45  ;;  %v704_v1 = vsel %vm703_vm13, %v1834_v55, %v1842_v58  ;;  %v380_v45 = vsel %vm378_vm14, %v1822_v51, %v1830_v54  ;;  %v381_v46 = vsel %vm378_vm14, %v1830_v54, %v1828_v53 }
 0x10a   : > { %v306_v16 = vsel %vm303_vm9, %v298_v17, %v300_v18  ;;  %v307_v3 = vsel %vm303_vm9, %v300_v18, %v302_v23  ;;  %v691_v23 = vsel %vm688_vm11, %v1817_v50, %v1815_v49  ;;  %v755_v50 = vsel %vm473_vm1, %v675_v31, %v690_v24 }
 0x10b   : > { %809 = vrot.lane.b32.xlu1 %v719_v29, %s1568_s10  ;;  %817 = vrot.lane.b32.xlu0 %v731_v32, %s1568_s10  ;;  %v758_v19 = vsel %vm473_vm1, %v676_v38, %v691_v23  ;;  %v692_v29 = vsel %vm688_vm11, %v1815_v49, %v1824_v52  ;;  %v705_v49 = vsel %vm703_vm13, %v1842_v58, %v1840_v57  ;;  %v1569_v23 = vmov 0  }
 0x10c   : > { %v749_v52 = vsel %vm473_vm1, %v1790_v41, %v1811_v48  ;;  %v761_v25 = vsel %vm473_vm1, %v677_v44, %v692_v29  ;;  %v768_v41 = vsel %vm473_vm1, %v705_v49, %v381_v46  ;;  %v766_v48 = vsel %vm473_vm1, %v704_v1, %v380_v45  ;;  %1476 = vset.pattern.permute.xlu0 %v1569_v23  ;;  %v911_v29 = vld [vmem:[%s2332_s1 + $0x18] sm:$0xff] }
 0x10d   : > { %v313_v28 = vpop.permute.xlu1 %312  ;;  %v311_v37 = vpop.permute.xlu0 %310  ;;  %v706_v26 = vsel %vm703_vm13, %v1840_v57, %v1848_v60  ;;  %v382_v14 = vsel %vm378_vm14, %v1828_v53, %v1836_v56  ;;  %v707_v57 = vsel %vm703_vm13, %v1848_v60, %v1846_v59  ;;  %1477 = vset.pattern.permute.xlu1 %v1569_v23  ;;  %vm408_vm5 = vcmask 211968  }
 0x10e   : > { %v320_v6 = vsel %vm318_vm10, %v311_v37, %v313_v28  ;;  %vm423_vm6 = vcmask 146432   ;;  %vm438_vm7 = vcmask 138240   ;;  %vm468_vm8 = vcmask 64512  }
 0x10f   : > { %823 = vrot.lane.b32.xlu1 %v740_v15, %s1568_s10  ;;  %821 = vrot.lane.b32.xlu0 %v737_v22, %s1568_s10  ;;  %v512_v34 = vsel %vm473_vm1, %v305_v4, %v320_v6 }
 0x110   : > { %973 = vmatprep.subr.bf16.mxu0 %v512_v34  ;;  %v770_v34 = vsel %vm473_vm1, %v706_v26, %v382_v14 }
 0x111   : > { %v317_v42 = vpop.permute.xlu1 %316  ;;  %v315_v9 = vpop.permute.xlu0 %314 }
 0x112   : > { %v321_v21 = vsel %vm318_vm10, %v313_v28, %v315_v9  ;;  %v322_v33 = vsel %vm318_vm10, %v315_v9, %v317_v42  ;;  %v710_v28 = vsel %vm378_vm14, %v1836_v56, %v1854_v62  ;;  %v1486_v62 = vld [vmem:[%s2331_s0 + $0x4] ss:$8 sps:$4 sm:$0xff]  }
 0x113   : > { %827 = vrot.lane.b32.xlu1 %v746_v12, %s1568_s10  ;;  %825 = vrot.lane.b32.xlu0 %v743_v13, %s1568_s10  ;;  %v520_v36 = vsel %vm473_vm1, %v307_v3, %v322_v33  ;;  %v516_v5 = vsel %vm473_vm1, %v306_v16, %v321_v21  ;;  %v773_v40 = vsel %vm473_vm1, %v707_v57, %v710_v28 }
 0x114   : > { %1026 = vmatprep.subr.bf16.mxu1 %v520_v36  ;;  %1399 = vmatprep.mubr.msk.bf16.mxu0 %vm950_vm3, %v1486_v62  ;;  %v764_v16 = vsel %vm473_vm1, %v1834_v55, %v1822_v51  ;;  %v396_v36 = vsel %vm393_vm2, %v1860_v0, %v1858_v63  ;;  %v395_v55 = vsel %vm393_vm2, %v1852_v61, %v1860_v0 }
 0x115   : > { %v309_v10 = vpop.permute.xlu1 %308  ;;  %1027 = vmatpush1.bf16.msra.mxu1 %v516_v5  ;;  %v294_v27 = vpop.permute.xlu0 %293  ;;  %1402 = vmatprep.mubr.msk.bf16.mxu1 %vm950_vm3, %v1486_v62 }
 0x116   : > { %v319_v17 = vsel %vm318_vm10, %v309_v10, %v311_v37  ;;  %v304_v30 = vsel %vm303_vm9, %v294_v27, %v296_v2  ;;  %v2340_v27 = vld [vmem:[#allocation3_spill] sm:$0xff]  ;;  %vm859_vm9 = vcmask 56320  }
 0x117   : > { %819 = vrot.lane.b32.xlu0 %v734_v7, %s1568_s10  ;;  %831 = vrot.lane.b32.xlu1 %v752_v20, %s1568_s10  ;;  %v508_v2 = vsel %vm473_vm1, %v304_v30, %v319_v17  ;;  %v397_v17 = vsel %vm393_vm2, %v1858_v63, %v2340_v27  ;;  %v2341_v20 = vld [vmem:[#allocation4_spill] sm:$0xff]  ;;  %v908_v63 = vld [vmem:[%s2332_s1] sm:$0xff] }
 0x118   : > { %974 = vmatpush1.bf16.msra.mxu0 %v508_v2  ;;  %v909_v2 = vld [vmem:[%s2332_s1 + $0x8] sm:$0xff] }
 0x119   : > { %v328_v47 = vpop.permute.xlu1 %327  ;;  %v326_v18 = vpop.permute.xlu0 %325 }
 0x11a   : > { %v335_v37 = vsel %vm333_vm15, %v326_v18, %v328_v47 }
 0x11b   : > { %835 = vrot.lane.b32.xlu1 %v758_v19, %s1568_s10  ;;  %833 = vrot.lane.b32.xlu0 %v755_v50, %s1568_s10  ;;  %v910_v50 = vld [vmem:[%s2332_s1 + $0x10] sm:$0xff] }
 0x11d   : > { %v332_v43 = vpop.permute.xlu1 %331  ;;  %v330_v32 = vpop.permute.xlu0 %329 }
 0x11e   : > { %v336_v4 = vsel %vm333_vm15, %v328_v47, %v330_v32  ;;  %v337_v53 = vsel %vm333_vm15, %v330_v32, %v332_v43 }
 0x11f   : > { %829 = vrot.lane.b32.xlu1 %v749_v52, %s1568_s10  ;;  %837 = vrot.lane.b32.xlu0 %v761_v25, %s1568_s10 }
 0x121   : > { %v343_v58 = vpop.permute.xlu1 %342  ;;  %v341_v11 = vpop.permute.xlu0 %340 }
 0x122   : > { %v350_v22 = vsel %vm348_vm0, %v341_v11, %v343_v58 }
 0x123   : > { %843 = vrot.lane.b32.xlu1 %v768_v41, %s1568_s10  ;;  %841 = vrot.lane.b32.xlu0 %v766_v48, %s1568_s10  ;;  %v528_v54 = vsel %vm473_vm1, %v335_v37, %v350_v22 }
 0x124   : > { %975 = vmatprep.subr.bf16.mxu0 %v528_v54 }
 0x125   : > { %v347_v6 = vpop.permute.xlu1 %346  ;;  %v345_v15 = vpop.permute.xlu0 %344 }
 0x126   : > { %v351_v56 = vsel %vm348_vm0, %v343_v58, %v345_v15  ;;  %v352_v59 = vsel %vm348_vm0, %v345_v15, %v347_v6 }
 0x127   : > { %845 = vrot.lane.b32.xlu0 %v770_v34, %s1568_s10  ;;  %847 = vrot.lane.b32.xlu1 %v773_v40, %s1568_s10  ;;  %v536_v60 = vsel %vm473_vm1, %v337_v53, %v352_v59  ;;  %v532_v39 = vsel %vm473_vm1, %v336_v4, %v351_v56 }
 0x128   : > { %1028 = vmatprep.subr.bf16.mxu1 %v536_v60 }
 0x129   : > { %v339_v42 = vpop.permute.xlu1 %338  ;;  %1029 = vmatpush1.bf16.msra.mxu1 %v532_v39  ;;  %v324_v9 = vpop.permute.xlu0 %323 }
 0x12a   : > { %v349_v12 = vsel %vm348_vm0, %v339_v42, %v341_v11  ;;  %v334_v13 = vsel %vm333_vm15, %v324_v9, %v326_v18 }
 0x12b   : > { %839 = vrot.lane.b32.xlu0 %v764_v16, %s1568_s10  ;;  %849 = vrot.lane.b32.xlu1 %v1852_v61, %s1568_s10  ;;  %v524_v3 = vsel %vm473_vm1, %v334_v13, %v349_v12 }
 0x12c   : > { %976 = vmatpush1.bf16.msra.mxu0 %v524_v3 }
 0x12d   : > { %v358_v21 = vpop.permute.xlu1 %357  ;;  %v356_v33 = vpop.permute.xlu0 %355 }
 0x12e   : > { %v365_v35 = vsel %vm363_vm4, %v356_v33, %v358_v21 }
 0x12f   : > { %853 = vrot.lane.b32.xlu1 %v396_v36, %s1568_s10  ;;  %851 = vrot.lane.b32.xlu0 %v395_v55, %s1568_s10  ;;  %v544_v5 = vsel %vm473_vm1, %v365_v35, %v380_v45 }
 0x130   : > { %977 = vmatprep.subr.bf16.mxu0 %v544_v5 }
 0x131   : > { %v362_v8 = vpop.permute.xlu1 %361  ;;  %v360_v10 = vpop.permute.xlu0 %359 }
 0x132   : > { %v366_v30 = vsel %vm363_vm4, %v358_v21, %v360_v10  ;;  %v367_v7 = vsel %vm363_vm4, %v360_v10, %v362_v8 }
 0x133   : > { %857 = vrot.lane.b32.xlu1 %v2341_v20, %s1568_s10  ;;  %855 = vrot.lane.b32.xlu0 %v397_v17, %s1568_s10  ;;  %v552_v0 = vsel %vm473_vm1, %v367_v7, %v382_v14  ;;  %v548_v24 = vsel %vm473_vm1, %v366_v30, %v381_v46 }
 0x134   : > { %1030 = vmatprep.subr.bf16.mxu1 %v552_v0 }
 0x135   : > { %v369_v31 = vpop.permute.xlu1 %368  ;;  %1031 = vmatpush1.bf16.msra.mxu1 %v548_v24  ;;  %v354_v38 = vpop.permute.xlu0 %353 }
 0x136   : > { %v379_v47 = vsel %vm378_vm14, %v369_v31, %v1822_v51  ;;  %v364_v18 = vsel %vm363_vm4, %v354_v38, %v356_v33 }
 0x137   : > { %v540_v19 = vsel %vm473_vm1, %v364_v18, %v379_v47  ;;  %914 = vperm.xlu0 %1476, %v908_v63   ;;  %919 = vperm.xlu1 %1477, %v909_v2  }
 0x138   : > { %978 = vmatpush1.bf16.msra.mxu0 %v540_v19 }
 0x139   : > { %v403_v44 = vpop.permute.xlu1 %402  ;;  %v401_v43 = vpop.permute.xlu0 %400 }
 0x13a   : > { %v410_v51 = vsel %vm408_vm5, %v401_v43, %v403_v44 }
 0x13b   : > { %v560_v32 = vsel %vm473_vm1, %v395_v55, %v410_v51  ;;  %924 = vperm.xlu1 %1477, %v910_v50   ;;  %929 = vperm.xlu0 %1476, %v911_v29  }
 0x13c   : > { %979 = vmatprep.subr.bf16.mxu0 %v560_v32 }
 0x13d   : > { %v407_v1 = vpop.permute.xlu1 %406  ;;  %v405_v49 = vpop.permute.xlu0 %404 }
 0x13e   : > { %v411_v52 = vsel %vm408_vm5, %v403_v44, %v405_v49  ;;  %v412_v25 = vsel %vm408_vm5, %v405_v49, %v407_v1 }
 0x13f   : > { %v568_v45 = vsel %vm473_vm1, %v397_v17, %v412_v25  ;;  %v564_v46 = vsel %vm473_vm1, %v396_v36, %v411_v52 }
 0x140   : > { %1032 = vmatprep.subr.bf16.mxu1 %v568_v45 }
 0x141   : > { %v399_v58 = vpop.permute.xlu1 %398  ;;  %1033 = vmatpush1.bf16.msra.mxu1 %v564_v46  ;;  %v384_v11 = vpop.permute.xlu0 %383 }
 0x142   : > { %v409_v41 = vsel %vm408_vm5, %v399_v58, %v401_v43  ;;  %v394_v48 = vsel %vm393_vm2, %v384_v11, %v1852_v61  ;;  %vm453_vm2 = vcmask 130048  }
 0x143   : > { %v556_v26 = vsel %vm473_vm1, %v394_v48, %v409_v41 }
 0x144   : > { %980 = vmatpush1.bf16.msra.mxu0 %v556_v26 }
 0x145   : > { %v418_v28 = vpop.permute.xlu1 %417  ;;  %v416_v37 = vpop.permute.xlu0 %415 }
 0x146   : > { %v425_v62 = vsel %vm423_vm6, %v416_v37, %v418_v28 }
 0x149   : > { %v422_v22 = vpop.permute.xlu1 %421  ;;  %v420_v54 = vpop.permute.xlu0 %419 }
 0x14a   : > { %v426_v34 = vsel %vm423_vm6, %v418_v28, %v420_v54  ;;  %v427_v40 = vsel %vm423_vm6, %v420_v54, %v422_v22 }
 0x14d   : > { %v433_v14 = vpop.permute.xlu1 %432  ;;  %v431_v57 = vpop.permute.xlu0 %430 }
 0x14e   : > { %v440_v4 = vsel %vm438_vm7, %v431_v57, %v433_v14 }
 0x14f   : > { %v576_v6 = vsel %vm473_vm1, %v425_v62, %v440_v4 }
 0x150   : > { %981 = vmatprep.subr.bf16.mxu0 %v576_v6 }
 0x151   : > { %v437_v15 = vpop.permute.xlu1 %436  ;;  %v435_v61 = vpop.permute.xlu0 %434 }
 0x152   : > { %v441_v53 = vsel %vm438_vm7, %v433_v14, %v435_v61  ;;  %v442_v56 = vsel %vm438_vm7, %v435_v61, %v437_v15 }
 0x153   : > { %v584_v59 = vsel %vm473_vm1, %v427_v40, %v442_v56  ;;  %v580_v60 = vsel %vm473_vm1, %v426_v34, %v441_v53 }
 0x154   : > { %1034 = vmatprep.subr.bf16.mxu1 %v584_v59 }
 0x155   : > { %v429_v39 = vpop.permute.xlu1 %428  ;;  %1035 = vmatpush1.bf16.msra.mxu1 %v580_v60  ;;  %v414_v42 = vpop.permute.xlu0 %413 }
 0x156   : > { %v439_v9 = vsel %vm438_vm7, %v429_v39, %v431_v57  ;;  %v424_v12 = vsel %vm423_vm6, %v414_v42, %v416_v37 }
 0x157   : > { %v572_v13 = vsel %vm473_vm1, %v424_v12, %v439_v9 }
 0x158   : > { %982 = vmatpush1.bf16.msra.mxu0 %v572_v13 }
 0x159   : > { %v448_v16 = vpop.permute.xlu1 %447  ;;  %v446_v3 = vpop.permute.xlu0 %445 }
 0x15a   : > { %v455_v55 = vsel %vm453_vm2, %v446_v3, %v448_v16 }
 0x15d   : > { %v452_v21 = vpop.permute.xlu1 %451  ;;  %v450_v33 = vpop.permute.xlu0 %449 }
 0x15e   : > { %v456_v17 = vsel %vm453_vm2, %v448_v16, %v450_v33  ;;  %v457_v30 = vsel %vm453_vm2, %v450_v33, %v452_v21 }
 0x161   : > { %v463_v35 = vpop.permute.xlu1 %462  ;;  %v461_v36 = vpop.permute.xlu0 %460 }
 0x162   : > { %v470_v5 = vsel %vm468_vm8, %v461_v36, %v463_v35 }
 0x163   : > { %v592_v8 = vsel %vm473_vm1, %v455_v55, %v470_v5 }
 0x164   : > { %983 = vmatprep.subr.bf16.mxu0 %v592_v8 }
 0x165   : > { %v467_v10 = vpop.permute.xlu1 %466  ;;  %v465_v27 = vpop.permute.xlu0 %464 }
 0x166   : > { %v471_v7 = vsel %vm468_vm8, %v463_v35, %v465_v27  ;;  %v472_v20 = vsel %vm468_vm8, %v465_v27, %v467_v10  ;;  %v1484_v10 = vld [vmem:[%s2331_s0] ss:$8 sps:$4 sm:$0xff]   ;;  %v1487_v27 = vld [vmem:[%s2331_s0 + $0x14] ss:$8 sps:$4 sm:$0xff]  }
 0x167   : > { %v600_v0 = vsel %vm473_vm1, %v457_v30, %v472_v20  ;;  %v596_v24 = vsel %vm473_vm1, %v456_v17, %v471_v7 }
 0x168   : > { %1036 = vmatprep.subr.bf16.mxu1 %v600_v0 }
 0x169   : > { %v459_v23 = vpop.permute.xlu1 %458  ;;  %1037 = vmatpush1.bf16.msra.mxu1 %v596_v24  ;;  %v444_v63 = vpop.permute.xlu0 %443  ;;  %v1489_v24 = vld [vmem:[%s2331_s0 + $0x10] ss:$8 sps:$4 sm:$0xff]  }
 0x16a   : > { %v469_v2 = vsel %vm468_vm8, %v459_v23, %v461_v36  ;;  %v454_v31 = vsel %vm453_vm2, %v444_v63, %v446_v3 }
 0x16b   : > { %v588_v38 = vsel %vm473_vm1, %v454_v31, %v469_v2 }
 0x16c   : > { %984 = vmatpush1.bf16.msra.mxu0 %v588_v38 }
 0x16d   : > { %v804_v47 = vpop.permute.xlu1 %803  ;;  %v802_v18 = vpop.permute.xlu0 %801 }
 0x16e   : > { %v861_v19 = vsel %vm859_vm9, %v802_v18, %v804_v47 }
 0x16f   : > { %985 = vmatprep.subr.bf16.mxu0 %v861_v19 }
 0x171   : > { %v808_v50 = vpop.permute.xlu1 %807  ;;  %v806_v29 = vpop.permute.xlu0 %805 }
 0x172   : > { %v863_v44 = vsel %vm859_vm9, %v806_v29, %v808_v50  ;;  %v862_v43 = vsel %vm859_vm9, %v804_v47, %v806_v29 }
 0x173   : > { %1038 = vmatprep.subr.bf16.mxu1 %v863_v44 }
 0x174   : > { %1039 = vmatpush1.bf16.msra.mxu1 %v862_v43 }
 0x175   : > { %v812_v51 = vpop.permute.xlu1 %811  ;;  %v800_v32 = vpop.permute.xlu0 %799 }
 0x176   : > { %v860_v1 = vsel %vm859_vm9, %v800_v32, %v802_v18 }
 0x177   : > { %986 = vmatpush1.bf16.msra.mxu0 %v860_v1 }
 0x179   : > { %v816_v49 = vpop.permute.xlu1 %815  ;;  %v814_v52 = vpop.permute.xlu0 %813 }
 0x17a   : > { %v865_v25 = vsel %vm859_vm9, %v812_v51, %v814_v52  ;;  %v866_v41 = vsel %vm859_vm9, %v814_v52, %v816_v49 }
 0x17b   : > { %987 = vmatprep.subr.bf16.mxu0 %v865_v25 }
 0x17d   : > { %v810_v45 = vpop.permute.xlu1 %809  ;;  %v818_v46 = vpop.permute.xlu0 %817 }
 0x17e   : > { %v864_v58 = vsel %vm859_vm9, %v810_v45, %v812_v51  ;;  %v867_v11 = vsel %vm859_vm9, %v816_v49, %v818_v46 }
 0x17f   : > { %988 = vmatpush1.bf16.msra.mxu0 %v864_v58  ;;  %1040 = vmatprep.subr.bf16.mxu1 %v867_v11 }
 0x180   : > { %1041 = vmatpush1.bf16.msra.mxu1 %v866_v41 }
 0x181   : > { %v824_v48 = vpop.permute.xlu1 %823  ;;  %v822_v26 = vpop.permute.xlu0 %821 }
 0x182   : > { %v869_v28 = vsel %vm859_vm9, %v822_v26, %v824_v48 }
 0x183   : > { %989 = vmatprep.subr.bf16.mxu0 %v869_v28 }
 0x185   : > { %v828_v37 = vpop.permute.xlu1 %827  ;;  %v826_v22 = vpop.permute.xlu0 %825 }
 0x186   : > { %v871_v54 = vsel %vm859_vm9, %v826_v22, %v828_v37  ;;  %v870_v14 = vsel %vm859_vm9, %v824_v48, %v826_v22 }
 0x187   : > { %1042 = vmatprep.subr.bf16.mxu1 %v871_v54 }
 0x188   : > { %1043 = vmatpush1.bf16.msra.mxu1 %v870_v14 }
 0x189   : > { %v832_v57 = vpop.permute.xlu1 %831  ;;  %v820_v62 = vpop.permute.xlu0 %819 }
 0x18a   : > { %v868_v4 = vsel %vm859_vm9, %v820_v62, %v822_v26 }
 0x18b   : > { %990 = vmatpush1.bf16.msra.mxu0 %v868_v4 }
 0x18d   : > { %v836_v6 = vpop.permute.xlu1 %835  ;;  %v834_v15 = vpop.permute.xlu0 %833 }
 0x18e   : > { %v873_v61 = vsel %vm859_vm9, %v832_v57, %v834_v15  ;;  %v874_v59 = vsel %vm859_vm9, %v834_v15, %v836_v6 }
 0x18f   : > { %991 = vmatprep.subr.bf16.mxu0 %v873_v61 }
 0x191   : > { %v830_v34 = vpop.permute.xlu1 %829  ;;  %v838_v40 = vpop.permute.xlu0 %837 }
 0x192   : > { %v872_v53 = vsel %vm859_vm9, %v830_v34, %v832_v57  ;;  %v875_v56 = vsel %vm859_vm9, %v836_v6, %v838_v40 }
 0x193   : > { %992 = vmatpush1.bf16.msra.mxu0 %v872_v53  ;;  %1044 = vmatprep.subr.bf16.mxu1 %v875_v56 }
 0x194   : > { %1045 = vmatpush1.bf16.msra.mxu1 %v874_v59 }
 0x195   : > { %v844_v60 = vpop.permute.xlu1 %843  ;;  %v842_v39 = vpop.permute.xlu0 %841 }
 0x196   : > { %v877_v42 = vsel %vm859_vm9, %v842_v39, %v844_v60 }
 0x197   : > { %993 = vmatprep.subr.bf16.mxu0 %v877_v42 }
 0x199   : > { %v848_v9 = vpop.permute.xlu1 %847  ;;  %v846_v12 = vpop.permute.xlu0 %845 }
 0x19a   : > { %v879_v13 = vsel %vm859_vm9, %v846_v12, %v848_v9  ;;  %v878_v16 = vsel %vm859_vm9, %v844_v60, %v846_v12 }
 0x19b   : > { %1046 = vmatprep.subr.bf16.mxu1 %v879_v13 }
 0x19c   : > { %1047 = vmatpush1.bf16.msra.mxu1 %v878_v16 }
 0x19d   : > { %v850_v3 = vpop.permute.xlu1 %849  ;;  %v840_v21 = vpop.permute.xlu0 %839 }
 0x19e   : > { %v876_v33 = vsel %vm859_vm9, %v840_v21, %v842_v39 }
 0x19f   : > { %994 = vmatpush1.bf16.msra.mxu0 %v876_v33 }
 0x1a1   : > { %v854_v35 = vpop.permute.xlu1 %853  ;;  %v852_v36 = vpop.permute.xlu0 %851 }
 0x1a2   : > { %v880_v55 = vsel %vm859_vm9, %v850_v3, %v852_v36  ;;  %v881_v5 = vsel %vm859_vm9, %v852_v36, %v854_v35 }
 0x1a3   : > { %1398 = vmatprep.subr.msk.bf16.mxu0 %vm473_vm1, %v881_v5  ;;  %v958_v8 = vsel %vm473_vm1, %v880_v55, 0 }
 0x1a4   : > { %996 = vmatpush1.bf16.msra.mxu0 %v958_v8 }
 0x1a5   : > { %v858_v17 = vpop.permute.xlu1 %857  ;;  %v856_v30 = vpop.permute.xlu0 %855 }
 0x1a6   : > { %v882_v7 = vsel %vm859_vm9, %v854_v35, %v856_v30  ;;  %v883_v20 = vsel %vm859_vm9, %v856_v30, %v858_v17 }
 0x1a7   : > { %1002 = vmatmul.mubr.bf16.vlgmr.msra.gmra.mrb[0].mxu0 %v1484_v10  ;;  %1401 = vmatprep.subr.msk.bf16.mxu1 %vm473_vm1, %v883_v20  ;;  %v964_v0 = vsel %vm473_vm1, %v882_v7, 0 }
 0x1a8   : > { %1049 = vmatpush1.bf16.msra.mxu1 %v964_v0  ;;  %1400 = vmatprep.mubr.msk.bf16.mxu0 %vm950_vm3, %v1487_v27 }
 0x1ab   : > { %1055 = vmatmul.mubr.bf16.vlgmr.msra.gmra.mrb[0].mxu1 %v1484_v10 }
 0x1ac   : > { %1403 = vmatprep.mubr.msk.bf16.mxu1 %vm950_vm3, %v1487_v27 }
 0x1af   : > { %1012 = vmatmul.mubr.bf16.gmra.mrb[4].mxu0 %v1489_v24 }
 0x1b3   : > { %1065 = vmatmul.mubr.bf16.gmra.mrb[4].mxu1 %v1489_v24 }
 0x1b6   : > { %v915_v23 = vpop.permute.xlu0 %914  ;;  %v920_v2 = vpop.permute.xlu1 %919 }
 0x1ba   : > { %v925_v33 = vpop.permute.xlu1 %924  ;;  %v930_v30 = vpop.permute.xlu0 %929 }
 0x27a   : > { %v1003_v63 = vpop.f32.mrb[0].mxu0 }
 0x27b   : > { %v2184_v31 = vadd.f32 %v1003_v63, %v915_v23  ;;  %v1005_v38 = vpop.f32.mrb[1].mxu0 }
 0x27c   : > { %v2186_v47 = vadd.f32 %v1005_v38, %v915_v23  ;;  %v1007_v18 = vpop.f32.mrb[2].mxu0 }
 0x27d   : > { %v1075_v19 = vmul.f32 %v2184_v31, %v2184_v31  ;;  %v2190_v50 = vadd.f32 %v1007_v18, %v920_v2  ;;  %v1009_v29 = vpop.f32.mrb[3].mxu0 }
 0x27e   : > { %v1076_v44 = vmul.f32 %v2186_v47, %v2186_v47  ;;  %v2194_v43 = vadd.f32 %v1009_v29, %v920_v2  ;;  %v1056_v51 = vpop.f32.mrb[0].mxu1 }
 0x27f   : > { %v1091_v32 = vmul.f32 %v1075_v19, %v2184_v31  ;;  %v1079_v1 = vmul.f32 %v2190_v50, %v2190_v50  ;;  %v2199_v49 = vadd.f32 %v1056_v51, %v915_v23  ;;  %v1058_v52 = vpop.f32.mrb[1].mxu1 }
 0x280   : > { %v1092_v25 = vmul.f32 %v1076_v44, %v2186_v47  ;;  %v1080_v45 = vmul.f32 %v2194_v43, %v2194_v43  ;;  %v2204_v46 = vadd.f32 %v1058_v52, %v915_v23  ;;  %v1060_v58 = vpop.f32.mrb[2].mxu1 }
 0x281   : > { %v1107_v11 = vmul.f32 0.044715, %v1091_v32  ;;  %v1095_v41 = vmul.f32 %v1079_v1, %v2190_v50  ;;  %v1077_v48 = vmul.f32 %v2199_v49, %v2199_v49  ;;  %v2209_v26 = vadd.f32 %v1060_v58, %v920_v2  ;;  %v1062_v28 = vpop.f32.mrb[3].mxu1 }
 0x282   : > { %v1108_v37 = vmul.f32 0.044715, %v1092_v25  ;;  %v1096_v22 = vmul.f32 %v1080_v45, %v2194_v43  ;;  %v1078_v54 = vmul.f32 %v2204_v46, %v2204_v46  ;;  %v2214_v14 = vadd.f32 %v1062_v28, %v920_v2  ;;  %v1013_v57 = vpop.f32.mrb[4].mxu0 }
 0x283   : > { %v1123_v62 = vadd.f32 %v1107_v11, %v2184_v31  ;;  %v1111_v4 = vmul.f32 0.044715, %v1095_v41  ;;  %v1093_v6 = vmul.f32 %v1077_v48, %v2199_v49  ;;  %v1081_v15 = vmul.f32 %v2209_v26, %v2209_v26  ;;  %v1015_v61 = vpop.f32.mrb[5].mxu0 }
 0x284   : > { %v1124_v34 = vadd.f32 %v1108_v37, %v2186_v47  ;;  %v1112_v40 = vmul.f32 0.044715, %v1096_v22  ;;  %v1094_v53 = vmul.f32 %v1078_v54, %v2204_v46  ;;  %v1082_v56 = vmul.f32 %v2214_v14, %v2214_v14  ;;  %v1017_v59 = vpop.f32.mrb[6].mxu0 }
 0x285   : > { %v1139_v60 = vmul.f32 0.7978846, %v1123_v62  ;;  %v1127_v39 = vadd.f32 %v1111_v4, %v2190_v50  ;;  %v1109_v42 = vmul.f32 0.044715, %v1093_v6  ;;  %v1097_v9 = vmul.f32 %v1081_v15, %v2209_v26  ;;  %v1019_v12 = vpop.f32.mrb[7].mxu0 }
 0x286   : > { %v1140_v13 = vmul.f32 0.7978846, %v1124_v34  ;;  %v1128_v16 = vadd.f32 %v1112_v40, %v2194_v43  ;;  %v1110_v3 = vmul.f32 0.044715, %v1094_v53  ;;  %v1098_v21 = vmul.f32 %v1082_v56, %v2214_v14  ;;  %v1066_v35 = vpop.f32.mrb[4].mxu1 }
 0x287   : > { %1490 = vtanh.f32 %v1139_v60  ;;  %v1143_v36 = vmul.f32 0.7978846, %v1127_v39  ;;  %v1125_v55 = vadd.f32 %v1109_v42, %v2199_v49  ;;  %v1113_v5 = vmul.f32 0.044715, %v1097_v9  ;;  %v1068_v8 = vpop.f32.mrb[5].mxu1 }
 0x288   : > { %1492 = vtanh.f32 %v1140_v13  ;;  %v1144_v10 = vmul.f32 0.7978846, %v1128_v16  ;;  %v1126_v27 = vadd.f32 %v1110_v3, %v2204_v46  ;;  %v1114_v17 = vmul.f32 0.044715, %v1098_v21  ;;  %v1070_v7 = vpop.f32.mrb[6].mxu1 }
 0x289   : > { %1494 = vtanh.f32 %v1143_v36  ;;  %v1141_v20 = vmul.f32 0.7978846, %v1125_v55  ;;  %v1129_v0 = vadd.f32 %v1113_v5, %v2209_v26  ;;  %v2231_v24 = vadd.f32 %v1013_v57, %v925_v33  ;;  %v1072_v23 = vpop.f32.mrb[7].mxu1 }
 0x28a   : > { %1496 = vtanh.f32 %v1144_v10  ;;  %v1142_v63 = vmul.f32 0.7978846, %v1126_v27  ;;  %v1130_v2 = vadd.f32 %v1114_v17, %v2214_v14  ;;  %v2234_v38 = vadd.f32 %v1015_v61, %v925_v33 }
 0x28b   : > { %1498 = vtanh.f32 %v1141_v20  ;;  %v1145_v18 = vmul.f32 0.7978846, %v1129_v0  ;;  %v1083_v19 = vmul.f32 %v2231_v24, %v2231_v24  ;;  %v2238_v29 = vadd.f32 %v1017_v59, %v930_v30 }
 0x28c   : > { %1500 = vtanh.f32 %v1142_v63  ;;  %v1146_v44 = vmul.f32 0.7978846, %v1130_v2  ;;  %v1084_v51 = vmul.f32 %v2234_v38, %v2234_v38  ;;  %v2242_v32 = vadd.f32 %v1019_v12, %v930_v30 }
 0x28d   : > { %1502 = vtanh.f32 %v1145_v18  ;;  %v1099_v1 = vmul.f32 %v1083_v19, %v2231_v24  ;;  %v1087_v52 = vmul.f32 %v2238_v29, %v2238_v29  ;;  %v2247_v25 = vadd.f32 %v1066_v35, %v925_v33 }
 0x28e   : > { %1504 = vtanh.f32 %v1146_v44  ;;  %v1100_v45 = vmul.f32 %v1084_v51, %v2234_v38  ;;  %v1088_v58 = vmul.f32 %v2242_v32, %v2242_v32  ;;  %v2252_v11 = vadd.f32 %v1068_v8, %v925_v33 }
 0x28f   : > { %v1115_v41 = vmul.f32 0.044715, %v1099_v1  ;;  %v1103_v48 = vmul.f32 %v1087_v52, %v2238_v29  ;;  %v1085_v28 = vmul.f32 %v2247_v25, %v2247_v25  ;;  %v2257_v37 = vadd.f32 %v1070_v7, %v930_v30 }
 0x290   : > { %v1116_v22 = vmul.f32 0.044715, %v1100_v45  ;;  %v1104_v54 = vmul.f32 %v1088_v58, %v2242_v32  ;;  %v1086_v57 = vmul.f32 %v2252_v11, %v2252_v11  ;;  %v2262_v62 = vadd.f32 %v1072_v23, %v930_v30 }
 0x291   : > { %v1491_v4 = vpop.eup %1490  ;;  %v1131_v6 = vadd.f32 %v1115_v41, %v2231_v24  ;;  %v1119_v15 = vmul.f32 0.044715, %v1103_v48  ;;  %v1101_v61 = vmul.f32 %v1085_v28, %v2247_v25  ;;  %v1089_v34 = vmul.f32 %v2257_v37, %v2257_v37 }
 0x292   : > { %v1493_v40 = vpop.eup %1492  ;;  %v1171_v53 = vadd.f32 1.0, %v1491_v4  ;;  %v1132_v56 = vadd.f32 %v1116_v22, %v2234_v38  ;;  %v1120_v59 = vmul.f32 0.044715, %v1104_v54  ;;  %v1102_v60 = vmul.f32 %v1086_v57, %v2252_v11 }
 0x293   : > { %v1495_v39 = vpop.eup %1494  ;;  %v1172_v42 = vadd.f32 1.0, %v1493_v40  ;;  %v1147_v9 = vmul.f32 0.7978846, %v1131_v6  ;;  %v1135_v12 = vadd.f32 %v1119_v15, %v2238_v29  ;;  %v1117_v13 = vmul.f32 0.044715, %v1101_v61 }
 0x294   : > { %v1497_v16 = vpop.eup %1496  ;;  %v1187_v3 = vmul.f32 0.5, %v1171_v53  ;;  %v1175_v21 = vadd.f32 1.0, %v1495_v39  ;;  %v1148_v33 = vmul.f32 0.7978846, %v1132_v56  ;;  %v1136_v35 = vadd.f32 %v1120_v59, %v2242_v32 }
 0x295   : > { %v1499_v36 = vpop.eup %1498  ;;  %v1188_v55 = vmul.f32 0.5, %v1172_v42  ;;  %v1176_v5 = vadd.f32 1.0, %v1497_v16  ;;  %1506 = vtanh.f32 %v1147_v9  ;;  %v1151_v8 = vmul.f32 0.7978846, %v1135_v12 }
 0x296   : > { %v1501_v10 = vpop.eup %1500  ;;  %v1203_v27 = vmul.f32 %v1187_v3, %v2184_v31  ;;  %v1191_v17 = vmul.f32 0.5, %v1175_v21  ;;  %v1173_v30 = vadd.f32 1.0, %v1499_v36  ;;  %1508 = vtanh.f32 %v1148_v33 }
 0x297   : > { %v1503_v7 = vpop.eup %1502  ;;  %v1204_v20 = vmul.f32 %v1188_v55, %v2186_v47  ;;  %v1192_v0 = vmul.f32 0.5, %v1176_v5  ;;  %v1174_v23 = vadd.f32 1.0, %v1501_v10  ;;  %1510 = vtanh.f32 %v1151_v8 }
 0x298   : > { %v1505_v63 = vpop.eup %1504  ;;  %v1207_v2 = vmul.f32 %v1191_v17, %v2190_v50  ;;  %v1189_v18 = vmul.f32 0.5, %v1173_v30  ;;  %v1177_v19 = vadd.f32 1.0, %v1503_v7  ;;  %v1152_v44 = vmul.f32 0.7978846, %v1136_v35 }
 0x299   : > { %v1419_v51 = vpack.c.bf16 %v1204_v20, %v1203_v27  ;;  %v1208_v1 = vmul.f32 %v1192_v0, %v2194_v43  ;;  %v1190_v52 = vmul.f32 0.5, %v1174_v23  ;;  %v1178_v31 = vadd.f32 1.0, %v1505_v63 }
 0x29a   : > { %v1205_v45 = vmul.f32 %v1189_v18, %v2199_v49  ;;  %v1193_v58 = vmul.f32 0.5, %v1177_v19  ;;  %1512 = vtanh.f32 %v1152_v44  ;;  %v1133_v47 = vadd.f32 %v1117_v13, %v2247_v25 }
 0x29b   : > { %1267 = vst [vmem:[%s2279_s8] sm:$0xff] %v1419_v51  ;;  %v1421_v50 = vpack.c.bf16 %v1208_v1, %v1207_v2  ;;  %v1206_v41 = vmul.f32 %v1190_v52, %v2204_v46  ;;  %v1194_v48 = vmul.f32 0.5, %v1178_v31  ;;  %v1118_v28 = vmul.f32 0.044715, %v1102_v60 }
 0x29c   : > { %v1209_v43 = vmul.f32 %v1193_v58, %v2209_v26  ;;  %v1149_v22 = vmul.f32 0.7978846, %v1133_v47  ;;  %v1105_v49 = vmul.f32 %v1089_v34, %v2257_v37  ;;  %v1090_v54 = vmul.f32 %v2262_v62, %v2262_v62 }
 0x29d   : > { %1269 = vst [vmem:[%s2279_s8 + $0x10] sm:$0xff] %v1421_v50  ;;  %v1420_v57 = vpack.c.bf16 %v1206_v41, %v1205_v45  ;;  %v1210_v4 = vmul.f32 %v1194_v48, %v2214_v14  ;;  %v1134_v6 = vadd.f32 %v1118_v28, %v2252_v11 }
 0x29e   : > { %1514 = vtanh.f32 %v1149_v22  ;;  %v1121_v15 = vmul.f32 0.044715, %v1105_v49  ;;  %v1106_v46 = vmul.f32 %v1090_v54, %v2262_v62 }
 0x29f   : > { %v1507_v61 = vpop.eup %1506  ;;  %1268 = vst [vmem:[%s2279_s8 + $0x8] sm:$0xff] %v1420_v57  ;;  %v1422_v26 = vpack.c.bf16 %v1210_v4, %v1209_v43  ;;  %v1150_v40 = vmul.f32 0.7978846, %v1134_v6 }
 0x2a0   : > { %v1509_v53 = vpop.eup %1508  ;;  %v1179_v34 = vadd.f32 1.0, %v1507_v61  ;;  %v1137_v56 = vadd.f32 %v1121_v15, %v2257_v37  ;;  %v1122_v59 = vmul.f32 0.044715, %v1106_v46 }
 0x2a1   : > { %v1511_v60 = vpop.eup %1510  ;;  %1270 = vst [vmem:[%s2279_s8 + $0x18] sm:$0xff] %v1422_v26  ;;  %v1180_v39 = vadd.f32 1.0, %v1509_v53  ;;  %1516 = vtanh.f32 %v1150_v40 }
 0x2a2   : > { %v1195_v14 = vmul.f32 0.5, %v1179_v34  ;;  %v1183_v42 = vadd.f32 1.0, %v1511_v60  ;;  %v1153_v9 = vmul.f32 0.7978846, %v1137_v56  ;;  %v1138_v12 = vadd.f32 %v1122_v59, %v2262_v62 }
 0x2a3   : > { %v1196_v13 = vmul.f32 0.5, %v1180_v39 }
 0x2a4   : > { %v1513_v16 = vpop.eup %1512  ;;  %v1211_v3 = vmul.f32 %v1195_v14, %v2231_v24  ;;  %v1199_v21 = vmul.f32 0.5, %v1183_v42  ;;  %1518 = vtanh.f32 %v1153_v9  ;;  %v1154_v33 = vmul.f32 0.7978846, %v1138_v12 }
 0x2a5   : > { %v1212_v35 = vmul.f32 %v1196_v13, %v2234_v38  ;;  %v1184_v36 = vadd.f32 1.0, %v1513_v16 }
 0x2a6   : > { %1520 = vtanh.f32 %v1154_v33  ;;  %v1215_v5 = vmul.f32 %v1199_v21, %v2238_v29 }
 0x2a7   : > { %v1423_v55 = vpack.c.bf16 %v1212_v35, %v1211_v3  ;;  %v1200_v8 = vmul.f32 0.5, %v1184_v36 }
 0x2a8   : > { %v1515_v10 = vpop.eup %1514 }
 0x2a9   : > { %1271 = vst [vmem:[%s2279_s8 + $0x20] sm:$0xff] %v1423_v55  ;;  %v1216_v27 = vmul.f32 %v1200_v8, %v2242_v32  ;;  %v1181_v17 = vadd.f32 1.0, %v1515_v10 }
 0x2ab   : > { %v1517_v30 = vpop.eup %1516  ;;  %v1425_v24 = vpack.c.bf16 %v1216_v27, %v1215_v5  ;;  %v1197_v7 = vmul.f32 0.5, %v1181_v17 }
 0x2ac   : > { %v1182_v20 = vadd.f32 1.0, %v1517_v30 }
 0x2ad   : > { %1273 = vst [vmem:[%s2279_s8 + $0x30] sm:$0xff] %v1425_v24  ;;  %v1213_v38 = vmul.f32 %v1197_v7, %v2247_v25  ;;  %v1297_v25 = vld [vmem:[%s2279_s8] sm:$0xff] (%p1620_p4) }
 0x2ae   : > { %v1519_v0 = vpop.eup %1518  ;;  %v1198_v23 = vmul.f32 0.5, %v1182_v20  ;;  %1298 = vst [vmem:[%s1284_s12] sm:$0xff] (%p1620_p4), %v1297_v25 }
 0x2af   : > { %v1185_v63 = vadd.f32 1.0, %v1519_v0 }
 0x2b0   : > { %v1521_v2 = vpop.eup %1520  ;;  %v1214_v29 = vmul.f32 %v1198_v23, %v2252_v11  ;;  %v1299_v11 = vld [vmem:[%s2279_s8 + $0x8] sm:$0xff] (%p1620_p4)  ;;  %v1305_v31 = vld [vmem:[%s2279_s8 + $0x20] sm:$0xff] (%p1620_p4) }
 0x2b1   : > { %v1201_v18 = vmul.f32 0.5, %v1185_v63  ;;  %v1186_v19 = vadd.f32 1.0, %v1521_v2  ;;  %1300 = vst [vmem:[%s1284_s12 + $0x8] sm:$0xff] (%p1620_p4), %v1299_v11  ;;  %1306 = vst [vmem:[%s1284_s12 + $0x80] sm:$0xff] (%p1620_p4), %v1305_v31 }
 0x2b2   : > { %v1424_v44 = vpack.c.bf16 %v1214_v29, %v1213_v38 }
 0x2b3   : > { %v1217_v32 = vmul.f32 %v1201_v18, %v2257_v37  ;;  %v1202_v51 = vmul.f32 0.5, %v1186_v19  ;;  %1281 = sbr.rel (!%p1620_p4) target bundleno = 706 (0x2c2), region = 40  ;;  %v1301_v37 = vld [vmem:[%s2279_s8 + $0x10] sm:$0xff] (%p1620_p4) }
 0x2b4   : > { %1272 = vst [vmem:[%s2279_s8 + $0x28] sm:$0xff] %v1424_v44  ;;  %1302 = vst [vmem:[%s1284_s12 + $0x40] sm:$0xff] (%p1620_p4), %v1301_v37  ;;  %v1309_v58 = vld [vmem:[%s2279_s8 + $0x30] sm:$0xff] (%p1620_p4) }
 0x2b5   : > { %v1218_v1 = vmul.f32 %v1202_v51, %v2262_v62  ;;  %v1303_v62 = vld [vmem:[%s2279_s8 + $0x18] sm:$0xff] (%p1620_p4)  ;;  %1310 = vst [vmem:[%s1284_s12 + $0xc0] sm:$0xff] (%p1620_p4), %v1309_v58 }
 0x2b6   : > { %1304 = vst [vmem:[%s1284_s12 + $0x48] sm:$0xff] (%p1620_p4), %v1303_v62 }
 0x2b7   : > { %v1426_v52 = vpack.c.bf16 %v1218_v1, %v1217_v32 }
 0x2b9   : > { %1274 = vst [vmem:[%s2279_s8 + $0x38] sm:$0xff] %v1426_v52 }
 0x2bb   : > { %v1307_v45 = vld [vmem:[%s2279_s8 + $0x28] sm:$0xff] }
 0x2bc   : > { %1308 = vst [vmem:[%s1284_s12 + $0x88] sm:$0xff] %v1307_v45 }
 0x2c0   : > { %v1311_v47 = vld [vmem:[%s2279_s8 + $0x38] sm:$0xff] }
 0x2c1   : > { %1312 = vst [vmem:[%s1284_s12 + $0xc8] sm:$0xff] %v1311_v47 }
 0x2c2 PF: > { %p11_p9 = scmp.ge.s32.totalorder %s1610_s19, 6   ;;  %s2342_s15 = smov %s1540_s16 }
 0x2c3   : > { %s2343_s16 = smov %s1618_s22  ;;  %s2344_s17 = smov %s1610_s19 }
 0x2c4   :  { %13 = sbr.rel (!%p11_p9) target bundleno = 2 (0x2), region = 92 }

// kernel: quant_decoder_forward.7
= control target key start
LH: loop header
LB: loop body
LE: loop exit
PB: predicated region body
PF: predicated region fallthrough
CT: control target
= control target key end

     0   :  { %s3177_s15 = smov 0   ;;  %s6377_s0 = inlined_call_operand.vmem [shape: bf16[4,108], index: 0, kind: input, shape index: {}]   ;;  %s6378_s1 = inlined_call_operand.vmem [shape: f32[4,128], index: 1, kind: input, shape index: {}]   ;;  %s6379_s2 = inlined_call_operand.vmem [shape: bf16[4,14336], index: 2, kind: input, shape index: {}, may-alias: {2,3}]   ;;  %s6380_s3 = inlined_call_operand.vmem [shape: bf16[4,14336], index: 3, kind: input, shape index: {}, may-alias: {2,3}]   ;;  %s6381_s4 = inlined_call_operand.vmem [shape: f32[4,12288], index: 4, kind: output, shape index: {}]  }
   0x1 LB: > { %s3047_s16 = sadd.s32 4294967295, %s3125_s15   ;;  %p3051_p0 = scmp.ge.s32.totalorder %s3125_s15, 1  ;;  %s3125_s15 = sphi %s3177_s15, %s14_s15  }
   0x2   : > { %p178_p1 = scmp.lt.s32.totalorder %s3125_s15, 7 }
   0x4   : > { %p179_p2 = pnand %p3051_p0, %p178_p1 }
   0x6   : > { %182 = sbr.rel (%p179_p2) target bundleno = 1244 (0x4dc), region = 36 }
   0xd   : > { %s3185_s17 = sshll.u32 %s3047_s16, 4  ;;  %v245_v0 = vlaneseq  ;;  %v3127_v1 = vmov 1983009808   ;;  %s3128_s23 = smov 127   ;;  %vm6623_vm0 = vcmask 1039360   ;;  %vm455_vm1 = vcmask 1031168  }
   0xe   : > { %p211_p3 = scmp.lt.s32.totalorder %s3185_s17, 111  ;;  %v243_v2 = vunpack.c.l.s4 %v3127_v1  ;;  %s3078_s24 = sadd.s32 16, %s3185_s17  ;;  %vm523_vm2 = vcmask 900096   ;;  %vm1158_vm3 = vcmask 1041408   ;;  %vm1207_vm4 = vcmask 1043456  }
   0xf   : > { %v246_v3 = vshrl.u32 %v245_v0, 7  ;;  %p218_p4 = scmp.lt.s32.totalorder %s3078_s24, 111  ;;  %s3129_s29 = smov 126   ;;  %vm1240_vm5 = vcmask 1045504   ;;  %vm625_vm6 = vcmask 883712   ;;  %vm574_vm7 = vcmask 891904  }
  0x10   : > { %s212_s18 = scalar_select %p211_p3, %s3185_s17, 111  ;;  %v244_v4 = vunpack.c.0.s8 %v243_v2  ;;  %vm676_vm8 = vcmask 752640   ;;  %vm727_vm9 = vcmask 744448   ;;  %vm6600_vm10 = vcmask 490496  }
  0x11   : > { %s7112_s24 = smov (!%p218_p4, %s3078_s24), 111  ;;  %s3130_s30 = smov 110   ;;  %vm778_vm11 = vcmask 736256   ;;  %vm6599_vm12 = vcmask 482304   ;;  %vm937_vm13 = vcmask 474112   ;;  %vm1716_vm14 = vcmask 793600  }
  0x12   : > { %s3053_s19 = sshll.u32 %s212_s18, 1  ;;  %v3189_v5 = vsub.s32 %v244_v4, %v246_v3  ;;  %s3055_s25 = sshll.u32 %s7112_s24, 1  ;;  %vm1770_vm15 = vcmask 785408  }
  0x13   : > { %s3194_s22 = scalar_lea.vmem %s6379_s2, %s3053_s19  ;;  %s3298_s28 = scalar_lea.vmem %s6380_s3, %s3055_s25 }
  0x14   : > { %6625 = vst [vmem:[#allocation2_spill] sm:$0xff] %v3189_v5  ;;  %v231_v6 = vld [vmem:[%s3194_s22] sm:$0xff]  ;;  %v232_v7 = vld [vmem:[%s3194_s22 + $0x8] sm:$0xff]  ;;  %v233_v10 = vld [vmem:[%s3194_s22 + $0x10] sm:$0xff]  ;;  %s3131_s5 = smov 109   ;;  %s3132_s6 = smov 108  }
  0x15   : > { %v3199_v8 = vrot.slane %v231_v6, %v3189_v5  ;;  %v3202_v9 = vrot.slane %v232_v7, %v3189_v5  ;;  %v241_v12 = vcombine.high %v231_v6, %v231_v6  ;;  %v258_v13 = vcombine.high %v232_v7, %v232_v7  ;;  %v234_v30 = vld [vmem:[%s3194_s22 + $0x18] sm:$0xff]  ;;  %v3309_v40 = vld [vmem:[%s3298_s28] sm:$0xff]  ;;  %s3133_s7 = smov 92   ;;  %s3134_s8 = smov 91  }
  0x16   : > { %v3217_v16 = vrot.slane %v233_v10, %v3189_v5  ;;  %v275_v24 = vcombine.high %v233_v10, %v233_v10  ;;  %v292_v33 = vcombine.high %v234_v30, %v234_v30  ;;  %v3279_v34 = vrot.slane %v234_v30, %v3189_v5  ;;  %6645 = vst [vmem:[#allocation22_spill] sm:$0xff] %v3309_v40  ;;  %s3135_s9 = smov 90   ;;  %s3136_s10 = smov 60  }
  0x17   : > { %6626 = vst [vmem:[#allocation3_spill] sm:$0xff] %v3202_v9  ;;  %v6386_v11 = vrot.slane %v3199_v8, 6  ;;  %v3210_v14 = vrot.slane %v3202_v9, 6  ;;  %v3214_v15 = vcombine.high %v3202_v9, %v3202_v9  ;;  %v3220_v17 = vrot.slane %v241_v12, %v3189_v5  ;;  %s3137_s11 = smov 59   ;;  %s3138_s12 = smov 58  }
  0x18   : > { %6628 = vst [vmem:[#allocation5_spill] sm:$0xff] %v3217_v16  ;;  %v3224_v18 = vcombine.high %v3199_v8, %v3199_v8  ;;  %v3231_v20 = vrot.slane %v258_v13, %v3189_v5  ;;  %v3238_v22 = vcombine.high %v3217_v16, %v3217_v16  ;;  %v3261_v28 = vrot.slane %v275_v24, %v3189_v5  ;;  %s3139_s13 = smov 42   ;;  %s3140_s14 = smov 41  }
  0x19   : > { %353 = vrot.lane.b32.xlu0 %v6386_v11, %s3128_s23  ;;  %6627 = vst [vmem:[#allocation4_spill] sm:$0xff] %v3210_v14  ;;  %6629 = vst [vmem:[#allocation6_spill] sm:$0xff] %v3220_v17  ;;  %v3227_v19 = vrot.slane %v3220_v17, 6  ;;  %v3243_v23 = vrot.slane %v3214_v15, 6  ;;  %v3258_v27 = vcombine.high %v3220_v17, %v3220_v17  ;;  %v3266_v29 = vrot.slane %v3217_v16, 6  ;;  %s3141_s16 = smov 97  }
  0x1a   : > { %6631 = vst [vmem:[#allocation8_spill] sm:$0xff] %v3231_v20  ;;  %v6385_v21 = vrot.slane %v3224_v18, 6  ;;  %v3249_v25 = vrot.slane %v3231_v20, 6  ;;  %v3254_v26 = vrot.slane %v3238_v22, 6  ;;  %6636 = vst [vmem:[#allocation13_spill] sm:$0xff] %v3261_v28  ;;  %v3271_v31 = vcombine.high %v3231_v20, %v3231_v20  ;;  %s3142_s18 = smov 96  }
  0x1b   : > { %6630 = vst [vmem:[#allocation7_spill] sm:$0xff] %v3227_v19  ;;  %357 = vrot.lane.b32.xlu1 %v3227_v19, %s3128_s23  ;;  %6632 = vst [vmem:[#allocation9_spill] sm:$0xff] %v3243_v23  ;;  %v3276_v32 = vrot.slane %v3258_v27, 6  ;;  %v3284_v35 = vrot.slane %v3261_v28, 6  ;;  %v3288_v36 = vcombine.high %v3261_v28, %v3261_v28  ;;  %v3301_v38 = vrot.slane %v292_v33, %v3189_v5  ;;  %s3143_s19 = smov 95   ;;  %s3144_s20 = smov 79  }
  0x1c   : > { %6633 = vst [vmem:[#allocation10_spill] sm:$0xff] %v3249_v25  ;;  %6634 = vst [vmem:[#allocation11_spill] sm:$0xff] %v3254_v26  ;;  %v3293_v37 = vrot.slane %v3271_v31, 6  ;;  %v3306_v39 = vrot.slane %v3279_v34, 6  ;;  %v3313_v41 = vcombine.high %v3279_v34, %v3279_v34  ;;  %v3322_v43 = vrot.slane %v3309_v40, %v3189_v5  ;;  %s3145_s21 = smov 78   ;;  %s3146_s22 = smov 77  }
  0x1d   : > { %361 = vrot.lane.b32.xlu0 %v3210_v14, %s3128_s23  ;;  %6635 = vst [vmem:[#allocation12_spill] sm:$0xff] %v3258_v27  ;;  %6637 = vst [vmem:[#allocation14_spill] sm:$0xff] %v3266_v29  ;;  %v3318_v42 = vrot.slane %v3288_v36, 6  ;;  %v3327_v44 = vrot.slane %v3301_v38, 6  ;;  %v3331_v45 = vcombine.high %v3301_v38, %v3301_v38  ;;  %v6384_v49 = vrot.slane %v3199_v8, 4  ;;  %s3147_s24 = smov 61  }
  0x1e   : > { %6638 = vst [vmem:[#allocation15_spill] sm:$0xff] %v3276_v32  ;;  %6639 = vst [vmem:[#allocation16_spill] sm:$0xff] %v3279_v34  ;;  %v3336_v46 = vrot.slane %v3313_v41, 6  ;;  %v3341_v47 = vrot.slane %v3322_v43, 6  ;;  %v3357_v50 = vrot.slane %v3220_v17, 4  ;;  %v3362_v51 = vrot.slane %v3202_v9, 4 }
  0x1f   : > { %363 = vrot.lane.b32.xlu1 %v3243_v23, %s3128_s23  ;;  %6640 = vst [vmem:[#allocation17_spill] sm:$0xff] %v3284_v35  ;;  %6641 = vst [vmem:[#allocation18_spill] sm:$0xff] %v3288_v36  ;;  %v3346_v48 = vrot.slane %v3331_v45, 6  ;;  %v3367_v52 = vrot.slane %v3231_v20, 4  ;;  %v3372_v53 = vrot.slane %v3217_v16, 4  ;;  %v3377_v54 = vrot.slane %v3261_v28, 4 }
  0x20   : > { %6642 = vst [vmem:[#allocation19_spill] sm:$0xff] %v3293_v37  ;;  %6643 = vst [vmem:[#allocation20_spill] sm:$0xff] %v3301_v38  ;;  %v3382_v55 = vrot.slane %v3279_v34, 4  ;;  %v3387_v56 = vrot.slane %v3301_v38, 4  ;;  %v6383_v57 = vrot.slane %v3199_v8, 2  ;;  %v3393_v58 = vrot.slane %v3322_v43, 4 }
  0x21   : > { %355 = vrot.lane.b32.xlu0 %v6385_v21, %s3128_s23  ;;  %6644 = vst [vmem:[#allocation21_spill] sm:$0xff] %v3306_v39  ;;  %6646 = vst [vmem:[#allocation23_spill] sm:$0xff] %v3313_v41  ;;  %v3399_v59 = vrot.slane %v3220_v17, 2  ;;  %v6382_v60 = vrot.slane %v3224_v18, 2  ;;  %v3406_v61 = vrot.slane %v3202_v9, 2  ;;  %v3412_v62 = vrot.slane %v3258_v27, 2 }
  0x22   : > { %6647 = vst [vmem:[#allocation24_spill] sm:$0xff] %v3318_v42  ;;  %6648 = vst [vmem:[#allocation25_spill] sm:$0xff] %v3322_v43  ;;  %v3417_v63 = vrot.slane %v3231_v20, 2  ;;  %v3422_v0 = vrot.slane %v3214_v15, 2  ;;  %v3427_v1 = vrot.slane %v3217_v16, 2  ;;  %v3432_v2 = vrot.slane %v3271_v31, 2 }
  0x23   : > { %371 = vrot.lane.b32.xlu1 %v3254_v26, %s3128_s23  ;;  %6649 = vst [vmem:[#allocation26_spill] sm:$0xff] %v3327_v44  ;;  %6650 = vst [vmem:[#allocation27_spill] sm:$0xff] %v3331_v45  ;;  %v3437_v3 = vrot.slane %v3261_v28, 2  ;;  %v3442_v4 = vrot.slane %v3238_v22, 2  ;;  %v3447_v6 = vrot.slane %v3279_v34, 2  ;;  %v3452_v7 = vrot.slane %v3288_v36, 2 }
  0x24   : > { %6651 = vst [vmem:[#allocation28_spill] sm:$0xff] %v3336_v46  ;;  %6652 = vst [vmem:[#allocation29_spill] sm:$0xff] %v3341_v47  ;;  %v3457_v10 = vrot.slane %v3301_v38, 2  ;;  %v3462_v12 = vrot.slane %v3313_v41, 2  ;;  %v3467_v13 = vrot.slane %v3322_v43, 2  ;;  %v3472_v24 = vrot.slane %v3331_v45, 2 }
  0x25   : > { %365 = vrot.lane.b32.xlu0 %v3249_v25, %s3128_s23  ;;  %6653 = vst [vmem:[#allocation30_spill] sm:$0xff] %v3346_v48  ;;  %6654 = vst [vmem:[#allocation31_spill] sm:$0xff] %v3357_v50  ;;  %s3148_s25 = smov 40   ;;  %s3149_s26 = smov 24  }
  0x26   : > { %6655 = vst [vmem:[#allocation32_spill] sm:$0xff] %v3362_v51  ;;  %6656 = vst [vmem:[#allocation33_spill] sm:$0xff] %v3367_v52  ;;  %s3150_s27 = smov 23   ;;  %p225_p5 = scmp.lt.s32.totalorder %s3185_s17, 95 }
  0x27   : > { %359 = vrot.lane.b32.xlu1 %v3276_v32, %s3128_s23  ;;  %6657 = vst [vmem:[#allocation34_spill] sm:$0xff] %v3372_v53  ;;  %6658 = vst [vmem:[#allocation35_spill] sm:$0xff] %v3377_v54 }
  0x28   : > { %6659 = vst [vmem:[#allocation36_spill] sm:$0xff] %v3382_v55  ;;  %6660 = vst [vmem:[#allocation37_spill] sm:$0xff] %v3387_v56  ;;  %s7114_s17 = smov (!%p225_p5, %s3185_s17), 95 }
  0x29   : > { %369 = vrot.lane.b32.xlu0 %v3266_v29, %s3128_s23  ;;  %6661 = vst [vmem:[#allocation38_spill] sm:$0xff] %v3393_v58  ;;  %6662 = vst [vmem:[#allocation39_spill] sm:$0xff] %v3399_v59 }
  0x2a   : > { %6663 = vst [vmem:[#allocation40_spill] sm:$0xff] %v3406_v61  ;;  %6664 = vst [vmem:[#allocation41_spill] sm:$0xff] %v3412_v62 }
  0x2b   : > { %367 = vrot.lane.b32.xlu1 %v3293_v37, %s3128_s23  ;;  %6665 = vst [vmem:[#allocation42_spill] sm:$0xff] %v3417_v63  ;;  %6666 = vst [vmem:[#allocation43_spill] sm:$0xff] %v3422_v0 }
  0x2c   : > { %6667 = vst [vmem:[#allocation44_spill] sm:$0xff] %v3427_v1  ;;  %6668 = vst [vmem:[#allocation45_spill] sm:$0xff] %v3432_v2 }
  0x2d   : > { %373 = vrot.lane.b32.xlu0 %v3284_v35, %s3128_s23  ;;  %6669 = vst [vmem:[#allocation46_spill] sm:$0xff] %v3437_v3  ;;  %6670 = vst [vmem:[#allocation47_spill] sm:$0xff] %v3442_v4 }
  0x2e   : > { %6671 = vst [vmem:[#allocation48_spill] sm:$0xff] %v3447_v6  ;;  %6672 = vst [vmem:[#allocation49_spill] sm:$0xff] %v3452_v7 }
  0x2f   : > { %375 = vrot.lane.b32.xlu1 %v3318_v42, %s3128_s23  ;;  %6673 = vst [vmem:[#allocation50_spill] sm:$0xff] %v3457_v10  ;;  %6674 = vst [vmem:[#allocation51_spill] sm:$0xff] %v3462_v12 }
  0x30   : > { %6675 = vst [vmem:[#allocation52_spill] sm:$0xff] %v3467_v13  ;;  %6676 = vst [vmem:[#allocation53_spill] sm:$0xff] %v3472_v24 }
  0x31   : > { %377 = vrot.lane.b32.xlu0 %v3306_v39, %s3128_s23 }
  0x33   : > { %379 = vrot.lane.b32.xlu1 %v3336_v46, %s3128_s23 }
  0x35   : > { %381 = vrot.lane.b32.xlu0 %v3327_v44, %s3128_s23 }
  0x37   : > { %383 = vrot.lane.b32.xlu1 %v3346_v48, %s3128_s23 }
  0x39   : > { %385 = vrot.lane.b32.xlu0 %v3341_v47, %s3128_s23 }
  0x3b   : > { %421 = vrot.lane.b32.xlu1 %v6384_v49, %s3129_s29 }
  0x3d   : > { %423 = vrot.lane.b32.xlu0 %v3224_v18, %s3129_s29 }
  0x3f   : > { %425 = vrot.lane.b32.xlu1 %v3357_v50, %s3129_s29 }
  0x41   : > { %427 = vrot.lane.b32.xlu0 %v3258_v27, %s3129_s29 }
  0x43   : > { %429 = vrot.lane.b32.xlu1 %v3362_v51, %s3129_s29 }
  0x45   : > { %431 = vrot.lane.b32.xlu0 %v3214_v15, %s3129_s29 }
  0x47   : > { %433 = vrot.lane.b32.xlu1 %v3367_v52, %s3129_s29 }
  0x49   : > { %435 = vrot.lane.b32.xlu0 %v3271_v31, %s3129_s29 }
  0x4b   : > { %437 = vrot.lane.b32.xlu1 %v3372_v53, %s3129_s29 }
  0x4d   : > { %439 = vrot.lane.b32.xlu0 %v3238_v22, %s3129_s29 }
  0x4f   : > { %441 = vrot.lane.b32.xlu1 %v3377_v54, %s3129_s29 }
  0x51   : > { %443 = vrot.lane.b32.xlu0 %v3288_v36, %s3129_s29 }
  0x53   : > { %445 = vrot.lane.b32.xlu1 %v3382_v55, %s3129_s29 }
  0x55   : > { %447 = vrot.lane.b32.xlu0 %v3313_v41, %s3129_s29 }
  0x57   : > { %449 = vrot.lane.b32.xlu1 %v3387_v56, %s3129_s29 }
  0x59   : > { %451 = vrot.lane.b32.xlu0 %v3331_v45, %s3129_s29 }
  0x5b   : > { %453 = vrot.lane.b32.xlu1 %v3393_v58, %s3129_s29 }
  0x5d   : > { %489 = vrot.lane.b32.xlu0 %v6383_v57, %s3130_s30 }
  0x5f   : > { %491 = vrot.lane.b32.xlu1 %v6382_v60, %s3130_s30 }
  0x61   : > { %493 = vrot.lane.b32.xlu0 %v3399_v59, %s3130_s30 }
  0x63   : > { %495 = vrot.lane.b32.xlu1 %v3412_v62, %s3130_s30 }
  0x65   : > { %497 = vrot.lane.b32.xlu0 %v3406_v61, %s3130_s30 }
  0x67   : > { %499 = vrot.lane.b32.xlu1 %v3422_v0, %s3130_s30 }
  0x69   : > { %501 = vrot.lane.b32.xlu0 %v3417_v63, %s3130_s30 }
  0x6b   : > { %503 = vrot.lane.b32.xlu1 %v3432_v2, %s3130_s30 }
  0x6d   : > { %505 = vrot.lane.b32.xlu0 %v3427_v1, %s3130_s30 }
  0x6f   : > { %507 = vrot.lane.b32.xlu1 %v3442_v4, %s3130_s30 }
  0x71   : > { %509 = vrot.lane.b32.xlu0 %v3437_v3, %s3130_s30 }
  0x73   : > { %511 = vrot.lane.b32.xlu1 %v3452_v7, %s3130_s30 }
  0x75   : > { %513 = vrot.lane.b32.xlu0 %v3447_v6, %s3130_s30  ;;  %v6678_v6 = vrot.slane %v3224_v18, 6 }
  0x77   : > { %515 = vrot.lane.b32.xlu1 %v3462_v12, %s3130_s30  ;;  %v6677_v12 = vrot.slane %v3199_v8, 6 }
  0x79   : > { %517 = vrot.lane.b32.xlu0 %v3457_v10, %s3130_s30 }
  0x7b   : > { %519 = vrot.lane.b32.xlu1 %v3472_v24, %s3130_s30 }
  0x7d   : > { %521 = vrot.lane.b32.xlu0 %v3467_v13, %s3130_s30 }
  0x7f   : > { %540 = vrot.lane.b32.xlu1 %v3199_v8, %s3131_s5 }
  0x81   : > { %542 = vrot.lane.b32.xlu0 %v3224_v18, %s3131_s5 }
  0x83   : > { %544 = vrot.lane.b32.xlu1 %v3220_v17, %s3131_s5 }
  0x85   : > { %546 = vrot.lane.b32.xlu0 %v3258_v27, %s3131_s5 }
  0x87   : > { %548 = vrot.lane.b32.xlu1 %v3202_v9, %s3131_s5 }
  0x89   : > { %550 = vrot.lane.b32.xlu0 %v3214_v15, %s3131_s5 }
  0x8b   : > { %v3490_v30 = vpop.permute.xlu0 %353  ;;  %552 = vrot.lane.b32.xlu1 %v3231_v20, %s3131_s5 }
  0x8d   : > { %554 = vrot.lane.b32.xlu0 %v3271_v31, %s3131_s5  ;;  %v3498_v60 = vpop.permute.xlu1 %357 }
  0x8f   : > { %v3496_v33 = vpop.permute.xlu0 %361  ;;  %556 = vrot.lane.b32.xlu1 %v3217_v16, %s3131_s5 }
  0x91   : > { %558 = vrot.lane.b32.xlu0 %v3238_v22, %s3131_s5  ;;  %v3506_v49 = vpop.permute.xlu1 %363 }
  0x93   : > { %v3504_v57 = vpop.permute.xlu0 %355  ;;  %560 = vrot.lane.b32.xlu1 %v3261_v28, %s3131_s5 }
  0x94   : > { %v388_v0 = vsel %vm6623_vm0, %v3490_v30, %v3504_v57 }
  0x95   : > { %562 = vrot.lane.b32.xlu0 %v3288_v36, %s3131_s5  ;;  %v3514_v11 = vpop.permute.xlu1 %371 }
  0x97   : > { %v3512_v21 = vpop.permute.xlu0 %365  ;;  %564 = vrot.lane.b32.xlu1 %v3279_v34, %s3131_s5 }
  0x99   : > { %566 = vrot.lane.b32.xlu0 %v3313_v41, %s3131_s5  ;;  %v3522_v40 = vpop.permute.xlu1 %359 }
  0x9b   : > { %v3520_v5 = vpop.permute.xlu0 %369  ;;  %568 = vrot.lane.b32.xlu1 %v3301_v38, %s3131_s5 }
  0x9d   : > { %570 = vrot.lane.b32.xlu0 %v3331_v45, %s3131_s5  ;;  %v3530_v13 = vpop.permute.xlu1 %367 }
  0x9f   : > { %v3528_v24 = vpop.permute.xlu0 %373  ;;  %572 = vrot.lane.b32.xlu1 %v3322_v43, %s3131_s5  ;;  %s3057_s5 = sshll.u32 %s7114_s17, 2 }
  0xa1   : > { %591 = vrot.lane.b32.xlu0 %v6677_v12, %s3132_s6  ;;  %v3539_v7 = vpop.permute.xlu1 %375 }
  0xa3   : > { %v3537_v10 = vpop.permute.xlu0 %377  ;;  %593 = vrot.lane.b32.xlu1 %v6678_v6, %s3132_s6 }
  0xa5   : > { %595 = vrot.lane.b32.xlu0 %v3227_v19, %s3132_s6  ;;  %v3548_v3 = vpop.permute.xlu1 %379 }
  0xa7   : > { %v3546_v4 = vpop.permute.xlu0 %381  ;;  %597 = vrot.lane.b32.xlu1 %v3276_v32, %s3132_s6 }
  0xa9   : > { %599 = vrot.lane.b32.xlu0 %v3210_v14, %s3132_s6  ;;  %v3556_v43 = vpop.permute.xlu1 %383 }
  0xab   : > { %v3554_v12 = vpop.permute.xlu0 %385  ;;  %601 = vrot.lane.b32.xlu1 %v3243_v23, %s3132_s6 }
  0xac   : > { %6679 = vst [vmem:[#allocation54_spill] sm:$0xff] %v3554_v12 }
  0xad   : > { %603 = vrot.lane.b32.xlu0 %v3249_v25, %s3132_s6  ;;  %v422_v19 = vpop.permute.xlu1 %421 }
  0xaf   : > { %v424_v6 = vpop.permute.xlu0 %423  ;;  %605 = vrot.lane.b32.xlu1 %v3293_v37, %s3132_s6 }
  0xb1   : > { %607 = vrot.lane.b32.xlu0 %v3266_v29, %s3132_s6  ;;  %v426_v32 = vpop.permute.xlu1 %425 }
  0xb2   : > { %v457_v63 = vsel %vm455_vm1, %v424_v6, %v426_v32 }
  0xb3   : > { %v428_v14 = vpop.permute.xlu0 %427  ;;  %609 = vrot.lane.b32.xlu1 %v3254_v26, %s3132_s6 }
  0xb4   : > { %v458_v12 = vsel %vm455_vm1, %v426_v32, %v428_v14 }
  0xb5   : > { %611 = vrot.lane.b32.xlu0 %v3284_v35, %s3132_s6  ;;  %v3572_v2 = vpop.permute.xlu1 %429 }
  0xb7   : > { %v3570_v25 = vpop.permute.xlu0 %431  ;;  %613 = vrot.lane.b32.xlu1 %v3318_v42, %s3132_s6 }
  0xb9   : > { %615 = vrot.lane.b32.xlu0 %v3306_v39, %s3132_s6  ;;  %v3580_v37 = vpop.permute.xlu1 %433 }
  0xbb   : > { %v3578_v29 = vpop.permute.xlu0 %435  ;;  %617 = vrot.lane.b32.xlu1 %v3336_v46, %s3132_s6  ;;  %v6680_v46 = vrot.slane %v3199_v8, 4 }
  0xbd   : > { %619 = vrot.lane.b32.xlu0 %v3327_v44, %s3132_s6  ;;  %v3588_v35 = vpop.permute.xlu1 %437 }
  0xbf   : > { %v3586_v26 = vpop.permute.xlu0 %439  ;;  %621 = vrot.lane.b32.xlu1 %v3346_v48, %s3132_s6 }
  0xc1   : > { %623 = vrot.lane.b32.xlu0 %v3341_v47, %s3132_s6  ;;  %v3596_v39 = vpop.permute.xlu1 %441 }
  0xc3   : > { %v3594_v42 = vpop.permute.xlu0 %443  ;;  %642 = vrot.lane.b32.xlu1 %v6680_v46, %s3133_s7 }
  0xc5   : > { %644 = vrot.lane.b32.xlu0 %v3224_v18, %s3133_s7  ;;  %v3605_v23 = vpop.permute.xlu1 %445 }
  0xc7   : > { %v3603_v44 = vpop.permute.xlu0 %447  ;;  %646 = vrot.lane.b32.xlu1 %v3357_v50, %s3133_s7  ;;  %v389_v50 = vsel %vm6623_vm0, %v3504_v57, %v3498_v60  ;;  %v1161_v57 = vsel %vm1158_vm3, %v3199_v8, %v388_v0  ;;  %v459_v0 = vsel %vm455_vm1, %v428_v14, %v3572_v2 }
  0xc8   : > { %v1164_v30 = vsel %vm1158_vm3, %v3224_v18, %v389_v50  ;;  %v390_v50 = vsel %vm6623_vm0, %v3498_v60, %v3522_v40  ;;  %v393_v60 = vsel %vm6623_vm0, %v3506_v49, %v3512_v21 }
  0xc9   : > { %648 = vrot.lane.b32.xlu0 %v3258_v27, %s3133_s7  ;;  %v3613_v47 = vpop.permute.xlu1 %449 }
  0xcb   : > { %v3611_v48 = vpop.permute.xlu0 %451  ;;  %650 = vrot.lane.b32.xlu1 %v3362_v51, %s3133_s7  ;;  %v456_v51 = vsel %vm455_vm1, %v422_v19, %v424_v6  ;;  %v1211_v19 = vsel %vm1207_vm4, %v1164_v30, %v457_v63 }
  0xcc   : > { %6681 = vst [vmem:[#allocation55_spill] sm:$0xff] %v3611_v48  ;;  %v1209_v61 = vsel %vm1207_vm4, %v1161_v57, %v456_v51  ;;  %v3674_v51 = vsel %vm1158_vm3, %v3220_v17, %v390_v50 }
  0xcd   : > { %652 = vrot.lane.b32.xlu0 %v3214_v15, %s3133_s7  ;;  %v3619_v1 = vpop.permute.xlu1 %453  ;;  %6684 = vst [vmem:[#allocation58_spill] sm:$0xff] %v3674_v51 }
  0xce   : > { %6682 = vst [vmem:[#allocation56_spill] sm:$0xff] %v3619_v1  ;;  %v391_v1 = vsel %vm6623_vm0, %v3522_v40, %v3496_v33  ;;  %v392_v40 = vsel %vm6623_vm0, %v3496_v33, %v3506_v49  ;;  %v460_v49 = vsel %vm455_vm1, %v3572_v2, %v3570_v25  ;;  %v3694_v2 = vsel %vm1158_vm3, %v3214_v15, %v393_v60 }
  0xcf   : > { %v490_v46 = vpop.permute.xlu0 %489  ;;  %654 = vrot.lane.b32.xlu1 %v3367_v52, %s3133_s7  ;;  %v3690_v57 = vsel %vm1158_vm3, %v3202_v9, %v392_v40  ;;  %6686 = vst [vmem:[#allocation60_spill] sm:$0xff] %v3694_v2 }
  0xd0   : > { %6685 = vst [vmem:[#allocation59_spill] sm:$0xff] %v3690_v57 }
  0xd1   : > { %656 = vrot.lane.b32.xlu0 %v3271_v31, %s3133_s7  ;;  %v492_v62 = vpop.permute.xlu1 %491 }
  0xd2   : > { %v524_v6 = vsel %vm523_vm2, %v490_v46, %v492_v62 }
  0xd3   : > { %v494_v38 = vpop.permute.xlu0 %493  ;;  %658 = vrot.lane.b32.xlu1 %v3372_v53, %s3133_s7 }
  0xd4   : > { %v525_v52 = vsel %vm523_vm2, %v492_v62, %v494_v38  ;;  %v1242_v62 = vsel %vm1240_vm5, %v1209_v61, %v524_v6  ;;  %v461_v61 = vsel %vm455_vm1, %v3570_v25, %v3580_v37  ;;  %v394_v25 = vsel %vm6623_vm0, %v3512_v21, %v3530_v13 }
  0xd5   : > { %660 = vrot.lane.b32.xlu0 %v3238_v22, %s3133_s7  ;;  %v1245_v48 = vsel %vm1240_vm5, %v1211_v19, %v525_v52  ;;  %v496_v46 = vpop.permute.xlu1 %495  ;;  %v3664_v52 = vsel %vm1158_vm3, %v3258_v27, %v391_v1  ;;  %v462_v21 = vsel %vm455_vm1, %v3580_v37, %v3578_v29  ;;  %v3729_v37 = vsel %vm1158_vm3, %v3231_v20, %v394_v25 }
  0xd6   : > { %2611 = vmatprep.subr.bf16.mxu0 %v1245_v48  ;;  %6683 = vst [vmem:[#allocation57_spill] sm:$0xff] %v3664_v52  ;;  %v1215_v32 = vsel %vm1207_vm4, %v3664_v52, %v459_v0  ;;  %v526_v48 = vsel %vm523_vm2, %v494_v38, %v496_v46  ;;  %v1213_v38 = vsel %vm1207_vm4, %v3674_v51, %v458_v12  ;;  %6689 = vst [vmem:[#allocation63_spill] sm:$0xff] %v3729_v37  ;;  %v6730_v52 = vld [vmem:[#allocation25_spill] sm:$0xff] }
  0xd7   : > { %v498_v63 = vpop.permute.xlu0 %497  ;;  %2612 = vmatpush1.bf16.msra.mxu0 %v1242_v62  ;;  %662 = vrot.lane.b32.xlu1 %v3377_v54, %s3133_s7  ;;  %v1248_v30 = vsel %vm1240_vm5, %v1213_v38, %v526_v48  ;;  %v395_v12 = vsel %vm6623_vm0, %v3530_v13, %v3520_v5  ;;  %v1219_v0 = vsel %vm1207_vm4, %v3694_v2, %v461_v61  ;;  %v6729_v2 = vld [vmem:[#allocation7_spill] sm:$0xff] }
  0xd8   : > { %v527_v14 = vsel %vm523_vm2, %v496_v46, %v498_v63  ;;  %v1217_v62 = vsel %vm1207_vm4, %v3690_v57, %v460_v49  ;;  %v463_v13 = vsel %vm455_vm1, %v3578_v29, %v3588_v35  ;;  %v396_v46 = vsel %vm6623_vm0, %v3520_v5, %v3514_v11 }
  0xd9   : > { %664 = vrot.lane.b32.xlu0 %v3288_v36, %s3133_s7  ;;  %v1251_v1 = vsel %vm1240_vm5, %v1215_v32, %v527_v14  ;;  %v500_v19 = vpop.permute.xlu1 %499  ;;  %v3733_v29 = vsel %vm1158_vm3, %v3271_v31, %v395_v12  ;;  %v397_v14 = vsel %vm6623_vm0, %v3514_v11, %v3528_v24  ;;  %v1221_v61 = vsel %vm1207_vm4, %v3729_v37, %v462_v21 }
  0xda   : > { %2652 = vmatprep.subr.bf16.mxu1 %v1251_v1  ;;  %v528_v6 = vsel %vm523_vm2, %v498_v63, %v500_v19  ;;  %6690 = vst [vmem:[#allocation64_spill] sm:$0xff] %v3733_v29  ;;  %v1223_v5 = vsel %vm1207_vm4, %v3733_v29, %v463_v13  ;;  %v464_v1 = vsel %vm455_vm1, %v3588_v35, %v3586_v26 }
  0xdb   : > { %v502_v33 = vpop.permute.xlu0 %501  ;;  %2653 = vmatpush1.bf16.msra.mxu1 %v1248_v30  ;;  %666 = vrot.lane.b32.xlu1 %v3382_v55, %s3133_s7  ;;  %v3722_v40 = vsel %vm1240_vm5, %v1217_v62, %v528_v6  ;;  %v465_v11 = vsel %vm455_vm1, %v3586_v26, %v3596_v39  ;;  %v3762_v25 = vsel %vm1158_vm3, %v3217_v16, %v396_v46 }
  0xdc   : > { %v529_v50 = vsel %vm523_vm2, %v500_v19, %v502_v33  ;;  %6688 = vst [vmem:[#allocation62_spill] sm:$0xff] %v3722_v40  ;;  %6693 = vst [vmem:[#allocation67_spill] sm:$0xff] %v3762_v25  ;;  %v3766_v35 = vsel %vm1158_vm3, %v3238_v22, %v397_v14  ;;  %v398_v26 = vsel %vm6623_vm0, %v3528_v24, %v3539_v7 }
  0xdd   : > { %668 = vrot.lane.b32.xlu0 %v3313_v41, %s3133_s7  ;;  %v3719_v63 = vsel %vm1240_vm5, %v1219_v0, %v529_v50  ;;  %v504_v32 = vpop.permute.xlu1 %503  ;;  %6694 = vst [vmem:[#allocation68_spill] sm:$0xff] %v3766_v35  ;;  %v399_v12 = vsel %vm6623_vm0, %v3539_v7, %v3537_v10  ;;  %v6695_v0 = vrot.slane %v3199_v8, 2  ;;  %v1227_v62 = vsel %vm1207_vm4, %v3766_v35, %v465_v11 }
  0xde   : > { %6687 = vst [vmem:[#allocation61_spill] sm:$0xff] %v3719_v63  ;;  %v530_v48 = vsel %vm523_vm2, %v502_v33, %v504_v32  ;;  %v1225_v24 = vsel %vm1207_vm4, %v3762_v25, %v464_v1  ;;  %v466_v7 = vsel %vm455_vm1, %v3596_v39, %v3594_v42  ;;  %v467_v21 = vsel %vm455_vm1, %v3594_v42, %v3605_v23 }
  0xdf   : > { %v506_v60 = vpop.permute.xlu0 %505  ;;  %670 = vrot.lane.b32.xlu1 %v3387_v56, %s3133_s7  ;;  %v3758_v33 = vsel %vm1240_vm5, %v1221_v61, %v530_v48  ;;  %v3799_v14 = vsel %vm1158_vm3, %v3261_v28, %v398_v26  ;;  %v3803_v39 = vsel %vm1158_vm3, %v3288_v36, %v399_v12  ;;  %v400_v42 = vsel %vm6623_vm0, %v3537_v10, %v3548_v3 }
  0xe0   : > { %v531_v49 = vsel %vm523_vm2, %v504_v32, %v506_v60  ;;  %6692 = vst [vmem:[#allocation66_spill] sm:$0xff] %v3758_v33  ;;  %6698 = vst [vmem:[#allocation71_spill] sm:$0xff] %v3799_v14  ;;  %v401_v32 = vsel %vm6623_vm0, %v3548_v3, %v3546_v4  ;;  %v1231_v61 = vsel %vm1207_vm4, %v3803_v39, %v467_v21  ;;  %v6700_v11 = vrot.slane %v3224_v18, 2 }
  0xe1   : > { %672 = vrot.lane.b32.xlu0 %v3331_v45, %s3133_s7  ;;  %v3755_v38 = vsel %vm1240_vm5, %v1223_v5, %v531_v49  ;;  %v508_v19 = vpop.permute.xlu1 %507  ;;  %6699 = vst [vmem:[#allocation72_spill] sm:$0xff] %v3803_v39  ;;  %v1229_v1 = vsel %vm1207_vm4, %v3799_v14, %v466_v7  ;;  %v468_v10 = vsel %vm455_vm1, %v3605_v23, %v3603_v44  ;;  %v6706_v7 = vld [vmem:[#allocation40_spill] sm:$0xff] }
  0xe2   : > { %6691 = vst [vmem:[#allocation65_spill] sm:$0xff] %v3755_v38  ;;  %v532_v6 = vsel %vm523_vm2, %v506_v60, %v508_v19  ;;  %v469_v3 = vsel %vm455_vm1, %v3603_v44, %v3613_v47  ;;  %v3840_v23 = vsel %vm1158_vm3, %v3313_v41, %v401_v32  ;;  %v402_v44 = vsel %vm6623_vm0, %v3546_v4, %v3556_v43  ;;  %v6707_v32 = vld [vmem:[#allocation55_spill] sm:$0xff] }
  0xe3   : > { %v510_v30 = vpop.permute.xlu0 %509  ;;  %674 = vrot.lane.b32.xlu1 %v3393_v58, %s3133_s7  ;;  %v3795_v60 = vsel %vm1240_vm5, %v1225_v24, %v532_v6  ;;  %6704 = vst [vmem:[#allocation76_spill] sm:$0xff] %v3840_v23  ;;  %v6705_v6 = vld [vmem:[#allocation54_spill] sm:$0xff]  ;;  %v1235_v21 = vsel %vm1207_vm4, %v3840_v23, %v469_v3  ;;  %v470_v4 = vsel %vm455_vm1, %v3613_v47, %v6707_v32  ;;  %v6746_v58 = vld [vmem:[#allocation28_spill] sm:$0xff] }
  0xe4   : > { %v533_v50 = vsel %vm523_vm2, %v508_v19, %v510_v30  ;;  %6697 = vst [vmem:[#allocation70_spill] sm:$0xff] %v3795_v60  ;;  %v3836_v19 = vsel %vm1158_vm3, %v3279_v34, %v400_v42 }
  0xe5   : > { %693 = vrot.lane.b32.xlu0 %v6695_v0, %s3134_s8  ;;  %v3792_v13 = vsel %vm1240_vm5, %v1227_v62, %v533_v50  ;;  %v512_v48 = vpop.permute.xlu1 %511  ;;  %6703 = vst [vmem:[#allocation75_spill] sm:$0xff] %v3836_v19  ;;  %v403_v50 = vsel %vm6623_vm0, %v3556_v43, %v6705_v6  ;;  %v1233_v42 = vsel %vm1207_vm4, %v3836_v19, %v468_v10  ;;  %vm2471_vm0 = vcmask 187392  }
  0xe6   : > { %6696 = vst [vmem:[#allocation69_spill] sm:$0xff] %v3792_v13  ;;  %v534_v49 = vsel %vm523_vm2, %v510_v30, %v512_v48  ;;  %v3876_v47 = vsel %vm1158_vm3, %v3331_v45, %v403_v50  ;;  %v6727_v13 = vld [vmem:[#allocation52_spill] sm:$0xff] }
  0xe7   : > { %v514_v46 = vpop.permute.xlu0 %513  ;;  %695 = vrot.lane.b32.xlu1 %v6700_v11, %s3134_s8  ;;  %v3832_v26 = vsel %vm1240_vm5, %v1229_v1, %v534_v49  ;;  %v6712_v1 = vld [vmem:[#allocation20_spill] sm:$0xff]  ;;  %6714 = vst [vmem:[#allocation78_spill] sm:$0xff] %v3876_v47 }
  0xe8   : > { %v535_v5 = vsel %vm523_vm2, %v512_v48, %v514_v46  ;;  %6702 = vst [vmem:[#allocation74_spill] sm:$0xff] %v3832_v26  ;;  %v6708_v48 = vld [vmem:[#allocation56_spill] sm:$0xff]  ;;  %v3872_v10 = vsel %vm1158_vm3, %v6712_v1, %v402_v44  ;;  %v6716_v44 = vld [vmem:[#allocation43_spill] sm:$0xff] }
  0xe9   : > { %697 = vrot.lane.b32.xlu0 %v3399_v59, %s3134_s8  ;;  %v3829_v30 = vsel %vm1240_vm5, %v1231_v61, %v535_v5  ;;  %v516_v0 = vpop.permute.xlu1 %515  ;;  %v471_v43 = vsel %vm455_vm1, %v6707_v32, %v6708_v48  ;;  %6713 = vst [vmem:[#allocation77_spill] sm:$0xff] %v3872_v10  ;;  %v6719_v48 = vld [vmem:[#allocation44_spill] sm:$0xff]  ;;  %v6726_v26 = vld [vmem:[#allocation51_spill] sm:$0xff]  ;;  %vm1875_vm1 = vcmask 646144  }
  0xea   : > { %6701 = vst [vmem:[#allocation73_spill] sm:$0xff] %v3829_v30  ;;  %v536_v62 = vsel %vm523_vm2, %v514_v46, %v516_v0  ;;  %v6709_v46 = vld [vmem:[#allocation41_spill] sm:$0xff] }
  0xeb   : > { %v518_v12 = vpop.permute.xlu0 %517  ;;  %699 = vrot.lane.b32.xlu1 %v6709_v46, %s3134_s8  ;;  %v3868_v5 = vsel %vm1240_vm5, %v1233_v42, %v536_v62  ;;  %v1239_v62 = vsel %vm1207_vm4, %v3876_v47, %v471_v43  ;;  %v6720_v43 = vld [vmem:[#allocation45_spill] sm:$0xff]  ;;  %v6745_v46 = vld [vmem:[#allocation26_spill] sm:$0xff] }
  0xec   : > { %v537_v24 = vsel %vm523_vm2, %v516_v0, %v518_v12  ;;  %6711 = vst [vmem:[#allocation56_spill] sm:$0xff] %v3868_v5  ;;  %v6728_v47 = vld [vmem:[#allocation53_spill] sm:$0xff] }
  0xed   : > { %701 = vrot.lane.b32.xlu0 %v6706_v7, %s3134_s8  ;;  %v3865_v49 = vsel %vm1240_vm5, %v1235_v21, %v537_v24  ;;  %v520_v3 = vpop.permute.xlu1 %519  ;;  %v6715_v24 = vld [vmem:[#allocation42_spill] sm:$0xff]  ;;  %v1237_v21 = vsel %vm1207_vm4, %v3872_v10, %v470_v4 }
  0xee   : > { %6710 = vst [vmem:[#allocation55_spill] sm:$0xff] %v3865_v49  ;;  %v538_v11 = vsel %vm523_vm2, %v518_v12, %v520_v3  ;;  %v6725_v49 = vld [vmem:[#allocation50_spill] sm:$0xff] }
  0xef   : > { %v522_v61 = vpop.permute.xlu0 %521  ;;  %703 = vrot.lane.b32.xlu1 %v6716_v44, %s3134_s8  ;;  %v3892_v42 = vsel %vm1240_vm5, %v1237_v21, %v538_v11  ;;  %v6722_v11 = vld [vmem:[#allocation47_spill] sm:$0xff]  ;;  %v6723_v21 = vld [vmem:[#allocation48_spill] sm:$0xff] }
  0xf0   : > { %v539_v0 = vsel %vm523_vm2, %v520_v3, %v522_v61  ;;  %6718 = vst [vmem:[#allocation80_spill] sm:$0xff] %v3892_v42  ;;  %v6721_v3 = vld [vmem:[#allocation46_spill] sm:$0xff]  ;;  %v6724_v42 = vld [vmem:[#allocation49_spill] sm:$0xff]  ;;  %vm1926_vm2 = vcmask 637952  }
  0xf1   : > { %705 = vrot.lane.b32.xlu0 %v6715_v24, %s3134_s8  ;;  %v3889_v50 = vsel %vm1240_vm5, %v1239_v62, %v539_v0  ;;  %v3896_v32 = vpop.permute.xlu1 %540 }
  0xf2   : > { %6717 = vst [vmem:[#allocation79_spill] sm:$0xff] %v3889_v50 }
  0xf3   : > { %v3894_v12 = vpop.permute.xlu0 %542  ;;  %707 = vrot.lane.b32.xlu1 %v6720_v43, %s3134_s8  ;;  %v6741_v43 = vld [vmem:[#allocation24_spill] sm:$0xff] }
  0xf5   : > { %709 = vrot.lane.b32.xlu0 %v6719_v48, %s3134_s8  ;;  %v3904_v61 = vpop.permute.xlu1 %544 }
  0xf7   : > { %v3902_v4 = vpop.permute.xlu0 %546  ;;  %711 = vrot.lane.b32.xlu1 %v6722_v11, %s3134_s8  ;;  %v6739_v11 = vld [vmem:[#allocation22_spill] sm:$0xff] }
  0xf9   : > { %713 = vrot.lane.b32.xlu0 %v6721_v3, %s3134_s8  ;;  %v3912_v62 = vpop.permute.xlu1 %548 }
  0xfb   : > { %v3910_v0 = vpop.permute.xlu0 %550  ;;  %715 = vrot.lane.b32.xlu1 %v6724_v42, %s3134_s8  ;;  %v6737_v42 = vld [vmem:[#allocation17_spill] sm:$0xff] }
  0xfd   : > { %717 = vrot.lane.b32.xlu0 %v6723_v21, %s3134_s8  ;;  %v3920_v5 = vpop.permute.xlu1 %552 }
  0xff   : > { %v3918_v50 = vpop.permute.xlu0 %554  ;;  %719 = vrot.lane.b32.xlu1 %v6726_v26, %s3134_s8  ;;  %v6735_v26 = vld [vmem:[#allocation14_spill] sm:$0xff] }
 0x101   : > { %721 = vrot.lane.b32.xlu0 %v6725_v49, %s3134_s8  ;;  %v3928_v60 = vpop.permute.xlu1 %556 }
 0x103   : > { %v3926_v30 = vpop.permute.xlu0 %558  ;;  %723 = vrot.lane.b32.xlu1 %v6728_v47, %s3134_s8 }
 0x105   : > { %725 = vrot.lane.b32.xlu0 %v6727_v13, %s3134_s8  ;;  %v3936_v10 = vpop.permute.xlu1 %560  ;;  %s6364_s8 = scalar_lea.vmem %s6381_s4, %s3057_s5 }
 0x107   : > { %v3934_v6 = vpop.permute.xlu0 %562  ;;  %744 = vrot.lane.b32.xlu1 %v3199_v8, %s3135_s9 }
 0x109   : > { %746 = vrot.lane.b32.xlu0 %v3224_v18, %s3135_s9  ;;  %v3944_v19 = vpop.permute.xlu1 %564 }
 0x10b   : > { %v3942_v23 = vpop.permute.xlu0 %566  ;;  %748 = vrot.lane.b32.xlu1 %v3220_v17, %s3135_s9  ;;  %v6733_v17 = vld [vmem:[#allocation10_spill] sm:$0xff] }
 0x10d   : > { %750 = vrot.lane.b32.xlu0 %v3258_v27, %s3135_s9  ;;  %v3952_v33 = vpop.permute.xlu1 %568 }
 0x10f   : > { %v3950_v39 = vpop.permute.xlu0 %570  ;;  %752 = vrot.lane.b32.xlu1 %v3202_v9, %s3135_s9 }
 0x111   : > { %754 = vrot.lane.b32.xlu0 %v3214_v15, %s3135_s9  ;;  %v3960_v18 = vpop.permute.xlu1 %572 }
 0x113   : > { %v3958_v8 = vpop.permute.xlu0 %591  ;;  %756 = vrot.lane.b32.xlu1 %v3231_v20, %s3135_s9 }
 0x115   : > { %758 = vrot.lane.b32.xlu0 %v3271_v31, %s3135_s9  ;;  %v3968_v40 = vpop.permute.xlu1 %593 }
 0x117   : > { %v3966_v38 = vpop.permute.xlu0 %595  ;;  %760 = vrot.lane.b32.xlu1 %v3217_v16, %s3135_s9  ;;  %v6731_v16 = vld [vmem:[#allocation4_spill] sm:$0xff] }
 0x119   : > { %762 = vrot.lane.b32.xlu0 %v3238_v22, %s3135_s9  ;;  %v3976_v35 = vpop.permute.xlu1 %597 }
 0x11b   : > { %v3974_v63 = vpop.permute.xlu0 %599  ;;  %764 = vrot.lane.b32.xlu1 %v3261_v28, %s3135_s9 }
 0x11d   : > { %766 = vrot.lane.b32.xlu0 %v3288_v36, %s3135_s9  ;;  %v602_v29 = vpop.permute.xlu1 %601 }
 0x11e   : > { %v630_v3 = vsel %vm625_vm6, %v3974_v63, %v602_v29 }
 0x11f   : > { %v604_v14 = vpop.permute.xlu0 %603  ;;  %768 = vrot.lane.b32.xlu1 %v3279_v34, %s3135_s9 }
 0x120   : > { %v631_v7 = vsel %vm625_vm6, %v602_v29, %v604_v14 }
 0x121   : > { %770 = vrot.lane.b32.xlu0 %v3313_v41, %s3135_s9  ;;  %v606_v37 = vpop.permute.xlu1 %605 }
 0x122   : > { %v632_v59 = vsel %vm625_vm6, %v604_v14, %v606_v37 }
 0x123   : > { %v608_v25 = vpop.permute.xlu0 %607  ;;  %772 = vrot.lane.b32.xlu1 %v6712_v1, %s3135_s9  ;;  %v6732_v1 = vld [vmem:[#allocation15_spill] sm:$0xff] }
 0x125   : > { %774 = vrot.lane.b32.xlu0 %v3331_v45, %s3135_s9  ;;  %v3992_v57 = vpop.permute.xlu1 %609 }
 0x127   : > { %v3990_v51 = vpop.permute.xlu0 %611  ;;  %776 = vrot.lane.b32.xlu1 %v6730_v52, %s3135_s9 }
 0x129   : > { %797 = vrot.lane.b32.xlu0 %v6729_v2, %s3136_s10  ;;  %v4000_v28 = vpop.permute.xlu1 %613  ;;  %v6734_v2 = vld [vmem:[#allocation9_spill] sm:$0xff] }
 0x12b   : > { %v3998_v34 = vpop.permute.xlu0 %615  ;;  %799 = vrot.lane.b32.xlu1 %v6732_v1, %s3136_s10 }
 0x12d   : > { %801 = vrot.lane.b32.xlu0 %v6731_v16, %s3136_s10  ;;  %v4008_v9 = vpop.permute.xlu1 %617  ;;  %v6736_v16 = vld [vmem:[#allocation19_spill] sm:$0xff] }
 0x12f   : > { %v4006_v20 = vpop.permute.xlu0 %619  ;;  %803 = vrot.lane.b32.xlu1 %v6734_v2, %s3136_s10 }
 0x131   : > { %805 = vrot.lane.b32.xlu0 %v6733_v17, %s3136_s10  ;;  %v4016_v13 = vpop.permute.xlu1 %621  ;;  %v6738_v17 = vld [vmem:[#allocation11_spill] sm:$0xff] }
 0x133   : > { %v4014_v47 = vpop.permute.xlu0 %623  ;;  %807 = vrot.lane.b32.xlu1 %v6736_v16, %s3136_s10  ;;  %v6740_v16 = vld [vmem:[#allocation21_spill] sm:$0xff] }
 0x135   : > { %809 = vrot.lane.b32.xlu0 %v6735_v26, %s3136_s10  ;;  %v4024_v49 = vpop.permute.xlu1 %642  ;;  %v311_v26 = vcombine.high %v6739_v11, %v6739_v11  ;;  %v4049_v11 = vcombine.high %v6730_v52, %v6730_v52 }
 0x137   : > { %v4022_v1 = vpop.permute.xlu0 %644  ;;  %811 = vrot.lane.b32.xlu1 %v6738_v17, %s3136_s10  ;;  %v579_v17 = vsel %vm574_vm7, %v3912_v62, %v3910_v0  ;;  %6742 = vst [vmem:[#allocation22_spill] sm:$0xff] %v4049_v11  ;;  %v4073_v29 = vrot.slane %v4049_v11, 6  ;;  %v634_v11 = vsel %vm625_vm6, %v608_v25, %v3992_v57 }
 0x138   : > { %v1303_v24 = vsel %vm1158_vm3, %v579_v17, %v630_v3  ;;  %v580_v17 = vsel %vm574_vm7, %v3910_v0, %v3920_v5  ;;  %v6750_v0 = vld [vmem:[#allocation29_spill] sm:$0xff] }
 0x139   : > { %813 = vrot.lane.b32.xlu0 %v6737_v42, %s3136_s10  ;;  %v4032_v21 = vpop.permute.xlu1 %646  ;;  %6748 = vst [vmem:[#allocation82_spill] sm:$0xff] %v4073_v29 }
 0x13b   : > { %v4030_v2 = vpop.permute.xlu0 %648  ;;  %815 = vrot.lane.b32.xlu1 %v6741_v43, %s3136_s10 }
 0x13d   : > { %817 = vrot.lane.b32.xlu0 %v6740_v16, %s3136_s10  ;;  %v4045_v48 = vpop.permute.xlu1 %650  ;;  %v6743_v16 = vld [vmem:[#allocation2_spill] sm:$0xff] }
 0x13e   : > { %v4052_v44 = vrot.slane %v311_v26, %v6743_v16  ;;  %v581_v26 = vsel %vm574_vm7, %v3920_v5, %v3918_v50  ;;  %v633_v5 = vsel %vm625_vm6, %v606_v37, %v608_v25  ;;  %v583_v37 = vsel %vm574_vm7, %v3928_v60, %v3926_v30 }
 0x13f   : > { %v653_v42 = vpop.permute.xlu0 %652  ;;  %819 = vrot.lane.b32.xlu1 %v6746_v58, %s3136_s10  ;;  %v1306_v58 = vsel %vm1158_vm3, %v580_v17, %v631_v7 }
 0x140   : > { %6744 = vst [vmem:[#allocation2_spill] sm:$0xff] %v4052_v44  ;;  %v681_v43 = vsel %vm676_vm8, %v4045_v48, %v653_v42  ;;  %v4076_v14 = vrot.slane %v4052_v44, 6 }
 0x141   : > { %821 = vrot.lane.b32.xlu0 %v6745_v46, %s3136_s10  ;;  %v4064_v52 = vsel %vm1207_vm4, %v1303_v24, %v681_v43  ;;  %v655_v3 = vpop.permute.xlu1 %654  ;;  %v1309_v24 = vsel %vm1158_vm3, %v581_v26, %v632_v59  ;;  %v1315_v26 = vsel %vm1158_vm3, %v583_v37, %v634_v11 }
 0x142   : > { %6747 = vst [vmem:[#allocation81_spill] sm:$0xff] %v4064_v52  ;;  %6749 = vst [vmem:[#allocation83_spill] sm:$0xff] %v4076_v14  ;;  %v682_v43 = vsel %vm676_vm8, %v653_v42, %v655_v3  ;;  %v6751_v52 = vld [vmem:[#allocation30_spill] sm:$0xff]  ;;  %v582_v42 = vsel %vm574_vm7, %v3918_v50, %v3928_v60  ;;  %v636_v60 = vsel %vm625_vm6, %v3990_v51, %v4000_v28 }
 0x143   : > { %v657_v16 = vpop.permute.xlu0 %656  ;;  %823 = vrot.lane.b32.xlu1 %v6751_v52, %s3136_s10  ;;  %v4090_v44 = vsel %vm1207_vm4, %v1306_v58, %v682_v43  ;;  %v1312_v25 = vsel %vm1158_vm3, %v582_v42, %v633_v5 }
 0x144   : > { %v683_v46 = vsel %vm676_vm8, %v655_v3, %v657_v16 }
 0x145   : > { %825 = vrot.lane.b32.xlu0 %v6750_v0, %s3136_s10  ;;  %v4093_v59 = vsel %vm1207_vm4, %v1309_v24, %v683_v46  ;;  %v659_v17 = vpop.permute.xlu1 %658  ;;  %v635_v46 = vsel %vm625_vm6, %v3992_v57, %v3990_v51  ;;  %v584_v24 = vsel %vm574_vm7, %v3926_v30, %v3936_v10  ;;  %v585_v57 = vsel %vm574_vm7, %v3936_v10, %v3934_v6 }
 0x146   : > { %v684_v58 = vsel %vm676_vm8, %v657_v16, %v659_v17  ;;  %v1318_v51 = vsel %vm1158_vm3, %v584_v24, %v635_v46  ;;  %v1321_v5 = vsel %vm1158_vm3, %v585_v57, %v636_v60  ;;  %v637_v30 = vsel %vm625_vm6, %v4000_v28, %v3998_v34  ;;  %v6753_v57 = vld [vmem:[#allocation32_spill] sm:$0xff] }
 0x147   : > { %v661_v7 = vpop.permute.xlu0 %660  ;;  %827 = vrot.lane.b32.xlu1 %v4073_v29, %s3136_s10  ;;  %v4116_v50 = vsel %vm1207_vm4, %v1312_v25, %v684_v58  ;;  %v638_v10 = vsel %vm625_vm6, %v3998_v34, %v4008_v9  ;;  %v586_v58 = vsel %vm574_vm7, %v3934_v6, %v3944_v19  ;;  %v587_v28 = vsel %vm574_vm7, %v3944_v19, %v3942_v23  ;;  %v6799_v29 = vld [vmem:[#allocation20_spill] sm:$0xff] }
 0x148   : > { %v685_v3 = vsel %vm676_vm8, %v659_v17, %v661_v7  ;;  %v6752_v17 = vld [vmem:[#allocation31_spill] sm:$0xff]  ;;  %v1324_v34 = vsel %vm1158_vm3, %v586_v58, %v637_v30  ;;  %v1327_v46 = vsel %vm1158_vm3, %v587_v28, %v638_v10  ;;  %v639_v6 = vsel %vm625_vm6, %v4008_v9, %v4006_v20  ;;  %v6754_v58 = vld [vmem:[#allocation33_spill] sm:$0xff] }
 0x149   : > { %829 = vrot.lane.b32.xlu0 %v4076_v14, %s3136_s10  ;;  %v4119_v11 = vsel %vm1207_vm4, %v1315_v26, %v685_v3  ;;  %v663_v43 = vpop.permute.xlu1 %662  ;;  %v640_v19 = vsel %vm625_vm6, %v4006_v20, %v4016_v13  ;;  %v589_v9 = vsel %vm574_vm7, %v3952_v33, %v3950_v39 }
 0x14a   : > { %v686_v42 = vsel %vm676_vm8, %v661_v7, %v663_v43 }
 0x14b   : > { %v665_v16 = vpop.permute.xlu0 %664  ;;  %850 = vrot.lane.b32.xlu1 %v6752_v17, %s3137_s11  ;;  %v4142_v25 = vsel %vm1207_vm4, %v1318_v51, %v686_v42 }
 0x14c   : > { %v687_v37 = vsel %vm676_vm8, %v663_v43, %v665_v16 }
 0x14d   : > { %852 = vrot.lane.b32.xlu0 %v3258_v27, %s3137_s11  ;;  %v4145_v7 = vsel %vm1207_vm4, %v1321_v5, %v687_v37  ;;  %v667_v3 = vpop.permute.xlu1 %666  ;;  %v588_v5 = vsel %vm574_vm7, %v3942_v23, %v3952_v33  ;;  %v1333_v37 = vsel %vm1158_vm3, %v589_v9, %v640_v19  ;;  %v641_v23 = vsel %vm625_vm6, %v4016_v13, %v4014_v47 }
 0x14e   : > { %v688_v60 = vsel %vm676_vm8, %v665_v16, %v667_v3  ;;  %v1330_v20 = vsel %vm1158_vm3, %v588_v5, %v639_v6  ;;  %v627_v13 = vsel %vm625_vm6, %v3968_v40, %v3966_v38  ;;  %v629_v9 = vsel %vm625_vm6, %v3976_v35, %v3974_v63 }
 0x14f   : > { %v669_v26 = vpop.permute.xlu0 %668  ;;  %854 = vrot.lane.b32.xlu1 %v6753_v57, %s3137_s11  ;;  %v4168_v43 = vsel %vm1207_vm4, %v1324_v34, %v688_v60  ;;  %v6808_v57 = vld [vmem:[#allocation14_spill] sm:$0xff] }
 0x150   : > { %v689_v24 = vsel %vm676_vm8, %v667_v3, %v669_v26 }
 0x151   : > { %856 = vrot.lane.b32.xlu0 %v3214_v15, %s3137_s11  ;;  %v4171_v16 = vsel %vm1207_vm4, %v1327_v46, %v689_v24  ;;  %v671_v42 = vpop.permute.xlu1 %670  ;;  %v626_v46 = vsel %vm625_vm6, %v3958_v8, %v3968_v40  ;;  %v575_v40 = vsel %vm574_vm7, %v3896_v32, %v3894_v12  ;;  %v677_v24 = vsel %vm676_vm8, %v4024_v49, %v4022_v1 }
 0x152   : > { %v690_v30 = vsel %vm676_vm8, %v669_v26, %v671_v42  ;;  %v590_v26 = vsel %vm574_vm7, %v3950_v39, %v3960_v18  ;;  %v678_v39 = vsel %vm676_vm8, %v4022_v1, %v4032_v21  ;;  %v576_v18 = vsel %vm574_vm7, %v3894_v12, %v3904_v61 }
 0x153   : > { %v673_v51 = vpop.permute.xlu0 %672  ;;  %858 = vrot.lane.b32.xlu1 %v6754_v58, %s3137_s11  ;;  %v4191_v33 = vsel %vm1207_vm4, %v1330_v20, %v690_v30  ;;  %v1336_v47 = vsel %vm1158_vm3, %v590_v26, %v641_v23  ;;  %v1291_v19 = vsel %vm1158_vm3, %v575_v40, %v626_v46  ;;  %v628_v49 = vsel %vm625_vm6, %v3966_v38, %v3976_v35 }
 0x154   : > { %v691_v10 = vsel %vm676_vm8, %v671_v42, %v673_v51  ;;  %v680_v1 = vsel %vm676_vm8, %v4030_v2, %v4045_v48  ;;  %v1338_v20 = vsel %vm1207_vm4, %v1291_v19, %v677_v24  ;;  %v679_v30 = vsel %vm676_vm8, %v4032_v21, %v4030_v2 }
 0x155   : > { %860 = vrot.lane.b32.xlu0 %v3271_v31, %s3137_s11  ;;  %v4194_v28 = vsel %vm1207_vm4, %v1333_v37, %v691_v10  ;;  %v675_v34 = vpop.permute.xlu1 %674  ;;  %v578_v37 = vsel %vm574_vm7, %v3902_v4, %v3912_v62  ;;  %v577_v48 = vsel %vm574_vm7, %v3904_v61, %v3902_v4  ;;  %vm1821_vm7 = vcmask 777216  }
 0x156   : > { %v692_v60 = vsel %vm676_vm8, %v673_v51, %v675_v34  ;;  %v1294_v51 = vsel %vm1158_vm3, %v576_v18, %v627_v13  ;;  %v1300_v10 = vsel %vm1158_vm3, %v578_v37, %v629_v9  ;;  %v6760_v9 = vld [vmem:[#allocation2_spill] sm:$0xff]  ;;  %vm1977_vm8 = vcmask 629760  }
 0x157   : > { %v694_v3 = vpop.permute.xlu0 %693  ;;  %862 = vrot.lane.b32.xlu1 %v3372_v53, %s3137_s11  ;;  %v4215_v8 = vsel %vm1207_vm4, %v1336_v47, %v692_v60  ;;  %v1340_v12 = vsel %vm1207_vm4, %v1294_v51, %v678_v39  ;;  %v1344_v2 = vsel %vm1207_vm4, %v1300_v10, %v680_v1  ;;  %v6756_v39 = vld [vmem:[#allocation81_spill] sm:$0xff]  ;;  %v6758_v51 = vld [vmem:[#allocation22_spill] sm:$0xff] }
 0x158   : > { %v6768_v10 = vld [vmem:[#allocation41_spill] sm:$0xff] }
 0x159   : > { %864 = vrot.lane.b32.xlu0 %v3238_v22, %s3137_s11  ;;  %v696_v5 = vpop.permute.xlu1 %695 }
 0x15a   : > { %v728_v32 = vsel %vm727_vm9, %v694_v3, %v696_v5  ;;  %v1297_v3 = vsel %vm1158_vm3, %v577_v48, %v628_v49  ;;  %v6767_v48 = vld [vmem:[#allocation40_spill] sm:$0xff] }
 0x15b   : > { %v698_v6 = vpop.permute.xlu0 %697  ;;  %866 = vrot.lane.b32.xlu1 %v3377_v54, %s3137_s11  ;;  %v1370_v35 = vsel %vm1240_vm5, %v1338_v20, %v728_v32  ;;  %v1342_v61 = vsel %vm1207_vm4, %v1297_v3, %v679_v30  ;;  %v4289_v32 = vrot.slane %v6760_v9, 4  ;;  %v6764_v20 = vld [vmem:[#allocation39_spill] sm:$0xff] }
 0x15c   : > { %v729_v42 = vsel %vm727_vm9, %v696_v5, %v698_v6  ;;  %v6759_v5 = vld [vmem:[#allocation38_spill] sm:$0xff] }
 0x15d   : > { %868 = vrot.lane.b32.xlu0 %v3288_v36, %s3137_s11  ;;  %v1373_v63 = vsel %vm1240_vm5, %v1340_v12, %v729_v42  ;;  %v700_v23 = vpop.permute.xlu1 %699  ;;  %6761 = vst [vmem:[#allocation84_spill] sm:$0xff] %v4289_v32 }
 0x15e   : > { %2613 = vmatprep.subr.bf16.mxu0 %v1373_v63  ;;  %v730_v62 = vsel %vm727_vm9, %v698_v6, %v700_v23 }
 0x15f   : > { %v702_v38 = vpop.permute.xlu0 %701  ;;  %2614 = vmatpush1.bf16.msra.mxu0 %v1370_v35  ;;  %870 = vrot.lane.b32.xlu1 %v3382_v55, %s3137_s11  ;;  %v1376_v34 = vsel %vm1240_vm5, %v1342_v61, %v730_v62  ;;  %v6814_v55 = vld [vmem:[#allocation26_spill] sm:$0xff] }
 0x160   : > { %v731_v26 = vsel %vm727_vm9, %v700_v23, %v702_v38 }
 0x161   : > { %872 = vrot.lane.b32.xlu0 %v3313_v41, %s3137_s11  ;;  %v1379_v4 = vsel %vm1240_vm5, %v1344_v2, %v731_v26  ;;  %v704_v46 = vpop.permute.xlu1 %703  ;;  %v6771_v2 = vld [vmem:[#allocation42_spill] sm:$0xff] }
 0x162   : > { %2654 = vmatprep.subr.bf16.mxu1 %v1379_v4  ;;  %v732_v13 = vsel %vm727_vm9, %v702_v38, %v704_v46  ;;  %v6772_v4 = vld [vmem:[#allocation43_spill] sm:$0xff] }
 0x163   : > { %v706_v21 = vpop.permute.xlu0 %705  ;;  %2655 = vmatpush1.bf16.msra.mxu1 %v1376_v34  ;;  %874 = vrot.lane.b32.xlu1 %v3387_v56, %s3137_s11  ;;  %v4280_v40 = vsel %vm1240_vm5, %v6756_v39, %v732_v13  ;;  %v6775_v13 = vld [vmem:[#allocation44_spill] sm:$0xff] }
 0x164   : > { %v733_v47 = vsel %vm727_vm9, %v704_v46, %v706_v21  ;;  %6757 = vst [vmem:[#allocation81_spill] sm:$0xff] %v4280_v40 }
 0x165   : > { %876 = vrot.lane.b32.xlu0 %v3331_v45, %s3137_s11  ;;  %v4276_v60 = vsel %vm1240_vm5, %v4090_v44, %v733_v47  ;;  %v708_v24 = vpop.permute.xlu1 %707  ;;  %v6776_v47 = vld [vmem:[#allocation45_spill] sm:$0xff] }
 0x166   : > { %6755 = vst [vmem:[#allocation33_spill] sm:$0xff] %v4276_v60  ;;  %v734_v6 = vsel %vm727_vm9, %v706_v21, %v708_v24 }
 0x167   : > { %v710_v18 = vpop.permute.xlu0 %709  ;;  %878 = vrot.lane.b32.xlu1 %v6759_v5, %s3137_s11  ;;  %v4297_v42 = vsel %vm1240_vm5, %v4093_v59, %v734_v6  ;;  %v6780_v6 = vld [vmem:[#allocation47_spill] sm:$0xff] }
 0x168   : > { %v735_v19 = vsel %vm727_vm9, %v708_v24, %v710_v18  ;;  %6763 = vst [vmem:[#allocation86_spill] sm:$0xff] %v4297_v42  ;;  %v6779_v24 = vld [vmem:[#allocation46_spill] sm:$0xff]  ;;  %v6801_v5 = vld [vmem:[#allocation7_spill] sm:$0xff] }
 0x169   : > { %880 = vrot.lane.b32.xlu0 %v6758_v51, %s3137_s11  ;;  %v4293_v44 = vsel %vm1240_vm5, %v4116_v50, %v735_v19  ;;  %v712_v49 = vpop.permute.xlu1 %711 }
 0x16a   : > { %6762 = vst [vmem:[#allocation85_spill] sm:$0xff] %v4293_v44  ;;  %v736_v1 = vsel %vm727_vm9, %v710_v18, %v712_v49  ;;  %v6797_v44 = vld [vmem:[#allocation13_spill] sm:$0xff] }
 0x16b   : > { %v714_v12 = vpop.permute.xlu0 %713  ;;  %882 = vrot.lane.b32.xlu1 %v4289_v32, %s3137_s11  ;;  %v4311_v59 = vsel %vm1240_vm5, %v4119_v11, %v736_v1 }
 0x16c   : > { %v737_v63 = vsel %vm727_vm9, %v712_v49, %v714_v12  ;;  %6766 = vst [vmem:[#allocation88_spill] sm:$0xff] %v4311_v59 }
 0x16d   : > { %903 = vrot.lane.b32.xlu0 %v6764_v20, %s3138_s12  ;;  %v4307_v50 = vsel %vm1240_vm5, %v4142_v25, %v737_v63  ;;  %v716_v30 = vpop.permute.xlu1 %715  ;;  %v6783_v63 = vld [vmem:[#allocation50_spill] sm:$0xff] }
 0x16e   : > { %6765 = vst [vmem:[#allocation87_spill] sm:$0xff] %v4307_v50  ;;  %v738_v38 = vsel %vm727_vm9, %v714_v12, %v716_v30  ;;  %v6796_v50 = vld [vmem:[#allocation5_spill] sm:$0xff] }
 0x16f   : > { %v718_v37 = vpop.permute.xlu0 %717  ;;  %905 = vrot.lane.b32.xlu1 %v6768_v10, %s3138_s12  ;;  %v4325_v11 = vsel %vm1240_vm5, %v4145_v7, %v738_v38 }
 0x170   : > { %v739_v35 = vsel %vm727_vm9, %v716_v30, %v718_v37  ;;  %6770 = vst [vmem:[#allocation90_spill] sm:$0xff] %v4325_v11 }
 0x171   : > { %907 = vrot.lane.b32.xlu0 %v6767_v48, %s3138_s12  ;;  %v4321_v25 = vsel %vm1240_vm5, %v4168_v43, %v739_v35  ;;  %v720_v3 = vpop.permute.xlu1 %719  ;;  %v6785_v35 = vld [vmem:[#allocation52_spill] sm:$0xff]  ;;  %v6804_v48 = vld [vmem:[#allocation10_spill] sm:$0xff] }
 0x172   : > { %6769 = vst [vmem:[#allocation89_spill] sm:$0xff] %v4321_v25  ;;  %v740_v62 = vsel %vm727_vm9, %v718_v37, %v720_v3  ;;  %v6784_v37 = vld [vmem:[#allocation51_spill] sm:$0xff]  ;;  %v6794_v25 = vld [vmem:[#allocation8_spill] sm:$0xff] }
 0x173   : > { %v722_v23 = vpop.permute.xlu0 %721  ;;  %909 = vrot.lane.b32.xlu1 %v6772_v4, %s3138_s12  ;;  %v4339_v7 = vsel %vm1240_vm5, %v4171_v16, %v740_v62  ;;  %v4391_v62 = vrot.slane %v6758_v51, 2 }
 0x174   : > { %v741_v26 = vsel %vm727_vm9, %v720_v3, %v722_v23  ;;  %6774 = vst [vmem:[#allocation92_spill] sm:$0xff] %v4339_v7  ;;  %v6787_v3 = vld [vmem:[#allocation53_spill] sm:$0xff]  ;;  %v6791_v7 = vld [vmem:[#allocation3_spill] sm:$0xff] }
 0x175   : > { %911 = vrot.lane.b32.xlu0 %v6771_v2, %s3138_s12  ;;  %v4335_v43 = vsel %vm1240_vm5, %v4191_v33, %v741_v26  ;;  %v724_v21 = vpop.permute.xlu1 %723  ;;  %6788 = vst [vmem:[#allocation96_spill] sm:$0xff] %v4391_v62 }
 0x176   : > { %6773 = vst [vmem:[#allocation91_spill] sm:$0xff] %v4335_v43  ;;  %v742_v34 = vsel %vm727_vm9, %v722_v23, %v724_v21  ;;  %v4386_v23 = vrot.slane %v6760_v9, 2 }
 0x177   : > { %v726_v61 = vpop.permute.xlu0 %725  ;;  %913 = vrot.lane.b32.xlu1 %v6776_v47, %s3138_s12  ;;  %v4353_v16 = vsel %vm1240_vm5, %v4194_v28, %v742_v34  ;;  %v6782_v28 = vld [vmem:[#allocation49_spill] sm:$0xff] }
 0x178   : > { %v743_v46 = vsel %vm727_vm9, %v724_v21, %v726_v61  ;;  %6778 = vst [vmem:[#allocation94_spill] sm:$0xff] %v4353_v16  ;;  %6786 = vst [vmem:[#allocation95_spill] sm:$0xff] %v4386_v23  ;;  %vm2028_vm9 = vcmask 498688  }
 0x179   : > { %915 = vrot.lane.b32.xlu0 %v6775_v13, %s3138_s12  ;;  %v4349_v33 = vsel %vm1240_vm5, %v4215_v8, %v743_v46  ;;  %v4357_v18 = vpop.permute.xlu1 %744  ;;  %v6781_v8 = vld [vmem:[#allocation48_spill] sm:$0xff]  ;;  %v6789_v46 = vld [vmem:[#allocation6_spill] sm:$0xff] }
 0x17a   : > { %6777 = vst [vmem:[#allocation93_spill] sm:$0xff] %v4349_v33 }
 0x17b   : > { %v4355_v39 = vpop.permute.xlu0 %746  ;;  %917 = vrot.lane.b32.xlu1 %v6780_v6, %s3138_s12 }
 0x17d   : > { %919 = vrot.lane.b32.xlu0 %v6779_v24, %s3138_s12  ;;  %v4365_v12 = vpop.permute.xlu1 %748 }
 0x17f   : > { %v4363_v19 = vpop.permute.xlu0 %750  ;;  %921 = vrot.lane.b32.xlu1 %v6782_v28, %s3138_s12 }
 0x181   : > { %923 = vrot.lane.b32.xlu0 %v6781_v8, %s3138_s12  ;;  %v4373_v1 = vpop.permute.xlu1 %752  ;;  %v6812_v8 = vld [vmem:[#allocation21_spill] sm:$0xff] }
 0x183   : > { %v4371_v49 = vpop.permute.xlu0 %754  ;;  %925 = vrot.lane.b32.xlu1 %v6784_v37, %s3138_s12  ;;  %v6811_v37 = vld [vmem:[#allocation11_spill] sm:$0xff] }
 0x185   : > { %927 = vrot.lane.b32.xlu0 %v6783_v63, %s3138_s12  ;;  %v4381_v38 = vpop.permute.xlu1 %756 }
 0x187   : > { %v4379_v30 = vpop.permute.xlu0 %758  ;;  %929 = vrot.lane.b32.xlu1 %v6787_v3, %s3138_s12 }
 0x189   : > { %931 = vrot.lane.b32.xlu0 %v6785_v35, %s3138_s12  ;;  %v4395_v61 = vpop.permute.xlu1 %760  ;;  %v6800_v35 = vld [vmem:[#allocation25_spill] sm:$0xff] }
 0x18b   : > { %v4393_v26 = vpop.permute.xlu0 %762  ;;  %933 = vrot.lane.b32.xlu1 %v4391_v62, %s3138_s12 }
 0x18d   : > { %935 = vrot.lane.b32.xlu0 %v4386_v23, %s3138_s12  ;;  %v4403_v34 = vpop.permute.xlu1 %764  ;;  %v6798_v23 = vld [vmem:[#allocation16_spill] sm:$0xff] }
 0x18f   : > { %v4401_v21 = vpop.permute.xlu0 %766  ;;  %954 = vrot.lane.b32.xlu1 %v6789_v46, %s3139_s13 }
 0x191   : > { %956 = vrot.lane.b32.xlu0 %v3258_v27, %s3139_s13  ;;  %v4411_v33 = vpop.permute.xlu1 %768 }
 0x193   : > { %v4409_v16 = vpop.permute.xlu0 %770  ;;  %958 = vrot.lane.b32.xlu1 %v6791_v7, %s3139_s13 }
 0x194   : > { %6790 = vst [vmem:[#allocation6_spill] sm:$0xff] %v4409_v16 }
 0x195   : > { %960 = vrot.lane.b32.xlu0 %v3214_v15, %s3139_s13  ;;  %v4419_v11 = vpop.permute.xlu1 %772 }
 0x196   : > { %6793 = vst [vmem:[#allocation97_spill] sm:$0xff] %v4419_v11 }
 0x197   : > { %v4417_v43 = vpop.permute.xlu0 %774  ;;  %962 = vrot.lane.b32.xlu1 %v6794_v25, %s3139_s13 }
 0x198   : > { %6792 = vst [vmem:[#allocation3_spill] sm:$0xff] %v4417_v43 }
 0x199   : > { %964 = vrot.lane.b32.xlu0 %v3271_v31, %s3139_s13  ;;  %v4427_v59 = vpop.permute.xlu1 %776 }
 0x19a   : > { %6795 = vst [vmem:[#allocation8_spill] sm:$0xff] %v4427_v59 }
 0x19b   : > { %v4425_v46 = vpop.permute.xlu0 %797  ;;  %966 = vrot.lane.b32.xlu1 %v6796_v50, %s3139_s13 }
 0x19d   : > { %968 = vrot.lane.b32.xlu0 %v3238_v22, %s3139_s13  ;;  %v4435_v42 = vpop.permute.xlu1 %799 }
 0x19f   : > { %v4433_v7 = vpop.permute.xlu0 %801  ;;  %970 = vrot.lane.b32.xlu1 %v6797_v44, %s3139_s13 }
 0x1a1   : > { %972 = vrot.lane.b32.xlu0 %v3288_v36, %s3139_s13  ;;  %v4443_v60 = vpop.permute.xlu1 %803 }
 0x1a3   : > { %v4441_v40 = vpop.permute.xlu0 %805  ;;  %974 = vrot.lane.b32.xlu1 %v6798_v23, %s3139_s13  ;;  %v6810_v23 = vld [vmem:[#allocation17_spill] sm:$0xff] }
 0x1a5   : > { %976 = vrot.lane.b32.xlu0 %v3313_v41, %s3139_s13  ;;  %v4451_v14 = vpop.permute.xlu1 %807  ;;  %v6813_v41 = vld [vmem:[#allocation24_spill] sm:$0xff] }
 0x1a7   : > { %v4449_v32 = vpop.permute.xlu0 %809  ;;  %978 = vrot.lane.b32.xlu1 %v6799_v29, %s3139_s13 }
 0x1a9   : > { %980 = vrot.lane.b32.xlu0 %v3331_v45, %s3139_s13  ;;  %v4459_v3 = vpop.permute.xlu1 %811 }
 0x1ab   : > { %v4457_v62 = vpop.permute.xlu0 %813  ;;  %982 = vrot.lane.b32.xlu1 %v6800_v35, %s3139_s13  ;;  %v6803_v35 = vld [vmem:[#allocation15_spill] sm:$0xff] }
 0x1ad   : > { %984 = vrot.lane.b32.xlu0 %v6758_v51, %s3139_s13  ;;  %v4467_v63 = vpop.permute.xlu1 %815  ;;  %v6802_v51 = vld [vmem:[#allocation4_spill] sm:$0xff] }
 0x1af   : > { %v4465_v20 = vpop.permute.xlu0 %817  ;;  %986 = vrot.lane.b32.xlu1 %v6760_v9, %s3139_s13 }
 0x1b1   : > { %1005 = vrot.lane.b32.xlu0 %v6801_v5, %s3140_s14  ;;  %v4475_v56 = vpop.permute.xlu1 %819  ;;  %v6805_v5 = vld [vmem:[#allocation9_spill] sm:$0xff] }
 0x1b3   : > { %v4473_v29 = vpop.permute.xlu0 %821  ;;  %1007 = vrot.lane.b32.xlu1 %v6803_v35, %s3140_s14 }
 0x1b5   : > { %1009 = vrot.lane.b32.xlu0 %v6802_v51, %s3140_s14  ;;  %v4483_v10 = vpop.permute.xlu1 %823  ;;  %v6809_v51 = vld [vmem:[#allocation19_spill] sm:$0xff] }
 0x1b7   : > { %v4481_v45 = vpop.permute.xlu0 %825  ;;  %1011 = vrot.lane.b32.xlu1 %v6805_v5, %s3140_s14 }
 0x1b9   : > { %1013 = vrot.lane.b32.xlu0 %v6804_v48, %s3140_s14  ;;  %v4491_v17 = vpop.permute.xlu1 %827 }
 0x1ba   : > { %6807 = vst [vmem:[#allocation7_spill] sm:$0xff] %v4491_v17 }
 0x1bb   : > { %v4489_v9 = vpop.permute.xlu0 %829  ;;  %1015 = vrot.lane.b32.xlu1 %v6809_v51, %s3140_s14 }
 0x1bc   : > { %6806 = vst [vmem:[#allocation5_spill] sm:$0xff] %v4489_v9 }
 0x1bd   : > { %1017 = vrot.lane.b32.xlu0 %v6808_v57, %s3140_s14  ;;  %v851_v27 = vpop.permute.xlu1 %850 }
 0x1bf   : > { %v853_v35 = vpop.permute.xlu0 %852  ;;  %1019 = vrot.lane.b32.xlu1 %v6811_v37, %s3140_s14 }
 0x1c1   : > { %1021 = vrot.lane.b32.xlu0 %v6810_v23, %s3140_s14  ;;  %v855_v28 = vpop.permute.xlu1 %854  ;;  %v6815_v23 = vld [vmem:[#allocation28_spill] sm:$0xff] }
 0x1c3   : > { %v4501_v44 = vpop.permute.xlu0 %856  ;;  %1023 = vrot.lane.b32.xlu1 %v6813_v41, %s3140_s14 }
 0x1c5   : > { %1025 = vrot.lane.b32.xlu0 %v6812_v8, %s3140_s14  ;;  %v4509_v36 = vpop.permute.xlu1 %858 }
 0x1c7   : > { %v4507_v24 = vpop.permute.xlu0 %860  ;;  %1027 = vrot.lane.b32.xlu1 %v6815_v23, %s3140_s14 }
 0x1c9   : > { %1029 = vrot.lane.b32.xlu0 %v6814_v55, %s3140_s14  ;;  %v4517_v59 = vpop.permute.xlu1 %862 }
 0x1cb   : > { %v4515_v54 = vpop.permute.xlu0 %864  ;;  %1031 = vrot.lane.b32.xlu1 %v6751_v52, %s3140_s14 }
 0x1cd   : > { %1033 = vrot.lane.b32.xlu0 %v6750_v0, %s3140_s14  ;;  %v4525_v8 = vpop.permute.xlu1 %866 }
 0x1cf   : > { %v4523_v41 = vpop.permute.xlu0 %868  ;;  %1682 = vrot.lane.b32.xlu1 %v3214_v15, %s3141_s16 }
 0x1d1   : > { %1684 = vrot.lane.b32.xlu0 %v6754_v58, %s3141_s16  ;;  %v4533_v23 = vpop.permute.xlu1 %870 }
 0x1d3   : > { %v4531_v55 = vpop.permute.xlu0 %872  ;;  %1686 = vrot.lane.b32.xlu1 %v3271_v31, %s3141_s16 }
 0x1d5   : > { %1688 = vrot.lane.b32.xlu0 %v3372_v53, %s3141_s16  ;;  %v4541_v0 = vpop.permute.xlu1 %874 }
 0x1d7   : > { %v4539_v52 = vpop.permute.xlu0 %876  ;;  %1690 = vrot.lane.b32.xlu1 %v3238_v22, %s3141_s16 }
 0x1d9   : > { %1736 = vrot.lane.b32.xlu0 %v6772_v4, %s3142_s18  ;;  %v4549_v9 = vpop.permute.xlu1 %878  ;;  %v832_v4 = vsel %vm6600_vm10, %v4425_v46, %v4435_v42  ;;  %v780_v46 = vsel %vm778_vm11, %v4355_v39, %v4365_v12 }
 0x1da   : > { %6817 = vst [vmem:[#allocation15_spill] sm:$0xff] %v4549_v9 }
 0x1db   : > { %v4547_v43 = vpop.permute.xlu0 %880  ;;  %1738 = vrot.lane.b32.xlu1 %v6771_v2, %s3142_s18  ;;  %v779_v2 = vsel %vm778_vm11, %v4357_v18, %v4355_v39  ;;  %v4583_v18 = vsel %vm6600_vm10, %v4443_v60, %v4441_v40 }
 0x1dc   : > { %6816 = vst [vmem:[#allocation4_spill] sm:$0xff] %v4547_v43  ;;  %v833_v43 = vsel %vm6600_vm10, %v4435_v42, %v4433_v7  ;;  %v1419_v11 = vsel %vm1158_vm3, %v779_v2, %v832_v4  ;;  %v4593_v2 = vsel %vm6599_vm12, %v4501_v44, %v4509_v36 }
 0x1dd   : > { %1740 = vrot.lane.b32.xlu0 %v6776_v47, %s3142_s18  ;;  %v4555_v17 = vpop.permute.xlu1 %882  ;;  %v886_v47 = vsel %vm6599_vm12, %v853_v35, %v855_v28 }
 0x1de   : > { %6818 = vst [vmem:[#allocation10_spill] sm:$0xff] %v4555_v17  ;;  %v885_v17 = vsel %vm6599_vm12, %v851_v27, %v853_v35 }
 0x1df   : > { %v904_v53 = vpop.permute.xlu0 %903  ;;  %1742 = vrot.lane.b32.xlu1 %v6775_v13, %s3142_s18  ;;  %v834_v13 = vsel %vm6600_vm10, %v4433_v7, %v4443_v60 }
 0x1e1   : > { %1744 = vrot.lane.b32.xlu0 %v6780_v6, %s3142_s18  ;;  %v1422_v6 = vsel %vm1158_vm3, %v780_v46, %v833_v43  ;;  %v906_v16 = vpop.permute.xlu1 %905  ;;  %v781_v43 = vsel %vm778_vm11, %v4365_v12, %v4363_v19  ;;  %v4630_v46 = vsel %vm6599_vm12, %v4509_v36, %v4507_v24  ;;  %v784_v36 = vsel %vm778_vm11, %v4371_v49, %v4381_v38 }
 0x1e2   : > { %v938_v9 = vsel %vm937_vm13, %v904_v53, %v906_v16  ;;  %v1468_v27 = vsel %vm1207_vm4, %v1422_v6, %v886_v47  ;;  %v1466_v53 = vsel %vm1207_vm4, %v1419_v11, %v885_v17  ;;  %v782_v47 = vsel %vm778_vm11, %v4363_v19, %v4373_v1 }
 0x1e3   : > { %v908_v42 = vpop.permute.xlu0 %907  ;;  %1787 = vrot.lane.b32.xlu1 %v3214_v15, %s3143_s19  ;;  %v1498_v7 = vsel %vm1240_vm5, %v1466_v53, %v938_v9  ;;  %v1428_v35 = vsel %vm1158_vm3, %v782_v47, %v4583_v18  ;;  %v4613_v17 = vsel %vm6600_vm10, %v4441_v40, %v4451_v14  ;;  %v1425_v12 = vsel %vm1158_vm3, %v781_v43, %v834_v13 }
 0x1e4   : > { %v939_v39 = vsel %vm937_vm13, %v906_v16, %v908_v42  ;;  %v887_v16 = vsel %vm6599_vm12, %v855_v28, %v4501_v44  ;;  %v4619_v19 = vsel %vm6600_vm10, %v4451_v14, %v4449_v32  ;;  %v1472_v40 = vsel %vm1207_vm4, %v1428_v35, %v4593_v2 }
 0x1e5   : > { %1789 = vrot.lane.b32.xlu0 %v6794_v25, %s3143_s19  ;;  %v1501_v4 = vsel %vm1240_vm5, %v1468_v27, %v939_v39  ;;  %v910_v11 = vpop.permute.xlu1 %909  ;;  %v4635_v14 = vsel %vm6599_vm12, %v4507_v24, %v4517_v59  ;;  %v783_v39 = vsel %vm778_vm11, %v4373_v1, %v4371_v49  ;;  %v1434_v53 = vsel %vm1158_vm3, %v784_v36, %v4619_v19 }
 0x1e6   : > { %2615 = vmatprep.subr.bf16.mxu0 %v1501_v4  ;;  %v940_v28 = vsel %vm937_vm13, %v908_v42, %v910_v11  ;;  %v1470_v42 = vsel %vm1207_vm4, %v1425_v12, %v887_v16  ;;  %v1431_v4 = vsel %vm1158_vm3, %v783_v39, %v4613_v17  ;;  %v4655_v43 = vsel %vm6600_vm10, %v4449_v32, %v4459_v3 }
 0x1e7   : > { %v912_v6 = vpop.permute.xlu0 %911  ;;  %2616 = vmatpush1.bf16.msra.mxu0 %v1498_v7  ;;  %1791 = vrot.lane.b32.xlu1 %v3271_v31, %s3143_s19  ;;  %v1504_v24 = vsel %vm1240_vm5, %v1470_v42, %v940_v28  ;;  %v4660_v1 = vsel %vm6600_vm10, %v4459_v3, %v4457_v62  ;;  %v1476_v7 = vsel %vm1207_vm4, %v1434_v53, %v4635_v14 }
 0x1e8   : > { %v941_v9 = vsel %vm937_vm13, %v910_v11, %v912_v6  ;;  %6819 = vst [vmem:[#allocation9_spill] sm:$0xff] %v4660_v1  ;;  %v1474_v32 = vsel %vm1207_vm4, %v1431_v4, %v4630_v46  ;;  %v4673_v3 = vsel %vm6599_vm12, %v4517_v59, %v4515_v54  ;;  %v785_v11 = vsel %vm778_vm11, %v4381_v38, %v4379_v30 }
 0x1e9   : > { %1793 = vrot.lane.b32.xlu0 %v6796_v50, %s3143_s19  ;;  %v1507_v13 = vsel %vm1240_vm5, %v1472_v40, %v941_v9  ;;  %v914_v49 = vpop.permute.xlu1 %913  ;;  %v786_v59 = vsel %vm778_vm11, %v4379_v30, %v4395_v61  ;;  %v4701_v9 = vsel %vm6600_vm10, %v4457_v62, %v4467_v63  ;;  %v4706_v38 = vsel %vm6600_vm10, %v4467_v63, %v4465_v20 }
 0x1ea   : > { %2656 = vmatprep.subr.bf16.mxu1 %v1507_v13  ;;  %v942_v47 = vsel %vm937_vm13, %v912_v6, %v914_v49  ;;  %v4678_v6 = vsel %vm6599_vm12, %v4515_v54, %v4525_v8  ;;  %v1437_v54 = vsel %vm1158_vm3, %v785_v11, %v4655_v43  ;;  %v1440_v28 = vsel %vm1158_vm3, %v786_v59, %v4660_v1 }
 0x1eb   : > { %v916_v27 = vpop.permute.xlu0 %915  ;;  %2657 = vmatpush1.bf16.msra.mxu1 %v1504_v24  ;;  %6820 = vst [vmem:[#allocation14_spill] sm:$0xff] %v4678_v6  ;;  %1795 = vrot.lane.b32.xlu1 %v3238_v22, %s3143_s19  ;;  %v4686_v35 = vsel %vm1240_vm5, %v1474_v32, %v942_v47  ;;  %6823 = vst [vmem:[#allocation98_spill] sm:$0xff] %v4701_v9  ;;  %v1480_v42 = vsel %vm1207_vm4, %v1440_v28, %v4678_v6  ;;  %v6923_v6 = vld [vmem:[#allocation20_spill] sm:$0xff] }
 0x1ec   : > { %v943_v16 = vsel %vm937_vm13, %v914_v49, %v916_v27  ;;  %6822 = vst [vmem:[#allocation11_spill] sm:$0xff] %v4686_v35  ;;  %6824 = vst [vmem:[#allocation99_spill] sm:$0xff] %v4706_v38  ;;  %v1478_v62 = vsel %vm1207_vm4, %v1437_v54, %v4673_v3  ;;  %v4719_v39 = vsel %vm6599_vm12, %v4525_v8, %v4523_v41 }
 0x1ed   : > { %1841 = vrot.lane.b32.xlu0 %v6805_v5, %s3144_s20  ;;  %v4683_v5 = vsel %vm1240_vm5, %v1476_v7, %v943_v16  ;;  %v918_v40 = vpop.permute.xlu1 %917  ;;  %6825 = vst [vmem:[#allocation100_spill] sm:$0xff] %v4719_v39  ;;  %v4724_v63 = vsel %vm6599_vm12, %v4523_v41, %v4533_v23  ;;  %v788_v8 = vsel %vm778_vm11, %v4393_v26, %v4403_v34 }
 0x1ee   : > { %6821 = vst [vmem:[#allocation19_spill] sm:$0xff] %v4683_v5  ;;  %v944_v30 = vsel %vm937_vm13, %v916_v27, %v918_v40  ;;  %6826 = vst [vmem:[#allocation101_spill] sm:$0xff] %v4724_v63  ;;  %v787_v27 = vsel %vm778_vm11, %v4395_v61, %v4393_v26  ;;  %v4747_v4 = vsel %vm6600_vm10, %v4465_v20, %v4475_v56  ;;  %v6917_v5 = vld [vmem:[#allocation22_spill] sm:$0xff] }
 0x1ef   : > { %v920_v12 = vpop.permute.xlu0 %919  ;;  %1843 = vrot.lane.b32.xlu1 %v6804_v48, %s3144_s20  ;;  %v4732_v36 = vsel %vm1240_vm5, %v1478_v62, %v944_v30  ;;  %v1443_v41 = vsel %vm1158_vm3, %v787_v27, %v4701_v9  ;;  %v1446_v48 = vsel %vm1158_vm3, %v788_v8, %v4706_v38  ;;  %6829 = vst [vmem:[#allocation104_spill] sm:$0xff] %v4747_v4  ;;  %v6842_v62 = vld [vmem:[#allocation6_spill] sm:$0xff]  ;;  %v6925_v9 = vld [vmem:[#allocation25_spill] sm:$0xff] }
 0x1f0   : > { %v945_v13 = vsel %vm937_vm13, %v918_v40, %v920_v12  ;;  %6828 = vst [vmem:[#allocation103_spill] sm:$0xff] %v4732_v36  ;;  %v4752_v61 = vsel %vm6600_vm10, %v4475_v56, %v4473_v29  ;;  %v1484_v47 = vsel %vm1207_vm4, %v1446_v48, %v4724_v63  ;;  %v1482_v20 = vsel %vm1207_vm4, %v1443_v41, %v4719_v39  ;;  %v6838_v40 = vld [vmem:[#allocation15_spill] sm:$0xff]  ;;  %v6921_v63 = vld [vmem:[#allocation52_spill] sm:$0xff] }
 0x1f1   : > { %1845 = vrot.lane.b32.xlu0 %v6809_v51, %s3144_s20  ;;  %v4729_v51 = vsel %vm1240_vm5, %v1480_v42, %v945_v13  ;;  %6830 = vst [vmem:[#allocation105_spill] sm:$0xff] %v4752_v61  ;;  %v922_v53 = vpop.permute.xlu1 %921  ;;  %v4765_v16 = vsel %vm6599_vm12, %v4533_v23, %v4531_v55  ;;  %v4770_v56 = vsel %vm6599_vm12, %v4531_v55, %v4541_v0  ;;  %v6844_v48 = vld [vmem:[#allocation7_spill] sm:$0xff]  ;;  %v6924_v39 = vld [vmem:[#allocation96_spill] sm:$0xff] }
 0x1f2   : > { %6827 = vst [vmem:[#allocation102_spill] sm:$0xff] %v4729_v51  ;;  %v946_v26 = vsel %vm937_vm13, %v920_v12, %v922_v53  ;;  %6831 = vst [vmem:[#allocation106_spill] sm:$0xff] %v4765_v16  ;;  %v789_v32 = vsel %vm778_vm11, %v4403_v34, %v4401_v21  ;;  %v790_v23 = vsel %vm778_vm11, %v4401_v21, %v4411_v33 }
 0x1f3   : > { %v924_v24 = vpop.permute.xlu0 %923  ;;  %6832 = vst [vmem:[#allocation107_spill] sm:$0xff] %v4770_v56  ;;  %1847 = vrot.lane.b32.xlu1 %v6808_v57, %s3144_s20  ;;  %v4778_v7 = vsel %vm1240_vm5, %v1482_v20, %v946_v26  ;;  %v1449_v55 = vsel %vm1158_vm3, %v789_v32, %v4747_v4  ;;  %v1452_v57 = vsel %vm1158_vm3, %v790_v23, %v4752_v61  ;;  %v6846_v26 = vld [vmem:[#allocation5_spill] sm:$0xff]  ;;  %v6848_v32 = vld [vmem:[#allocation34_spill] sm:$0xff] }
 0x1f4   : > { %v947_v49 = vsel %vm937_vm13, %v922_v53, %v924_v24  ;;  %6834 = vst [vmem:[#allocation109_spill] sm:$0xff] %v4778_v7  ;;  %v4793_v59 = vsel %vm6600_vm10, %v4473_v29, %v4483_v10  ;;  %v4798_v34 = vsel %vm6600_vm10, %v4483_v10, %v4481_v45  ;;  %v1488_v28 = vsel %vm1207_vm4, %v1452_v57, %v4770_v56  ;;  %v6882_v7 = vld [vmem:[#allocation23_spill] sm:$0xff]  ;;  %v6900_v56 = vld [vmem:[#allocation24_spill] sm:$0xff] }
 0x1f5   : > { %1849 = vrot.lane.b32.xlu0 %v6811_v37, %s3144_s20  ;;  %v4775_v37 = vsel %vm1240_vm5, %v1484_v47, %v947_v49  ;;  %6835 = vst [vmem:[#allocation110_spill] sm:$0xff] %v4793_v59  ;;  %6836 = vst [vmem:[#allocation111_spill] sm:$0xff] %v4798_v34  ;;  %v926_v12 = vpop.permute.xlu1 %925  ;;  %v1486_v29 = vsel %vm1207_vm4, %v1449_v55, %v4765_v16  ;;  %v4811_v10 = vsel %vm6599_vm12, %v4541_v0, %v4539_v52  ;;  %v6843_v0 = vld [vmem:[#allocation97_spill] sm:$0xff]  ;;  %v6849_v55 = vld [vmem:[#allocation4_spill] sm:$0xff] }
 0x1f6   : > { %6833 = vst [vmem:[#allocation108_spill] sm:$0xff] %v4775_v37  ;;  %v948_v21 = vsel %vm937_vm13, %v924_v24, %v926_v12  ;;  %6837 = vst [vmem:[#allocation112_spill] sm:$0xff] %v4811_v10  ;;  %v4816_v30 = vsel %vm6599_vm12, %v4539_v52, %v6838_v40  ;;  %v791_v27 = vsel %vm778_vm11, %v4411_v33, %v6842_v62  ;;  %v6886_v37 = vld [vmem:[#allocation49_spill] sm:$0xff] }
 0x1f7   : > { %v928_v11 = vpop.permute.xlu0 %927  ;;  %6839 = vst [vmem:[#allocation15_spill] sm:$0xff] %v4816_v30  ;;  %1892 = vrot.lane.b32.xlu1 %v3214_v15, %s3145_s21  ;;  %v4824_v42 = vsel %vm1240_vm5, %v1486_v29, %v948_v21  ;;  %v792_v8 = vsel %vm778_vm11, %v6842_v62, %v6843_v0  ;;  %v1455_v52 = vsel %vm1158_vm3, %v791_v27, %v4793_v59  ;;  %v6922_v16 = vld [vmem:[#allocation53_spill] sm:$0xff] }
 0x1f8   : > { %v949_v54 = vsel %vm937_vm13, %v926_v12, %v928_v11  ;;  %6841 = vst [vmem:[#allocation114_spill] sm:$0xff] %v4824_v42  ;;  %v1458_v41 = vsel %vm1158_vm3, %v792_v8, %v4798_v34  ;;  %v4839_v53 = vsel %vm6600_vm10, %v4481_v45, %v6844_v48  ;;  %v4844_v33 = vsel %vm6600_vm10, %v6844_v48, %v6846_v26  ;;  %v6851_v12 = vld [vmem:[#allocation10_spill] sm:$0xff]  ;;  %v6890_v26 = vld [vmem:[#allocation51_spill] sm:$0xff] }
 0x1f9   : > { %1894 = vrot.lane.b32.xlu0 %v6754_v58, %s3145_s21  ;;  %v4821_v13 = vsel %vm1240_vm5, %v1488_v28, %v949_v54  ;;  %6845 = vst [vmem:[#allocation6_spill] sm:$0xff] %v4839_v53  ;;  %6847 = vst [vmem:[#allocation97_spill] sm:$0xff] %v4844_v33  ;;  %v930_v49 = vpop.permute.xlu1 %929  ;;  %v1492_v23 = vsel %vm1207_vm4, %v1458_v41, %v4816_v30  ;;  %v1490_v45 = vsel %vm1207_vm4, %v1455_v52, %v4811_v10  ;;  %v6855_v28 = vld [vmem:[#allocation3_spill] sm:$0xff]  ;;  %vm6624_vm10 = vcmask 195584  }
 0x1fa   : > { %6840 = vst [vmem:[#allocation113_spill] sm:$0xff] %v4821_v13  ;;  %v950_v47 = vsel %vm937_vm13, %v928_v11, %v930_v49  ;;  %v4857_v57 = vsel %vm6599_vm12, %v6838_v40, %v6849_v55  ;;  %v4862_v11 = vsel %vm6599_vm12, %v6849_v55, %v6851_v12  ;;  %v793_v29 = vsel %vm778_vm11, %v6843_v0, %v6855_v28  ;;  %v6856_v40 = vld [vmem:[#allocation8_spill] sm:$0xff]  ;;  %v6881_v13 = vld [vmem:[#allocation46_spill] sm:$0xff] }
 0x1fb   : > { %v932_v24 = vpop.permute.xlu0 %931  ;;  %6850 = vst [vmem:[#allocation7_spill] sm:$0xff] %v4857_v57  ;;  %6852 = vst [vmem:[#allocation34_spill] sm:$0xff] %v4862_v11  ;;  %1896 = vrot.lane.b32.xlu1 %v3271_v31, %s3145_s21  ;;  %v4870_v54 = vsel %vm1240_vm5, %v1490_v45, %v950_v47  ;;  %v794_v62 = vsel %vm778_vm11, %v6855_v28, %v6856_v40  ;;  %v1461_v8 = vsel %vm1158_vm3, %v793_v29, %v4839_v53  ;;  %v6857_v47 = vld [vmem:[#allocation43_spill] sm:$0xff]  ;;  %v6862_v28 = vld [vmem:[#allocation45_spill] sm:$0xff]  ;;  %vm1090_vm11 = vcmask 326656  }
 0x1fc   : > { %v951_v20 = vsel %vm937_vm13, %v930_v49, %v932_v24  ;;  %6854 = vst [vmem:[#allocation115_spill] sm:$0xff] %v4870_v54  ;;  %v1464_v52 = vsel %vm1158_vm3, %v794_v62, %v4844_v33  ;;  %v6863_v29 = vld [vmem:[#allocation42_spill] sm:$0xff]  ;;  %v6877_v54 = vld [vmem:[#allocation36_spill] sm:$0xff]  ;;  %v6899_v53 = vld [vmem:[#allocation21_spill] sm:$0xff]  ;;  %vm988_vm12 = vcmask 343040  }
 0x1fd   : > { %1898 = vrot.lane.b32.xlu0 %v6848_v32, %s3145_s21  ;;  %v4867_v21 = vsel %vm1240_vm5, %v1492_v23, %v951_v20  ;;  %v934_v41 = vpop.permute.xlu1 %933  ;;  %v1496_v0 = vsel %vm1207_vm4, %v1464_v52, %v4862_v11  ;;  %v1494_v20 = vsel %vm1207_vm4, %v1461_v8, %v4857_v57  ;;  %v6867_v8 = vld [vmem:[#allocation44_spill] sm:$0xff] }
 0x1fe   : > { %6853 = vst [vmem:[#allocation4_spill] sm:$0xff] %v4867_v21  ;;  %v952_v48 = vsel %vm937_vm13, %v932_v24, %v934_v41 }
 0x1ff   : > { %v936_v27 = vpop.permute.xlu0 %935  ;;  %1900 = vrot.lane.b32.xlu1 %v3238_v22, %s3145_s21  ;;  %v4896_v24 = vsel %vm1240_vm5, %v1494_v20, %v952_v48 }
 0x200   : > { %v953_v49 = vsel %vm937_vm13, %v934_v41, %v936_v27  ;;  %6859 = vst [vmem:[#allocation8_spill] sm:$0xff] %v4896_v24  ;;  %v6866_v27 = vld [vmem:[#allocation47_spill] sm:$0xff]  ;;  %vm1039_vm13 = vcmask 334848  }
 0x201   : > { %1943 = vrot.lane.b32.xlu0 %v6857_v47, %s3146_s22  ;;  %v4893_v23 = vsel %vm1240_vm5, %v1496_v0, %v953_v49  ;;  %v4900_v55 = vpop.permute.xlu1 %954  ;;  %v6874_v24 = vld [vmem:[#allocation35_spill] sm:$0xff] }
 0x202   : > { %6858 = vst [vmem:[#allocation3_spill] sm:$0xff] %v4893_v23  ;;  %6861 = vst [vmem:[#allocation116_spill] sm:$0xff] %v4900_v55 }
 0x203   : > { %v4898_v45 = vpop.permute.xlu0 %956  ;;  %1945 = vrot.lane.b32.xlu1 %v6863_v29, %s3146_s22 }
 0x204   : > { %6860 = vst [vmem:[#allocation43_spill] sm:$0xff] %v4898_v45  ;;  %v6928_v45 = vld [vmem:[#allocation30_spill] sm:$0xff] }
 0x205   : > { %1947 = vrot.lane.b32.xlu0 %v6862_v28, %s3146_s22  ;;  %v4908_v62 = vpop.permute.xlu1 %958  ;;  %v6934_v28 = vld [vmem:[#allocation57_spill] sm:$0xff] }
 0x206   : > { %6865 = vst [vmem:[#allocation117_spill] sm:$0xff] %v4908_v62 }
 0x207   : > { %v4906_v40 = vpop.permute.xlu0 %960  ;;  %1949 = vrot.lane.b32.xlu1 %v6867_v8, %s3146_s22 }
 0x208   : > { %6864 = vst [vmem:[#allocation42_spill] sm:$0xff] %v4906_v40 }
 0x209   : > { %1951 = vrot.lane.b32.xlu0 %v6866_v27, %s3146_s22  ;;  %v4916_v41 = vpop.permute.xlu1 %962 }
 0x20a   : > { %6869 = vst [vmem:[#allocation119_spill] sm:$0xff] %v4916_v41  ;;  %v6926_v41 = vld [vmem:[#allocation26_spill] sm:$0xff] }
 0x20b   : > { %v4914_v52 = vpop.permute.xlu0 %964  ;;  %1994 = vrot.lane.b32.xlu1 %v3214_v15, %s3147_s24 }
 0x20c   : > { %6868 = vst [vmem:[#allocation118_spill] sm:$0xff] %v4914_v52 }
 0x20d   : > { %1996 = vrot.lane.b32.xlu0 %v6794_v25, %s3147_s24  ;;  %v4924_v49 = vpop.permute.xlu1 %966 }
 0x20e   : > { %6871 = vst [vmem:[#allocation121_spill] sm:$0xff] %v4924_v49  ;;  %v6915_v49 = vld [vmem:[#allocation27_spill] sm:$0xff] }
 0x20f   : > { %v4922_v48 = vpop.permute.xlu0 %968  ;;  %1998 = vrot.lane.b32.xlu1 %v3271_v31, %s3147_s24 }
 0x210   : > { %6870 = vst [vmem:[#allocation120_spill] sm:$0xff] %v4922_v48 }
 0x211   : > { %2000 = vrot.lane.b32.xlu0 %v6796_v50, %s3147_s24  ;;  %v4932_v20 = vpop.permute.xlu1 %970  ;;  %v6878_v50 = vld [vmem:[#allocation18_spill] sm:$0xff] }
 0x212   : > { %6873 = vst [vmem:[#allocation123_spill] sm:$0xff] %v4932_v20  ;;  %v6912_v20 = vld [vmem:[#allocation31_spill] sm:$0xff] }
 0x213   : > { %v4930_v0 = vpop.permute.xlu0 %972  ;;  %2002 = vrot.lane.b32.xlu1 %v3238_v22, %s3147_s24 }
 0x214   : > { %6872 = vst [vmem:[#allocation122_spill] sm:$0xff] %v4930_v0 }
 0x215   : > { %1692 = vrot.lane.b32.xlu0 %v6874_v24, %s3141_s16  ;;  %v4940_v23 = vpop.permute.xlu1 %974 }
 0x216   : > { %6876 = vst [vmem:[#allocation124_spill] sm:$0xff] %v4940_v23  ;;  %v6885_v23 = vld [vmem:[#allocation48_spill] sm:$0xff] }
 0x217   : > { %v4938_v25 = vpop.permute.xlu0 %976  ;;  %1694 = vrot.lane.b32.xlu1 %v6878_v50, %s3141_s16 }
 0x218   : > { %6875 = vst [vmem:[#allocation35_spill] sm:$0xff] %v4938_v25 }
 0x219   : > { %1696 = vrot.lane.b32.xlu0 %v6877_v54, %s3141_s16  ;;  %v4948_v42 = vpop.permute.xlu1 %978 }
 0x21a   : > { %6880 = vst [vmem:[#allocation126_spill] sm:$0xff] %v4948_v42  ;;  %v6889_v42 = vld [vmem:[#allocation13_spill] sm:$0xff] }
 0x21b   : > { %v4946_v21 = vpop.permute.xlu0 %980  ;;  %1698 = vrot.lane.b32.xlu1 %v6882_v7, %s3141_s16 }
 0x21c   : > { %6879 = vst [vmem:[#allocation125_spill] sm:$0xff] %v4946_v21 }
 0x21d   : > { %1746 = vrot.lane.b32.xlu0 %v6881_v13, %s3142_s18  ;;  %v4956_v25 = vpop.permute.xlu1 %982 }
 0x21e   : > { %6884 = vst [vmem:[#allocation128_spill] sm:$0xff] %v4956_v25  ;;  %v6893_v25 = vld [vmem:[#allocation16_spill] sm:$0xff] }
 0x21f   : > { %v4954_v0 = vpop.permute.xlu0 %984  ;;  %1748 = vrot.lane.b32.xlu1 %v6886_v37, %s3142_s18 }
 0x220   : > { %6883 = vst [vmem:[#allocation127_spill] sm:$0xff] %v4954_v0 }
 0x221   : > { %1750 = vrot.lane.b32.xlu0 %v6885_v23, %s3142_s18  ;;  %v4964_v21 = vpop.permute.xlu1 %986 }
 0x222   : > { %6888 = vst [vmem:[#allocation130_spill] sm:$0xff] %v4964_v21  ;;  %v6896_v21 = vld [vmem:[#allocation17_spill] sm:$0xff] }
 0x223   : > { %v4962_v12 = vpop.permute.xlu0 %1005  ;;  %1752 = vrot.lane.b32.xlu1 %v6890_v26, %s3142_s18 }
 0x224   : > { %6887 = vst [vmem:[#allocation129_spill] sm:$0xff] %v4962_v12 }
 0x225   : > { %1797 = vrot.lane.b32.xlu0 %v6889_v42, %s3143_s19  ;;  %v4972_v0 = vpop.permute.xlu1 %1007 }
 0x226   : > { %6892 = vst [vmem:[#allocation131_spill] sm:$0xff] %v4972_v0 }
 0x227   : > { %v4970_v11 = vpop.permute.xlu0 %1009  ;;  %1799 = vrot.lane.b32.xlu1 %v6878_v50, %s3143_s19 }
 0x228   : > { %6891 = vst [vmem:[#allocation13_spill] sm:$0xff] %v4970_v11 }
 0x229   : > { %1801 = vrot.lane.b32.xlu0 %v6893_v25, %s3143_s19  ;;  %v4980_v30 = vpop.permute.xlu1 %1011 }
 0x22a   : > { %6895 = vst [vmem:[#allocation132_spill] sm:$0xff] %v4980_v30  ;;  %v6927_v30 = vld [vmem:[#allocation29_spill] sm:$0xff] }
 0x22b   : > { %v4978_v33 = vpop.permute.xlu0 %1013  ;;  %1803 = vrot.lane.b32.xlu1 %v6882_v7, %s3143_s19 }
 0x22c   : > { %6894 = vst [vmem:[#allocation16_spill] sm:$0xff] %v4978_v33 }
 0x22d   : > { %1851 = vrot.lane.b32.xlu0 %v6896_v21, %s3144_s20  ;;  %v4988_v34 = vpop.permute.xlu1 %1015  ;;  %v6903_v21 = vld [vmem:[#allocation28_spill] sm:$0xff] }
 0x22e   : > { %6898 = vst [vmem:[#allocation133_spill] sm:$0xff] %v4988_v34  ;;  %v6919_v34 = vld [vmem:[#allocation50_spill] sm:$0xff] }
 0x22f   : > { %v4986_v57 = vpop.permute.xlu0 %1017  ;;  %1853 = vrot.lane.b32.xlu1 %v6900_v56, %s3144_s20 }
 0x230   : > { %6897 = vst [vmem:[#allocation17_spill] sm:$0xff] %v4986_v57 }
 0x231   : > { %1855 = vrot.lane.b32.xlu0 %v6899_v53, %s3144_s20  ;;  %v4996_v61 = vpop.permute.xlu1 %1019 }
 0x232   : > { %6902 = vst [vmem:[#allocation24_spill] sm:$0xff] %v4996_v61 }
 0x233   : > { %v4994_v10 = vpop.permute.xlu0 %1021  ;;  %1857 = vrot.lane.b32.xlu1 %v6903_v21, %s3144_s20 }
 0x234   : > { %6901 = vst [vmem:[#allocation21_spill] sm:$0xff] %v4994_v10 }
 0x235   : > { %1902 = vrot.lane.b32.xlu0 %v6874_v24, %s3145_s21  ;;  %v5004_v36 = vpop.permute.xlu1 %1023 }
 0x236   : > { %6905 = vst [vmem:[#allocation134_spill] sm:$0xff] %v5004_v36 }
 0x237   : > { %v5002_v59 = vpop.permute.xlu0 %1025  ;;  %1904 = vrot.lane.b32.xlu1 %v6878_v50, %s3145_s21 }
 0x238   : > { %6904 = vst [vmem:[#allocation28_spill] sm:$0xff] %v5002_v59 }
 0x239   : > { %1906 = vrot.lane.b32.xlu0 %v6877_v54, %s3145_s21  ;;  %v5012_v53 = vpop.permute.xlu1 %1027 }
 0x23a   : > { %6907 = vst [vmem:[#allocation136_spill] sm:$0xff] %v5012_v53 }
 0x23b   : > { %v5010_v56 = vpop.permute.xlu0 %1029  ;;  %1908 = vrot.lane.b32.xlu1 %v6882_v7, %s3145_s21 }
 0x23c   : > { %6906 = vst [vmem:[#allocation135_spill] sm:$0xff] %v5010_v56 }
 0x23d   : > { %1953 = vrot.lane.b32.xlu0 %v6881_v13, %s3146_s22  ;;  %v5020_v59 = vpop.permute.xlu1 %1031 }
 0x23e   : > { %6909 = vst [vmem:[#allocation138_spill] sm:$0xff] %v5020_v59 }
 0x23f   : > { %v5018_v21 = vpop.permute.xlu0 %1033  ;;  %1955 = vrot.lane.b32.xlu1 %v6886_v37, %s3146_s22 }
 0x240   : > { %6908 = vst [vmem:[#allocation137_spill] sm:$0xff] %v5018_v21 }
 0x241   : > { %1957 = vrot.lane.b32.xlu0 %v6885_v23, %s3146_s22  ;;  %v5028_v56 = vpop.permute.xlu1 %1682 }
 0x243   : > { %v5026_v36 = vpop.permute.xlu0 %1684  ;;  %1959 = vrot.lane.b32.xlu1 %v6890_v26, %s3146_s22 }
 0x245   : > { %2004 = vrot.lane.b32.xlu0 %v6889_v42, %s3147_s24  ;;  %v5036_v21 = vpop.permute.xlu1 %1686  ;;  %v6910_v42 = vld [vmem:[#allocation12_spill] sm:$0xff] }
 0x247   : > { %v5034_v53 = vpop.permute.xlu0 %1688  ;;  %2006 = vrot.lane.b32.xlu1 %v6878_v50, %s3147_s24 }
 0x248   : > { %v1719_v8 = vsel %vm1716_vm14, %v5036_v21, %v5034_v53 }
 0x249   : > { %2008 = vrot.lane.b32.xlu0 %v6893_v25, %s3147_s24  ;;  %v5044_v51 = vpop.permute.xlu1 %1690  ;;  %v6911_v25 = vld [vmem:[#allocation32_spill] sm:$0xff] }
 0x24b   : > { %v5042_v59 = vpop.permute.xlu0 %1736  ;;  %2010 = vrot.lane.b32.xlu1 %v6882_v7, %s3147_s24  ;;  %v6920_v7 = vld [vmem:[#allocation39_spill] sm:$0xff] }
 0x24d   : > { %1058 = vrot.lane.b32.xlu0 %v6910_v42, %s3148_s25  ;;  %v5052_v35 = vpop.permute.xlu1 %1738 }
 0x24f   : > { %v5050_v26 = vpop.permute.xlu0 %1740  ;;  %1060 = vrot.lane.b32.xlu1 %v6911_v25, %s3148_s25  ;;  %v6914_v25 = vld [vmem:[#allocation41_spill] sm:$0xff] }
 0x251   : > { %1062 = vrot.lane.b32.xlu0 %v3214_v15, %s3148_s25  ;;  %v5060_v61 = vpop.permute.xlu1 %1742  ;;  %v6913_v15 = vld [vmem:[#allocation40_spill] sm:$0xff] }
 0x253   : > { %v5058_v10 = vpop.permute.xlu0 %1744  ;;  %1064 = vrot.lane.b32.xlu1 %v6754_v58, %s3148_s25 }
 0x255   : > { %1056 = vrot.lane.b32.xlu0 %v6912_v20, %s3148_s25  ;;  %v5068_v37 = vpop.permute.xlu1 %1787 }
 0x257   : > { %v5066_v42 = vpop.permute.xlu0 %1789  ;;  %1109 = vrot.lane.b32.xlu1 %v6914_v25, %s3149_s26 }
 0x259   : > { %1111 = vrot.lane.b32.xlu0 %v6913_v15, %s3149_s26  ;;  %v5076_v48 = vpop.permute.xlu1 %1791  ;;  %v6916_v15 = vld [vmem:[#allocation37_spill] sm:$0xff] }
 0x25b   : > { %v5074_v57 = vpop.permute.xlu0 %1793  ;;  %1113 = vrot.lane.b32.xlu1 %v6857_v47, %s3149_s26 }
 0x25d   : > { %1115 = vrot.lane.b32.xlu0 %v6863_v29, %s3149_s26  ;;  %v5084_v20 = vpop.permute.xlu1 %1795  ;;  %v6918_v29 = vld [vmem:[#allocation38_spill] sm:$0xff] }
 0x25f   : > { %v5082_v58 = vpop.permute.xlu0 %1841  ;;  %1700 = vrot.lane.b32.xlu1 %v6916_v15, %s3141_s16 }
 0x261   : > { %1702 = vrot.lane.b32.xlu0 %v6915_v49, %s3141_s16  ;;  %v5092_v23 = vpop.permute.xlu1 %1843 }
 0x263   : > { %v5090_v25 = vpop.permute.xlu0 %1845  ;;  %1704 = vrot.lane.b32.xlu1 %v6918_v29, %s3141_s16 }
 0x265   : > { %1706 = vrot.lane.b32.xlu0 %v6917_v5, %s3141_s16  ;;  %v5100_v52 = vpop.permute.xlu1 %1847 }
 0x267   : > { %v5098_v47 = vpop.permute.xlu0 %1849  ;;  %1107 = vrot.lane.b32.xlu1 %v6920_v7, %s3149_s26 }
 0x269   : > { %1754 = vrot.lane.b32.xlu0 %v6919_v34, %s3142_s18  ;;  %v5108_v54 = vpop.permute.xlu1 %1892 }
 0x26b   : > { %v5106_v50 = vpop.permute.xlu0 %1894  ;;  %1756 = vrot.lane.b32.xlu1 %v6922_v16, %s3142_s18 }
 0x26d   : > { %1758 = vrot.lane.b32.xlu0 %v6921_v63, %s3142_s18  ;;  %v5116_v4 = vpop.permute.xlu1 %1896 }
 0x26f   : > { %v5114_v38 = vpop.permute.xlu0 %1898  ;;  %1760 = vrot.lane.b32.xlu1 %v6924_v39, %s3142_s18 }
 0x271   : > { %1805 = vrot.lane.b32.xlu0 %v6923_v6, %s3143_s19  ;;  %v5124_v1 = vpop.permute.xlu1 %1900 }
 0x273   : > { %v5122_v7 = vpop.permute.xlu0 %1943  ;;  %1807 = vrot.lane.b32.xlu1 %v6915_v49, %s3143_s19 }
 0x275   : > { %1809 = vrot.lane.b32.xlu0 %v6925_v9, %s3143_s19  ;;  %v5132_v12 = vpop.permute.xlu1 %1945 }
 0x277   : > { %v5130_v55 = vpop.permute.xlu0 %1947  ;;  %1811 = vrot.lane.b32.xlu1 %v6917_v5, %s3143_s19 }
 0x279   : > { %1859 = vrot.lane.b32.xlu0 %v6926_v41, %s3144_s20  ;;  %v5140_v33 = vpop.permute.xlu1 %1949  ;;  %v6929_v41 = vld [vmem:[#allocation82_spill] sm:$0xff] }
 0x27b   : > { %v5138_v40 = vpop.permute.xlu0 %1951  ;;  %1861 = vrot.lane.b32.xlu1 %v6928_v45, %s3144_s20 }
 0x27d   : > { %1863 = vrot.lane.b32.xlu0 %v6927_v30, %s3144_s20  ;;  %v5148_v27 = vpop.permute.xlu1 %1994 }
 0x27f   : > { %v5146_v62 = vpop.permute.xlu0 %1996  ;;  %1865 = vrot.lane.b32.xlu1 %v6929_v41, %s3144_s20 }
 0x281   : > { %1910 = vrot.lane.b32.xlu0 %v6916_v15, %s3145_s21  ;;  %v5156_v0 = vpop.permute.xlu1 %1998 }
 0x283   : > { %v5154_v13 = vpop.permute.xlu0 %2000  ;;  %1912 = vrot.lane.b32.xlu1 %v6915_v49, %s3145_s21 }
 0x285   : > { %1914 = vrot.lane.b32.xlu0 %v6918_v29, %s3145_s21  ;;  %v5164_v45 = vpop.permute.xlu1 %2002  ;;  %v1717_v29 = vsel %vm1716_vm14, %v5028_v56, %v5026_v36 }
 0x287   : > { %v5162_v30 = vpop.permute.xlu0 %1692  ;;  %1916 = vrot.lane.b32.xlu1 %v6917_v5, %s3145_s21 }
 0x288   : > { %6930 = vst [vmem:[#allocation12_spill] sm:$0xff] %v5162_v30  ;;  %v1771_v30 = vsel %vm1770_vm15, %v5042_v59, %v5052_v35 }
 0x289   : > { %1961 = vrot.lane.b32.xlu0 %v6919_v34, %s3146_s22  ;;  %v5175_v11 = vpop.permute.xlu1 %1694 }
 0x28a   : > { %6932 = vst [vmem:[#allocation31_spill] sm:$0xff] %v5175_v11 }
 0x28b   : > { %v5170_v15 = vpop.permute.xlu0 %1696  ;;  %1963 = vrot.lane.b32.xlu1 %v6922_v16, %s3146_s22  ;;  %v1773_v16 = vsel %vm1770_vm15, %v5050_v26, %v5060_v61 }
 0x28c   : > { %6931 = vst [vmem:[#allocation32_spill] sm:$0xff] %v5170_v15  ;;  %v2075_v15 = vsel %vm1207_vm4, %v6934_v28, %v1717_v29  ;;  %v1772_v28 = vsel %vm1770_vm15, %v5052_v35, %v5050_v26  ;;  %v1774_v26 = vsel %vm1770_vm15, %v5060_v61, %v5058_v10 }
 0x28d   : > { %1965 = vrot.lane.b32.xlu0 %v6921_v63, %s3146_s22  ;;  %v5191_v11 = vpop.permute.xlu1 %1698  ;;  %v2109_v41 = vsel %vm1240_vm5, %v2075_v15, %v1771_v30  ;;  %v1718_v63 = vsel %vm1716_vm14, %v5026_v36, %v5036_v21  ;;  %v6936_v15 = vld [vmem:[#allocation60_spill] sm:$0xff]  ;;  %v6937_v21 = vld [vmem:[#allocation59_spill] sm:$0xff] }
 0x28e   : > { %6935 = vst [vmem:[#allocation41_spill] sm:$0xff] %v5191_v11  ;;  %v2079_v30 = vsel %vm1207_vm4, %v6936_v15, %v1719_v8  ;;  %v2077_v11 = vsel %vm1207_vm4, %v6937_v21, %v1718_v63  ;;  %v6938_v8 = vld [vmem:[#allocation58_spill] sm:$0xff]  ;;  %v1876_v21 = vsel %vm1875_vm1, %v5082_v58, %v5092_v23 }
 0x28f   : > { %v5184_v34 = vpop.permute.xlu0 %1746  ;;  %1967 = vrot.lane.b32.xlu1 %v6924_v39, %s3146_s22  ;;  %v2111_v35 = vsel %vm1240_vm5, %v2077_v11, %v1772_v28  ;;  %v2073_v63 = vsel %vm1207_vm4, %v6938_v8, %v5028_v56  ;;  %v1979_v8 = vsel %vm1977_vm8, %v5132_v12, %v5130_v55 }
 0x290   : > { %6933 = vst [vmem:[#allocation40_spill] sm:$0xff] %v5184_v34  ;;  %v2113_v34 = vsel %vm1240_vm5, %v2079_v30, %v1773_v16  ;;  %v6939_v30 = vld [vmem:[#allocation63_spill] sm:$0xff] }
 0x291   : > { %2371 = vrot.lane.b32.xlu0 %v2109_v41, %s3150_s27  ;;  %v5210_v36 = vpop.permute.xlu1 %1748  ;;  %v1720_v41 = vsel %vm1716_vm14, %v5034_v53, %v5044_v51 }
 0x292   : > { %v2081_v53 = vsel %vm1207_vm4, %v6939_v30, %v1720_v41  ;;  %v1928_v41 = vsel %vm1926_vm2, %v5106_v50, %v5116_v4  ;;  %v1978_v30 = vsel %vm1977_vm8, %v5122_v7, %v5132_v12  ;;  %v1930_v12 = vsel %vm1926_vm2, %v5114_v38, %v5124_v1 }
 0x293   : > { %v5206_v29 = vpop.permute.xlu0 %1750  ;;  %2373 = vrot.lane.b32.xlu1 %v2111_v35, %s3150_s27  ;;  %v2115_v11 = vsel %vm1240_vm5, %v2081_v53, %v1774_v26  ;;  %v1927_v26 = vsel %vm1926_vm2, %v5108_v54, %v5106_v50  ;;  %v1879_v53 = vsel %vm1875_vm1, %v5100_v52, %v5098_v47 }
 0x295   : > { %2375 = vrot.lane.b32.xlu0 %v2113_v34, %s3150_s27  ;;  %v5229_v16 = vpop.permute.xlu1 %1752  ;;  %v2107_v34 = vsel %vm1240_vm5, %v2073_v63, %v5042_v59  ;;  %v1877_v59 = vsel %vm1875_vm1, %v5092_v23, %v5090_v25  ;;  %v1822_v23 = vsel %vm1821_vm7, %v5068_v37, %v5066_v42 }
 0x296   : > { %v2145_v50 = vsel %vm1158_vm3, %v1822_v23, %v1876_v21  ;;  %v1825_v23 = vsel %vm1821_vm7, %v5074_v57, %v5084_v20 }
 0x297   : > { %v5227_v15 = vpop.permute.xlu0 %1797  ;;  %2377 = vrot.lane.b32.xlu1 %v2115_v11, %s3150_s27  ;;  %v2194_v21 = vsel %vm1207_vm4, %v2145_v50, %v1927_v26  ;;  %v1824_v26 = vsel %vm1821_vm7, %v5076_v48, %v5074_v57 }
 0x299   : > { %2369 = vrot.lane.b32.xlu0 %v2107_v34, %s3150_s27  ;;  %v5240_v28 = vpop.permute.xlu1 %1799 }
 0x29b   : > { %v5238_v61 = vpop.permute.xlu0 %1801  ;;  %2012 = vrot.lane.b32.xlu1 %v6923_v6, %s3147_s24  ;;  %v1823_v6 = vsel %vm1821_vm7, %v5066_v42, %v5076_v48  ;;  %v1878_v42 = vsel %vm1875_vm1, %v5090_v25, %v5100_v52  ;;  %v1981_v52 = vsel %vm1977_vm8, %v5140_v33, %v5138_v40  ;;  %v2228_v25 = vsel %vm1240_vm5, %v2194_v21, %v1978_v30 }
 0x29c   : > { %v2148_v63 = vsel %vm1158_vm3, %v1823_v6, %v1877_v59  ;;  %v2261_v48 = vsel %vm1158_vm3, %v5148_v27, %v4443_v60  ;;  %v6601_v60 = vmov 0  }
 0x29d   : > { %2014 = vrot.lane.b32.xlu0 %v6915_v49, %s3147_s24  ;;  %v5257_v35 = vpop.permute.xlu1 %1803  ;;  %v2196_v11 = vsel %vm1207_vm4, %v2148_v63, %v1928_v41  ;;  %v1929_v41 = vsel %vm1926_vm2, %v5116_v4, %v5114_v38  ;;  %v1980_v63 = vsel %vm1977_vm8, %v5130_v55, %v5140_v33  ;;  %v2151_v38 = vsel %vm1158_vm3, %v1824_v26, %v1878_v42 }
 0x29e   : > { %v2230_v6 = vsel %vm1240_vm5, %v2196_v11, %v1979_v8  ;;  %v2154_v8 = vsel %vm1158_vm3, %v1825_v23, %v1879_v53  ;;  %v2198_v11 = vsel %vm1207_vm4, %v2151_v38, %v1929_v41  ;;  %v2030_v55 = vsel %vm2028_vm9, %v5146_v62, %v5156_v0  ;;  %2643 = vmatprep.mubr.bf16.mxu0 %v6601_v60  ;;  %v6942_v38 = vld [vmem:[#allocation44_spill] sm:$0xff] }
 0x29f   : > { %v5249_v56 = vpop.permute.xlu0 %1851  ;;  %2016 = vrot.lane.b32.xlu1 %v6925_v9, %s3147_s24  ;;  %v2200_v30 = vsel %vm1207_vm4, %v2154_v8, %v1930_v12  ;;  %v2232_v33 = vsel %vm1240_vm5, %v2198_v11, %v1980_v63  ;;  %v2142_v53 = vsel %vm1158_vm3, %v5068_v37, %v5082_v58  ;;  %v2029_v42 = vsel %vm2028_vm9, %v5148_v27, %v5146_v62  ;;  %v6940_v8 = vld [vmem:[#allocation83_spill] sm:$0xff]  ;;  %v6944_v11 = vld [vmem:[#allocation13_spill] sm:$0xff] }
 0x2a0   : > { %v2234_v57 = vsel %vm1240_vm5, %v2200_v30, %v1981_v52  ;;  %2684 = vmatprep.mubr.bf16.mxu1 %v6601_v60  ;;  %v2192_v21 = vsel %vm1207_vm4, %v2142_v53, %v5108_v54  ;;  %v2298_v23 = vsel %vm1207_vm4, %v2261_v48, %v4501_v44  ;;  %3112 = vset.pattern.permute.xlu1 %v6601_v60 }
 0x2a1   : > { %2018 = vrot.lane.b32.xlu0 %v6917_v5, %s3147_s24  ;;  %v5292_v59 = vpop.permute.xlu1 %1853  ;;  %v2226_v37 = vsel %vm1240_vm5, %v2192_v21, %v5122_v7  ;;  %v2265_v62 = vsel %vm1158_vm3, %v2030_v55, %v4613_v17  ;;  %v2032_v54 = vsel %vm2028_vm9, %v5154_v13, %v5164_v45  ;;  %v2263_v44 = vsel %vm1158_vm3, %v2029_v42, %v4583_v18  ;;  %v6947_v55 = vld [vmem:[#allocation2_spill] sm:$0xff]  ;;  %v6948_v21 = vld [vmem:[#allocation47_spill] sm:$0xff] }
 0x2a2   : > { %3113 = vset.pattern.permute.xlu0 %v6601_v60  ;;  %v2031_v27 = vsel %vm2028_vm9, %v5156_v0, %v5154_v13  ;;  %v2300_v17 = vsel %vm1207_vm4, %v2265_v62, %v4630_v46  ;;  %v2299_v41 = vsel %vm1207_vm4, %v2263_v44, %v4593_v2  ;;  %v2269_v52 = vsel %vm1158_vm3, %v2032_v54, %v4655_v43  ;;  %v5435_v44 = vld.sshfl [vmem:[%s3298_s28 + $0x8] sm:$0xff pattern:$0x76325410] }
 0x2a3   : > { %v5283_v34 = vpop.permute.xlu0 %1855  ;;  %2405 = vrot.lane.b32.xlu1 %v2228_v25, %s3150_s27  ;;  %v2267_v18 = vsel %vm1158_vm3, %v2031_v27, %v4619_v19  ;;  %v2302_v46 = vsel %vm1207_vm4, %v2269_v52, %v4673_v3  ;;  %v5425_v53 = vcombine.high %v6947_v55, %v6947_v55 }
 0x2a4   : > { %v2301_v2 = vsel %vm1207_vm4, %v2267_v18, %v4635_v14  ;;  %v6952_v18 = vld [vmem:[#allocation16_spill] sm:$0xff] }
 0x2a5   : > { %2407 = vrot.lane.b32.xlu0 %v2230_v6, %s3150_s27  ;;  %v5319_v50 = vpop.permute.xlu1 %1857 }
 0x2a7   : > { %v5316_v4 = vpop.permute.xlu0 %1902  ;;  %2409 = vrot.lane.b32.xlu1 %v2232_v33, %s3150_s27  ;;  %v6946_v33 = vld [vmem:[#allocation46_spill] sm:$0xff] }
 0x2a9   : > { %2411 = vrot.lane.b32.xlu0 %v2234_v57, %s3150_s27  ;;  %v5344_v6 = vpop.permute.xlu1 %1904  ;;  %v6945_v57 = vld [vmem:[#allocation131_spill] sm:$0xff] }
 0x2aa   : > { %v1041_v48 = vsel %vm1039_vm13, %v6945_v57, %v6944_v11 }
 0x2ab   : > { %v5338_v12 = vpop.permute.xlu0 %1906  ;;  %2403 = vrot.lane.b32.xlu1 %v2226_v37, %s3150_s27  ;;  %v6950_v37 = vld [vmem:[#allocation43_spill] sm:$0xff] }
 0x2ad   : > { %2437 = vrot.lane.b32.xlu0 %v2298_v23, %s3150_s27  ;;  %v5366_v7 = vpop.permute.xlu1 %1908  ;;  %v6949_v23 = vld [vmem:[#allocation117_spill] sm:$0xff] }
 0x2ae   : > { %v990_v62 = vsel %vm988_vm12, %v6950_v37, %v6949_v23 }
 0x2af   : > { %v5364_v58 = vpop.permute.xlu0 %1953  ;;  %2439 = vrot.lane.b32.xlu1 %v2299_v41, %s3150_s27  ;;  %v1550_v27 = vsel %vm1158_vm3, %v990_v62, %v1041_v48  ;;  %v6954_v62 = vld [vmem:[#allocation42_spill] sm:$0xff] }
 0x2b1   : > { %2441 = vrot.lane.b32.xlu0 %v2300_v17, %s3150_s27  ;;  %v5380_v0 = vpop.permute.xlu1 %1955  ;;  %v6951_v17 = vld [vmem:[#allocation132_spill] sm:$0xff] }
 0x2b2   : > { %v1042_v41 = vsel %vm1039_vm13, %v6944_v11, %v6951_v17  ;;  %v6953_v11 = vld [vmem:[#allocation84_spill] sm:$0xff] }
 0x2b3   : > { %v5378_v13 = vpop.permute.xlu0 %1957  ;;  %2443 = vrot.lane.b32.xlu1 %v2301_v2, %s3150_s27 }
 0x2b5   : > { %2445 = vrot.lane.b32.xlu0 %v2302_v46, %s3150_s27  ;;  %v5390_v25 = vpop.permute.xlu1 %1959  ;;  %v1043_v46 = vsel %vm1039_vm13, %v6951_v17, %v6952_v18  ;;  %v991_v17 = vsel %vm988_vm12, %v6949_v23, %v6954_v62 }
 0x2b6   : > { %v1553_v9 = vsel %vm1158_vm3, %v991_v17, %v1042_v41  ;;  %v1734_v17 = vrot.slane %v5435_v44, 2 }
 0x2b7   : > { %v5388_v43 = vpop.permute.xlu0 %2004  ;;  %1066 = vrot.lane.b32.xlu1 %v3271_v31, %s3148_s25 }
 0x2b9   : > { %1068 = vrot.lane.b32.xlu0 %v6848_v32, %s3148_s25  ;;  %v5398_v3 = vpop.permute.xlu1 %2006  ;;  %v6941_v32 = vld [vmem:[#allocation82_spill] sm:$0xff] }
 0x2bb   : > { %v5396_v19 = vpop.permute.xlu0 %2008  ;;  %1070 = vrot.lane.b32.xlu1 %v3238_v22, %s3148_s25 }
 0x2bd   : > { %1072 = vrot.lane.b32.xlu0 %v6874_v24, %s3148_s25  ;;  %v5406_v26 = vpop.permute.xlu1 %2010  ;;  %v6943_v24 = vld [vmem:[#allocation45_spill] sm:$0xff] }
 0x2bf   : > { %v5404_v14 = vpop.permute.xlu0 %1058  ;;  %1673 = vrot.lane.b32.xlu1 %v6941_v32, %s3128_s23  ;;  %v6969_v32 = vld [vmem:[#allocation31_spill] sm:$0xff] }
 0x2c1   : > { %1675 = vrot.lane.b32.xlu0 %v6940_v8, %s3128_s23  ;;  %v1061_v63 = vpop.permute.xlu1 %1060 }
 0x2c2   : > { %v1092_v42 = vsel %vm1090_vm11, %v5404_v14, %v1061_v63 }
 0x2c3   : > { %v1063_v31 = vpop.permute.xlu0 %1062  ;;  %1117 = vrot.lane.b32.xlu1 %v6943_v24, %s3149_s26  ;;  %v5450_v24 = vcombine.high %v5435_v44, %v5435_v44 }
 0x2c4   : > { %v1093_v60 = vsel %vm1090_vm11, %v1061_v63, %v1063_v31 }
 0x2c5   : > { %1119 = vrot.lane.b32.xlu0 %v6942_v38, %s3149_s26  ;;  %v5416_v30 = vpop.permute.xlu1 %1064  ;;  %v1596_v38 = vsel %vm1207_vm4, %v1550_v27, %v1092_v42  ;;  %v6955_v42 = vld [vmem:[#allocation119_spill] sm:$0xff]  ;;  %v1598_v41 = vsel %vm1207_vm4, %v1553_v9, %v1093_v60  ;;  %v6957_v60 = vld [vmem:[#allocation129_spill] sm:$0xff] }
 0x2c6   : > { %v1094_v48 = vsel %vm1090_vm11, %v1063_v31, %v5416_v30  ;;  %v992_v27 = vsel %vm988_vm12, %v6954_v62, %v6955_v42  ;;  %v1733_v31 = vrot.slane %v5425_v53, 2  ;;  %v6956_v62 = vld [vmem:[#allocation95_spill] sm:$0xff] }
 0x2c7   : > { %v1057_v22 = vpop.permute.xlu0 %1056  ;;  %1121 = vrot.lane.b32.xlu1 %v6948_v21, %s3149_s26  ;;  %v5458_v21 = vrot.slane %v5435_v44, 4 }
 0x2c9   : > { %1123 = vrot.lane.b32.xlu0 %v6946_v33, %s3149_s26  ;;  %v1110_v52 = vpop.permute.xlu1 %1109 }
 0x2cb   : > { %v1112_v54 = vpop.permute.xlu0 %1111  ;;  %1708 = vrot.lane.b32.xlu1 %v6953_v11, %s3141_s16 }
 0x2cc   : > { %v1143_v2 = vsel %vm6624_vm10, %v1110_v52, %v1112_v54 }
 0x2cd   : > { %1710 = vrot.lane.b32.xlu0 %v5425_v53, %s3141_s16  ;;  %v1629_v33 = vsel %vm1240_vm5, %v1596_v38, %v1143_v2  ;;  %v1556_v2 = vsel %vm1158_vm3, %v992_v27, %v1043_v46  ;;  %v1114_v38 = vpop.permute.xlu1 %1113  ;;  %v1091_v27 = vsel %vm1090_vm11, %v1057_v22, %v5404_v14 }
 0x2ce   : > { %2617 = vmatprep.subr.bf16.mxu0 %v1629_v33  ;;  %v1144_v5 = vsel %vm6624_vm10, %v1112_v54, %v1114_v38  ;;  %v1600_v23 = vsel %vm1207_vm4, %v1556_v2, %v1094_v48  ;;  %v1735_v48 = vrot.slane %v5450_v24, 2  ;;  %v6958_v2 = vld [vmem:[#allocation116_spill] sm:$0xff] }
 0x2cf   : > { %v5467_v39 = vpop.permute.xlu0 %1115  ;;  %1712 = vrot.lane.b32.xlu1 %v5458_v21, %s3141_s16  ;;  %v1632_v54 = vsel %vm1240_vm5, %v1598_v41, %v1144_v5  ;;  %v1040_v5 = vsel %vm1039_vm13, %v6957_v60, %v6945_v57 }
 0x2d0   : > { %v1145_v49 = vsel %vm6624_vm10, %v1114_v38, %v5467_v39  ;;  %v989_v38 = vsel %vm988_vm12, %v6958_v2, %v6950_v37  ;;  %v1839_v2 = vrot.slane %v5435_v44, 6 }
 0x2d1   : > { %1714 = vrot.lane.b32.xlu0 %v5450_v24, %s3141_s16  ;;  %v1635_v63 = vsel %vm1240_vm5, %v1600_v23, %v1145_v49  ;;  %v5485_v33 = vpop.permute.xlu1 %1700 }
 0x2d2   : > { %2658 = vmatprep.subr.bf16.mxu1 %v1635_v63  ;;  %v1547_v63 = vsel %vm1158_vm3, %v989_v38, %v1040_v5 }
 0x2d3   : > { %v5482_v46 = vpop.permute.xlu0 %1702  ;;  %2659 = vmatpush1.bf16.msra.mxu1 %v1632_v54  ;;  %1762 = vrot.lane.b32.xlu1 %v6956_v62, %s3142_s18  ;;  %v1594_v57 = vsel %vm1207_vm4, %v1547_v63, %v1091_v27  ;;  %v6607_v27 = vrot.slane %v5450_v24, 6 }
 0x2d5   : > { %1764 = vrot.lane.b32.xlu0 %v1733_v31, %s3142_s18  ;;  %v5494_v9 = vpop.permute.xlu1 %1704 }
 0x2d7   : > { %v5492_v49 = vpop.permute.xlu0 %1706  ;;  %1766 = vrot.lane.b32.xlu1 %v1734_v17, %s3142_s18 }
 0x2d9   : > { %1768 = vrot.lane.b32.xlu0 %v1735_v48, %s3142_s18  ;;  %v1108_v41 = vpop.permute.xlu1 %1107 }
 0x2da   : > { %v1142_v54 = vsel %vm6624_vm10, %v1108_v41, %v1110_v52  ;;  %v6608_v52 = vrot.slane %v5425_v53, 6 }
 0x2db   : > { %v5506_v23 = vpop.permute.xlu0 %1754  ;;  %1813 = vrot.lane.b32.xlu1 %v6947_v55, %s3143_s19  ;;  %v1626_v14 = vsel %vm1240_vm5, %v1594_v57, %v1142_v54 }
 0x2dc   : > { %2618 = vmatpush1.bf16.msra.mxu0 %v1626_v14 }
 0x2dd   : > { %1815 = vrot.lane.b32.xlu0 %v5425_v53, %s3143_s19  ;;  %v5518_v37 = vpop.permute.xlu1 %1756 }
 0x2df   : > { %v5516_v22 = vpop.permute.xlu0 %1758  ;;  %1817 = vrot.lane.b32.xlu1 %v5435_v44, %s3143_s19 }
 0x2e1   : > { %1819 = vrot.lane.b32.xlu0 %v5450_v24, %s3143_s19  ;;  %v5527_v5 = vpop.permute.xlu1 %1760 }
 0x2e3   : > { %v5525_v60 = vpop.permute.xlu0 %1805  ;;  %1867 = vrot.lane.b32.xlu1 %v6940_v8, %s3144_s20  ;;  %v6970_v8 = vld [vmem:[#allocation12_spill] sm:$0xff] }
 0x2e4   : > { %6959 = vst [vmem:[#allocation39_spill] sm:$0xff] %v5525_v60 }
 0x2e5   : > { %1869 = vrot.lane.b32.xlu0 %v6608_v52, %s3144_s20  ;;  %v5538_v63 = vpop.permute.xlu1 %1807 }
 0x2e6   : > { %6961 = vst [vmem:[#allocation26_spill] sm:$0xff] %v5538_v63  ;;  %v6974_v63 = vld [vmem:[#allocation41_spill] sm:$0xff] }
 0x2e7   : > { %v5536_v38 = vpop.permute.xlu0 %1809  ;;  %1871 = vrot.lane.b32.xlu1 %v1839_v2, %s3144_s20 }
 0x2e8   : > { %6960 = vst [vmem:[#allocation20_spill] sm:$0xff] %v5536_v38  ;;  %v1722_v38 = vsel %vm1716_vm14, %v6970_v8, %v6969_v32 }
 0x2e9   : > { %1873 = vrot.lane.b32.xlu0 %v6607_v27, %s3144_s20  ;;  %v5546_v54 = vpop.permute.xlu1 %1811 }
 0x2ea   : > { %6963 = vst [vmem:[#allocation30_spill] sm:$0xff] %v5546_v54 }
 0x2eb   : > { %v5544_v41 = vpop.permute.xlu0 %1859  ;;  %1918 = vrot.lane.b32.xlu1 %v6953_v11, %s3145_s21 }
 0x2ec   : > { %6962 = vst [vmem:[#allocation29_spill] sm:$0xff] %v5544_v41  ;;  %v6975_v41 = vld [vmem:[#allocation32_spill] sm:$0xff] }
 0x2ed   : > { %1920 = vrot.lane.b32.xlu0 %v5425_v53, %s3145_s21  ;;  %v5554_v14 = vpop.permute.xlu1 %1861 }
 0x2ee   : > { %6965 = vst [vmem:[#allocation60_spill] sm:$0xff] %v5554_v14  ;;  %v6976_v14 = vld [vmem:[#allocation64_spill] sm:$0xff] }
 0x2ef   : > { %v5552_v57 = vpop.permute.xlu0 %1863  ;;  %1922 = vrot.lane.b32.xlu1 %v5458_v21, %s3145_s21 }
 0x2f0   : > { %6964 = vst [vmem:[#allocation57_spill] sm:$0xff] %v5552_v57  ;;  %v1721_v57 = vsel %vm1716_vm14, %v5044_v51, %v6970_v8  ;;  %v1724_v51 = vsel %vm1716_vm14, %v6975_v41, %v6974_v63 }
 0x2f1   : > { %1924 = vrot.lane.b32.xlu0 %v5450_v24, %s3145_s21  ;;  %v5562_v52 = vpop.permute.xlu1 %1865 }
 0x2f2   : > { %6967 = vst [vmem:[#allocation58_spill] sm:$0xff] %v5562_v52 }
 0x2f3   : > { %v5560_v27 = vpop.permute.xlu0 %1910  ;;  %1969 = vrot.lane.b32.xlu1 %v6956_v62, %s3146_s22 }
 0x2f4   : > { %6966 = vst [vmem:[#allocation59_spill] sm:$0xff] %v5560_v27  ;;  %v6972_v27 = vld [vmem:[#allocation40_spill] sm:$0xff] }
 0x2f5   : > { %1971 = vrot.lane.b32.xlu0 %v1733_v31, %s3146_s22  ;;  %v5572_v54 = vpop.permute.xlu1 %1912  ;;  %v1776_v52 = vsel %vm1770_vm15, %v6972_v27, %v5210_v36  ;;  %v1775_v31 = vsel %vm1770_vm15, %v5058_v10, %v6972_v27  ;;  %v1723_v10 = vsel %vm1716_vm14, %v6969_v32, %v6975_v41  ;;  %v1777_v27 = vsel %vm1770_vm15, %v5210_v36, %v5206_v29  ;;  %v6978_v41 = vld [vmem:[#allocation68_spill] sm:$0xff] }
 0x2f6   : > { %6971 = vst [vmem:[#allocation44_spill] sm:$0xff] %v5572_v54 }
 0x2f7   : > { %v5567_v11 = vpop.permute.xlu0 %1914  ;;  %1973 = vrot.lane.b32.xlu1 %v1734_v17, %s3146_s22  ;;  %v1778_v17 = vsel %vm1770_vm15, %v5206_v29, %v5229_v16 }
 0x2f8   : > { %6968 = vst [vmem:[#allocation63_spill] sm:$0xff] %v5567_v11  ;;  %v6973_v11 = vld [vmem:[#allocation67_spill] sm:$0xff] }
 0x2f9   : > { %1975 = vrot.lane.b32.xlu0 %v1735_v48, %s3146_s22  ;;  %v2085_v54 = vsel %vm1207_vm4, %v6973_v11, %v1722_v38  ;;  %v5592_v8 = vpop.permute.xlu1 %1916  ;;  %v2083_v48 = vsel %vm1207_vm4, %v6976_v14, %v1721_v57  ;;  %v2087_v57 = vsel %vm1207_vm4, %v6978_v41, %v1723_v10 }
 0x2fa   : > { %v2119_v60 = vsel %vm1240_vm5, %v2085_v54, %v1776_v52  ;;  %v2117_v11 = vsel %vm1240_vm5, %v2083_v48, %v1775_v31  ;;  %v6977_v52 = vld [vmem:[#allocation71_spill] sm:$0xff] }
 0x2fb   : > { %v5585_v62 = vpop.permute.xlu0 %1961  ;;  %2379 = vrot.lane.b32.xlu1 %v2117_v11, %s3150_s27  ;;  %v2089_v54 = vsel %vm1207_vm4, %v6977_v52, %v1724_v51  ;;  %v6979_v52 = vrot.slane %v5425_v53, 6 }
 0x2fc   : > { %v2123_v14 = vsel %vm1240_vm5, %v2089_v54, %v1778_v17 }
 0x2fd   : > { %2381 = vrot.lane.b32.xlu0 %v2119_v60, %s3150_s27  ;;  %v5613_v32 = vpop.permute.xlu1 %1963  ;;  %v2121_v60 = vsel %vm1240_vm5, %v2087_v57, %v1777_v27  ;;  %v6980_v57 = vrot.slane %v5450_v24, 6 }
 0x2ff   : > { %v5609_v38 = vpop.permute.xlu0 %1965  ;;  %2383 = vrot.lane.b32.xlu1 %v2121_v60, %s3150_s27  ;;  %v1880_v60 = vsel %vm1875_vm1, %v5098_v47, %v5249_v56  ;;  %v1826_v47 = vsel %vm1821_vm7, %v5084_v20, %v5227_v15  ;;  %v1883_v20 = vsel %vm1875_vm1, %v5283_v34, %v5319_v50 }
 0x301   : > { %2385 = vrot.lane.b32.xlu0 %v2123_v14, %s3150_s27  ;;  %v5621_v36 = vpop.permute.xlu1 %1967 }
 0x303   : > { %v2372_v29 = vpop.permute.xlu0 %2371  ;;  %2020 = vrot.lane.b32.xlu1 %v6947_v55, %s3147_s24 }
 0x305   : > { %2022 = vrot.lane.b32.xlu0 %v5425_v53, %s3147_s24  ;;  %v2374_v51 = vpop.permute.xlu1 %2373 }
 0x306   : > { %v2473_v48 = vsel %vm2471_vm0, %v2372_v29, %v2374_v51 }
 0x307   : > { %v2376_v31 = vpop.permute.xlu0 %2375  ;;  %2024 = vrot.lane.b32.xlu1 %v5435_v44, %s3147_s24  ;;  %2619 = vmatprep.subr.bf16.mxu0 %v2473_v48  ;;  %v1983_v48 = vsel %vm1977_vm8, %v5364_v58, %v5380_v0 }
 0x308   : > { %v2474_v54 = vsel %vm2471_vm0, %v2374_v51, %v2376_v31  ;;  %v1931_v51 = vsel %vm1926_vm2, %v5124_v1, %v5316_v4  ;;  %v1982_v1 = vsel %vm1977_vm8, %v5138_v40, %v5364_v58  ;;  %v1882_v40 = vsel %vm1875_vm1, %v5292_v59, %v5283_v34 }
 0x309   : > { %2026 = vrot.lane.b32.xlu0 %v5450_v24, %s3147_s24  ;;  %v5632_v17 = vpop.permute.xlu1 %2377  ;;  %v1934_v58 = vsel %vm1926_vm2, %v5338_v12, %v5366_v7 }
 0x30a   : > { %v2475_v27 = vsel %vm2471_vm0, %v2376_v31, %v5632_v17 }
 0x30b   : > { %v2370_v10 = vpop.permute.xlu0 %2369  ;;  %2045 = vrot.lane.b32.xlu1 %v6979_v52, %s3136_s10  ;;  %2660 = vmatprep.subr.bf16.mxu1 %v2475_v27  ;;  %v1933_v27 = vsel %vm1926_vm2, %v5344_v6, %v5338_v12  ;;  %v1985_v52 = vsel %vm1977_vm8, %v5378_v13, %v5390_v25  ;;  %v2034_v12 = vsel %vm2028_vm9, %v5388_v43, %v5398_v3 }
 0x30c   : > { %v2472_v11 = vsel %vm2471_vm0, %v2370_v10, %v2372_v29  ;;  %2661 = vmatpush1.bf16.msra.mxu1 %v2474_v54  ;;  %v1932_v29 = vsel %vm1926_vm2, %v5316_v4, %v5344_v6  ;;  %v1829_v4 = vsel %vm1821_vm7, %v5238_v61, %v5257_v35 }
 0x30d   : > { %2047 = vrot.lane.b32.xlu0 %v1839_v2, %s3136_s10  ;;  %2620 = vmatpush1.bf16.msra.mxu0 %v2472_v11  ;;  %v5644_v41 = vpop.permute.xlu1 %2012  ;;  %v1881_v2 = vsel %vm1875_vm1, %v5249_v56, %v5292_v59  ;;  %v1828_v56 = vsel %vm1821_vm7, %v5240_v28, %v5238_v61  ;;  %v2166_v59 = vsel %vm1158_vm3, %v1829_v4, %v1883_v20 }
 0x30e   : > { %v2163_v6 = vsel %vm1158_vm3, %v1828_v56, %v1882_v40  ;;  %v2035_v4 = vsel %vm2028_vm9, %v5398_v3, %v5396_v19 }
 0x30f   : > { %v5642_v44 = vpop.permute.xlu0 %2014  ;;  %2049 = vrot.lane.b32.xlu1 %v6980_v57, %s3136_s10  ;;  %v1984_v57 = vsel %vm1977_vm8, %v5380_v0, %v5378_v13  ;;  %v2206_v13 = vsel %vm1207_vm4, %v2163_v6, %v1933_v27 }
 0x311   : > { %2054 = vrot.lane.b32.xlu0 %v5425_v53, %s3137_s11  ;;  %v5662_v31 = vpop.permute.xlu1 %2016  ;;  %v1827_v53 = vsel %vm1821_vm7, %v5227_v15, %v5240_v28 }
 0x312   : > { %v2160_v10 = vsel %vm1158_vm3, %v1827_v53, %v1881_v2  ;;  %v2033_v2 = vsel %vm2028_vm9, %v5164_v45, %v5388_v43  ;;  %v2036_v45 = vsel %vm2028_vm9, %v5396_v19, %v5406_v26  ;;  %v6986_v19 = vld [vmem:[#allocation99_spill] sm:$0xff] }
 0x313   : > { %v5654_v14 = vpop.permute.xlu0 %2018  ;;  %2056 = vrot.lane.b32.xlu1 %v5458_v21, %s3137_s11  ;;  %v2204_v28 = vsel %vm1207_vm4, %v2160_v10, %v1932_v29  ;;  %v2208_v29 = vsel %vm1207_vm4, %v2166_v59, %v1934_v58  ;;  %v6982_v10 = vld [vmem:[#allocation9_spill] sm:$0xff]  ;;  %v6984_v58 = vld [vmem:[#allocation14_spill] sm:$0xff]  ;;  %v2275_v3 = vsel %vm1158_vm3, %v2035_v4, %v6986_v19 }
 0x314   : > { %v2238_v11 = vsel %vm1240_vm5, %v2204_v28, %v1983_v48  ;;  %v2242_v0 = vsel %vm1240_vm5, %v2208_v29, %v1985_v52  ;;  %v6983_v28 = vld [vmem:[#allocation100_spill] sm:$0xff]  ;;  %v6993_v4 = vld [vmem:[#allocation65_spill] sm:$0xff] }
 0x315   : > { %2058 = vrot.lane.b32.xlu0 %v5450_v24, %s3137_s11  ;;  %v2157_v24 = vsel %vm1158_vm3, %v1826_v47, %v1880_v60  ;;  %v2406_v21 = vpop.permute.xlu1 %2405  ;;  %v6981_v47 = vld [vmem:[#allocation98_spill] sm:$0xff]  ;;  %v7000_v19 = vld [vmem:[#allocation81_spill] sm:$0xff] }
 0x316   : > { %v2202_v61 = vsel %vm1207_vm4, %v2157_v24, %v1931_v51  ;;  %v2240_v51 = vsel %vm1240_vm5, %v2206_v13, %v1984_v57  ;;  %v2273_v56 = vsel %vm1158_vm3, %v2034_v12, %v6981_v47  ;;  %v6988_v57 = vld [vmem:[#allocation101_spill] sm:$0xff] }
 0x317   : > { %v2408_v15 = vpop.permute.xlu0 %2407  ;;  %v2236_v54 = vsel %vm1240_vm5, %v2202_v61, %v1982_v1  ;;  %v2271_v1 = vsel %vm1158_vm3, %v2033_v2, %v6982_v10  ;;  %v2304_v40 = vsel %vm1207_vm4, %v2273_v56, %v6983_v28  ;;  %v2305_v12 = vsel %vm1207_vm4, %v2275_v3, %v6988_v57  ;;  %v6989_v13 = vld [vmem:[#allocation61_spill] sm:$0xff]  ;;  %v6991_v56 = vld [vmem:[#allocation18_spill] sm:$0xff]  ;;  %v6996_v28 = vld [vmem:[#allocation23_spill] sm:$0xff] }
 0x318   : > { %v2489_v34 = vsel %vm2471_vm0, %v2406_v21, %v2408_v15  ;;  %2413 = vrot.lane.b32.xlu1 %v2236_v54, %s3150_s27  ;;  %v2303_v61 = vsel %vm1207_vm4, %v2271_v1, %v6984_v58  ;;  %v6992_v1 = vld [vmem:[#allocation62_spill] sm:$0xff]  ;;  %v7001_v3 = vld [vmem:[#allocation85_spill] sm:$0xff] }
 0x319   : > { %2415 = vrot.lane.b32.xlu0 %v2238_v11, %s3150_s27  ;;  %2621 = vmatprep.subr.bf16.mxu0 %v2489_v34  ;;  %v2410_v53 = vpop.permute.xlu1 %2409  ;;  %v6987_v34 = vld [vmem:[#allocation106_spill] sm:$0xff]  ;;  %v7005_v57 = vld [vmem:[#allocation121_spill] sm:$0xff] }
 0x31a   : > { %v2490_v43 = vsel %vm2471_vm0, %v2408_v15, %v2410_v53  ;;  %v6985_v15 = vld [vmem:[#allocation104_spill] sm:$0xff] }
 0x31b   : > { %v5724_v60 = vpop.permute.xlu0 %2411  ;;  %v2277_v27 = vsel %vm1158_vm3, %v2036_v45, %v6985_v15 }
 0x31c   : > { %v2491_v48 = vsel %vm2471_vm0, %v2410_v53, %v5724_v60  ;;  %2417 = vrot.lane.b32.xlu1 %v2240_v51, %s3150_s27  ;;  %v2306_v59 = vsel %vm1207_vm4, %v2277_v27, %v6987_v34  ;;  %v6990_v51 = vld [vmem:[#allocation36_spill] sm:$0xff]  ;;  %v7003_v34 = vld [vmem:[#allocation19_spill] sm:$0xff] }
 0x31d   : > { %2419 = vrot.lane.b32.xlu0 %v2242_v0, %s3150_s27  ;;  %2662 = vmatprep.subr.bf16.mxu1 %v2491_v48  ;;  %v2404_v20 = vpop.permute.xlu1 %2403  ;;  %v5772_v0 = vld [vmem:[%s6377_s0] sm:$0x3] }
 0x31e   : > { %2663 = vmatpush1.bf16.msra.mxu1 %v2490_v43  ;;  %v2488_v11 = vsel %vm2471_vm0, %v2404_v20, %v2406_v21  ;;  %v6995_v20 = vld [vmem:[#allocation37_spill] sm:$0xff] }
 0x31f   : > { %v2438_v24 = vpop.permute.xlu0 %2437  ;;  %2622 = vmatpush1.bf16.msra.mxu0 %v2488_v11  ;;  %v6999_v11 = vld [vmem:[#allocation133_spill] sm:$0xff] }
 0x320   : > { %2447 = vrot.lane.b32.xlu1 %v2303_v61, %s3150_s27  ;;  %v6998_v61 = vmov 0   ;;  %v1044_v15 = vsel %vm1039_vm13, %v6952_v18, %v6999_v11 }
 0x321   : > { %2449 = vrot.lane.b32.xlu0 %v2304_v40, %s3150_s27  ;;  %v2440_v54 = vpop.permute.xlu1 %2439  ;;  %v6997_v40 = vld [vmem:[#allocation66_spill] sm:$0xff] }
 0x322   : > { %v2504_v6 = vsel %vm2471_vm0, %v2438_v24, %v2440_v54  ;;  %v6994_v24 = vld [vmem:[#allocation33_spill] sm:$0xff] }
 0x323   : > { %v2442_v52 = vpop.permute.xlu0 %2441  ;;  %v2564_v2 = vsel %vm1240_vm5, %v2504_v6, 0  ;;  %v7007_v6 = vld [vmem:[#allocation17_spill] sm:$0xff] }
 0x324   : > { %v2505_v21 = vsel %vm2471_vm0, %v2440_v54, %v2442_v52  ;;  %2451 = vrot.lane.b32.xlu1 %v2305_v12, %s3150_s27 }
 0x325   : > { %2453 = vrot.lane.b32.xlu0 %v2306_v59, %s3150_s27  ;;  %3059 = vmatprep.subr.msk.bf16.mxu0 %vm1240_vm5, %v2505_v21  ;;  %v2444_v53 = vpop.permute.xlu1 %2443  ;;  %v7004_v59 = vld [vmem:[#allocation48_spill] sm:$0xff] }
 0x326   : > { %2624 = vmatpush1.bf16.msra.mxu0 %v2564_v2  ;;  %v2506_v47 = vsel %vm2471_vm0, %v2442_v52, %v2444_v53  ;;  %v7002_v52 = vld [vmem:[#allocation118_spill] sm:$0xff]  ;;  %v7006_v21 = vld [vmem:[#allocation120_spill] sm:$0xff]  ;;  %v1045_v2 = vsel %vm1039_vm13, %v6999_v11, %v7007_v6  ;;  %v7013_v11 = vld [vmem:[#allocation11_spill] sm:$0xff] }
 0x327   : > { %v5766_v29 = vpop.permute.xlu0 %2445  ;;  %2693 = vmatprep.subr.bf16.mxu0 %v6989_v13  ;;  %v2570_v45 = vsel %vm1240_vm5, %v2506_v47, 0  ;;  %v993_v54 = vsel %vm988_vm12, %v6955_v42, %v7002_v52  ;;  %v994_v12 = vsel %vm988_vm12, %v7002_v52, %v7005_v57  ;;  %v995_v18 = vsel %vm988_vm12, %v7005_v57, %v7006_v21  ;;  %v7009_v42 = vld [vmem:[#allocation123_spill] sm:$0xff] }
 0x328   : > { %v2507_v48 = vsel %vm2471_vm0, %v2444_v53, %v5766_v29  ;;  %1074 = vrot.lane.b32.xlu1 %v6991_v56, %s3148_s25  ;;  %v7008_v53 = vld [vmem:[#allocation49_spill] sm:$0xff]  ;;  %v996_v13 = vsel %vm988_vm12, %v7006_v21, %v7009_v42 }
 0x329   : > { %1076 = vrot.lane.b32.xlu0 %v6990_v51, %s3148_s25  ;;  %3061 = vmatprep.subr.msk.bf16.mxu1 %vm1240_vm5, %v2507_v48  ;;  %v1067_v10 = vpop.permute.xlu1 %1066  ;;  %v1559_v51 = vsel %vm1158_vm3, %v993_v54, %v1044_v15  ;;  %v7010_v48 = vld [vmem:[#allocation24_spill] sm:$0xff]  ;;  %v7011_v56 = vld [vmem:[#allocation21_spill] sm:$0xff]  ;;  %v7014_v15 = vld [vmem:[#allocation102_spill] sm:$0xff] }
 0x32a   : > { %3060 = vmatmul.mubr.msk.bf16.vlgmr.msra.gmra.mrb[0].mxu0 %vm625_vm6, %v5772_v0  ;;  %2665 = vmatpush1.bf16.msra.mxu1 %v2570_v45  ;;  %v1046_v47 = vsel %vm1039_vm13, %v7007_v6, %v7010_v48  ;;  %v1047_v45 = vsel %vm1039_vm13, %v7010_v48, %v7011_v56 }
 0x32b   : > { %v5785_v43 = vpop.permute.xlu0 %1068  ;;  %2694 = vmatpush1.bf16.msra.mxu0 %v6992_v1  ;;  %2734 = vmatprep.subr.bf16.mxu1 %v6993_v4  ;;  %v7012_v1 = vld [vmem:[#allocation86_spill] sm:$0xff]  ;;  %v1565_v52 = vsel %vm1158_vm3, %v995_v18, %v1046_v47  ;;  %v1568_v54 = vsel %vm1158_vm3, %v996_v13, %v1047_v45  ;;  %v7019_v18 = vld [vmem:[#allocation75_spill] sm:$0xff] }
 0x32c   : > { %2695 = vmatprep.subr.bf16.mxu0 %v6994_v24  ;;  %1078 = vrot.lane.b32.xlu1 %v6996_v28, %s3148_s25  ;;  %v1725_v24 = vsel %vm1716_vm14, %v6974_v63, %v5485_v33  ;;  %v1727_v28 = vsel %vm1716_vm14, %v5482_v46, %v5494_v9  ;;  %v1728_v63 = vsel %vm1716_vm14, %v5494_v9, %v5492_v49 }
 0x32d   : > { %1080 = vrot.lane.b32.xlu0 %v6995_v20, %s3148_s25  ;;  %3062 = vmatmul.mubr.msk.bf16.vlgmr.msra.gmra.mrb[0].mxu1 %vm625_vm6, %v5772_v0  ;;  %v1071_v27 = vpop.permute.xlu1 %1070  ;;  %v1726_v20 = vsel %vm1716_vm14, %v5485_v33, %v5482_v46  ;;  %v1779_v33 = vsel %vm1770_vm15, %v5229_v16, %v5506_v23  ;;  %v1780_v46 = vsel %vm1770_vm15, %v5506_v23, %v5518_v37  ;;  %v7016_v16 = vld [vmem:[#allocation51_spill] sm:$0xff] }
 0x32e   : > { %2735 = vmatpush1.bf16.msra.mxu1 %v6997_v40  ;;  %2725 = vmatprep.mubr.bf16.mxu0 %v6998_v61  ;;  %v1096_v9 = vsel %vm1090_vm11, %v1067_v10, %v5785_v43  ;;  %v1095_v23 = vsel %vm1090_vm11, %v5416_v30, %v1067_v10  ;;  %v2093_v6 = vsel %vm1207_vm4, %v7019_v18, %v1726_v20  ;;  %v7021_v10 = vld [vmem:[#allocation77_spill] sm:$0xff] }
 0x32f   : > { %v5797_v58 = vpop.permute.xlu0 %1072  ;;  %2696 = vmatpush1.bf16.msra.mxu0 %v7000_v19  ;;  %2736 = vmatprep.subr.bf16.mxu1 %v7001_v3  ;;  %v1562_v19 = vsel %vm1158_vm3, %v994_v12, %v1045_v2  ;;  %v7015_v3 = vld [vmem:[#allocation50_spill] sm:$0xff]  ;;  %v7018_v12 = vld [vmem:[#allocation72_spill] sm:$0xff]  ;;  %v2127_v30 = vsel %vm1240_vm5, %v2093_v6, %v1780_v46  ;;  %v2097_v47 = vsel %vm1207_vm4, %v7021_v10, %v1728_v63 }
 0x330   : > { %2697 = vmatprep.subr.bf16.mxu0 %v7003_v34  ;;  %1125 = vrot.lane.b32.xlu1 %v7008_v53, %s3149_s26  ;;  %v1781_v34 = vsel %vm1770_vm15, %v5518_v37, %v5516_v22  ;;  %v2091_v21 = vsel %vm1207_vm4, %v7018_v12, %v1725_v24  ;;  %v7020_v2 = vld [vmem:[#allocation76_spill] sm:$0xff]  ;;  %v1782_v53 = vsel %vm1770_vm15, %v5516_v22, %v5527_v5  ;;  %v7022_v22 = vld [vmem:[#allocation39_spill] sm:$0xff] }
 0x331   : > { %1127 = vrot.lane.b32.xlu0 %v7004_v59, %s3149_s26  ;;  %2766 = vmatprep.mubr.bf16.mxu1 %v6998_v61  ;;  %v5845_v40 = vpop.permute.xlu1 %1673  ;;  %v7017_v59 = vld [vmem:[#allocation103_spill] sm:$0xff]  ;;  %v2095_v37 = vsel %vm1207_vm4, %v7020_v2, %v1727_v28  ;;  %v2125_v48 = vsel %vm1240_vm5, %v2091_v21, %v1779_v33  ;;  %v1604_v24 = vsel %vm1207_vm4, %v1562_v19, %v1096_v9  ;;  %v7023_v63 = vld [vmem:[#allocation60_spill] sm:$0xff]  ;;  %v7024_v33 = vld [vmem:[#allocation29_spill] sm:$0xff] }
 0x332   : > { %2737 = vmatpush1.bf16.msra.mxu1 %v7012_v1  ;;  %v2129_v20 = vsel %vm1240_vm5, %v2095_v37, %v1781_v34  ;;  %v1830_v28 = vsel %vm1821_vm7, %v5257_v35, %v7022_v22  ;;  %v1885_v46 = vsel %vm1875_vm1, %v7024_v33, %v7023_v63  ;;  %v1097_v19 = vsel %vm1090_vm11, %v5785_v43, %v1071_v27  ;;  %v7025_v9 = vld [vmem:[#allocation26_spill] sm:$0xff]  ;;  %v7027_v43 = vld [vmem:[#allocation44_spill] sm:$0xff] }
 0x333   : > { %v5834_v4 = vpop.permute.xlu0 %1675  ;;  %2698 = vmatpush1.bf16.msra.mxu0 %v7013_v11  ;;  %2738 = vmatprep.subr.bf16.mxu1 %v7014_v15  ;;  %v1098_v11 = vsel %vm1090_vm11, %v1071_v27, %v5797_v58  ;;  %v2131_v34 = vsel %vm1240_vm5, %v2097_v47, %v1782_v53  ;;  %v1987_v21 = vsel %vm1977_vm8, %v5585_v62, %v5613_v32 }
 0x334   : > { %1129 = vrot.lane.b32.xlu1 %v7016_v16, %s3149_s26  ;;  %v1831_v16 = vsel %vm1821_vm7, %v7022_v22, %v7025_v9  ;;  %v1986_v2 = vsel %vm1977_vm8, %v5390_v25, %v5585_v62  ;;  %v1606_v37 = vsel %vm1207_vm4, %v1565_v52, %v1097_v19  ;;  %v7030_v62 = vld [vmem:[#allocation63_spill] sm:$0xff]  ;;  %v7032_v22 = vld [vmem:[#allocation20_spill] sm:$0xff]  ;;  %v2038_v19 = vsel %vm2028_vm9, %v5644_v41, %v5642_v44 }
 0x335   : > { %1131 = vrot.lane.b32.xlu0 %v7015_v3, %s3149_s26  ;;  %v1118_v13 = vpop.permute.xlu1 %1117  ;;  %v1938_v52 = vsel %vm1926_vm2, %v7030_v62, %v5592_v8 }
 0x336   : > { %2739 = vmatpush1.bf16.msra.mxu1 %v7017_v59  ;;  %v1146_v45 = vsel %vm6624_vm10, %v5467_v39, %v1118_v13  ;;  %v1602_v39 = vsel %vm1207_vm4, %v1559_v51, %v1095_v23  ;;  %v1884_v51 = vsel %vm1875_vm1, %v5319_v50, %v7024_v33  ;;  %v7026_v23 = vld [vmem:[#allocation59_spill] sm:$0xff]  ;;  %v1608_v50 = vsel %vm1207_vm4, %v1568_v54, %v1098_v11 }
 0x337   : > { %v1120_v57 = vpop.permute.xlu0 %1119  ;;  %v1638_v35 = vsel %vm1240_vm5, %v1602_v39, %v1146_v45  ;;  %v1935_v59 = vsel %vm1926_vm2, %v5366_v7, %v7026_v23  ;;  %v1936_v27 = vsel %vm1926_vm2, %v7026_v23, %v7027_v43  ;;  %v2172_v7 = vsel %vm1158_vm3, %v1831_v16, %v1885_v46 }
 0x338   : > { %v1147_v1 = vsel %vm6624_vm10, %v1118_v13, %v1120_v57  ;;  %2387 = vrot.lane.b32.xlu1 %v2125_v48, %s3150_s27  ;;  %v7028_v13 = vld [vmem:[#allocation58_spill] sm:$0xff]  ;;  %v7029_v48 = vld [vmem:[#allocation57_spill] sm:$0xff]  ;;  %v2212_v47 = vsel %vm1207_vm4, %v2172_v7, %v1936_v27  ;;  %v1937_v11 = vsel %vm1926_vm2, %v7027_v43, %v7030_v62  ;;  %v1988_v46 = vsel %vm1977_vm8, %v5613_v32, %v5609_v38  ;;  %v7036_v7 = vld [vmem:[#allocation107_spill] sm:$0xff] }
 0x339   : > { %2389 = vrot.lane.b32.xlu0 %v2127_v30, %s3150_s27  ;;  %v1641_v15 = vsel %vm1240_vm5, %v1604_v24, %v1147_v1  ;;  %v1122_v12 = vpop.permute.xlu1 %1121  ;;  %v1887_v30 = vsel %vm1875_vm1, %v7029_v48, %v7028_v13  ;;  %v1886_v25 = vsel %vm1875_vm1, %v7023_v63, %v7029_v48  ;;  %v2246_v24 = vsel %vm1240_vm5, %v2212_v47, %v1987_v21  ;;  %v7040_v47 = vld [vmem:[#allocation15_spill] sm:$0xff] }
 0x33a   : > { %2699 = vmatprep.subr.bf16.mxu0 %v1641_v15  ;;  %v1148_v18 = vsel %vm6624_vm10, %v1120_v57, %v1122_v12  ;;  %v2169_v57 = vsel %vm1158_vm3, %v1830_v28, %v1884_v51  ;;  %v1989_v15 = vsel %vm1977_vm8, %v5609_v38, %v5621_v36  ;;  %v1832_v63 = vsel %vm1821_vm7, %v7025_v9, %v7032_v22 }
 0x33b   : > { %v5905_v3 = vpop.permute.xlu0 %1123  ;;  %2700 = vmatpush1.bf16.msra.mxu0 %v1638_v35  ;;  %v1644_v10 = vsel %vm1240_vm5, %v1606_v37, %v1148_v18  ;;  %v2210_v1 = vsel %vm1207_vm4, %v2169_v57, %v1935_v59  ;;  %v2175_v35 = vsel %vm1158_vm3, %v1832_v63, %v1886_v25  ;;  %v7033_v59 = vld [vmem:[#allocation110_spill] sm:$0xff]  ;;  %v2040_v27 = vsel %vm2028_vm9, %v5662_v31, %v5654_v14  ;;  %v7038_v57 = vld [vmem:[#allocation111_spill] sm:$0xff] }
 0x33c   : > { %v1149_v6 = vsel %vm6624_vm10, %v1122_v12, %v5905_v3  ;;  %2391 = vrot.lane.b32.xlu1 %v2129_v20, %s3150_s27  ;;  %v7031_v20 = vld [vmem:[#allocation30_spill] sm:$0xff]  ;;  %v2244_v39 = vsel %vm1240_vm5, %v2210_v1, %v1986_v2  ;;  %v2214_v23 = vsel %vm1207_vm4, %v2175_v35, %v1937_v11  ;;  %v2281_v43 = vsel %vm1158_vm3, %v2038_v19, %v7033_v59  ;;  %v7041_v1 = vld [vmem:[#allocation83_spill] sm:$0xff] }
 0x33d   : > { %2393 = vrot.lane.b32.xlu0 %v2131_v34, %s3150_s27  ;;  %v1647_v53 = vsel %vm1240_vm5, %v1608_v50, %v1149_v6  ;;  %v5950_v45 = vpop.permute.xlu1 %1708  ;;  %v1833_v28 = vsel %vm1821_vm7, %v7032_v22, %v7031_v20  ;;  %v2037_v34 = vsel %vm2028_vm9, %v5406_v26, %v5644_v41  ;;  %v2248_v32 = vsel %vm1240_vm5, %v2214_v23, %v1988_v46  ;;  %v7034_v26 = vld [vmem:[#allocation105_spill] sm:$0xff]  ;;  %v7035_v6 = vld [vmem:[#allocation112_spill] sm:$0xff]  ;;  %v7037_v37 = vld [vmem:[#allocation6_spill] sm:$0xff] }
 0x33e   : > { %2740 = vmatprep.subr.bf16.mxu1 %v1647_v53  ;;  %v2178_v33 = vsel %vm1158_vm3, %v1833_v28, %v1887_v30  ;;  %v2279_v41 = vsel %vm1158_vm3, %v2037_v34, %v7034_v26  ;;  %v2039_v12 = vsel %vm2028_vm9, %v5642_v44, %v5662_v31  ;;  %v2308_v50 = vsel %vm1207_vm4, %v2281_v43, %v7035_v6  ;;  %v7039_v31 = vld [vmem:[#allocation7_spill] sm:$0xff]  ;;  %v7043_v11 = vld [vmem:[#allocation38_spill] sm:$0xff]  ;;  %v7047_v34 = vld [vmem:[#allocation52_spill] sm:$0xff] }
 0x33f   : > { %v5940_v54 = vpop.permute.xlu0 %1710  ;;  %2741 = vmatpush1.bf16.msra.mxu1 %v1644_v10  ;;  %v2216_v9 = vsel %vm1207_vm4, %v2178_v33, %v1938_v52  ;;  %v2307_v2 = vsel %vm1207_vm4, %v2279_v41, %v7036_v7  ;;  %v2285_v53 = vsel %vm1158_vm3, %v2040_v27, %v7037_v37  ;;  %v2283_v48 = vsel %vm1158_vm3, %v2039_v12, %v7038_v57  ;;  %v7045_v33 = vld [vmem:[#allocation84_spill] sm:$0xff]  ;;  %v7046_v46 = vld [vmem:[#allocation22_spill] sm:$0xff]  ;;  %v7051_v41 = vld [vmem:[#allocation95_spill] sm:$0xff] }
 0x340   : > { %2421 = vrot.lane.b32.xlu1 %v2244_v39, %s3150_s27  ;;  %v2250_v38 = vsel %vm1240_vm5, %v2216_v9, %v1989_v15  ;;  %v2310_v10 = vsel %vm1207_vm4, %v2285_v53, %v7039_v31  ;;  %v2309_v25 = vsel %vm1207_vm4, %v2283_v48, %v7040_v47  ;;  %v7044_v15 = vld [vmem:[#allocation27_spill] sm:$0xff]  ;;  %v7048_v9 = vld [vmem:[#allocation53_spill] sm:$0xff]  ;;  %v7049_v23 = vld [vmem:[#allocation54_spill] sm:$0xff]  ;;  %vm7050_vm10 = vcmask 1039360  }
 0x341   : > { %2423 = vrot.lane.b32.xlu0 %v2246_v24, %s3150_s27  ;;  %v1713_v51 = vpop.permute.xlu1 %1712  ;;  %v7042_v24 = vld [vmem:[#allocation82_spill] sm:$0xff]  ;;  %v1730_v59 = vsel %vm1716_vm14, %v5950_v45, %v5940_v54  ;;  %v1729_v27 = vsel %vm1716_vm14, %v5492_v49, %v5950_v45  ;;  %v7052_v12 = vld [vmem:[#allocation25_spill] sm:$0xff]  ;;  %v7053_v7 = vld [vmem:[#allocation96_spill] sm:$0xff]  ;;  %v1678_v49 = vsel %vm7050_vm10, %v5845_v40, %v5834_v4 }
 0x342   : > { %v7054_v45 = vld [vmem:[#allocation78_spill] sm:$0xff] }
 0x343   : > { %v1715_v16 = vpop.permute.xlu0 %1714  ;;  %v2099_v53 = vsel %vm1207_vm4, %v7054_v45, %v1729_v27 }
 0x344   : > { %2425 = vrot.lane.b32.xlu1 %v2248_v32, %s3150_s27  ;;  %v1732_v57 = vsel %vm1716_vm14, %v1713_v51, %v1715_v16  ;;  %v2068_v16 = vsel %vm1158_vm3, %v7046_v46, %v1678_v49 }
 0x345   : > { %2427 = vrot.lane.b32.xlu0 %v2250_v38, %s3150_s27  ;;  %v1763_v18 = vpop.permute.xlu1 %1762  ;;  %v1677_v38 = vsel %vm7050_vm10, %v7049_v23, %v5845_v40  ;;  %v2071_v40 = vsel %vm1158_vm3, %v6947_v55, %v5834_v4 }
 0x346   : > { %v2065_v6 = vsel %vm1158_vm3, %v7052_v12, %v1677_v38 }
 0x347   : > { %v1765_v21 = vpop.permute.xlu0 %1764 }
 0x348   : > { %2455 = vrot.lane.b32.xlu1 %v2307_v2, %s3150_s27  ;;  %v1784_v26 = vsel %vm1770_vm15, %v1763_v18, %v1765_v21  ;;  %v2101_v2 = vsel %vm1207_vm4, %v2065_v6, %v1730_v59 }
 0x349   : > { %2457 = vrot.lane.b32.xlu0 %v2308_v50, %s3150_s27  ;;  %v1767_v44 = vpop.permute.xlu1 %1766  ;;  %v1783_v50 = vsel %vm1770_vm15, %v5527_v5, %v1763_v18  ;;  %v2135_v31 = vsel %vm1240_vm5, %v2101_v2, %v1784_v26  ;;  %v1731_v5 = vsel %vm1716_vm14, %v5940_v54, %v1713_v51  ;;  %vm7058_vm14 = vcmask 490496  }
 0x34a   : > { %v1785_v47 = vsel %vm1770_vm15, %v1765_v21, %v1767_v44 }
 0x34b   : > { %v1769_v30 = vpop.permute.xlu0 %1768 }
 0x34c   : > { %2459 = vrot.lane.b32.xlu1 %v2309_v25, %s3150_s27  ;;  %v1786_v18 = vsel %vm1770_vm15, %v1767_v44, %v1769_v30  ;;  %v2105_v25 = vsel %vm1207_vm4, %v2071_v40, %v1732_v57  ;;  %v2103_v30 = vsel %vm1207_vm4, %v2068_v16, %v1731_v5  ;;  %v7056_v5 = vld [vmem:[#allocation34_spill] sm:$0xff]  ;;  %vm7060_vm15 = vcmask 482304  }
 0x34d   : > { %2461 = vrot.lane.b32.xlu0 %v2310_v10, %s3150_s27  ;;  %v1814_v52 = vpop.permute.xlu1 %1813  ;;  %v2133_v10 = vsel %vm1240_vm5, %v2099_v53, %v1783_v50  ;;  %v2139_v4 = vsel %vm1240_vm5, %v2105_v25, %v1786_v18  ;;  %v7057_v25 = vld [vmem:[#allocation5_spill] sm:$0xff] }
 0x34f   : > { %v6012_v62 = vpop.permute.xlu0 %1815 }
 0x350   : > { %1035 = vrot.lane.b32.xlu1 %v7042_v24, %s3140_s14  ;;  %v1835_v21 = vsel %vm1821_vm7, %v1814_v52, %v6012_v62 }
 0x351   : > { %1037 = vrot.lane.b32.xlu0 %v7041_v1, %s3140_s14  ;;  %v6020_v28 = vpop.permute.xlu1 %1817 }
 0x353   : > { %v6018_v22 = vpop.permute.xlu0 %1819 }
 0x354   : > { %1082 = vrot.lane.b32.xlu1 %v7044_v15, %s3148_s25  ;;  %v2137_v15 = vsel %vm1240_vm5, %v2103_v30, %v1785_v47 }
 0x355   : > { %1084 = vrot.lane.b32.xlu0 %v7043_v11, %s3148_s25  ;;  %v1868_v63 = vpop.permute.xlu1 %1867 }
 0x356   : > { %v1888_v1 = vsel %vm1875_vm1, %v7028_v13, %v1868_v63  ;;  %v1834_v13 = vsel %vm1821_vm7, %v7031_v20, %v1814_v52 }
 0x357   : > { %v1870_v39 = vpop.permute.xlu0 %1869 }
 0x358   : > { %1086 = vrot.lane.b32.xlu1 %v7046_v46, %s3148_s25  ;;  %v1889_v54 = vsel %vm1875_vm1, %v1868_v63, %v1870_v39  ;;  %v2181_v46 = vsel %vm1158_vm3, %v1834_v13, %v1888_v1 }
 0x359   : > { %1088 = vrot.lane.b32.xlu0 %v7045_v33, %s3148_s25  ;;  %v1872_v35 = vpop.permute.xlu1 %1871  ;;  %v2184_v63 = vsel %vm1158_vm3, %v1835_v21, %v1889_v54 }
 0x35a   : > { %v1890_v23 = vsel %vm1875_vm1, %v1870_v39, %v1872_v35  ;;  %v1836_v39 = vsel %vm1821_vm7, %v6012_v62, %v6020_v28 }
 0x35b   : > { %v1874_v19 = vpop.permute.xlu0 %1873 }
 0x35c   : > { %1133 = vrot.lane.b32.xlu1 %v7048_v9, %s3149_s26 }
 0x35d   : > { %1135 = vrot.lane.b32.xlu0 %v7047_v34, %s3149_s26  ;;  %v1919_v43 = vpop.permute.xlu1 %1918 }
 0x35e   : > { %v1939_v44 = vsel %vm1926_vm2, %v5592_v8, %v1919_v43  ;;  %v1891_v8 = vsel %vm1875_vm1, %v1872_v35, %v1874_v19  ;;  %vm7061_vm1 = vmmov %vm7058_vm14 }
 0x35f   : > { %v1921_v32 = vpop.permute.xlu0 %1920  ;;  %v2218_v38 = vsel %vm1207_vm4, %v2181_v46, %v1939_v44 }
 0x360   : > { %1137 = vrot.lane.b32.xlu1 %v7053_v7, %s3149_s26  ;;  %v1940_v24 = vsel %vm1926_vm2, %v1919_v43, %v1921_v32 }
 0x361   : > { %1139 = vrot.lane.b32.xlu0 %v7051_v41, %s3149_s26  ;;  %v1923_v48 = vpop.permute.xlu1 %1922  ;;  %v2220_v34 = vsel %vm1207_vm4, %v2184_v63, %v1940_v24  ;;  %v7059_v24 = vld [vmem:[#allocation10_spill] sm:$0xff] }
 0x362   : > { %v1941_v43 = vsel %vm1926_vm2, %v1921_v32, %v1923_v48 }
 0x363   : > { %v1925_v37 = vpop.permute.xlu0 %1924 }
 0x364   : > { %2395 = vrot.lane.b32.xlu1 %v2133_v10, %s3150_s27  ;;  %v1942_v20 = vsel %vm1926_vm2, %v1923_v48, %v1925_v37  ;;  %vm7062_vm2 = vmmov %vm7061_vm1 }
 0x365   : > { %2397 = vrot.lane.b32.xlu0 %v2135_v31, %s3150_s27  ;;  %v1970_v55 = vpop.permute.xlu1 %1969 }
 0x366   : > { %v1990_v33 = vsel %vm1977_vm8, %v5621_v36, %v1970_v55  ;;  %v1837_v36 = vsel %vm1821_vm7, %v6020_v28, %v6018_v22  ;;  %v2187_v22 = vsel %vm1158_vm3, %v1836_v39, %v1890_v23  ;;  %vm7063_vm7 = vmmov %vm7060_vm15 }
 0x367   : > { %v1972_v51 = vpop.permute.xlu0 %1971  ;;  %v2252_v27 = vsel %vm1240_vm5, %v2218_v38, %v1990_v33  ;;  %v2190_v35 = vsel %vm1158_vm3, %v1837_v36, %v1891_v8  ;;  %v2222_v12 = vsel %vm1207_vm4, %v2187_v22, %v1941_v43 }
 0x368   : > { %v1991_v11 = vsel %vm1977_vm8, %v1970_v55, %v1972_v51  ;;  %2399 = vrot.lane.b32.xlu1 %v2137_v15, %s3150_s27  ;;  %v2224_v32 = vsel %vm1207_vm4, %v2190_v35, %v1942_v20 }
 0x369   : > { %2401 = vrot.lane.b32.xlu0 %v2139_v4, %s3150_s27  ;;  %v1974_v52 = vpop.permute.xlu1 %1973  ;;  %v2254_v59 = vsel %vm1240_vm5, %v2220_v34, %v1991_v11 }
 0x36a   : > { %v1992_v26 = vsel %vm1977_vm8, %v1972_v51, %v1974_v52 }
 0x36b   : > { %v1976_v9 = vpop.permute.xlu0 %1975  ;;  %v2256_v7 = vsel %vm1240_vm5, %v2222_v12, %v1992_v26 }
 0x36c   : > { %v1993_v19 = vsel %vm1977_vm8, %v1974_v52, %v1976_v9  ;;  %2429 = vrot.lane.b32.xlu1 %v2252_v27, %s3150_s27  ;;  %vm7064_vm8 = vmmov %vm7063_vm7  ;;  %v2553_v52 = vld [vmem:[%s6378_s1] sm:$0xf] }
 0x36d   : > { %2431 = vrot.lane.b32.xlu0 %v2254_v59, %s3150_s27  ;;  %v2380_v6 = vpop.permute.xlu1 %2379  ;;  %v2258_v50 = vsel %vm1240_vm5, %v2224_v32, %v1993_v19 }
 0x36e   : > { %v2476_v28 = vsel %vm2471_vm0, %v5632_v17, %v2380_v6  ;;  %v7055_v17 = vld [vmem:[#allocation97_spill] sm:$0xff] }
 0x36f   : > { %v2382_v41 = vpop.permute.xlu0 %2381 }
 0x370   : > { %v2477_v62 = vsel %vm2471_vm0, %v2380_v6, %v2382_v41  ;;  %2433 = vrot.lane.b32.xlu1 %v2256_v7, %s3150_s27  ;;  %v7065_v6 = vld [vmem:[#allocation69_spill] sm:$0xff] }
 0x371   : > { %2435 = vrot.lane.b32.xlu0 %v2258_v50, %s3150_s27  ;;  %2701 = vmatprep.subr.bf16.mxu0 %v2477_v62  ;;  %v2384_v37 = vpop.permute.xlu1 %2383 }
 0x372   : > { %2702 = vmatpush1.bf16.msra.mxu0 %v2476_v28  ;;  %v2478_v45 = vsel %vm2471_vm0, %v2382_v41, %v2384_v37 }
 0x373   : > { %v6122_v2 = vpop.permute.xlu0 %2385 }
 0x374   : > { %v2479_v49 = vsel %vm2471_vm0, %v2384_v37, %v6122_v2 }
 0x375   : > { %2742 = vmatprep.subr.bf16.mxu1 %v2479_v49  ;;  %v2021_v57 = vpop.permute.xlu1 %2020  ;;  %v7067_v49 = vld [vmem:[#allocation87_spill] sm:$0xff] }
 0x376   : > { %2743 = vmatpush1.bf16.msra.mxu1 %v2478_v45  ;;  %v2041_v48 = vsel %vm2028_vm9, %v5654_v14, %v2021_v57  ;;  %v7068_v45 = vld [vmem:[#allocation73_spill] sm:$0xff] }
 0x377   : > { %v2023_v53 = vpop.permute.xlu0 %2022  ;;  %v2287_v31 = vsel %vm1158_vm3, %v2041_v48, %v7055_v17 }
 0x378   : > { %v2311_v18 = vsel %vm1207_vm4, %v2287_v31, %v7056_v5  ;;  %v2042_v51 = vsel %vm2028_vm9, %v2021_v57, %v2023_v53  ;;  %v7070_v57 = vld [vmem:[#allocation74_spill] sm:$0xff]  ;;  %v7071_v31 = vld [vmem:[#allocation108_spill] sm:$0xff]  ;;  %v7072_v5 = vld [vmem:[#allocation89_spill] sm:$0xff] }
 0x379   : > { %2463 = vrot.lane.b32.xlu1 %v2311_v18, %s3150_s27  ;;  %v2025_v40 = vpop.permute.xlu1 %2024  ;;  %v7073_v18 = vld [vmem:[#allocation134_spill] sm:$0xff] }
 0x37a   : > { %v2043_v15 = vsel %vm2028_vm9, %v2023_v53, %v2025_v40  ;;  %v7069_v53 = vld [vmem:[#allocation88_spill] sm:$0xff] }
 0x37b   : > { %v2027_v10 = vpop.permute.xlu0 %2026 }
 0x37c   : > { %v2044_v13 = vsel %vm2028_vm9, %v2025_v40, %v2027_v10  ;;  %v1048_v10 = vsel %vm1039_vm13, %v7011_v56, %v7073_v18  ;;  %v7074_v40 = vld [vmem:[#allocation28_spill] sm:$0xff]  ;;  %v7077_v56 = vld [vmem:[#allocation109_spill] sm:$0xff]  ;;  %vm7082_vm9 = vcmask 195584  }
 0x37d   : > { %v2046_v16 = vpop.permute.xlu1 %2045  ;;  %vm7083_vm10 = vmmov %vm7082_vm9 }
 0x37e   : > { %v2051_v54 = vsel %vm7058_vm14, %v7057_v25, %v2046_v16  ;;  %v7075_v25 = vld [vmem:[#allocation122_spill] sm:$0xff]  ;;  %vm7087_vm14 = vmmov %vm7082_vm9 }
 0x37f   : > { %v2048_v47 = vpop.permute.xlu0 %2047  ;;  %v2290_v14 = vsel %vm1158_vm3, %v2042_v51, %v2051_v54  ;;  %v997_v54 = vsel %vm988_vm12, %v7009_v42, %v7075_v25  ;;  %v7076_v51 = vld [vmem:[#allocation124_spill] sm:$0xff]  ;;  %v7080_v42 = vld [vmem:[#allocation135_spill] sm:$0xff] }
 0x380   : > { %v2052_v21 = vsel %vm7061_vm1, %v2046_v16, %v2048_v47  ;;  %vm7105_vm1 = vmmov %vm7082_vm9 }
 0x381   : > { %v2050_v1 = vpop.permute.xlu1 %2049  ;;  %v2293_v33 = vsel %vm1158_vm3, %v2043_v15, %v2052_v21 }
 0x382   : > { %v2053_v44 = vsel %vm7062_vm2, %v2048_v47, %v2050_v1  ;;  %v1049_v47 = vsel %vm1039_vm13, %v7073_v18, %v7074_v40  ;;  %v7078_v1 = vld [vmem:[#allocation90_spill] sm:$0xff]  ;;  %vm7106_vm2 = vmmov %vm7105_vm1 }
 0x383   : > { %v2055_v30 = vpop.permute.xlu0 %2054  ;;  %v2296_v46 = vsel %vm1158_vm3, %v2044_v13, %v2053_v44  ;;  %v7079_v44 = vld [vmem:[#allocation113_spill] sm:$0xff] }
 0x384   : > { %v2060_v55 = vsel %vm7060_vm15, %v7059_v24, %v2055_v30  ;;  %vm7088_vm15 = vmmov %vm7082_vm9 }
 0x385   : > { %v2313_v4 = vsel %vm1207_vm4, %v2290_v14, %v2060_v55  ;;  %v2057_v63 = vpop.permute.xlu1 %2056  ;;  %v1571_v55 = vsel %vm1158_vm3, %v997_v54, %v1048_v10 }
 0x386   : > { %2465 = vrot.lane.b32.xlu0 %v2313_v4, %s3150_s27  ;;  %v2061_v8 = vsel %vm7063_vm7, %v2055_v30, %v2057_v63  ;;  %v998_v30 = vsel %vm988_vm12, %v7075_v25, %v7076_v51  ;;  %vm7110_vm7 = vmmov %vm7105_vm1 }
 0x387   : > { %v2059_v11 = vpop.permute.xlu0 %2058  ;;  %v2315_v9 = vsel %vm1207_vm4, %v2293_v33, %v2061_v8  ;;  %v1574_v4 = vsel %vm1158_vm3, %v998_v30, %v1049_v47 }
 0x388   : > { %v2062_v34 = vsel %vm7064_vm8, %v2057_v63, %v2059_v11  ;;  %2467 = vrot.lane.b32.xlu1 %v2315_v9, %s3150_s27  ;;  %v7081_v11 = vld [vmem:[#allocation136_spill] sm:$0xff]  ;;  %v7084_v9 = vld [vmem:[#allocation126_spill] sm:$0xff] }
 0x389   : > { %v2317_v23 = vsel %vm1207_vm4, %v2296_v46, %v2062_v34  ;;  %v1051_v15 = vsel %vm1039_vm13, %v7081_v11, %v7080_v42  ;;  %v1050_v33 = vsel %vm1039_vm13, %v7074_v40, %v7081_v11 }
 0x38a   : > { %2469 = vrot.lane.b32.xlu0 %v2317_v23, %s3150_s27  ;;  %v2414_v20 = vpop.permute.xlu1 %2413  ;;  %v7085_v23 = vld [vmem:[#allocation35_spill] sm:$0xff] }
 0x38b   : > { %v2416_v38 = vpop.permute.xlu0 %2415  ;;  %v2492_v36 = vsel %vm2471_vm0, %v5724_v60, %v2414_v20 }
 0x38c   : > { %v2493_v59 = vsel %vm2471_vm0, %v2414_v20, %v2416_v38  ;;  %2556 = vperm.xlu1 %3112, %v2553_v52   ;;  %v7086_v20 = vld [vmem:[#allocation114_spill] sm:$0xff] }
 0x38d   : > { %2703 = vmatprep.subr.bf16.mxu0 %v2493_v59 }
 0x38e   : > { %2704 = vmatpush1.bf16.msra.mxu0 %v2492_v36  ;;  %v2418_v19 = vpop.permute.xlu1 %2417  ;;  %v999_v36 = vsel %vm988_vm12, %v7076_v51, %v7085_v23  ;;  %v7089_v51 = vld [vmem:[#allocation55_spill] sm:$0xff] }
 0x38f   : > { %v6160_v43 = vpop.permute.xlu0 %2419  ;;  %v2494_v39 = vsel %vm2471_vm0, %v2416_v38, %v2418_v19  ;;  %v1000_v38 = vsel %vm988_vm12, %v7085_v23, %v7084_v9  ;;  %v7100_v23 = vld [vmem:[#allocation138_spill] sm:$0xff] }
 0x390   : > { %v2495_v27 = vsel %vm2471_vm0, %v2418_v19, %v6160_v43  ;;  %v1580_v19 = vsel %vm1158_vm3, %v1000_v38, %v1051_v15  ;;  %v1052_v38 = vsel %vm1039_vm13, %v7080_v42, %v7100_v23 }
 0x391   : > { %2744 = vmatprep.subr.bf16.mxu1 %v2495_v27 }
 0x392   : > { %2745 = vmatpush1.bf16.msra.mxu1 %v2494_v39  ;;  %v2448_v26 = vpop.permute.xlu1 %2447  ;;  %v1577_v39 = vsel %vm1158_vm3, %v999_v36, %v1050_v33  ;;  %v7098_v33 = vld [vmem:[#allocation94_spill] sm:$0xff]  ;;  %v7102_v36 = vld [vmem:[#allocation125_spill] sm:$0xff] }
 0x393   : > { %v2450_v35 = vpop.permute.xlu0 %2449  ;;  %v2508_v22 = vsel %vm2471_vm0, %v5766_v29, %v2448_v26  ;;  %v7066_v29 = vld [vmem:[#allocation70_spill] sm:$0xff] }
 0x394   : > { %v2509_v60 = vsel %vm2471_vm0, %v2448_v26, %v2450_v35  ;;  %v2576_v32 = vsel %vm1240_vm5, %v2508_v22, 0 }
 0x395   : > { %3063 = vmatprep.subr.msk.bf16.mxu0 %vm1240_vm5, %v2509_v60 }
 0x396   : > { %2706 = vmatpush1.bf16.msra.mxu0 %v2576_v32  ;;  %v2452_v12 = vpop.permute.xlu1 %2451 }
 0x397   : > { %v6170_v41 = vpop.permute.xlu0 %2453  ;;  %2775 = vmatprep.subr.bf16.mxu0 %v7065_v6  ;;  %v2510_v50 = vsel %vm2471_vm0, %v2450_v35, %v2452_v12 }
 0x398   : > { %v2511_v7 = vsel %vm2471_vm0, %v2452_v12, %v6170_v41  ;;  %v2582_v62 = vsel %vm1240_vm5, %v2510_v50, 0 }
 0x399   : > { %3065 = vmatprep.subr.msk.bf16.mxu1 %vm1240_vm5, %v2511_v7  ;;  %3064 = vmatmul.mubr.msk.bf16.vlgmr.msra.gmra.mrb[4].mxu0 %vm625_vm6, %v5772_v0 }
 0x39a   : > { %2747 = vmatpush1.bf16.msra.mxu1 %v2582_v62  ;;  %2776 = vmatpush1.bf16.msra.mxu0 %v7066_v29  ;;  %v1075_v37 = vpop.permute.xlu1 %1074 }
 0x39b   : > { %v1077_v28 = vpop.permute.xlu0 %1076  ;;  %2777 = vmatprep.subr.bf16.mxu0 %v7067_v49  ;;  %2816 = vmatprep.subr.bf16.mxu1 %v7068_v45  ;;  %v1099_v14 = vsel %vm1090_vm11, %v5797_v58, %v1075_v37 }
 0x39c   : > { %2807 = vmatprep.mubr.bf16.mxu0 %v6998_v61  ;;  %v1100_v16 = vsel %vm1090_vm11, %v1075_v37, %v1077_v28  ;;  %v1610_v46 = vsel %vm1207_vm4, %v1571_v55, %v1099_v14  ;;  %v7091_v55 = vld [vmem:[#allocation91_spill] sm:$0xff] }
 0x39d   : > { %3066 = vmatmul.mubr.msk.bf16.vlgmr.msra.gmra.mrb[4].mxu1 %vm625_vm6, %v5772_v0  ;;  %v1612_v63 = vsel %vm1207_vm4, %v1574_v4, %v1100_v16  ;;  %v7092_v4 = vld [vmem:[#allocation79_spill] sm:$0xff] }
 0x39e   : > { %2778 = vmatpush1.bf16.msra.mxu0 %v7069_v53  ;;  %2817 = vmatpush1.bf16.msra.mxu1 %v7070_v57  ;;  %v1079_v17 = vpop.permute.xlu1 %1078 }
 0x39f   : > { %v6188_v48 = vpop.permute.xlu0 %1080  ;;  %2779 = vmatprep.subr.bf16.mxu0 %v7071_v31  ;;  %2818 = vmatprep.subr.bf16.mxu1 %v7072_v5 }
 0x3a0   : > { %2848 = vmatprep.mubr.bf16.mxu1 %v6998_v61  ;;  %v1102_v8 = vsel %vm1090_vm11, %v1079_v17, %v6188_v48 }
 0x3a1   : > { %v1616_v22 = vsel %vm1207_vm4, %v1580_v19, %v1102_v8  ;;  %v7103_v19 = vld [vmem:[#allocation128_spill] sm:$0xff] }
 0x3a2   : > { %2780 = vmatpush1.bf16.msra.mxu0 %v7077_v56  ;;  %2819 = vmatpush1.bf16.msra.mxu1 %v7078_v1  ;;  %v1126_v21 = vpop.permute.xlu1 %1125 }
 0x3a3   : > { %v1128_v24 = vpop.permute.xlu0 %1127  ;;  %2820 = vmatprep.subr.bf16.mxu1 %v7079_v44  ;;  %v1150_v13 = vsel %vm7082_vm9, %v5905_v3, %v1126_v21  ;;  %v1101_v3 = vsel %vm1090_vm11, %v1077_v28, %v1079_v17  ;;  %v7094_v44 = vld [vmem:[#allocation80_spill] sm:$0xff] }
 0x3a4   : > { %v1151_v58 = vsel %vm7083_vm10, %v1126_v21, %v1128_v24  ;;  %v1650_v59 = vsel %vm1240_vm5, %v1610_v46, %v1150_v13  ;;  %v1614_v60 = vsel %vm1207_vm4, %v1577_v39, %v1101_v3  ;;  %v7093_v21 = vld [vmem:[#allocation92_spill] sm:$0xff]  ;;  %v7101_v3 = vld [vmem:[#allocation137_spill] sm:$0xff] }
 0x3a5   : > { %v1653_v34 = vsel %vm1240_vm5, %v1612_v63, %v1151_v58  ;;  %v7095_v13 = vld [vmem:[#allocation4_spill] sm:$0xff]  ;;  %v7096_v58 = vld [vmem:[#allocation93_spill] sm:$0xff]  ;;  %v7097_v63 = vld [vmem:[#allocation115_spill] sm:$0xff] }
 0x3a6   : > { %2781 = vmatprep.subr.bf16.mxu0 %v1653_v34  ;;  %2821 = vmatpush1.bf16.msra.mxu1 %v7086_v20  ;;  %v1130_v27 = vpop.permute.xlu1 %1129  ;;  %v7099_v34 = vld [vmem:[#allocation3_spill] sm:$0xff]  ;;  %v1053_v20 = vsel %vm1039_vm13, %v7100_v23, %v7101_v3 }
 0x3a7   : > { %v6232_v52 = vpop.permute.xlu0 %1131  ;;  %2782 = vmatpush1.bf16.msra.mxu0 %v1650_v59  ;;  %v1152_v35 = vsel %vm7087_vm14, %v1128_v24, %v1130_v27 }
 0x3a8   : > { %v1153_v26 = vsel %vm7088_vm15, %v1130_v27, %v6232_v52  ;;  %v1656_v6 = vsel %vm1240_vm5, %v1614_v60, %v1152_v35  ;;  %v1002_v27 = vsel %vm988_vm12, %v7102_v36, %v7103_v19  ;;  %v7104_v35 = vld [vmem:[#allocation8_spill] sm:$0xff] }
 0x3a9   : > { %v1659_v32 = vsel %vm1240_vm5, %v1616_v22, %v1153_v26  ;;  %v1586_v22 = vsel %vm1158_vm3, %v1002_v27, %v1053_v20 }
 0x3aa   : > { %2822 = vmatprep.subr.bf16.mxu1 %v1659_v32  ;;  %v2388_v50 = vpop.permute.xlu1 %2387 }
 0x3ab   : > { %v2390_v12 = vpop.permute.xlu0 %2389  ;;  %2823 = vmatpush1.bf16.msra.mxu1 %v1656_v6  ;;  %v2480_v62 = vsel %vm2471_vm0, %v6122_v2, %v2388_v50 }
 0x3ac   : > { %v2481_v7 = vsel %vm2471_vm0, %v2388_v50, %v2390_v12 }
 0x3ad   : > { %2783 = vmatprep.subr.bf16.mxu0 %v2481_v7 }
 0x3ae   : > { %2784 = vmatpush1.bf16.msra.mxu0 %v2480_v62  ;;  %v2392_v28 = vpop.permute.xlu1 %2391 }
 0x3af   : > { %v6250_v29 = vpop.permute.xlu0 %2393  ;;  %v2482_v49 = vsel %vm2471_vm0, %v2390_v12, %v2392_v28 }
 0x3b0   : > { %v2483_v37 = vsel %vm2471_vm0, %v2392_v28, %v6250_v29  ;;  %v7107_v28 = vld [vmem:[#allocation130_spill] sm:$0xff] }
 0x3b1   : > { %2824 = vmatprep.subr.bf16.mxu1 %v2483_v37  ;;  %v7108_v37 = vld [vmem:[#allocation127_spill] sm:$0xff] }
 0x3b2   : > { %2825 = vmatpush1.bf16.msra.mxu1 %v2482_v49  ;;  %v2422_v53 = vpop.permute.xlu1 %2421  ;;  %v1004_v49 = vsel %vm988_vm12, %v7108_v37, %v7107_v28 }
 0x3b3   : > { %v2424_v45 = vpop.permute.xlu0 %2423  ;;  %v2496_v17 = vsel %vm2471_vm0, %v6160_v43, %v2422_v53 }
 0x3b4   : > { %v2497_v57 = vsel %vm2471_vm0, %v2422_v53, %v2424_v45 }
 0x3b5   : > { %2785 = vmatprep.subr.bf16.mxu0 %v2497_v57  ;;  %v1003_v57 = vsel %vm988_vm12, %v7103_v19, %v7108_v37 }
 0x3b6   : > { %2786 = vmatpush1.bf16.msra.mxu0 %v2496_v17  ;;  %v2426_v31 = vpop.permute.xlu1 %2425 }
 0x3b7   : > { %v6258_v2 = vpop.permute.xlu0 %2427  ;;  %v2498_v18 = vsel %vm2471_vm0, %v2424_v45, %v2426_v31 }
 0x3b8   : > { %v2499_v5 = vsel %vm2471_vm0, %v2426_v31, %v6258_v2 }
 0x3b9   : > { %2826 = vmatprep.subr.bf16.mxu1 %v2499_v5 }
 0x3ba   : > { %2827 = vmatpush1.bf16.msra.mxu1 %v2498_v18  ;;  %v2456_v40 = vpop.permute.xlu1 %2455 }
 0x3bb   : > { %v2458_v10 = vpop.permute.xlu0 %2457  ;;  %v2512_v47 = vsel %vm2471_vm0, %v6170_v41, %v2456_v40  ;;  %v7090_v41 = vld [vmem:[#allocation56_spill] sm:$0xff] }
 0x3bc   : > { %v2513_v16 = vsel %vm2471_vm0, %v2456_v40, %v2458_v10  ;;  %v2588_v43 = vsel %vm1240_vm5, %v2512_v47, 0 }
 0x3bd   : > { %3067 = vmatprep.subr.msk.bf16.mxu0 %vm1240_vm5, %v2513_v16 }
 0x3be   : > { %2788 = vmatpush1.bf16.msra.mxu0 %v2588_v43  ;;  %v2460_v54 = vpop.permute.xlu1 %2459 }
 0x3bf   : > { %v6268_v25 = vpop.permute.xlu0 %2461  ;;  %2857 = vmatprep.subr.bf16.mxu0 %v7089_v51  ;;  %v2514_v30 = vsel %vm2471_vm0, %v2458_v10, %v2460_v54 }
 0x3c0   : > { %v2515_v14 = vsel %vm2471_vm0, %v2460_v54, %v6268_v25  ;;  %v2594_v56 = vsel %vm1240_vm5, %v2514_v30, 0 }
 0x3c1   : > { %3069 = vmatprep.subr.msk.bf16.mxu1 %vm1240_vm5, %v2515_v14  ;;  %3068 = vmatmul.mubr.msk.bf16.vlgmr.msra.gmra.mrb[8].mxu0 %vm625_vm6, %v5772_v0 }
 0x3c2   : > { %2829 = vmatpush1.bf16.msra.mxu1 %v2594_v56  ;;  %2858 = vmatpush1.bf16.msra.mxu0 %v7090_v41  ;;  %v1036_v24 = vpop.permute.xlu1 %1035 }
 0x3c3   : > { %v1038_v1 = vpop.permute.xlu0 %1037  ;;  %2859 = vmatprep.subr.bf16.mxu0 %v7091_v55  ;;  %2898 = vmatprep.subr.bf16.mxu1 %v7092_v4 }
 0x3c4   : > { %2889 = vmatprep.mubr.bf16.mxu0 %v6998_v61  ;;  %v1055_v32 = vsel %vm1039_vm13, %v1036_v24, %v1038_v1 }
 0x3c5   : > { %3070 = vmatmul.mubr.msk.bf16.vlgmr.msra.gmra.mrb[8].mxu1 %vm625_vm6, %v5772_v0  ;;  %v1592_v17 = vsel %vm1158_vm3, %v1004_v49, %v1055_v32 }
 0x3c6   : > { %2860 = vmatpush1.bf16.msra.mxu0 %v7093_v21  ;;  %2899 = vmatpush1.bf16.msra.mxu1 %v7094_v44  ;;  %v1083_v15 = vpop.permute.xlu1 %1082 }
 0x3c7   : > { %v1085_v11 = vpop.permute.xlu0 %1084  ;;  %2861 = vmatprep.subr.bf16.mxu0 %v7095_v13  ;;  %2900 = vmatprep.subr.bf16.mxu1 %v7096_v58  ;;  %v1103_v39 = vsel %vm1090_vm11, %v6188_v48, %v1083_v15  ;;  %v1054_v48 = vsel %vm1039_vm13, %v7101_v3, %v1036_v24  ;;  %vm7109_vm13 = vmmov %vm7105_vm1 }
 0x3c8   : > { %2930 = vmatprep.mubr.bf16.mxu1 %v6998_v61  ;;  %v1104_v59 = vsel %vm1090_vm11, %v1083_v15, %v1085_v11  ;;  %v1001_v61 = vsel %vm988_vm12, %v7084_v9, %v7102_v36  ;;  %v1589_v5 = vsel %vm1158_vm3, %v1003_v57, %v1054_v48 }
 0x3c9   : > { %v1583_v26 = vsel %vm1158_vm3, %v1001_v61, %v1052_v38  ;;  %v1620_v6 = vsel %vm1207_vm4, %v1586_v22, %v1104_v59 }
 0x3ca   : > { %2862 = vmatpush1.bf16.msra.mxu0 %v7097_v63  ;;  %2901 = vmatpush1.bf16.msra.mxu1 %v7098_v33  ;;  %v1087_v8 = vpop.permute.xlu1 %1086  ;;  %v1618_v50 = vsel %vm1207_vm4, %v1583_v26, %v1103_v39 }
 0x3cb   : > { %v1089_v46 = vpop.permute.xlu0 %1088  ;;  %2902 = vmatprep.subr.bf16.mxu1 %v7099_v34  ;;  %v1105_v45 = vsel %vm1090_vm11, %v1085_v11, %v1087_v8 }
 0x3cc   : > { %v1106_v7 = vsel %vm1090_vm11, %v1087_v8, %v1089_v46  ;;  %v1622_v47 = vsel %vm1207_vm4, %v1589_v5, %v1105_v45 }
 0x3cd   : > { %v1624_v40 = vsel %vm1207_vm4, %v1592_v17, %v1106_v7 }
 0x3ce   : > { %2903 = vmatpush1.bf16.msra.mxu1 %v7104_v35  ;;  %v1134_v60 = vpop.permute.xlu1 %1133 }
 0x3cf   : > { %v1136_v42 = vpop.permute.xlu0 %1135  ;;  %v1154_v9 = vsel %vm7105_vm1, %v6232_v52, %v1134_v60 }
 0x3d0   : > { %v1155_v12 = vsel %vm7106_vm2, %v1134_v60, %v1136_v42  ;;  %v1662_v53 = vsel %vm1240_vm5, %v1618_v50, %v1154_v9 }
 0x3d1   : > { %v1665_v62 = vsel %vm1240_vm5, %v1620_v6, %v1155_v12 }
 0x3d2   : > { %2863 = vmatprep.subr.bf16.mxu0 %v1665_v62  ;;  %v1138_v31 = vpop.permute.xlu1 %1137 }
 0x3d3   : > { %v1140_v52 = vpop.permute.xlu0 %1139  ;;  %2864 = vmatpush1.bf16.msra.mxu0 %v1662_v53  ;;  %v1156_v18 = vsel %vm7109_vm13, %v1136_v42, %v1138_v31 }
 0x3d4   : > { %v1157_v10 = vsel %vm7110_vm7, %v1138_v31, %v1140_v52  ;;  %v1668_v54 = vsel %vm1240_vm5, %v1622_v47, %v1156_v18 }
 0x3d5   : > { %v1671_v16 = vsel %vm1240_vm5, %v1624_v40, %v1157_v10 }
 0x3d6   : > { %2904 = vmatprep.subr.bf16.mxu1 %v1671_v16  ;;  %v2396_v51 = vpop.permute.xlu1 %2395 }
 0x3d7   : > { %v2398_v43 = vpop.permute.xlu0 %2397  ;;  %2905 = vmatpush1.bf16.msra.mxu1 %v1668_v54  ;;  %v2484_v14 = vsel %vm2471_vm0, %v6250_v29, %v2396_v51 }
 0x3d8   : > { %v2485_v30 = vsel %vm2471_vm0, %v2396_v51, %v2398_v43 }
 0x3d9   : > { %2865 = vmatprep.subr.bf16.mxu0 %v2485_v30 }
 0x3da   : > { %2866 = vmatpush1.bf16.msra.mxu0 %v2484_v14  ;;  %v2400_v41 = vpop.permute.xlu1 %2399 }
 0x3db   : > { %v2402_v56 = vpop.permute.xlu0 %2401  ;;  %v2486_v24 = vsel %vm2471_vm0, %v2398_v43, %v2400_v41 }
 0x3dc   : > { %v2487_v1 = vsel %vm2471_vm0, %v2400_v41, %v2402_v56 }
 0x3dd   : > { %2906 = vmatprep.subr.bf16.mxu1 %v2487_v1 }
 0x3de   : > { %2907 = vmatpush1.bf16.msra.mxu1 %v2486_v24  ;;  %v2430_v4 = vpop.permute.xlu1 %2429 }
 0x3df   : > { %v2432_v55 = vpop.permute.xlu0 %2431  ;;  %v2500_v44 = vsel %vm2471_vm0, %v6258_v2, %v2430_v4 }
 0x3e0   : > { %v2501_v21 = vsel %vm2471_vm0, %v2430_v4, %v2432_v55 }
 0x3e1   : > { %2867 = vmatprep.subr.bf16.mxu0 %v2501_v21 }
 0x3e2   : > { %2868 = vmatpush1.bf16.msra.mxu0 %v2500_v44  ;;  %v2434_v11 = vpop.permute.xlu1 %2433 }
 0x3e3   : > { %v2436_v29 = vpop.permute.xlu0 %2435  ;;  %v2502_v13 = vsel %vm2471_vm0, %v2432_v55, %v2434_v11 }
 0x3e4   : > { %v2503_v15 = vsel %vm2471_vm0, %v2434_v11, %v2436_v29 }
 0x3e5   : > { %2908 = vmatprep.subr.bf16.mxu1 %v2503_v15 }
 0x3e6   : > { %2909 = vmatpush1.bf16.msra.mxu1 %v2502_v13 }
 0x3eb   : > { %v2464_v58 = vpop.permute.xlu1 %2463 }
 0x3ec   : > { %v2516_v63 = vsel %vm2471_vm0, %v6268_v25, %v2464_v58 }
 0x3ed   : > { %v2600_v8 = vsel %vm1240_vm5, %v2516_v63, 0 }
 0x3f8   : > { %v2466_v33 = vpop.permute.xlu0 %2465 }
 0x3f9   : > { %v2517_v46 = vsel %vm2471_vm0, %v2464_v58, %v2466_v33 }
 0x3fa   : > { %3071 = vmatprep.subr.msk.bf16.mxu0 %vm1240_vm5, %v2517_v46  ;;  %v2468_v2 = vpop.permute.xlu1 %2467 }
 0x3fb   : > { %2870 = vmatpush1.bf16.msra.mxu0 %v2600_v8  ;;  %v2518_v23 = vsel %vm2471_vm0, %v2466_v33, %v2468_v2 }
 0x3fc   : > { %v2470_v34 = vpop.permute.xlu0 %2469  ;;  %v2606_v3 = vsel %vm1240_vm5, %v2518_v23, 0 }
 0x3fd   : > { %v2519_v38 = vsel %vm2471_vm0, %v2468_v2, %v2470_v34  ;;  %v2645_v25 = vpop.f32.mrb[0].mxu0 }
 0x3fe   : > { %3072 = vmatmul.mubr.msk.bf16.vlgmr.msra.gmra.mrb[12].mxu0 %vm625_vm6, %v5772_v0  ;;  %3073 = vmatprep.subr.msk.bf16.mxu1 %vm1240_vm5, %v2519_v38  ;;  %v2647_v20 = vpop.f32.mrb[1].mxu0 }
 0x3ff   : > { %2911 = vmatpush1.bf16.msra.mxu1 %v2606_v3  ;;  %v2649_v59 = vpop.f32.mrb[2].mxu0 }
 0x400   : > { %v2686_v36 = vpop.f32.mrb[0].mxu1  ;;  %v2650_v61 = vpop.f32.mrb[3].mxu0 }
 0x401   : > { %v2688_v19 = vpop.f32.mrb[1].mxu1 }
 0x402   : > { %3074 = vmatmul.mubr.msk.bf16.vlgmr.msra.gmra.mrb[12].mxu1 %vm625_vm6, %v5772_v0  ;;  %v2690_v27 = vpop.f32.mrb[2].mxu1 }
 0x403   : > { %v2691_v39 = vpop.f32.mrb[3].mxu1 }
 0x40b   : > { %v2557_v35 = vpop.permute.xlu1 %2556 }
 0x40c   : > { %v2646_v42 = vadd.f32 %v2645_v25, %v2557_v35  ;;  %v2648_v26 = vadd.f32 %v2647_v20, %v2557_v35  ;;  %v2687_v22 = vadd.f32 %v2686_v36, %v2557_v35  ;;  %v2689_v60 = vadd.f32 %v2688_v19, %v2557_v35 }
 0x40e   : > { %v2955_v32 = vcombine.low %v2646_v42, %v2648_v26  ;;  %v2956_v0 = vcombine.low %v2687_v22, %v2689_v60 }
 0x410   : > { %2971 = vst [vmem:[%s6364_s8] sm:$0xff] %v2955_v32  ;;  %2972 = vst [vmem:[%s6364_s8 + $0x8] sm:$0xff] %v2956_v0 }
 0x46c   : > { %v2727_v9 = vpop.f32.mrb[4].mxu0 }
 0x46d   : > { %v2728_v12 = vadd.f32 %v2727_v9, %v2557_v35  ;;  %v2729_v6 = vpop.f32.mrb[5].mxu0 }
 0x46e   : > { %v2730_v48 = vadd.f32 %v2729_v6, %v2557_v35  ;;  %v2731_v50 = vpop.f32.mrb[6].mxu0 }
 0x46f   : > { %v2732_v7 = vpop.f32.mrb[7].mxu0 }
 0x470   : > { %v2768_v62 = vpop.f32.mrb[4].mxu1  ;;  %v2957_v28 = vcombine.low %v2728_v12, %v2730_v48 }
 0x471   : > { %v2769_v37 = vadd.f32 %v2768_v62, %v2557_v35  ;;  %v2770_v49 = vpop.f32.mrb[5].mxu1 }
 0x472   : > { %2973 = vst [vmem:[%s6364_s8 + $0x10] sm:$0xff] %v2957_v28  ;;  %v2771_v45 = vadd.f32 %v2770_v49, %v2557_v35  ;;  %v2772_v52 = vpop.f32.mrb[6].mxu1 }
 0x473   : > { %v2773_v53 = vpop.f32.mrb[7].mxu1 }
 0x474   : > { %v2958_v57 = vcombine.low %v2769_v37, %v2771_v45 }
 0x476   : > { %2974 = vst [vmem:[%s6364_s8 + $0x18] sm:$0xff] %v2958_v57 }
 0x494   : > { %v2809_v17 = vpop.f32.mrb[8].mxu0 }
 0x495   : > { %v2810_v31 = vadd.f32 %v2809_v17, %v2557_v35  ;;  %v2811_v5 = vpop.f32.mrb[9].mxu0 }
 0x496   : > { %v2812_v18 = vadd.f32 %v2811_v5, %v2557_v35  ;;  %v2813_v10 = vpop.f32.mrb[10].mxu0 }
 0x497   : > { %v2814_v40 = vpop.f32.mrb[11].mxu0 }
 0x498   : > { %v2850_v47 = vpop.f32.mrb[8].mxu1  ;;  %v2959_v16 = vcombine.low %v2810_v31, %v2812_v18 }
 0x499   : > { %v2851_v43 = vadd.f32 %v2850_v47, %v2557_v35  ;;  %v2852_v54 = vpop.f32.mrb[9].mxu1 }
 0x49a   : > { %2975 = vst [vmem:[%s6364_s8 + $0x20] sm:$0xff] %v2959_v16  ;;  %v2853_v51 = vadd.f32 %v2852_v54, %v2557_v35  ;;  %v2854_v30 = vpop.f32.mrb[10].mxu1 }
 0x49b   : > { %v2855_v14 = vpop.f32.mrb[11].mxu1 }
 0x49c   : > { %v2960_v56 = vcombine.low %v2851_v43, %v2853_v51 }
 0x49e   : > { %2976 = vst [vmem:[%s6364_s8 + $0x28] sm:$0xff] %v2960_v56 }
 0x4d1   : > { %v2891_v41 = vpop.f32.mrb[12].mxu0 }
 0x4d2   : > { %v2892_v1 = vadd.f32 %v2891_v41, %v2557_v35  ;;  %v2893_v24 = vpop.f32.mrb[13].mxu0 }
 0x4d3   : > { %v2894_v55 = vadd.f32 %v2893_v24, %v2557_v35  ;;  %v2895_v4 = vpop.f32.mrb[14].mxu0 }
 0x4d4   : > { %v2896_v21 = vpop.f32.mrb[15].mxu0 }
 0x4d5   : > { %v2961_v44 = vcombine.low %v2892_v1, %v2894_v55  ;;  %v2932_v29 = vpop.f32.mrb[12].mxu1 }
 0x4d6   : > { %v2933_v11 = vadd.f32 %v2932_v29, %v2557_v35  ;;  %v2934_v15 = vpop.f32.mrb[13].mxu1 }
 0x4d7   : > { %2977 = vst [vmem:[%s6364_s8 + $0x30] sm:$0xff] %v2961_v44  ;;  %v2935_v13 = vadd.f32 %v2934_v15, %v2557_v35  ;;  %v2936_v58 = vpop.f32.mrb[14].mxu1 }
 0x4d8   : > { %v2937_v63 = vpop.f32.mrb[15].mxu1 }
 0x4d9   : > { %v2962_v33 = vcombine.low %v2933_v11, %v2935_v13 }
 0x4db   : > { %2978 = vst [vmem:[%s6364_s8 + $0x38] sm:$0xff] %v2962_v33 }
 0x4dc PF: > { %s14_s15 = sadd.s32 1, %s3125_s15  }
 0x4dd   : > { %p11_p6 = scmp.ge.s32.totalorder %s14_s15, 8  }
 0x4df   :  { %13 = sbr.rel (!%p11_p6) target bundleno = 1 (0x1), region = 69 }

</bundles_post_ra>
